<compile_context>
chip_gen: v7x
topology: tpu7x:2x2x1
jax: 0.10.0
libtpu: 0.0.40
codegen_flags: <defaults>
</compile_context>

<pallas_src>
import functools

import numpy as np

import jax
import jax.numpy as jnp
from jax.experimental import pallas as pl
from jax.experimental.pallas import tpu as pltpu


_LP = 8  # leading zero rows of each flat padded scratch (keeps every tap-slice start >= 0)


# --------------------- host-built pooling selection matrices ---------------------

def _maxpool_select_matrix(H, W):
    """(OH*OW, L) 0/1 matrix selecting the stride-2 window maxima from the flat
    padded-row conv activation (also skips the junk pad columns)."""
    Wp = W + 2
    L = H * Wp - Wp - 1
    OH, OW = H // 2, W // 2
    sel = np.zeros((OH * OW, L), np.float32)
    for h2 in range(OH):
        for w2 in range(OW):
            sel[h2 * OW + w2, 2 * h2 * Wp + 2 * w2 + 1] = 1.0
    return jnp.asarray(sel)


def _avgpool_select_matrix(H, W, OH=4, OW=4):
    """(OH*OW, H*(W+2)) averaging matrix implementing AdaptiveAvgPool2d((4,4)) for
    divisible H, W on the flat padded-row conv activation."""
    Wp = W + 2
    kh, kw = H // OH, W // OW
    inv = 1.0 / float(kh * kw)
    avg = np.zeros((OH * OW, H * Wp), np.float32)
    for h2 in range(OH):
        for w2 in range(OW):
            for dy in range(kh):
                for dx in range(kw):
                    avg[h2 * OW + w2, (h2 * kh + dy) * Wp + (w2 * kw + dx) + 1] = inv
    return jnp.asarray(avg)


# -------------------------------- fused kernel -----------------------------------

def _fused_classifier_kernel(
        x_ref,
        w1_ref, s1_ref, b1_ref, sel1_ref,
        w2_ref, s2_ref, b2_ref, sel2_ref,
        w3_ref, s3_ref, b3_ref, avg3_ref,
        fc1w_ref, fc1b_ref, fc2w_ref, fc2b_ref,
        o_ref,
        p1_ref, col1_ref, p2_ref, col2_ref, p3_ref, col3_ref,
        *, H, W):
    """Whole network for one image, entirely inside VMEM."""
    f32 = jnp.float32

    def scatter_into_padded(p_ref, src, h, w):
        # Zero the flat padded scratch, then write src ((h*w, c), row-major) into its interior.
        wp = w + 2
        p_ref[...] = jnp.zeros(p_ref.shape, p_ref.dtype)
        for r in range(h):
            p_ref[pl.ds(_LP + (r + 1) * wp + 1, w), :] = src[r * w:(r + 1) * w, :]

    def conv3x3_bn_relu(p_ref, col_ref, w_ref, s_ref, b_ref, h, w, cin):
        # 3x3 'same' conv + folded BN + ReLU over the flat padded rows.
        # Output rows cover all (w+2) columns of rows 1..h of the padded grid; columns 0 and
        # w+1 of each row are junk and are dropped by the pooling selection matmul.
        wp = w + 2
        m = h * wp
        for ky in range(3):
            for kx in range(3):
                k = ky * 3 + kx
                col_ref[:, k * cin:(k + 1) * cin] = p_ref[pl.ds(_LP + ky * wp + kx - 1, m), :]
        acc = jnp.dot(col_ref[...], w_ref[...], preferred_element_type=f32)   # (m, cout)
        return jnp.maximum(acc * s_ref[...] + b_ref[...], 0.0)

    def maxpool2x2(act, sel_ref, h, w):
        # In-register 2x2/stride-2 max pool: shifted value slices + selection matmul.
        wp = w + 2
        m = h * wp
        l = m - wp - 1
        rows = jnp.maximum(act[0:m - wp, :], act[wp:m, :])        # pair rows h, h+1
        mm = jnp.maximum(rows[0:l, :], rows[1:l + 1, :])          # pair columns w, w+1
        return jnp.dot(sel_ref[...], mm, preferred_element_type=f32)   # (oh*ow, cout)

    H2, W2 = H // 2, W // 2
    H3, W3 = H2 // 2, W2 // 2

    # ---- stage 1: Conv2d(1,32,3,pad=1) + BN + ReLU + MaxPool2d(2,2) ----
    scatter_into_padded(p1_ref, x_ref[0], H, W)
    act1 = conv3x3_bn_relu(p1_ref, col1_ref, w1_ref, s1_ref, b1_ref, H, W, 1)
    pooled1 = maxpool2x2(act1, sel1_ref, H, W)                    # (H2*W2, 32)

    # ---- stage 2: Conv2d(32,64) + BN + ReLU + MaxPool2d(2,2) ----
    scatter_into_padded(p2_ref, pooled1, H2, W2)
    act2 = conv3x3_bn_relu(p2_ref, col2_ref, w2_ref, s2_ref, b2_ref, H2, W2, 32)
    pooled2 = maxpool2x2(act2, sel2_ref, H2, W2)                  # (H3*W3, 64)

    # ---- stage 3: Conv2d(64,128) + BN + ReLU + AdaptiveAvgPool2d((4,4)) ----
    scatter_into_padded(p3_ref, pooled2, H3, W3)
    act3 = conv3x3_bn_relu(p3_ref, col3_ref, w3_ref, s3_ref, b3_ref, H3, W3, 64)
    pooled3 = jnp.dot(avg3_ref[...], act3, preferred_element_type=f32)   # (16, 128)

    # ---- head: Linear(2048->256) + ReLU + [Dropout=identity] + Linear(256->3) ----
    # fc1 as a sum over the 16 pooled positions (no (4,4,128)->2048 lane-collapsing reshape).
    h1 = fc1b_ref[...]                                            # (1, 256) f32
    for p in range(16):
        h1 = h1 + jnp.dot(pooled3[p:p + 1, :].astype(fc1w_ref.dtype), fc1w_ref[p],
                          preferred_element_type=f32)
    h1 = jnp.maximum(h1, 0.0)
    logits = jnp.dot(h1.astype(fc2w_ref.dtype), fc2w_ref[...],
                     preferred_element_type=f32) + fc2b_ref[...]  # (1, 3)
    o_ref[0] = logits


# ----------------------------------- wrapper -------------------------------------

def category_classifier_forward(x_nchw, params):
    n, cin, H, W = x_nchw.shape
    assert cin == 1
    assert H % 16 == 0 and W % 16 == 0, "uniform AdaptiveAvgPool((4,4)) path needs H,W % 16 == 0"
    H2, W2 = H // 2, W // 2
    H3, W3 = H2 // 2, W2 // 2

    sel1 = _maxpool_select_matrix(H, W)
    sel2 = _maxpool_select_matrix(H2, W2)
    avg3 = _avgpool_select_matrix(H3, W3)

    # (N,1,H,W) -> (N, H*W, 1): pure reshape (row-major (h,w) order), no transpose.
    x_flat = x_nchw.reshape(n, H * W, 1).astype(jnp.float32)

    weights = (params["conv0_w"], params["conv0_scale"], params["conv0_bias"], sel1,
               params["conv1_w"], params["conv1_scale"], params["conv1_bias"], sel2,
               params["conv2_w"], params["conv2_scale"], params["conv2_bias"], avg3,
               params["fc1_w"], params["fc1_b"], params["fc2_w"], params["fc2_b"])

    def _const_spec(a):
        nd = a.ndim
        return pl.BlockSpec(a.shape, lambda i, _nd=nd: (0,) * _nd)

    in_specs = [pl.BlockSpec((1, H * W, 1), lambda i: (i, 0, 0))]
    in_specs += [_const_spec(a) for a in weights]

    kern = functools.partial(_fused_classifier_kernel, H=H, W=W)

    out = pl.pallas_call(
        kern,
        out_shape=jax.ShapeDtypeStruct((n, 1, 3), jnp.float32),
        grid=(n,),
        in_specs=in_specs,
        out_specs=pl.BlockSpec((1, 1, 3), lambda i: (i, 0, 0)),
        scratch_shapes=[
            pltpu.VMEM((_LP + (H + 2) * (W + 2) + 8, 1), jnp.float32),      # p1 (padded input)
            pltpu.VMEM((H * (W + 2), 9), jnp.float32),                      # col1 (im2col)
            pltpu.VMEM((_LP + (H2 + 2) * (W2 + 2) + 8, 32), jnp.float32),   # p2
            pltpu.VMEM((H2 * (W2 + 2), 9 * 32), jnp.float32),               # col2
            pltpu.VMEM((_LP + (H3 + 2) * (W3 + 2) + 8, 64), jnp.float32),   # p3
            pltpu.VMEM((H3 * (W3 + 2), 9 * 64), jnp.float32),               # col3
        ],
        compiler_params=pltpu.CompilerParams(
            dimension_semantics=("parallel",)),   # one image per step; v7x runs 2 TCs
    )(x_flat, *weights)

    return out.reshape(n, 3)


# --------------------------- parameters (synthetic) --------------------------

def init_params(key):
    """Deterministic synthetic parameters matching the PyTorch module's shapes."""
    ks = iter(jax.random.split(key, 32))
    eps = 1e-5
    p = {}
    conv_dims = [(1, 32), (32, 64), (64, 128)]
    for l, (cin, cout) in enumerate(conv_dims):
        w = 0.05 * jax.random.normal(next(ks), (cout, cin, 3, 3), jnp.float32)   # OIHW
        b = 0.01 * jax.random.normal(next(ks), (cout,), jnp.float32)
        gamma = 1.0 + 0.1 * jax.random.normal(next(ks), (cout,), jnp.float32)
        beta = 0.1 * jax.random.normal(next(ks), (cout,), jnp.float32)
        rmean = 0.05 * jax.random.normal(next(ks), (cout,), jnp.float32)
        rvar = 1.0 + 0.1 * jnp.abs(jax.random.normal(next(ks), (cout,), jnp.float32))
        # OIHW (co,ci,ky,kx) -> (ky,kx,ci,co) -> tap-concatenated (9*Cin, Cout) matmul weight.
        w_mat = jnp.transpose(w, (2, 3, 1, 0)).reshape(9 * cin, cout)
        inv = gamma / jnp.sqrt(rvar + eps)
        p[f"conv{l}_w"] = w_mat.astype(jnp.float32)
        p[f"conv{l}_scale"] = inv.reshape(1, cout)
        p[f"conv{l}_bias"] = ((b - rmean) * inv + beta).reshape(1, cout)

    w1 = 0.05 * jax.random.normal(next(ks), (256, 128 * 4 * 4), jnp.float32)   # (out, in)
    b1 = 0.01 * jax.random.normal(next(ks), (256,), jnp.float32)
    w2 = 0.05 * jax.random.normal(next(ks), (3, 256), jnp.float32)
    b2 = 0.01 * jax.random.normal(next(ks), (3,), jnp.float32)
    # PyTorch flattens NCHW so fc1 input index = c*16 + (h*4 + w).  Reorganise fc1 into
    # per-position (p = h*4 + w) blocks of (128, 256) so the kernel sums 16 matmuls.
    w1_pos = jnp.transpose(w1.reshape(256, 128, 16), (2, 1, 0))   # (16, 128, 256) = [p, c, out]
    p["fc1_w"] = w1_pos.astype(jnp.bfloat16)
    p["fc1_b"] = b1.reshape(1, 256)
    p["fc2_w"] = w2.T.astype(jnp.bfloat16)
    p["fc2_b"] = b2.reshape(1, 3)
    return p


# ------------------------------------ main ----------------------------------------

if __name__ == "__main__":
    key = jax.random.PRNGKey(0)
    pkey, xkey = jax.random.split(key)
    params = init_params(pkey)

    # NCHW input consistent with the module: (batch=2, C=1, H=16, W=16).
    x = jax.random.normal(xkey, (2, 1, 16, 16), jnp.float32)

    fwd = jax.jit(lambda inp: category_classifier_forward(inp, params))
    out = jax.block_until_ready(fwd(x))

    assert out.shape == (2, 3), out.shape
    assert out.dtype == jnp.float32
    assert bool(jnp.all(jnp.isfinite(out)))
    print("KERNEL_OK")
</pallas_src>

<mosaic_0001>
module attributes {stable_mosaic.version = 11 : i64} {
  func.func @_fused_classifier_kernel(%arg0: i32, %arg1: memref<1x256x1xf32, #tpu.memory_space<vmem>>, %arg2: memref<9x32xf32, #tpu.memory_space<vmem>>, %arg3: memref<1x32xf32, #tpu.memory_space<vmem>>, %arg4: memref<1x32xf32, #tpu.memory_space<vmem>>, %arg5: memref<64x269xf32, #tpu.memory_space<vmem>>, %arg6: memref<288x64xf32, #tpu.memory_space<vmem>>, %arg7: memref<1x64xf32, #tpu.memory_space<vmem>>, %arg8: memref<1x64xf32, #tpu.memory_space<vmem>>, %arg9: memref<16x69xf32, #tpu.memory_space<vmem>>, %arg10: memref<576x128xf32, #tpu.memory_space<vmem>>, %arg11: memref<1x128xf32, #tpu.memory_space<vmem>>, %arg12: memref<1x128xf32, #tpu.memory_space<vmem>>, %arg13: memref<16x24xf32, #tpu.memory_space<vmem>>, %arg14: memref<16x128x256xbf16, #tpu.memory_space<vmem>>, %arg15: memref<1x256xf32, #tpu.memory_space<vmem>>, %arg16: memref<256x3xbf16, #tpu.memory_space<vmem>>, %arg17: memref<1x3xf32, #tpu.memory_space<vmem>>, %arg18: memref<1x1x3xf32, #tpu.memory_space<vmem>>, %arg19: memref<340x1xf32, #tpu.memory_space<vmem>>, %arg20: memref<288x9xf32, #tpu.memory_space<vmem>>, %arg21: memref<116x32xf32, #tpu.memory_space<vmem>>, %arg22: memref<80x288xf32, #tpu.memory_space<vmem>>, %arg23: memref<52x64xf32, #tpu.memory_space<vmem>>, %arg24: memref<24x576xf32, #tpu.memory_space<vmem>>) attributes {dimension_semantics = [#tpu.dimension_semantics<parallel>], iteration_bounds = array<i64: 2>, scalar_prefetch = 0 : i64, scratch_operands = 6 : i64, tpu.core_type = #tpu.core_type<tc>, window_params = [{transform_indices = @transform_0, window_bounds = array<i64: 1, 256, 1>}, {pipeline_mode = #tpu.pipeline_mode<synchronous>, transform_indices = @transform_1, window_bounds = array<i64: 9, 32>}, {pipeline_mode = #tpu.pipeline_mode<synchronous>, transform_indices = @transform_2, window_bounds = array<i64: 1, 32>}, {pipeline_mode = #tpu.pipeline_mode<synchronous>, transform_indices = @transform_3, window_bounds = array<i64: 1, 32>}, {pipeline_mode = #tpu.pipeline_mode<synchronous>, transform_indices = @transform_4, window_bounds = array<i64: 64, 269>}, {pipeline_mode = #tpu.pipeline_mode<synchronous>, transform_indices = @transform_5, window_bounds = array<i64: 288, 64>}, {pipeline_mode = #tpu.pipeline_mode<synchronous>, transform_indices = @transform_6, window_bounds = array<i64: 1, 64>}, {pipeline_mode = #tpu.pipeline_mode<synchronous>, transform_indices = @transform_7, window_bounds = array<i64: 1, 64>}, {pipeline_mode = #tpu.pipeline_mode<synchronous>, transform_indices = @transform_8, window_bounds = array<i64: 16, 69>}, {pipeline_mode = #tpu.pipeline_mode<synchronous>, transform_indices = @transform_9, window_bounds = array<i64: 576, 128>}, {pipeline_mode = #tpu.pipeline_mode<synchronous>, transform_indices = @transform_10, window_bounds = array<i64: 1, 128>}, {pipeline_mode = #tpu.pipeline_mode<synchronous>, transform_indices = @transform_11, window_bounds = array<i64: 1, 128>}, {pipeline_mode = #tpu.pipeline_mode<synchronous>, transform_indices = @transform_12, window_bounds = array<i64: 16, 24>}, {pipeline_mode = #tpu.pipeline_mode<synchronous>, transform_indices = @transform_13, window_bounds = array<i64: 16, 128, 256>}, {pipeline_mode = #tpu.pipeline_mode<synchronous>, transform_indices = @transform_14, window_bounds = array<i64: 1, 256>}, {pipeline_mode = #tpu.pipeline_mode<synchronous>, transform_indices = @transform_15, window_bounds = array<i64: 256, 3>}, {pipeline_mode = #tpu.pipeline_mode<synchronous>, transform_indices = @transform_16, window_bounds = array<i64: 1, 3>}, {transform_indices = @transform_17, window_bounds = array<i64: 1, 1, 3>}]} {
    %c0 = arith.constant 0 : index
    %c0_0 = arith.constant 0 : index
    %c0_1 = arith.constant 0 : index
    %0 = vector.load %arg1[%c0, %c0_0, %c0_1] : memref<1x256x1xf32, #tpu.memory_space<vmem>>, vector<1x256x1xf32>
    %1 = vector.shape_cast %0 : vector<1x256x1xf32> to vector<256x1xf32>
    %cst = arith.constant 0.000000e+00 : f32
    %2 = vector.broadcast %cst : f32 to vector<340x1xf32>
    %c0_2 = arith.constant 0 : index
    %c0_3 = arith.constant 0 : index
    %3 = vector.load %arg19[%c0_2, %c0_3] : memref<340x1xf32, #tpu.memory_space<vmem>>, vector<340x1xf32>
    tpu.vector_store %arg19[%c0_2, %c0_3], %2 {strides = array<i32>} : memref<340x1xf32, #tpu.memory_space<vmem>>, vector<340x1xf32>,
    %4 = vector.extract_strided_slice %1 {offsets = [0, 0], sizes = [16, 1], strides = [1, 1]} : vector<256x1xf32> to vector<16x1xf32>
    %c27 = arith.constant 27 : index
    %c0_4 = arith.constant 0 : index
    %5 = vector.load %arg19[%c27, %c0_4] : memref<340x1xf32, #tpu.memory_space<vmem>>, vector<16x1xf32>
    tpu.vector_store %arg19[%c27, %c0_4], %4 {strides = array<i32>} : memref<340x1xf32, #tpu.memory_space<vmem>>, vector<16x1xf32>,
    %6 = vector.extract_strided_slice %1 {offsets = [16, 0], sizes = [16, 1], strides = [1, 1]} : vector<256x1xf32> to vector<16x1xf32>
    %c45 = arith.constant 45 : index
    %c0_5 = arith.constant 0 : index
    %7 = vector.load %arg19[%c45, %c0_5] : memref<340x1xf32, #tpu.memory_space<vmem>>, vector<16x1xf32>
    tpu.vector_store %arg19[%c45, %c0_5], %6 {strides = array<i32>} : memref<340x1xf32, #tpu.memory_space<vmem>>, vector<16x1xf32>,
    %8 = vector.extract_strided_slice %1 {offsets = [32, 0], sizes = [16, 1], strides = [1, 1]} : vector<256x1xf32> to vector<16x1xf32>
    %c63 = arith.constant 63 : index
    %c0_6 = arith.constant 0 : index
    %9 = vector.load %arg19[%c63, %c0_6] : memref<340x1xf32, #tpu.memory_space<vmem>>, vector<16x1xf32>
    tpu.vector_store %arg19[%c63, %c0_6], %8 {strides = array<i32>} : memref<340x1xf32, #tpu.memory_space<vmem>>, vector<16x1xf32>,
    %10 = vector.extract_strided_slice %1 {offsets = [48, 0], sizes = [16, 1], strides = [1, 1]} : vector<256x1xf32> to vector<16x1xf32>
    %c81 = arith.constant 81 : index
    %c0_7 = arith.constant 0 : index
    %11 = vector.load %arg19[%c81, %c0_7] : memref<340x1xf32, #tpu.memory_space<vmem>>, vector<16x1xf32>
    tpu.vector_store %arg19[%c81, %c0_7], %10 {strides = array<i32>} : memref<340x1xf32, #tpu.memory_space<vmem>>, vector<16x1xf32>,
    %12 = vector.extract_strided_slice %1 {offsets = [64, 0], sizes = [16, 1], strides = [1, 1]} : vector<256x1xf32> to vector<16x1xf32>
    %c99 = arith.constant 99 : index
    %c0_8 = arith.constant 0 : index
    %13 = vector.load %arg19[%c99, %c0_8] : memref<340x1xf32, #tpu.memory_space<vmem>>, vector<16x1xf32>
    tpu.vector_store %arg19[%c99, %c0_8], %12 {strides = array<i32>} : memref<340x1xf32, #tpu.memory_space<vmem>>, vector<16x1xf32>,
    %14 = vector.extract_strided_slice %1 {offsets = [80, 0], sizes = [16, 1], strides = [1, 1]} : vector<256x1xf32> to vector<16x1xf32>
    %c117 = arith.constant 117 : index
    %c0_9 = arith.constant 0 : index
    %15 = vector.load %arg19[%c117, %c0_9] : memref<340x1xf32, #tpu.memory_space<vmem>>, vector<16x1xf32>
    tpu.vector_store %arg19[%c117, %c0_9], %14 {strides = array<i32>} : memref<340x1xf32, #tpu.memory_space<vmem>>, vector<16x1xf32>,
    %16 = vector.extract_strided_slice %1 {offsets = [96, 0], sizes = [16, 1], strides = [1, 1]} : vector<256x1xf32> to vector<16x1xf32>
    %c135 = arith.constant 135 : index
    %c0_10 = arith.constant 0 : index
    %17 = vector.load %arg19[%c135, %c0_10] : memref<340x1xf32, #tpu.memory_space<vmem>>, vector<16x1xf32>
    tpu.vector_store %arg19[%c135, %c0_10], %16 {strides = array<i32>} : memref<340x1xf32, #tpu.memory_space<vmem>>, vector<16x1xf32>,
    %18 = vector.extract_strided_slice %1 {offsets = [112, 0], sizes = [16, 1], strides = [1, 1]} : vector<256x1xf32> to vector<16x1xf32>
    %c153 = arith.constant 153 : index
    %c0_11 = arith.constant 0 : index
    %19 = vector.load %arg19[%c153, %c0_11] : memref<340x1xf32, #tpu.memory_space<vmem>>, vector<16x1xf32>
    tpu.vector_store %arg19[%c153, %c0_11], %18 {strides = array<i32>} : memref<340x1xf32, #tpu.memory_space<vmem>>, vector<16x1xf32>,
    %20 = vector.extract_strided_slice %1 {offsets = [128, 0], sizes = [16, 1], strides = [1, 1]} : vector<256x1xf32> to vector<16x1xf32>
    %c171 = arith.constant 171 : index
    %c0_12 = arith.constant 0 : index
    %21 = vector.load %arg19[%c171, %c0_12] : memref<340x1xf32, #tpu.memory_space<vmem>>, vector<16x1xf32>
    tpu.vector_store %arg19[%c171, %c0_12], %20 {strides = array<i32>} : memref<340x1xf32, #tpu.memory_space<vmem>>, vector<16x1xf32>,
    %22 = vector.extract_strided_slice %1 {offsets = [144, 0], sizes = [16, 1], strides = [1, 1]} : vector<256x1xf32> to vector<16x1xf32>
    %c189 = arith.constant 189 : index
    %c0_13 = arith.constant 0 : index
    %23 = vector.load %arg19[%c189, %c0_13] : memref<340x1xf32, #tpu.memory_space<vmem>>, vector<16x1xf32>
    tpu.vector_store %arg19[%c189, %c0_13], %22 {strides = array<i32>} : memref<340x1xf32, #tpu.memory_space<vmem>>, vector<16x1xf32>,
    %24 = vector.extract_strided_slice %1 {offsets = [160, 0], sizes = [16, 1], strides = [1, 1]} : vector<256x1xf32> to vector<16x1xf32>
    %c207 = arith.constant 207 : index
    %c0_14 = arith.constant 0 : index
    %25 = vector.load %arg19[%c207, %c0_14] : memref<340x1xf32, #tpu.memory_space<vmem>>, vector<16x1xf32>
    tpu.vector_store %arg19[%c207, %c0_14], %24 {strides = array<i32>} : memref<340x1xf32, #tpu.memory_space<vmem>>, vector<16x1xf32>,
    %26 = vector.extract_strided_slice %1 {offsets = [176, 0], sizes = [16, 1], strides = [1, 1]} : vector<256x1xf32> to vector<16x1xf32>
    %c225 = arith.constant 225 : index
    %c0_15 = arith.constant 0 : index
    %27 = vector.load %arg19[%c225, %c0_15] : memref<340x1xf32, #tpu.memory_space<vmem>>, vector<16x1xf32>
    tpu.vector_store %arg19[%c225, %c0_15], %26 {strides = array<i32>} : memref<340x1xf32, #tpu.memory_space<vmem>>, vector<16x1xf32>,
    %28 = vector.extract_strided_slice %1 {offsets = [192, 0], sizes = [16, 1], strides = [1, 1]} : vector<256x1xf32> to vector<16x1xf32>
    %c243 = arith.constant 243 : index
    %c0_16 = arith.constant 0 : index
    %29 = vector.load %arg19[%c243, %c0_16] : memref<340x1xf32, #tpu.memory_space<vmem>>, vector<16x1xf32>
    tpu.vector_store %arg19[%c243, %c0_16], %28 {strides = array<i32>} : memref<340x1xf32, #tpu.memory_space<vmem>>, vector<16x1xf32>,
    %30 = vector.extract_strided_slice %1 {offsets = [208, 0], sizes = [16, 1], strides = [1, 1]} : vector<256x1xf32> to vector<16x1xf32>
    %c261 = arith.constant 261 : index
    %c0_17 = arith.constant 0 : index
    %31 = vector.load %arg19[%c261, %c0_17] : memref<340x1xf32, #tpu.memory_space<vmem>>, vector<16x1xf32>
    tpu.vector_store %arg19[%c261, %c0_17], %30 {strides = array<i32>} : memref<340x1xf32, #tpu.memory_space<vmem>>, vector<16x1xf32>,
    %32 = vector.extract_strided_slice %1 {offsets = [224, 0], sizes = [16, 1], strides = [1, 1]} : vector<256x1xf32> to vector<16x1xf32>
    %c279 = arith.constant 279 : index
    %c0_18 = arith.constant 0 : index
    %33 = vector.load %arg19[%c279, %c0_18] : memref<340x1xf32, #tpu.memory_space<vmem>>, vector<16x1xf32>
    tpu.vector_store %arg19[%c279, %c0_18], %32 {strides = array<i32>} : memref<340x1xf32, #tpu.memory_space<vmem>>, vector<16x1xf32>,
    %34 = vector.extract_strided_slice %1 {offsets = [240, 0], sizes = [16, 1], strides = [1, 1]} : vector<256x1xf32> to vector<16x1xf32>
    %c297 = arith.constant 297 : index
    %c0_19 = arith.constant 0 : index
    %35 = vector.load %arg19[%c297, %c0_19] : memref<340x1xf32, #tpu.memory_space<vmem>>, vector<16x1xf32>
    tpu.vector_store %arg19[%c297, %c0_19], %34 {strides = array<i32>} : memref<340x1xf32, #tpu.memory_space<vmem>>, vector<16x1xf32>,
    %c7 = arith.constant 7 : index
    %c0_20 = arith.constant 0 : index
    %36 = vector.load %arg19[%c7, %c0_20] : memref<340x1xf32, #tpu.memory_space<vmem>>, vector<288x1xf32>
    %c0_21 = arith.constant 0 : index
    %c0_22 = arith.constant 0 : index
    %37 = vector.load %arg20[%c0_21, %c0_22] : memref<288x9xf32, #tpu.memory_space<vmem>>, vector<288x1xf32>
    tpu.vector_store %arg20[%c0_21, %c0_22], %36 {strides = array<i32>} : memref<288x9xf32, #tpu.memory_space<vmem>>, vector<288x1xf32>,
    %c8 = arith.constant 8 : index
    %c0_23 = arith.constant 0 : index
    %38 = vector.load %arg19[%c8, %c0_23] : memref<340x1xf32, #tpu.memory_space<vmem>>, vector<288x1xf32>
    %c0_24 = arith.constant 0 : index
    %c1 = arith.constant 1 : index
    %39 = vector.load %arg20[%c0_24, %c1] : memref<288x9xf32, #tpu.memory_space<vmem>>, vector<288x1xf32>
    tpu.vector_store %arg20[%c0_24, %c1], %38 {strides = array<i32>} : memref<288x9xf32, #tpu.memory_space<vmem>>, vector<288x1xf32>,
    %c9 = arith.constant 9 : index
    %c0_25 = arith.constant 0 : index
    %40 = vector.load %arg19[%c9, %c0_25] : memref<340x1xf32, #tpu.memory_space<vmem>>, vector<288x1xf32>
    %c0_26 = arith.constant 0 : index
    %c2 = arith.constant 2 : index
    %41 = vector.load %arg20[%c0_26, %c2] : memref<288x9xf32, #tpu.memory_space<vmem>>, vector<288x1xf32>
    tpu.vector_store %arg20[%c0_26, %c2], %40 {strides = array<i32>} : memref<288x9xf32, #tpu.memory_space<vmem>>, vector<288x1xf32>,
    %c25 = arith.constant 25 : index
    %c0_27 = arith.constant 0 : index
    %42 = vector.load %arg19[%c25, %c0_27] : memref<340x1xf32, #tpu.memory_space<vmem>>, vector<288x1xf32>
    %c0_28 = arith.constant 0 : index
    %c3 = arith.constant 3 : index
    %43 = vector.load %arg20[%c0_28, %c3] : memref<288x9xf32, #tpu.memory_space<vmem>>, vector<288x1xf32>
    tpu.vector_store %arg20[%c0_28, %c3], %42 {strides = array<i32>} : memref<288x9xf32, #tpu.memory_space<vmem>>, vector<288x1xf32>,
    %c26 = arith.constant 26 : index
    %c0_29 = arith.constant 0 : index
    %44 = vector.load %arg19[%c26, %c0_29] : memref<340x1xf32, #tpu.memory_space<vmem>>, vector<288x1xf32>
    %c0_30 = arith.constant 0 : index
    %c4 = arith.constant 4 : index
    %45 = vector.load %arg20[%c0_30, %c4] : memref<288x9xf32, #tpu.memory_space<vmem>>, vector<288x1xf32>
    tpu.vector_store %arg20[%c0_30, %c4], %44 {strides = array<i32>} : memref<288x9xf32, #tpu.memory_space<vmem>>, vector<288x1xf32>,
    %c27_31 = arith.constant 27 : index
    %c0_32 = arith.constant 0 : index
    %46 = vector.load %arg19[%c27_31, %c0_32] : memref<340x1xf32, #tpu.memory_space<vmem>>, vector<288x1xf32>
    %c0_33 = arith.constant 0 : index
    %c5 = arith.constant 5 : index
    %47 = vector.load %arg20[%c0_33, %c5] : memref<288x9xf32, #tpu.memory_space<vmem>>, vector<288x1xf32>
    tpu.vector_store %arg20[%c0_33, %c5], %46 {strides = array<i32>} : memref<288x9xf32, #tpu.memory_space<vmem>>, vector<288x1xf32>,
    %c43 = arith.constant 43 : index
    %c0_34 = arith.constant 0 : index
    %48 = vector.load %arg19[%c43, %c0_34] : memref<340x1xf32, #tpu.memory_space<vmem>>, vector<288x1xf32>
    %c0_35 = arith.constant 0 : index
    %c6 = arith.constant 6 : index
    %49 = vector.load %arg20[%c0_35, %c6] : memref<288x9xf32, #tpu.memory_space<vmem>>, vector<288x1xf32>
    tpu.vector_store %arg20[%c0_35, %c6], %48 {strides = array<i32>} : memref<288x9xf32, #tpu.memory_space<vmem>>, vector<288x1xf32>,
    %c44 = arith.constant 44 : index
    %c0_36 = arith.constant 0 : index
    %50 = vector.load %arg19[%c44, %c0_36] : memref<340x1xf32, #tpu.memory_space<vmem>>, vector<288x1xf32>
    %c0_37 = arith.constant 0 : index
    %c7_38 = arith.constant 7 : index
    %51 = vector.load %arg20[%c0_37, %c7_38] : memref<288x9xf32, #tpu.memory_space<vmem>>, vector<288x1xf32>
    tpu.vector_store %arg20[%c0_37, %c7_38], %50 {strides = array<i32>} : memref<288x9xf32, #tpu.memory_space<vmem>>, vector<288x1xf32>,
    %c45_39 = arith.constant 45 : index
    %c0_40 = arith.constant 0 : index
    %52 = vector.load %arg19[%c45_39, %c0_40] : memref<340x1xf32, #tpu.memory_space<vmem>>, vector<288x1xf32>
    %c0_41 = arith.constant 0 : index
    %c8_42 = arith.constant 8 : index
    %53 = vector.load %arg20[%c0_41, %c8_42] : memref<288x9xf32, #tpu.memory_space<vmem>>, vector<288x1xf32>
    tpu.vector_store %arg20[%c0_41, %c8_42], %52 {strides = array<i32>} : memref<288x9xf32, #tpu.memory_space<vmem>>, vector<288x1xf32>,
    %c0_43 = arith.constant 0 : index
    %c0_44 = arith.constant 0 : index
    %54 = vector.load %arg20[%c0_43, %c0_44] : memref<288x9xf32, #tpu.memory_space<vmem>>, vector<288x9xf32>
    %c0_45 = arith.constant 0 : index
    %c0_46 = arith.constant 0 : index
    %55 = vector.load %arg2[%c0_45, %c0_46] : memref<9x32xf32, #tpu.memory_space<vmem>>, vector<9x32xf32>
    %cst_47 = arith.constant dense<0.000000e+00> : vector<288x32xf32>
    %56 = tpu.matmul %54, %55, %cst_47 {dimension_numbers = #tpu.dot_dimension_numbers<[1], [0], [0], [1], [0, 0, 1, 1], [], []>} : vector<288x9xf32>, vector<9x32xf32>, vector<288x32xf32> -> vector<288x32xf32>
    %c0_48 = arith.constant 0 : index
    %c0_49 = arith.constant 0 : index
    %57 = vector.load %arg3[%c0_48, %c0_49] : memref<1x32xf32, #tpu.memory_space<vmem>>, vector<1x32xf32>
    %58 = vector.broadcast %57 : vector<1x32xf32> to vector<288x32xf32>
    %59 = arith.mulf %56, %58 : vector<288x32xf32>
    %c0_50 = arith.constant 0 : index
    %c0_51 = arith.constant 0 : index
    %60 = vector.load %arg4[%c0_50, %c0_51] : memref<1x32xf32, #tpu.memory_space<vmem>>, vector<1x32xf32>
    %61 = vector.broadcast %60 : vector<1x32xf32> to vector<288x32xf32>
    %62 = arith.addf %59, %61 : vector<288x32xf32>
    %cst_52 = arith.constant 0.000000e+00 : f32
    %63 = vector.broadcast %cst_52 : f32 to vector<288x32xf32>
    %64 = arith.maximumf %62, %63 : vector<288x32xf32>
    %65 = vector.extract_strided_slice %64 {offsets = [0, 0], sizes = [270, 32], strides = [1, 1]} : vector<288x32xf32> to vector<270x32xf32>
    %66 = vector.extract_strided_slice %64 {offsets = [18, 0], sizes = [270, 32], strides = [1, 1]} : vector<288x32xf32> to vector<270x32xf32>
    %67 = arith.maximumf %65, %66 : vector<270x32xf32>
    %68 = vector.extract_strided_slice %67 {offsets = [0, 0], sizes = [269, 32], strides = [1, 1]} : vector<270x32xf32> to vector<269x32xf32>
    %69 = vector.extract_strided_slice %67 {offsets = [1, 0], sizes = [269, 32], strides = [1, 1]} : vector<270x32xf32> to vector<269x32xf32>
    %70 = arith.maximumf %68, %69 : vector<269x32xf32>
    %c0_53 = arith.constant 0 : index
    %c0_54 = arith.constant 0 : index
    %71 = vector.load %arg5[%c0_53, %c0_54] : memref<64x269xf32, #tpu.memory_space<vmem>>, vector<64x269xf32>
    %cst_55 = arith.constant dense<0.000000e+00> : vector<64x32xf32>
    %72 = tpu.matmul %71, %70, %cst_55 {dimension_numbers = #tpu.dot_dimension_numbers<[1], [0], [0], [1], [0, 0, 1, 1], [], []>} : vector<64x269xf32>, vector<269x32xf32>, vector<64x32xf32> -> vector<64x32xf32>
    %cst_56 = arith.constant 0.000000e+00 : f32
    %73 = vector.broadcast %cst_56 : f32 to vector<116x32xf32>
    %c0_57 = arith.constant 0 : index
    %c0_58 = arith.constant 0 : index
    %74 = vector.load %arg21[%c0_57, %c0_58] : memref<116x32xf32, #tpu.memory_space<vmem>>, vector<116x32xf32>
    tpu.vector_store %arg21[%c0_57, %c0_58], %73 {strides = array<i32>} : memref<116x32xf32, #tpu.memory_space<vmem>>, vector<116x32xf32>,
    %75 = vector.extract_strided_slice %72 {offsets = [0, 0], sizes = [8, 32], strides = [1, 1]} : vector<64x32xf32> to vector<8x32xf32>
    %c19 = arith.constant 19 : index
    %c0_59 = arith.constant 0 : index
    %76 = vector.load %arg21[%c19, %c0_59] : memref<116x32xf32, #tpu.memory_space<vmem>>, vector<8x32xf32>
    tpu.vector_store %arg21[%c19, %c0_59], %75 {strides = array<i32>} : memref<116x32xf32, #tpu.memory_space<vmem>>, vector<8x32xf32>,
    %77 = vector.extract_strided_slice %72 {offsets = [8, 0], sizes = [8, 32], strides = [1, 1]} : vector<64x32xf32> to vector<8x32xf32>
    %c29 = arith.constant 29 : index
    %c0_60 = arith.constant 0 : index
    %78 = vector.load %arg21[%c29, %c0_60] : memref<116x32xf32, #tpu.memory_space<vmem>>, vector<8x32xf32>
    tpu.vector_store %arg21[%c29, %c0_60], %77 {strides = array<i32>} : memref<116x32xf32, #tpu.memory_space<vmem>>, vector<8x32xf32>,
    %79 = vector.extract_strided_slice %72 {offsets = [16, 0], sizes = [8, 32], strides = [1, 1]} : vector<64x32xf32> to vector<8x32xf32>
    %c39 = arith.constant 39 : index
    %c0_61 = arith.constant 0 : index
    %80 = vector.load %arg21[%c39, %c0_61] : memref<116x32xf32, #tpu.memory_space<vmem>>, vector<8x32xf32>
    tpu.vector_store %arg21[%c39, %c0_61], %79 {strides = array<i32>} : memref<116x32xf32, #tpu.memory_space<vmem>>, vector<8x32xf32>,
    %81 = vector.extract_strided_slice %72 {offsets = [24, 0], sizes = [8, 32], strides = [1, 1]} : vector<64x32xf32> to vector<8x32xf32>
    %c49 = arith.constant 49 : index
    %c0_62 = arith.constant 0 : index
    %82 = vector.load %arg21[%c49, %c0_62] : memref<116x32xf32, #tpu.memory_space<vmem>>, vector<8x32xf32>
    tpu.vector_store %arg21[%c49, %c0_62], %81 {strides = array<i32>} : memref<116x32xf32, #tpu.memory_space<vmem>>, vector<8x32xf32>,
    %83 = vector.extract_strided_slice %72 {offsets = [32, 0], sizes = [8, 32], strides = [1, 1]} : vector<64x32xf32> to vector<8x32xf32>
    %c59 = arith.constant 59 : index
    %c0_63 = arith.constant 0 : index
    %84 = vector.load %arg21[%c59, %c0_63] : memref<116x32xf32, #tpu.memory_space<vmem>>, vector<8x32xf32>
    tpu.vector_store %arg21[%c59, %c0_63], %83 {strides = array<i32>} : memref<116x32xf32, #tpu.memory_space<vmem>>, vector<8x32xf32>,
    %85 = vector.extract_strided_slice %72 {offsets = [40, 0], sizes = [8, 32], strides = [1, 1]} : vector<64x32xf32> to vector<8x32xf32>
    %c69 = arith.constant 69 : index
    %c0_64 = arith.constant 0 : index
    %86 = vector.load %arg21[%c69, %c0_64] : memref<116x32xf32, #tpu.memory_space<vmem>>, vector<8x32xf32>
    tpu.vector_store %arg21[%c69, %c0_64], %85 {strides = array<i32>} : memref<116x32xf32, #tpu.memory_space<vmem>>, vector<8x32xf32>,
    %87 = vector.extract_strided_slice %72 {offsets = [48, 0], sizes = [8, 32], strides = [1, 1]} : vector<64x32xf32> to vector<8x32xf32>
    %c79 = arith.constant 79 : index
    %c0_65 = arith.constant 0 : index
    %88 = vector.load %arg21[%c79, %c0_65] : memref<116x32xf32, #tpu.memory_space<vmem>>, vector<8x32xf32>
    tpu.vector_store %arg21[%c79, %c0_65], %87 {strides = array<i32>} : memref<116x32xf32, #tpu.memory_space<vmem>>, vector<8x32xf32>,
    %89 = vector.extract_strided_slice %72 {offsets = [56, 0], sizes = [8, 32], strides = [1, 1]} : vector<64x32xf32> to vector<8x32xf32>
    %c89 = arith.constant 89 : index
    %c0_66 = arith.constant 0 : index
    %90 = vector.load %arg21[%c89, %c0_66] : memref<116x32xf32, #tpu.memory_space<vmem>>, vector<8x32xf32>
    tpu.vector_store %arg21[%c89, %c0_66], %89 {strides = array<i32>} : memref<116x32xf32, #tpu.memory_space<vmem>>, vector<8x32xf32>,
    %c7_67 = arith.constant 7 : index
    %c0_68 = arith.constant 0 : index
    %91 = vector.load %arg21[%c7_67, %c0_68] : memref<116x32xf32, #tpu.memory_space<vmem>>, vector<80x32xf32>
    %c0_69 = arith.constant 0 : index
    %c0_70 = arith.constant 0 : index
    %92 = vector.load %arg22[%c0_69, %c0_70] : memref<80x288xf32, #tpu.memory_space<vmem>>, vector<80x32xf32>
    tpu.vector_store %arg22[%c0_69, %c0_70], %91 {strides = array<i32>} : memref<80x288xf32, #tpu.memory_space<vmem>>, vector<80x32xf32>,
    %c8_71 = arith.constant 8 : index
    %c0_72 = arith.constant 0 : index
    %93 = vector.load %arg21[%c8_71, %c0_72] : memref<116x32xf32, #tpu.memory_space<vmem>>, vector<80x32xf32>
    %c0_73 = arith.constant 0 : index
    %c32 = arith.constant 32 : index
    %94 = vector.load %arg22[%c0_73, %c32] : memref<80x288xf32, #tpu.memory_space<vmem>>, vector<80x32xf32>
    tpu.vector_store %arg22[%c0_73, %c32], %93 {strides = array<i32>} : memref<80x288xf32, #tpu.memory_space<vmem>>, vector<80x32xf32>,
    %c9_74 = arith.constant 9 : index
    %c0_75 = arith.constant 0 : index
    %95 = vector.load %arg21[%c9_74, %c0_75] : memref<116x32xf32, #tpu.memory_space<vmem>>, vector<80x32xf32>
    %c0_76 = arith.constant 0 : index
    %c64 = arith.constant 64 : index
    %96 = vector.load %arg22[%c0_76, %c64] : memref<80x288xf32, #tpu.memory_space<vmem>>, vector<80x32xf32>
    tpu.vector_store %arg22[%c0_76, %c64], %95 {strides = array<i32>} : memref<80x288xf32, #tpu.memory_space<vmem>>, vector<80x32xf32>,
    %c17 = arith.constant 17 : index
    %c0_77 = arith.constant 0 : index
    %97 = vector.load %arg21[%c17, %c0_77] : memref<116x32xf32, #tpu.memory_space<vmem>>, vector<80x32xf32>
    %c0_78 = arith.constant 0 : index
    %c96 = arith.constant 96 : index
    %98 = vector.load %arg22[%c0_78, %c96] : memref<80x288xf32, #tpu.memory_space<vmem>>, vector<80x32xf32>
    tpu.vector_store %arg22[%c0_78, %c96], %97 {strides = array<i32>} : memref<80x288xf32, #tpu.memory_space<vmem>>, vector<80x32xf32>,
    %c18 = arith.constant 18 : index
    %c0_79 = arith.constant 0 : index
    %99 = vector.load %arg21[%c18, %c0_79] : memref<116x32xf32, #tpu.memory_space<vmem>>, vector<80x32xf32>
    %c0_80 = arith.constant 0 : index
    %c128 = arith.constant 128 : index
    %100 = vector.load %arg22[%c0_80, %c128] : memref<80x288xf32, #tpu.memory_space<vmem>>, vector<80x32xf32>
    tpu.vector_store %arg22[%c0_80, %c128], %99 {strides = array<i32>} : memref<80x288xf32, #tpu.memory_space<vmem>>, vector<80x32xf32>,
    %c19_81 = arith.constant 19 : index
    %c0_82 = arith.constant 0 : index
    %101 = vector.load %arg21[%c19_81, %c0_82] : memref<116x32xf32, #tpu.memory_space<vmem>>, vector<80x32xf32>
    %c0_83 = arith.constant 0 : index
    %c160 = arith.constant 160 : index
    %102 = vector.load %arg22[%c0_83, %c160] : memref<80x288xf32, #tpu.memory_space<vmem>>, vector<80x32xf32>
    tpu.vector_store %arg22[%c0_83, %c160], %101 {strides = array<i32>} : memref<80x288xf32, #tpu.memory_space<vmem>>, vector<80x32xf32>,
    %c27_84 = arith.constant 27 : index
    %c0_85 = arith.constant 0 : index
    %103 = vector.load %arg21[%c27_84, %c0_85] : memref<116x32xf32, #tpu.memory_space<vmem>>, vector<80x32xf32>
    %c0_86 = arith.constant 0 : index
    %c192 = arith.constant 192 : index
    %104 = vector.load %arg22[%c0_86, %c192] : memref<80x288xf32, #tpu.memory_space<vmem>>, vector<80x32xf32>
    tpu.vector_store %arg22[%c0_86, %c192], %103 {strides = array<i32>} : memref<80x288xf32, #tpu.memory_space<vmem>>, vector<80x32xf32>,
    %c28 = arith.constant 28 : index
    %c0_87 = arith.constant 0 : index
    %105 = vector.load %arg21[%c28, %c0_87] : memref<116x32xf32, #tpu.memory_space<vmem>>, vector<80x32xf32>
    %c0_88 = arith.constant 0 : index
    %c224 = arith.constant 224 : index
    %106 = vector.load %arg22[%c0_88, %c224] : memref<80x288xf32, #tpu.memory_space<vmem>>, vector<80x32xf32>
    tpu.vector_store %arg22[%c0_88, %c224], %105 {strides = array<i32>} : memref<80x288xf32, #tpu.memory_space<vmem>>, vector<80x32xf32>,
    %c29_89 = arith.constant 29 : index
    %c0_90 = arith.constant 0 : index
    %107 = vector.load %arg21[%c29_89, %c0_90] : memref<116x32xf32, #tpu.memory_space<vmem>>, vector<80x32xf32>
    %c0_91 = arith.constant 0 : index
    %c256 = arith.constant 256 : index
    %108 = vector.load %arg22[%c0_91, %c256] : memref<80x288xf32, #tpu.memory_space<vmem>>, vector<80x32xf32>
    tpu.vector_store %arg22[%c0_91, %c256], %107 {strides = array<i32>} : memref<80x288xf32, #tpu.memory_space<vmem>>, vector<80x32xf32>,
    %c0_92 = arith.constant 0 : index
    %c0_93 = arith.constant 0 : index
    %109 = vector.load %arg22[%c0_92, %c0_93] : memref<80x288xf32, #tpu.memory_space<vmem>>, vector<80x288xf32>
    %c0_94 = arith.constant 0 : index
    %c0_95 = arith.constant 0 : index
    %110 = vector.load %arg6[%c0_94, %c0_95] : memref<288x64xf32, #tpu.memory_space<vmem>>, vector<288x64xf32>
    %cst_96 = arith.constant dense<0.000000e+00> : vector<80x64xf32>
    %111 = tpu.matmul %109, %110, %cst_96 {dimension_numbers = #tpu.dot_dimension_numbers<[1], [0], [0], [1], [0, 0, 1, 1], [], []>} : vector<80x288xf32>, vector<288x64xf32>, vector<80x64xf32> -> vector<80x64xf32>
    %c0_97 = arith.constant 0 : index
    %c0_98 = arith.constant 0 : index
    %112 = vector.load %arg7[%c0_97, %c0_98] : memref<1x64xf32, #tpu.memory_space<vmem>>, vector<1x64xf32>
    %113 = vector.broadcast %112 : vector<1x64xf32> to vector<80x64xf32>
    %114 = arith.mulf %111, %113 : vector<80x64xf32>
    %c0_99 = arith.constant 0 : index
    %c0_100 = arith.constant 0 : index
    %115 = vector.load %arg8[%c0_99, %c0_100] : memref<1x64xf32, #tpu.memory_space<vmem>>, vector<1x64xf32>
    %116 = vector.broadcast %115 : vector<1x64xf32> to vector<80x64xf32>
    %117 = arith.addf %114, %116 : vector<80x64xf32>
    %cst_101 = arith.constant 0.000000e+00 : f32
    %118 = vector.broadcast %cst_101 : f32 to vector<80x64xf32>
    %119 = arith.maximumf %117, %118 : vector<80x64xf32>
    %120 = vector.extract_strided_slice %119 {offsets = [0, 0], sizes = [70, 64], strides = [1, 1]} : vector<80x64xf32> to vector<70x64xf32>
    %121 = vector.extract_strided_slice %119 {offsets = [10, 0], sizes = [70, 64], strides = [1, 1]} : vector<80x64xf32> to vector<70x64xf32>
    %122 = arith.maximumf %120, %121 : vector<70x64xf32>
    %123 = vector.extract_strided_slice %122 {offsets = [0, 0], sizes = [69, 64], strides = [1, 1]} : vector<70x64xf32> to vector<69x64xf32>
    %124 = vector.extract_strided_slice %122 {offsets = [1, 0], sizes = [69, 64], strides = [1, 1]} : vector<70x64xf32> to vector<69x64xf32>
    %125 = arith.maximumf %123, %124 : vector<69x64xf32>
    %c0_102 = arith.constant 0 : index
    %c0_103 = arith.constant 0 : index
    %126 = vector.load %arg9[%c0_102, %c0_103] : memref<16x69xf32, #tpu.memory_space<vmem>>, vector<16x69xf32>
    %cst_104 = arith.constant dense<0.000000e+00> : vector<16x64xf32>
    %127 = tpu.matmul %126, %125, %cst_104 {dimension_numbers = #tpu.dot_dimension_numbers<[1], [0], [0], [1], [0, 0, 1, 1], [], []>} : vector<16x69xf32>, vector<69x64xf32>, vector<16x64xf32> -> vector<16x64xf32>
    %cst_105 = arith.constant 0.000000e+00 : f32
    %128 = vector.broadcast %cst_105 : f32 to vector<52x64xf32>
    %c0_106 = arith.constant 0 : index
    %c0_107 = arith.constant 0 : index
    %129 = vector.load %arg23[%c0_106, %c0_107] : memref<52x64xf32, #tpu.memory_space<vmem>>, vector<52x64xf32>
    tpu.vector_store %arg23[%c0_106, %c0_107], %128 {strides = array<i32>} : memref<52x64xf32, #tpu.memory_space<vmem>>, vector<52x64xf32>,
    %130 = vector.extract_strided_slice %127 {offsets = [0, 0], sizes = [4, 64], strides = [1, 1]} : vector<16x64xf32> to vector<4x64xf32>
    %c15 = arith.constant 15 : index
    %c0_108 = arith.constant 0 : index
    %131 = vector.load %arg23[%c15, %c0_108] : memref<52x64xf32, #tpu.memory_space<vmem>>, vector<4x64xf32>
    tpu.vector_store %arg23[%c15, %c0_108], %130 {strides = array<i32>} : memref<52x64xf32, #tpu.memory_space<vmem>>, vector<4x64xf32>,
    %132 = vector.extract_strided_slice %127 {offsets = [4, 0], sizes = [4, 64], strides = [1, 1]} : vector<16x64xf32> to vector<4x64xf32>
    %c21 = arith.constant 21 : index
    %c0_109 = arith.constant 0 : index
    %133 = vector.load %arg23[%c21, %c0_109] : memref<52x64xf32, #tpu.memory_space<vmem>>, vector<4x64xf32>
    tpu.vector_store %arg23[%c21, %c0_109], %132 {strides = array<i32>} : memref<52x64xf32, #tpu.memory_space<vmem>>, vector<4x64xf32>,
    %134 = vector.extract_strided_slice %127 {offsets = [8, 0], sizes = [4, 64], strides = [1, 1]} : vector<16x64xf32> to vector<4x64xf32>
    %c27_110 = arith.constant 27 : index
    %c0_111 = arith.constant 0 : index
    %135 = vector.load %arg23[%c27_110, %c0_111] : memref<52x64xf32, #tpu.memory_space<vmem>>, vector<4x64xf32>
    tpu.vector_store %arg23[%c27_110, %c0_111], %134 {strides = array<i32>} : memref<52x64xf32, #tpu.memory_space<vmem>>, vector<4x64xf32>,
    %136 = vector.extract_strided_slice %127 {offsets = [12, 0], sizes = [4, 64], strides = [1, 1]} : vector<16x64xf32> to vector<4x64xf32>
    %c33 = arith.constant 33 : index
    %c0_112 = arith.constant 0 : index
    %137 = vector.load %arg23[%c33, %c0_112] : memref<52x64xf32, #tpu.memory_space<vmem>>, vector<4x64xf32>
    tpu.vector_store %arg23[%c33, %c0_112], %136 {strides = array<i32>} : memref<52x64xf32, #tpu.memory_space<vmem>>, vector<4x64xf32>,
    %c7_113 = arith.constant 7 : index
    %c0_114 = arith.constant 0 : index
    %138 = vector.load %arg23[%c7_113, %c0_114] : memref<52x64xf32, #tpu.memory_space<vmem>>, vector<24x64xf32>
    %c0_115 = arith.constant 0 : index
    %c0_116 = arith.constant 0 : index
    %139 = vector.load %arg24[%c0_115, %c0_116] : memref<24x576xf32, #tpu.memory_space<vmem>>, vector<24x64xf32>
    tpu.vector_store %arg24[%c0_115, %c0_116], %138 {strides = array<i32>} : memref<24x576xf32, #tpu.memory_space<vmem>>, vector<24x64xf32>,
    %c8_117 = arith.constant 8 : index
    %c0_118 = arith.constant 0 : index
    %140 = vector.load %arg23[%c8_117, %c0_118] : memref<52x64xf32, #tpu.memory_space<vmem>>, vector<24x64xf32>
    %c0_119 = arith.constant 0 : index
    %c64_120 = arith.constant 64 : index
    %141 = vector.load %arg24[%c0_119, %c64_120] : memref<24x576xf32, #tpu.memory_space<vmem>>, vector<24x64xf32>
    tpu.vector_store %arg24[%c0_119, %c64_120], %140 {strides = array<i32>} : memref<24x576xf32, #tpu.memory_space<vmem>>, vector<24x64xf32>,
    %c9_121 = arith.constant 9 : index
    %c0_122 = arith.constant 0 : index
    %142 = vector.load %arg23[%c9_121, %c0_122] : memref<52x64xf32, #tpu.memory_space<vmem>>, vector<24x64xf32>
    %c0_123 = arith.constant 0 : index
    %c128_124 = arith.constant 128 : index
    %143 = vector.load %arg24[%c0_123, %c128_124] : memref<24x576xf32, #tpu.memory_space<vmem>>, vector<24x64xf32>
    tpu.vector_store %arg24[%c0_123, %c128_124], %142 {strides = array<i32>} : memref<24x576xf32, #tpu.memory_space<vmem>>, vector<24x64xf32>,
    %c13 = arith.constant 13 : index
    %c0_125 = arith.constant 0 : index
    %144 = vector.load %arg23[%c13, %c0_125] : memref<52x64xf32, #tpu.memory_space<vmem>>, vector<24x64xf32>
    %c0_126 = arith.constant 0 : index
    %c192_127 = arith.constant 192 : index
    %145 = vector.load %arg24[%c0_126, %c192_127] : memref<24x576xf32, #tpu.memory_space<vmem>>, vector<24x64xf32>
    tpu.vector_store %arg24[%c0_126, %c192_127], %144 {strides = array<i32>} : memref<24x576xf32, #tpu.memory_space<vmem>>, vector<24x64xf32>,
    %c14 = arith.constant 14 : index
    %c0_128 = arith.constant 0 : index
    %146 = vector.load %arg23[%c14, %c0_128] : memref<52x64xf32, #tpu.memory_space<vmem>>, vector<24x64xf32>
    %c0_129 = arith.constant 0 : index
    %c256_130 = arith.constant 256 : index
    %147 = vector.load %arg24[%c0_129, %c256_130] : memref<24x576xf32, #tpu.memory_space<vmem>>, vector<24x64xf32>
    tpu.vector_store %arg24[%c0_129, %c256_130], %146 {strides = array<i32>} : memref<24x576xf32, #tpu.memory_space<vmem>>, vector<24x64xf32>,
    %c15_131 = arith.constant 15 : index
    %c0_132 = arith.constant 0 : index
    %148 = vector.load %arg23[%c15_131, %c0_132] : memref<52x64xf32, #tpu.memory_space<vmem>>, vector<24x64xf32>
    %c0_133 = arith.constant 0 : index
    %c320 = arith.constant 320 : index
    %149 = vector.load %arg24[%c0_133, %c320] : memref<24x576xf32, #tpu.memory_space<vmem>>, vector<24x64xf32>
    tpu.vector_store %arg24[%c0_133, %c320], %148 {strides = array<i32>} : memref<24x576xf32, #tpu.memory_space<vmem>>, vector<24x64xf32>,
    %c19_134 = arith.constant 19 : index
    %c0_135 = arith.constant 0 : index
    %150 = vector.load %arg23[%c19_134, %c0_135] : memref<52x64xf32, #tpu.memory_space<vmem>>, vector<24x64xf32>
    %c0_136 = arith.constant 0 : index
    %c384 = arith.constant 384 : index
    %151 = vector.load %arg24[%c0_136, %c384] : memref<24x576xf32, #tpu.memory_space<vmem>>, vector<24x64xf32>
    tpu.vector_store %arg24[%c0_136, %c384], %150 {strides = array<i32>} : memref<24x576xf32, #tpu.memory_space<vmem>>, vector<24x64xf32>,
    %c20 = arith.constant 20 : index
    %c0_137 = arith.constant 0 : index
    %152 = vector.load %arg23[%c20, %c0_137] : memref<52x64xf32, #tpu.memory_space<vmem>>, vector<24x64xf32>
    %c0_138 = arith.constant 0 : index
    %c448 = arith.constant 448 : index
    %153 = vector.load %arg24[%c0_138, %c448] : memref<24x576xf32, #tpu.memory_space<vmem>>, vector<24x64xf32>
    tpu.vector_store %arg24[%c0_138, %c448], %152 {strides = array<i32>} : memref<24x576xf32, #tpu.memory_space<vmem>>, vector<24x64xf32>,
    %c21_139 = arith.constant 21 : index
    %c0_140 = arith.constant 0 : index
    %154 = vector.load %arg23[%c21_139, %c0_140] : memref<52x64xf32, #tpu.memory_space<vmem>>, vector<24x64xf32>
    %c0_141 = arith.constant 0 : index
    %c512 = arith.constant 512 : index
    %155 = vector.load %arg24[%c0_141, %c512] : memref<24x576xf32, #tpu.memory_space<vmem>>, vector<24x64xf32>
    tpu.vector_store %arg24[%c0_141, %c512], %154 {strides = array<i32>} : memref<24x576xf32, #tpu.memory_space<vmem>>, vector<24x64xf32>,
    %c0_142 = arith.constant 0 : index
    %c0_143 = arith.constant 0 : index
    %156 = vector.load %arg24[%c0_142, %c0_143] : memref<24x576xf32, #tpu.memory_space<vmem>>, vector<24x576xf32>
    %c0_144 = arith.constant 0 : index
    %c0_145 = arith.constant 0 : index
    %157 = vector.load %arg10[%c0_144, %c0_145] : memref<576x128xf32, #tpu.memory_space<vmem>>, vector<576x128xf32>
    %cst_146 = arith.constant dense<0.000000e+00> : vector<24x128xf32>
    %158 = tpu.matmul %156, %157, %cst_146 {dimension_numbers = #tpu.dot_dimension_numbers<[1], [0], [0], [1], [0, 0, 1, 1], [], []>} : vector<24x576xf32>, vector<576x128xf32>, vector<24x128xf32> -> vector<24x128xf32>
    %c0_147 = arith.constant 0 : index
    %c0_148 = arith.constant 0 : index
    %159 = vector.load %arg11[%c0_147, %c0_148] : memref<1x128xf32, #tpu.memory_space<vmem>>, vector<1x128xf32>
    %160 = vector.broadcast %159 : vector<1x128xf32> to vector<24x128xf32>
    %161 = arith.mulf %158, %160 : vector<24x128xf32>
    %c0_149 = arith.constant 0 : index
    %c0_150 = arith.constant 0 : index
    %162 = vector.load %arg12[%c0_149, %c0_150] : memref<1x128xf32, #tpu.memory_space<vmem>>, vector<1x128xf32>
    %163 = vector.broadcast %162 : vector<1x128xf32> to vector<24x128xf32>
    %164 = arith.addf %161, %163 : vector<24x128xf32>
    %cst_151 = arith.constant 0.000000e+00 : f32
    %165 = vector.broadcast %cst_151 : f32 to vector<24x128xf32>
    %166 = arith.maximumf %164, %165 : vector<24x128xf32>
    %c0_152 = arith.constant 0 : index
    %c0_153 = arith.constant 0 : index
    %167 = vector.load %arg13[%c0_152, %c0_153] : memref<16x24xf32, #tpu.memory_space<vmem>>, vector<16x24xf32>
    %cst_154 = arith.constant dense<0.000000e+00> : vector<16x128xf32>
    %168 = tpu.matmul %167, %166, %cst_154 {dimension_numbers = #tpu.dot_dimension_numbers<[1], [0], [0], [1], [0, 0, 1, 1], [], []>} : vector<16x24xf32>, vector<24x128xf32>, vector<16x128xf32> -> vector<16x128xf32>
    %c0_155 = arith.constant 0 : index
    %c0_156 = arith.constant 0 : index
    %169 = vector.load %arg15[%c0_155, %c0_156] : memref<1x256xf32, #tpu.memory_space<vmem>>, vector<1x256xf32>
    %170 = vector.extract_strided_slice %168 {offsets = [0, 0], sizes = [1, 128], strides = [1, 1]} : vector<16x128xf32> to vector<1x128xf32>
    %171 = arith.truncf %170 : vector<1x128xf32> to vector<1x128xbf16>
    %c0_157 = arith.constant 0 : index
    %c0_158 = arith.constant 0 : index
    %c0_159 = arith.constant 0 : index
    %172 = vector.load %arg14[%c0_157, %c0_158, %c0_159] : memref<16x128x256xbf16, #tpu.memory_space<vmem>>, vector<1x128x256xbf16>
    %173 = vector.shape_cast %172 : vector<1x128x256xbf16> to vector<128x256xbf16>
    %cst_160 = arith.constant dense<0.000000e+00> : vector<1x256xf32>
    %174 = tpu.matmul %171, %173, %cst_160 {dimension_numbers = #tpu.dot_dimension_numbers<[1], [0], [0], [1], [0, 0, 1, 1], [], []>} : vector<1x128xbf16>, vector<128x256xbf16>, vector<1x256xf32> -> vector<1x256xf32>
    %175 = arith.addf %169, %174 : vector<1x256xf32>
    %176 = vector.extract_strided_slice %168 {offsets = [1, 0], sizes = [1, 128], strides = [1, 1]} : vector<16x128xf32> to vector<1x128xf32>
    %177 = arith.truncf %176 : vector<1x128xf32> to vector<1x128xbf16>
    %c1_161 = arith.constant 1 : index
    %c0_162 = arith.constant 0 : index
    %c0_163 = arith.constant 0 : index
    %178 = vector.load %arg14[%c1_161, %c0_162, %c0_163] : memref<16x128x256xbf16, #tpu.memory_space<vmem>>, vector<1x128x256xbf16>
    %179 = vector.shape_cast %178 : vector<1x128x256xbf16> to vector<128x256xbf16>
    %cst_164 = arith.constant dense<0.000000e+00> : vector<1x256xf32>
    %180 = tpu.matmul %177, %179, %cst_164 {dimension_numbers = #tpu.dot_dimension_numbers<[1], [0], [0], [1], [0, 0, 1, 1], [], []>} : vector<1x128xbf16>, vector<128x256xbf16>, vector<1x256xf32> -> vector<1x256xf32>
    %181 = arith.addf %175, %180 : vector<1x256xf32>
    %182 = vector.extract_strided_slice %168 {offsets = [2, 0], sizes = [1, 128], strides = [1, 1]} : vector<16x128xf32> to vector<1x128xf32>
    %183 = arith.truncf %182 : vector<1x128xf32> to vector<1x128xbf16>
    %c2_165 = arith.constant 2 : index
    %c0_166 = arith.constant 0 : index
    %c0_167 = arith.constant 0 : index
    %184 = vector.load %arg14[%c2_165, %c0_166, %c0_167] : memref<16x128x256xbf16, #tpu.memory_space<vmem>>, vector<1x128x256xbf16>
    %185 = vector.shape_cast %184 : vector<1x128x256xbf16> to vector<128x256xbf16>
    %cst_168 = arith.constant dense<0.000000e+00> : vector<1x256xf32>
    %186 = tpu.matmul %183, %185, %cst_168 {dimension_numbers = #tpu.dot_dimension_numbers<[1], [0], [0], [1], [0, 0, 1, 1], [], []>} : vector<1x128xbf16>, vector<128x256xbf16>, vector<1x256xf32> -> vector<1x256xf32>
    %187 = arith.addf %181, %186 : vector<1x256xf32>
    %188 = vector.extract_strided_slice %168 {offsets = [3, 0], sizes = [1, 128], strides = [1, 1]} : vector<16x128xf32> to vector<1x128xf32>
    %189 = arith.truncf %188 : vector<1x128xf32> to vector<1x128xbf16>
    %c3_169 = arith.constant 3 : index
    %c0_170 = arith.constant 0 : index
    %c0_171 = arith.constant 0 : index
    %190 = vector.load %arg14[%c3_169, %c0_170, %c0_171] : memref<16x128x256xbf16, #tpu.memory_space<vmem>>, vector<1x128x256xbf16>
    %191 = vector.shape_cast %190 : vector<1x128x256xbf16> to vector<128x256xbf16>
    %cst_172 = arith.constant dense<0.000000e+00> : vector<1x256xf32>
    %192 = tpu.matmul %189, %191, %cst_172 {dimension_numbers = #tpu.dot_dimension_numbers<[1], [0], [0], [1], [0, 0, 1, 1], [], []>} : vector<1x128xbf16>, vector<128x256xbf16>, vector<1x256xf32> -> vector<1x256xf32>
    %193 = arith.addf %187, %192 : vector<1x256xf32>
    %194 = vector.extract_strided_slice %168 {offsets = [4, 0], sizes = [1, 128], strides = [1, 1]} : vector<16x128xf32> to vector<1x128xf32>
    %195 = arith.truncf %194 : vector<1x128xf32> to vector<1x128xbf16>
    %c4_173 = arith.constant 4 : index
    %c0_174 = arith.constant 0 : index
    %c0_175 = arith.constant 0 : index
    %196 = vector.load %arg14[%c4_173, %c0_174, %c0_175] : memref<16x128x256xbf16, #tpu.memory_space<vmem>>, vector<1x128x256xbf16>
    %197 = vector.shape_cast %196 : vector<1x128x256xbf16> to vector<128x256xbf16>
    %cst_176 = arith.constant dense<0.000000e+00> : vector<1x256xf32>
    %198 = tpu.matmul %195, %197, %cst_176 {dimension_numbers = #tpu.dot_dimension_numbers<[1], [0], [0], [1], [0, 0, 1, 1], [], []>} : vector<1x128xbf16>, vector<128x256xbf16>, vector<1x256xf32> -> vector<1x256xf32>
    %199 = arith.addf %193, %198 : vector<1x256xf32>
    %200 = vector.extract_strided_slice %168 {offsets = [5, 0], sizes = [1, 128], strides = [1, 1]} : vector<16x128xf32> to vector<1x128xf32>
    %201 = arith.truncf %200 : vector<1x128xf32> to vector<1x128xbf16>
    %c5_177 = arith.constant 5 : index
    %c0_178 = arith.constant 0 : index
    %c0_179 = arith.constant 0 : index
    %202 = vector.load %arg14[%c5_177, %c0_178, %c0_179] : memref<16x128x256xbf16, #tpu.memory_space<vmem>>, vector<1x128x256xbf16>
    %203 = vector.shape_cast %202 : vector<1x128x256xbf16> to vector<128x256xbf16>
    %cst_180 = arith.constant dense<0.000000e+00> : vector<1x256xf32>
    %204 = tpu.matmul %201, %203, %cst_180 {dimension_numbers = #tpu.dot_dimension_numbers<[1], [0], [0], [1], [0, 0, 1, 1], [], []>} : vector<1x128xbf16>, vector<128x256xbf16>, vector<1x256xf32> -> vector<1x256xf32>
    %205 = arith.addf %199, %204 : vector<1x256xf32>
    %206 = vector.extract_strided_slice %168 {offsets = [6, 0], sizes = [1, 128], strides = [1, 1]} : vector<16x128xf32> to vector<1x128xf32>
    %207 = arith.truncf %206 : vector<1x128xf32> to vector<1x128xbf16>
    %c6_181 = arith.constant 6 : index
    %c0_182 = arith.constant 0 : index
    %c0_183 = arith.constant 0 : index
    %208 = vector.load %arg14[%c6_181, %c0_182, %c0_183] : memref<16x128x256xbf16, #tpu.memory_space<vmem>>, vector<1x128x256xbf16>
    %209 = vector.shape_cast %208 : vector<1x128x256xbf16> to vector<128x256xbf16>
    %cst_184 = arith.constant dense<0.000000e+00> : vector<1x256xf32>
    %210 = tpu.matmul %207, %209, %cst_184 {dimension_numbers = #tpu.dot_dimension_numbers<[1], [0], [0], [1], [0, 0, 1, 1], [], []>} : vector<1x128xbf16>, vector<128x256xbf16>, vector<1x256xf32> -> vector<1x256xf32>
    %211 = arith.addf %205, %210 : vector<1x256xf32>
    %212 = vector.extract_strided_slice %168 {offsets = [7, 0], sizes = [1, 128], strides = [1, 1]} : vector<16x128xf32> to vector<1x128xf32>
    %213 = arith.truncf %212 : vector<1x128xf32> to vector<1x128xbf16>
    %c7_185 = arith.constant 7 : index
    %c0_186 = arith.constant 0 : index
    %c0_187 = arith.constant 0 : index
    %214 = vector.load %arg14[%c7_185, %c0_186, %c0_187] : memref<16x128x256xbf16, #tpu.memory_space<vmem>>, vector<1x128x256xbf16>
    %215 = vector.shape_cast %214 : vector<1x128x256xbf16> to vector<128x256xbf16>
    %cst_188 = arith.constant dense<0.000000e+00> : vector<1x256xf32>
    %216 = tpu.matmul %213, %215, %cst_188 {dimension_numbers = #tpu.dot_dimension_numbers<[1], [0], [0], [1], [0, 0, 1, 1], [], []>} : vector<1x128xbf16>, vector<128x256xbf16>, vector<1x256xf32> -> vector<1x256xf32>
    %217 = arith.addf %211, %216 : vector<1x256xf32>
    %218 = vector.extract_strided_slice %168 {offsets = [8, 0], sizes = [1, 128], strides = [1, 1]} : vector<16x128xf32> to vector<1x128xf32>
    %219 = arith.truncf %218 : vector<1x128xf32> to vector<1x128xbf16>
    %c8_189 = arith.constant 8 : index
    %c0_190 = arith.constant 0 : index
    %c0_191 = arith.constant 0 : index
    %220 = vector.load %arg14[%c8_189, %c0_190, %c0_191] : memref<16x128x256xbf16, #tpu.memory_space<vmem>>, vector<1x128x256xbf16>
    %221 = vector.shape_cast %220 : vector<1x128x256xbf16> to vector<128x256xbf16>
    %cst_192 = arith.constant dense<0.000000e+00> : vector<1x256xf32>
    %222 = tpu.matmul %219, %221, %cst_192 {dimension_numbers = #tpu.dot_dimension_numbers<[1], [0], [0], [1], [0, 0, 1, 1], [], []>} : vector<1x128xbf16>, vector<128x256xbf16>, vector<1x256xf32> -> vector<1x256xf32>
    %223 = arith.addf %217, %222 : vector<1x256xf32>
    %224 = vector.extract_strided_slice %168 {offsets = [9, 0], sizes = [1, 128], strides = [1, 1]} : vector<16x128xf32> to vector<1x128xf32>
    %225 = arith.truncf %224 : vector<1x128xf32> to vector<1x128xbf16>
    %c9_193 = arith.constant 9 : index
    %c0_194 = arith.constant 0 : index
    %c0_195 = arith.constant 0 : index
    %226 = vector.load %arg14[%c9_193, %c0_194, %c0_195] : memref<16x128x256xbf16, #tpu.memory_space<vmem>>, vector<1x128x256xbf16>
    %227 = vector.shape_cast %226 : vector<1x128x256xbf16> to vector<128x256xbf16>
    %cst_196 = arith.constant dense<0.000000e+00> : vector<1x256xf32>
    %228 = tpu.matmul %225, %227, %cst_196 {dimension_numbers = #tpu.dot_dimension_numbers<[1], [0], [0], [1], [0, 0, 1, 1], [], []>} : vector<1x128xbf16>, vector<128x256xbf16>, vector<1x256xf32> -> vector<1x256xf32>
    %229 = arith.addf %223, %228 : vector<1x256xf32>
    %230 = vector.extract_strided_slice %168 {offsets = [10, 0], sizes = [1, 128], strides = [1, 1]} : vector<16x128xf32> to vector<1x128xf32>
    %231 = arith.truncf %230 : vector<1x128xf32> to vector<1x128xbf16>
    %c10 = arith.constant 10 : index
    %c0_197 = arith.constant 0 : index
    %c0_198 = arith.constant 0 : index
    %232 = vector.load %arg14[%c10, %c0_197, %c0_198] : memref<16x128x256xbf16, #tpu.memory_space<vmem>>, vector<1x128x256xbf16>
    %233 = vector.shape_cast %232 : vector<1x128x256xbf16> to vector<128x256xbf16>
    %cst_199 = arith.constant dense<0.000000e+00> : vector<1x256xf32>
    %234 = tpu.matmul %231, %233, %cst_199 {dimension_numbers = #tpu.dot_dimension_numbers<[1], [0], [0], [1], [0, 0, 1, 1], [], []>} : vector<1x128xbf16>, vector<128x256xbf16>, vector<1x256xf32> -> vector<1x256xf32>
    %235 = arith.addf %229, %234 : vector<1x256xf32>
    %236 = vector.extract_strided_slice %168 {offsets = [11, 0], sizes = [1, 128], strides = [1, 1]} : vector<16x128xf32> to vector<1x128xf32>
    %237 = arith.truncf %236 : vector<1x128xf32> to vector<1x128xbf16>
    %c11 = arith.constant 11 : index
    %c0_200 = arith.constant 0 : index
    %c0_201 = arith.constant 0 : index
    %238 = vector.load %arg14[%c11, %c0_200, %c0_201] : memref<16x128x256xbf16, #tpu.memory_space<vmem>>, vector<1x128x256xbf16>
    %239 = vector.shape_cast %238 : vector<1x128x256xbf16> to vector<128x256xbf16>
    %cst_202 = arith.constant dense<0.000000e+00> : vector<1x256xf32>
    %240 = tpu.matmul %237, %239, %cst_202 {dimension_numbers = #tpu.dot_dimension_numbers<[1], [0], [0], [1], [0, 0, 1, 1], [], []>} : vector<1x128xbf16>, vector<128x256xbf16>, vector<1x256xf32> -> vector<1x256xf32>
    %241 = arith.addf %235, %240 : vector<1x256xf32>
    %242 = vector.extract_strided_slice %168 {offsets = [12, 0], sizes = [1, 128], strides = [1, 1]} : vector<16x128xf32> to vector<1x128xf32>
    %243 = arith.truncf %242 : vector<1x128xf32> to vector<1x128xbf16>
    %c12 = arith.constant 12 : index
    %c0_203 = arith.constant 0 : index
    %c0_204 = arith.constant 0 : index
    %244 = vector.load %arg14[%c12, %c0_203, %c0_204] : memref<16x128x256xbf16, #tpu.memory_space<vmem>>, vector<1x128x256xbf16>
    %245 = vector.shape_cast %244 : vector<1x128x256xbf16> to vector<128x256xbf16>
    %cst_205 = arith.constant dense<0.000000e+00> : vector<1x256xf32>
    %246 = tpu.matmul %243, %245, %cst_205 {dimension_numbers = #tpu.dot_dimension_numbers<[1], [0], [0], [1], [0, 0, 1, 1], [], []>} : vector<1x128xbf16>, vector<128x256xbf16>, vector<1x256xf32> -> vector<1x256xf32>
    %247 = arith.addf %241, %246 : vector<1x256xf32>
    %248 = vector.extract_strided_slice %168 {offsets = [13, 0], sizes = [1, 128], strides = [1, 1]} : vector<16x128xf32> to vector<1x128xf32>
    %249 = arith.truncf %248 : vector<1x128xf32> to vector<1x128xbf16>
    %c13_206 = arith.constant 13 : index
    %c0_207 = arith.constant 0 : index
    %c0_208 = arith.constant 0 : index
    %250 = vector.load %arg14[%c13_206, %c0_207, %c0_208] : memref<16x128x256xbf16, #tpu.memory_space<vmem>>, vector<1x128x256xbf16>
    %251 = vector.shape_cast %250 : vector<1x128x256xbf16> to vector<128x256xbf16>
    %cst_209 = arith.constant dense<0.000000e+00> : vector<1x256xf32>
    %252 = tpu.matmul %249, %251, %cst_209 {dimension_numbers = #tpu.dot_dimension_numbers<[1], [0], [0], [1], [0, 0, 1, 1], [], []>} : vector<1x128xbf16>, vector<128x256xbf16>, vector<1x256xf32> -> vector<1x256xf32>
    %253 = arith.addf %247, %252 : vector<1x256xf32>
    %254 = vector.extract_strided_slice %168 {offsets = [14, 0], sizes = [1, 128], strides = [1, 1]} : vector<16x128xf32> to vector<1x128xf32>
    %255 = arith.truncf %254 : vector<1x128xf32> to vector<1x128xbf16>
    %c14_210 = arith.constant 14 : index
    %c0_211 = arith.constant 0 : index
    %c0_212 = arith.constant 0 : index
    %256 = vector.load %arg14[%c14_210, %c0_211, %c0_212] : memref<16x128x256xbf16, #tpu.memory_space<vmem>>, vector<1x128x256xbf16>
    %257 = vector.shape_cast %256 : vector<1x128x256xbf16> to vector<128x256xbf16>
    %cst_213 = arith.constant dense<0.000000e+00> : vector<1x256xf32>
    %258 = tpu.matmul %255, %257, %cst_213 {dimension_numbers = #tpu.dot_dimension_numbers<[1], [0], [0], [1], [0, 0, 1, 1], [], []>} : vector<1x128xbf16>, vector<128x256xbf16>, vector<1x256xf32> -> vector<1x256xf32>
    %259 = arith.addf %253, %258 : vector<1x256xf32>
    %260 = vector.extract_strided_slice %168 {offsets = [15, 0], sizes = [1, 128], strides = [1, 1]} : vector<16x128xf32> to vector<1x128xf32>
    %261 = arith.truncf %260 : vector<1x128xf32> to vector<1x128xbf16>
    %c15_214 = arith.constant 15 : index
    %c0_215 = arith.constant 0 : index
    %c0_216 = arith.constant 0 : index
    %262 = vector.load %arg14[%c15_214, %c0_215, %c0_216] : memref<16x128x256xbf16, #tpu.memory_space<vmem>>, vector<1x128x256xbf16>
    %263 = vector.shape_cast %262 : vector<1x128x256xbf16> to vector<128x256xbf16>
    %cst_217 = arith.constant dense<0.000000e+00> : vector<1x256xf32>
    %264 = tpu.matmul %261, %263, %cst_217 {dimension_numbers = #tpu.dot_dimension_numbers<[1], [0], [0], [1], [0, 0, 1, 1], [], []>} : vector<1x128xbf16>, vector<128x256xbf16>, vector<1x256xf32> -> vector<1x256xf32>
    %265 = arith.addf %259, %264 : vector<1x256xf32>
    %cst_218 = arith.constant 0.000000e+00 : f32
    %266 = vector.broadcast %cst_218 : f32 to vector<1x256xf32>
    %267 = arith.maximumf %265, %266 : vector<1x256xf32>
    %268 = arith.truncf %267 : vector<1x256xf32> to vector<1x256xbf16>
    %c0_219 = arith.constant 0 : index
    %c0_220 = arith.constant 0 : index
    %269 = vector.load %arg16[%c0_219, %c0_220] : memref<256x3xbf16, #tpu.memory_space<vmem>>, vector<256x3xbf16>
    %cst_221 = arith.constant dense<0.000000e+00> : vector<1x3xf32>
    %270 = tpu.matmul %268, %269, %cst_221 {dimension_numbers = #tpu.dot_dimension_numbers<[1], [0], [0], [1], [0, 0, 1, 1], [], []>} : vector<1x256xbf16>, vector<256x3xbf16>, vector<1x3xf32> -> vector<1x3xf32>
    %c0_222 = arith.constant 0 : index
    %c0_223 = arith.constant 0 : index
    %271 = vector.load %arg17[%c0_222, %c0_223] : memref<1x3xf32, #tpu.memory_space<vmem>>, vector<1x3xf32>
    %272 = arith.addf %270, %271 : vector<1x3xf32>
    %c0_224 = arith.constant 0 : index
    %c0_225 = arith.constant 0 : index
    %c0_226 = arith.constant 0 : index
    %273 = vector.load %arg18[%c0_224, %c0_225, %c0_226] : memref<1x1x3xf32, #tpu.memory_space<vmem>>, vector<1x1x3xf32>
    %274 = vector.shape_cast %273 : vector<1x1x3xf32> to vector<1x3xf32>
    %275 = vector.shape_cast %272 : vector<1x3xf32> to vector<1x1x3xf32>
    tpu.vector_store %arg18[%c0_224, %c0_225, %c0_226], %275 {strides = array<i32>} : memref<1x1x3xf32, #tpu.memory_space<vmem>>, vector<1x1x3xf32>,
    return
  }
  func.func @transform_0(%arg0: i32) -> (i32, i32, i32) {
    %c0_i32 = arith.constant 0 : i32
    %c0_i32_0 = arith.constant 0 : i32
    %c0_i32_1 = arith.constant 0 : i32
    return %arg0, %c0_i32, %c0_i32_0 : i32, i32, i32
  }
  func.func @transform_1(%arg0: i32) -> (i32, i32) {
    %c0_i32 = arith.constant 0 : i32
    %c0_i32_0 = arith.constant 0 : i32
    %c0_i32_1 = arith.constant 0 : i32
    return %c0_i32, %c0_i32_0 : i32, i32
  }
  func.func @transform_2(%arg0: i32) -> (i32, i32) {
    %c0_i32 = arith.constant 0 : i32
    %c0_i32_0 = arith.constant 0 : i32
    %c0_i32_1 = arith.constant 0 : i32
    return %c0_i32, %c0_i32_0 : i32, i32
  }
  func.func @transform_3(%arg0: i32) -> (i32, i32) {
    %c0_i32 = arith.constant 0 : i32
    %c0_i32_0 = arith.constant 0 : i32
    %c0_i32_1 = arith.constant 0 : i32
    return %c0_i32, %c0_i32_0 : i32, i32
  }
  func.func @transform_4(%arg0: i32) -> (i32, i32) {
    %c0_i32 = arith.constant 0 : i32
    %c0_i32_0 = arith.constant 0 : i32
    %c0_i32_1 = arith.constant 0 : i32
    return %c0_i32, %c0_i32_0 : i32, i32
  }
  func.func @transform_5(%arg0: i32) -> (i32, i32) {
    %c0_i32 = arith.constant 0 : i32
    %c0_i32_0 = arith.constant 0 : i32
    %c0_i32_1 = arith.constant 0 : i32
    return %c0_i32, %c0_i32_0 : i32, i32
  }
  func.func @transform_6(%arg0: i32) -> (i32, i32) {
    %c0_i32 = arith.constant 0 : i32
    %c0_i32_0 = arith.constant 0 : i32
    %c0_i32_1 = arith.constant 0 : i32
    return %c0_i32, %c0_i32_0 : i32, i32
  }
  func.func @transform_7(%arg0: i32) -> (i32, i32) {
    %c0_i32 = arith.constant 0 : i32
    %c0_i32_0 = arith.constant 0 : i32
    %c0_i32_1 = arith.constant 0 : i32
    return %c0_i32, %c0_i32_0 : i32, i32
  }
  func.func @transform_8(%arg0: i32) -> (i32, i32) {
    %c0_i32 = arith.constant 0 : i32
    %c0_i32_0 = arith.constant 0 : i32
    %c0_i32_1 = arith.constant 0 : i32
    return %c0_i32, %c0_i32_0 : i32, i32
  }
  func.func @transform_9(%arg0: i32) -> (i32, i32) {
    %c0_i32 = arith.constant 0 : i32
    %c0_i32_0 = arith.constant 0 : i32
    %c0_i32_1 = arith.constant 0 : i32
    return %c0_i32, %c0_i32_0 : i32, i32
  }
  func.func @transform_10(%arg0: i32) -> (i32, i32) {
    %c0_i32 = arith.constant 0 : i32
    %c0_i32_0 = arith.constant 0 : i32
    %c0_i32_1 = arith.constant 0 : i32
    return %c0_i32, %c0_i32_0 : i32, i32
  }
  func.func @transform_11(%arg0: i32) -> (i32, i32) {
    %c0_i32 = arith.constant 0 : i32
    %c0_i32_0 = arith.constant 0 : i32
    %c0_i32_1 = arith.constant 0 : i32
    return %c0_i32, %c0_i32_0 : i32, i32
  }
  func.func @transform_12(%arg0: i32) -> (i32, i32) {
    %c0_i32 = arith.constant 0 : i32
    %c0_i32_0 = arith.constant 0 : i32
    %c0_i32_1 = arith.constant 0 : i32
    return %c0_i32, %c0_i32_0 : i32, i32
  }
  func.func @transform_13(%arg0: i32) -> (i32, i32, i32) {
    %c0_i32 = arith.constant 0 : i32
    %c0_i32_0 = arith.constant 0 : i32
    %c0_i32_1 = arith.constant 0 : i32
    %c0_i32_2 = arith.constant 0 : i32
    return %c0_i32, %c0_i32_0, %c0_i32_1 : i32, i32, i32
  }
  func.func @transform_14(%arg0: i32) -> (i32, i32) {
    %c0_i32 = arith.constant 0 : i32
    %c0_i32_0 = arith.constant 0 : i32
    %c0_i32_1 = arith.constant 0 : i32
    return %c0_i32, %c0_i32_0 : i32, i32
  }
  func.func @transform_15(%arg0: i32) -> (i32, i32) {
    %c0_i32 = arith.constant 0 : i32
    %c0_i32_0 = arith.constant 0 : i32
    %c0_i32_1 = arith.constant 0 : i32
    return %c0_i32, %c0_i32_0 : i32, i32
  }
  func.func @transform_16(%arg0: i32) -> (i32, i32) {
    %c0_i32 = arith.constant 0 : i32
    %c0_i32_0 = arith.constant 0 : i32
    %c0_i32_1 = arith.constant 0 : i32
    return %c0_i32, %c0_i32_0 : i32, i32
  }
  func.func @transform_17(%arg0: i32) -> (i32, i32, i32) {
    %c0_i32 = arith.constant 0 : i32
    %c0_i32_0 = arith.constant 0 : i32
    %c0_i32_1 = arith.constant 0 : i32
    return %arg0, %c0_i32, %c0_i32_0 : i32, i32, i32
  }
}

</mosaic_0001>

<bundles_post_ra>
// kernel: _lambda_.1
= control target key start
LH: loop header
LB: loop body
LE: loop exit
PB: predicated region body
PF: predicated region fallthrough
CT: control target
= control target key end

     0   :  { %s12865_s0 = inlined_call_operand.vmem [shape: f32[2,256,1], index: 0, kind: input, shape index: {}]   ;;  %s12866_s1 = inlined_call_operand.vmem [shape: f32[9,32], index: 1, kind: input, shape index: {}]   ;;  %s12867_s2 = inlined_call_operand.vmem [shape: f32[1,32], index: 2, kind: input, shape index: {}]   ;;  %s12868_s3 = inlined_call_operand.vmem [shape: f32[1,32], index: 3, kind: input, shape index: {}]   ;;  %s12869_s4 = inlined_call_operand.vmem [shape: f32[64,269], index: 4, kind: input, shape index: {}]   ;;  %s12870_s5 = inlined_call_operand.vmem [shape: f32[288,64], index: 5, kind: input, shape index: {}]   ;;  %s12871_s6 = inlined_call_operand.vmem [shape: f32[1,64], index: 6, kind: input, shape index: {}]   ;;  %s12872_s7 = inlined_call_operand.vmem [shape: f32[1,64], index: 7, kind: input, shape index: {}]   ;;  %s12873_s8 = inlined_call_operand.vmem [shape: f32[16,69], index: 8, kind: input, shape index: {}]   ;;  %s12874_s9 = inlined_call_operand.vmem [shape: f32[576,128], index: 9, kind: input, shape index: {}]   ;;  %s12875_s10 = inlined_call_operand.vmem [shape: f32[1,128], index: 10, kind: input, shape index: {}]   ;;  %s12876_s11 = inlined_call_operand.vmem [shape: f32[1,128], index: 11, kind: input, shape index: {}]   ;;  %s12877_s12 = inlined_call_operand.vmem [shape: f32[16,24], index: 12, kind: input, shape index: {}]   ;;  %s12878_s13 = inlined_call_operand.vmem [shape: bf16[16,128,256], index: 13, kind: input, shape index: {}]   ;;  %s12879_s14 = inlined_call_operand.vmem [shape: f32[1,256], index: 14, kind: input, shape index: {}]   ;;  %s12880_s15 = inlined_call_operand.vmem [shape: bf16[256,3], index: 15, kind: input, shape index: {}]   ;;  %s12881_s16 = inlined_call_operand.vmem [shape: f32[1,3], index: 16, kind: input, shape index: {}]   ;;  %s12882_s17 = inlined_call_operand.hbm [shape: f32[2,1,3], index: 17, kind: output, shape index: {}]  }
   0x1   :  { %12906 = sst [smem:[#allocation16_spill]] %s12865_s0 }
   0x2   :  { %12907 = sst [smem:[#allocation17_spill]] %s12866_s1 }
   0x3   :  { %12908 = sst [smem:[#allocation18_spill]] %s12867_s2 }
   0x4   :  { %22 = vsyncpa [#allocation9], 0 }
   0x5   :  { %24 = vsyncpa [#allocation9 + $0x1], 0  ;;  %s9804_s24 = smov 0   ;;  %s9806_s25 = smov 0  }
   0x6   :  { %s9808_s26 = smov 0   ;;  %s9810_s27 = smov 0  }
   0x7 LB: > { %12909 = sst [smem:[#allocation11_spill]] %s9682_s24  ;;  %s9825_s28 = sadd.s32 4294967295, %s9694_s27   ;;  %s9694_s27 = sphi %s9810_s27, %s12930_s27   ;;  %s9690_s26 = sphi %s9808_s26, %s12932_s26   ;;  %s9686_s25 = sphi %s9806_s25, %s12934_s25   ;;  %s9682_s24 = sphi %s9804_s24, %s12933_s24  }
   0x8   : > { %12910 = sst [smem:[#allocation12_spill]] %s9690_s26  ;;  %s7939_s29 = sadd.s32 4294967294, %s9694_s27  }
   0x9   : > { %s9829_s0 = sadd.s32 1, %s9694_s27   ;;  %s399_s30 = sadd.s32 1, %s9690_s26 }
   0xa   : > { %12911 = sst [smem:[#allocation13_spill]] %s9829_s0  ;;  %s396_s18 = ssub.s32 %s9694_s27, %s9829_s0 }
   0xb   : > { %p409_p0 = scmp.ne.s32.totalorder %s9690_s26, %s9686_s25  ;;  %p397_p1 = scmp.eq.s32.totalorder %s396_s18, 0 }
   0xc   : > { %p410_p2 = scmp.eq.s32.totalorder %s9825_s28, 1  ;;  %p415_p3 = scmp.ne.s32.totalorder %s9686_s25, %s9682_s24 }
   0xd   : > { %p416_p4 = scmp.eq.s32.totalorder %s7939_s29, 1  ;;  %p7942_p7 = scmp.ge.s32.totalorder %s9694_s27, 1 }
   0xe   : > { %s9840_s19 = scalar_select %p397_p1, %s9690_s26, %s399_s30  }
   0xf   : > { %p9842_p5 = por %p410_p2, %p409_p0  ;;  %p9846_p6 = por %p416_p4, %p415_p3 }
  0x10   : > { %12912 = sst [smem:[#allocation14_spill]] %s9840_s19  ;;  %p490_p8 = scmp.lt.s32.totalorder %s9694_s27, 3 }
  0x11   : > { %s12914_s20 = scalar_select %p9846_p6, 1, 0 }
  0x12   : > { %p491_p9 = pnand %p7942_p7, %p490_p8 }
  0x13   : > { %12915 = sst [smem:[#allocation15_spill]] %s12914_s20  ;;  %vm579_vm0 = vcmask (!%p491_p9), 7168   ;;  %v9696_v0 = vmov (!%p491_p9), 0.0   ;;  %p541_p10 = scmp.lt.s32.totalorder (!%p491_p9), %s9825_s28, 1  ;;  %vm2611_vm1 = vcmask (!%p491_p9), 1040384   ;;  %vm9704_vm2 = vmmov (!%p491_p9), 1  }
  0x14   : > { %494 = sbr.rel (%p491_p9) target bundleno = 3202 (0xc82), region = 88  ;;  %581 = vst.msk [vmem:[#allocation2 + $0x8] sm:$0xff] (!%p491_p9), %vm579_vm0, %v9696_v0  ;;  %582 = vst.msk [vmem:[#allocation2 + $0x10] sm:$0xff] (!%p491_p9), %vm579_vm0, %v9696_v0  ;;  %s12916_s30 = sld [smem:[#allocation16_spill]] (!%p491_p9)  ;;  %vm908_vm4 = vcmask (!%p491_p9), 15368   ;;  %vm1125_vm5 = vcmask (!%p491_p9), 23568  }
  0x15   : > { %580 = vst.msk [vmem:[#allocation2] sm:$0xff] (!%p491_p9), %vm579_vm0, %v9696_v0  ;;  %583 = vst.msk [vmem:[#allocation2 + $0x18] sm:$0xff] (!%p491_p9), %vm579_vm0, %v9696_v0  ;;  %s12884_s23 = smov (!%p491_p9), 3   ;;  %s9700_s29 = smov (!%p491_p9), 4   ;;  %vm1342_vm6 = vcmask (!%p491_p9), 31768   ;;  %vm1559_vm7 = vcmask (!%p491_p9), 39968  }
  0x16   : > { %584 = vst.msk [vmem:[#allocation2 + $0x20] sm:$0xff] (!%p491_p9), %vm579_vm0, %v9696_v0  ;;  %585 = vst.msk [vmem:[#allocation2 + $0x28] sm:$0xff] (!%p491_p9), %vm579_vm0, %v9696_v0  ;;  %s12918_s26 = sld [smem:[#allocation17_spill]] (!%p491_p9)  ;;  %s12920_s24 = smov (!%p491_p9), 1   ;;  %vm1776_vm8 = vcmask (!%p491_p9), 48168   ;;  %vm1993_vm9 = vcmask (!%p491_p9), 56368  }
  0x17   : > { %586 = vst.msk [vmem:[#allocation2 + $0x30] sm:$0xff] (!%p491_p9), %vm579_vm0, %v9696_v0  ;;  %587 = vst.msk [vmem:[#allocation2 + $0x38] sm:$0xff] (!%p491_p9), %vm579_vm0, %v9696_v0  ;;  %s12922_s19 = smov (!%p491_p9), 2   ;;  %s12923_s20 = smov (!%p491_p9), 6   ;;  %vm2210_vm10 = vcmask (!%p491_p9), 64568   ;;  %vm2427_vm11 = vcmask (!%p491_p9), 72768  }
  0x18   : > { %588 = vst.msk [vmem:[#allocation2 + $0x40] sm:$0xff] (!%p491_p9), %vm579_vm0, %v9696_v0  ;;  %589 = vst.msk [vmem:[#allocation2 + $0x48] sm:$0xff] (!%p491_p9), %vm579_vm0, %v9696_v0  ;;  %vm2502_vm12 = vcmask (!%p491_p9), 72704   ;;  %s12924_s2 = sld [smem:[#allocation18_spill]] (!%p491_p9)  ;;  %vm3016_vm13 = vcmask (!%p491_p9), 1045504   ;;  %vm3186_vm14 = vcmask (!%p491_p9), 1046528  }
  0x19   : > { %590 = vst.msk [vmem:[#allocation2 + $0x50] sm:$0xff] (!%p491_p9), %vm579_vm0, %v9696_v0  ;;  %591 = vst.msk [vmem:[#allocation2 + $0x58] sm:$0xff] (!%p491_p9), %vm579_vm0, %v9696_v0  ;;  %vm3371_vm15 = vcmask (!%p491_p9), 1044480  }
  0x1a   : > { %592 = vst.msk [vmem:[#allocation2 + $0x60] sm:$0xff] (!%p491_p9), %vm579_vm0, %v9696_v0  ;;  %593 = vst.msk [vmem:[#allocation2 + $0x68] sm:$0xff] (!%p491_p9), %vm579_vm0, %v9696_v0 }
  0x1b   : > { %594 = vst.msk [vmem:[#allocation2 + $0x70] sm:$0xff] %vm579_vm0, %v9696_v0  ;;  %595 = vst.msk [vmem:[#allocation2 + $0x78] sm:$0xff] %vm579_vm0, %v9696_v0  ;;  %s542_s21 = scalar_select %p541_p10, %s9825_s28, 1  ;;  %v945_v4 = vld [vmem:[#allocation2 + $0x9] sm:$0xff] }
  0x1c   : > { %596 = vst.msk [vmem:[#allocation2 + $0x80] sm:$0xff] %vm579_vm0, %v9696_v0  ;;  %597 = vst.msk [vmem:[#allocation2 + $0x88] sm:$0xff] %vm579_vm0, %v9696_v0  ;;  %v728_v5 = vld [vmem:[#allocation2 + $0x8] sm:$0xff]  ;;  %v946_v6 = vld [vmem:[#allocation2 + $0x11] sm:$0xff]  ;;  %s12919_s0 = smov %s12918_s26 }
  0x1d   : > { %598 = vst.msk [vmem:[#allocation2 + $0x90] sm:$0xff] %vm579_vm0, %v9696_v0  ;;  %599 = vst.msk [vmem:[#allocation2 + $0x98] sm:$0xff] %vm579_vm0, %v9696_v0  ;;  %s8530_s22 = sshll.u32 %s542_s21, 8  ;;  %s12890_s21 = smov 2   ;;  %v729_v7 = vld [vmem:[#allocation2 + $0x10] sm:$0xff]  ;;  %v656_v13 = vld [vmem:[#allocation2 + $0x7] sm:$0xff] }
  0x1e   : > { %600 = vst.msk [vmem:[#allocation2 + $0xa0] sm:$0xff] %vm579_vm0, %v9696_v0  ;;  %601 = vst.msk [vmem:[#allocation2 + $0xa8] sm:$0xff] %vm579_vm0, %v9696_v0  ;;  %s9941_s18 = scalar_lea.vmem %s12916_s30, %s8530_s22  ;;  %1017 = vrot.lane.b32.xlu1 %v945_v4, %s12890_s21  ;;  %s12886_s22 = smov 1   ;;  %v657_v14 = vld [vmem:[#allocation2 + $0xf] sm:$0xff]  ;;  %v2500_v38 = vld [vmem:[%s12918_s26] sm:$0xff] }
  0x1f   : > { %602 = vst.msk [vmem:[#allocation2 + $0xb0] sm:$0xff] %vm579_vm0, %v9696_v0  ;;  %603 = vst.msk [vmem:[#allocation2 + $0xb8] sm:$0xff] %vm579_vm0, %v9696_v0  ;;  %v547_v1 = vld [vmem:[%s9941_s18] sm:$0xff]  ;;  %v548_v2 = vld [vmem:[%s9941_s18 + $0x8] sm:$0xff]  ;;  %800 = vrot.lane.b32.xlu0 %v728_v5, %s12886_s22  ;;  %s12888_s30 = smov 5   ;;  %s12921_s26 = smov 5  }
  0x20   : > { %604 = vst.msk [vmem:[#allocation2 + $0xc0] sm:$0xff] %vm579_vm0, %v9696_v0  ;;  %605 = vst.msk [vmem:[#allocation2 + $0xc8] sm:$0xff] %vm579_vm0, %v9696_v0  ;;  %v549_v3 = vld [vmem:[%s9941_s18 + $0x10] sm:$0xff]  ;;  %v550_v8 = vld [vmem:[%s9941_s18 + $0x18] sm:$0xff] }
  0x21   : > { %606 = vst.msk [vmem:[#allocation2 + $0xd0] sm:$0xff] %vm579_vm0, %v9696_v0  ;;  %607 = vst.msk [vmem:[#allocation2 + $0xd8] sm:$0xff] %vm579_vm0, %v9696_v0  ;;  %v551_v9 = vld [vmem:[%s9941_s18 + $0x20] sm:$0xff]  ;;  %v552_v10 = vld [vmem:[%s9941_s18 + $0x28] sm:$0xff] }
  0x22   : > { %608 = vst.msk [vmem:[#allocation2 + $0xe0] sm:$0xff] %vm579_vm0, %v9696_v0  ;;  %609 = vst.msk [vmem:[#allocation2 + $0xe8] sm:$0xff] %vm579_vm0, %v9696_v0  ;;  %v553_v11 = vld [vmem:[%s9941_s18 + $0x30] sm:$0xff]  ;;  %v554_v12 = vld [vmem:[%s9941_s18 + $0x38] sm:$0xff]  ;;  %1019 = vrot.lane.b32.xlu1 %v946_v6, %s12890_s21 }
  0x23   : > { %610 = vst.msk [vmem:[#allocation2 + $0xf0] sm:$0xff] %vm579_vm0, %v9696_v0  ;;  %611 = vst.msk [vmem:[#allocation2 + $0xf8] sm:$0xff] %vm579_vm0, %v9696_v0  ;;  %v555_v15 = vld [vmem:[%s9941_s18 + $0x40] sm:$0xff]  ;;  %v556_v16 = vld [vmem:[%s9941_s18 + $0x48] sm:$0xff]  ;;  %802 = vrot.lane.b32.xlu0 %v729_v7, %s12886_s22 }
  0x24   : > { %612 = vst.msk [vmem:[#allocation2 + $0x100] sm:$0xff] %vm579_vm0, %v9696_v0  ;;  %613 = vst.msk [vmem:[#allocation2 + $0x108] sm:$0xff] %vm579_vm0, %v9696_v0  ;;  %v557_v29 = vld [vmem:[%s9941_s18 + $0x50] sm:$0xff]  ;;  %v2501_v39 = vld [vmem:[%s12919_s0 + $0x8] sm:$0x1] }
  0x25   : > { %614 = vst.msk [vmem:[#allocation2 + $0x110] sm:$0xff] %vm579_vm0, %v9696_v0  ;;  %615 = vst.msk [vmem:[#allocation2 + $0x118] sm:$0xff] %vm579_vm0, %v9696_v0  ;;  %v8994_v40 = vpack.c.bf16 %v2501_v39, %v2500_v38  ;;  %v558_v44 = vld [vmem:[%s9941_s18 + $0x58] sm:$0xff]  ;;  %v559_v47 = vld [vmem:[%s9941_s18 + $0x60] sm:$0xff] }
  0x26   : > { %616 = vst.msk [vmem:[#allocation2 + $0x120] sm:$0xff] %vm579_vm0, %v9696_v0  ;;  %617 = vst.msk [vmem:[#allocation2 + $0x128] sm:$0xff] %vm579_vm0, %v9696_v0  ;;  %v560_v60 = vld [vmem:[%s9941_s18 + $0x68] sm:$0xff]  ;;  %v561_v63 = vld [vmem:[%s9941_s18 + $0x70] sm:$0xff] }
  0x27   : > { %618 = vst.msk [vmem:[#allocation2 + $0x130] sm:$0xff] %vm579_vm0, %v9696_v0  ;;  %619 = vst.msk [vmem:[#allocation2 + $0x138] sm:$0xff] %vm579_vm0, %v9696_v0 }
  0x28   : > { %620 = vst.msk [vmem:[#allocation2 + $0x140] sm:$0xff] %vm579_vm0, %v9696_v0  ;;  %621 = vst.msk [vmem:[#allocation2 + $0x148] sm:$0xff] %vm579_vm0, %v9696_v0 }
  0x29   : > { %624 = vst.msk [vmem:[#allocation2 + $0x1b] sm:$0xff] %vm579_vm0, %v547_v1  ;;  %625 = vst.msk [vmem:[#allocation2 + $0x23] sm:$0xff] %vm579_vm0, %v548_v2 }
  0x2a   : > { %626 = vst.msk [vmem:[#allocation2 + $0x2d] sm:$0xff] %vm579_vm0, %v549_v3  ;;  %627 = vst.msk [vmem:[#allocation2 + $0x35] sm:$0xff] %vm579_vm0, %v550_v8 }
  0x2b   : > { %628 = vst.msk [vmem:[#allocation2 + $0x3f] sm:$0xff] %vm579_vm0, %v551_v9  ;;  %629 = vst.msk [vmem:[#allocation2 + $0x47] sm:$0xff] %vm579_vm0, %v552_v10 }
  0x2c   : > { %630 = vst.msk [vmem:[#allocation2 + $0x51] sm:$0xff] %vm579_vm0, %v553_v11  ;;  %631 = vst.msk [vmem:[#allocation2 + $0x59] sm:$0xff] %vm579_vm0, %v554_v12 }
  0x2d   : > { %692 = vst.msk [vmem:[#allocation3] sm:$0xff] %vm579_vm0, %v656_v13  ;;  %693 = vst.msk [vmem:[#allocation3 + $0x8] sm:$0xff] %vm579_vm0, %v657_v14  ;;  %v562_v13 = vld [vmem:[%s9941_s18 + $0x78] sm:$0xff] }
  0x2e   : > { %632 = vst.msk [vmem:[#allocation2 + $0x63] sm:$0xff] %vm579_vm0, %v555_v15  ;;  %633 = vst.msk [vmem:[#allocation2 + $0x6b] sm:$0xff] %vm579_vm0, %v556_v16 }
  0x2f   : > { %634 = vst.msk [vmem:[#allocation2 + $0x75] sm:$0xff] %vm579_vm0, %v557_v29  ;;  %vm8995_vm3 = vmpackc.low %vm2611_vm1, %vm9704_vm2  ;;  %v563_v29 = vld [vmem:[%s9941_s18 + $0x80] sm:$0xff]  ;;  %vm3346_vm1 = vcmask 105472  }
  0x30   : > { %v1163_v17 = vld [vmem:[#allocation2 + $0x21] sm:$0xff]  ;;  %v1162_v18 = vld [vmem:[#allocation2 + $0x19] sm:$0xff]  ;;  %8996 = vmatprep.subr.msk.bf16.mxu0 %vm8995_vm3, %v8994_v40  ;;  %635 = vst.msk [vmem:[#allocation2 + $0x7d] sm:$0xff] %vm579_vm0, %v558_v44  ;;  %636 = vst.msk [vmem:[#allocation2 + $0x87] sm:$0xff] %vm579_vm0, %v559_v47 }
  0x31   : > { %1236 = vrot.lane.b32.xlu1 %v1163_v17, %s12884_s23  ;;  %1234 = vrot.lane.b32.xlu0 %v1162_v18, %s12884_s23  ;;  %v1379_v19 = vld [vmem:[#allocation2 + $0x1a] sm:$0xff]  ;;  %v1380_v21 = vld [vmem:[#allocation2 + $0x22] sm:$0xff]  ;;  %v1813_v25 = vld [vmem:[#allocation2 + $0x2b] sm:$0xff]  ;;  %s12897_s23 = smov 6   ;;  %637 = vst.msk [vmem:[#allocation2 + $0x8f] sm:$0xff] %vm579_vm0, %v560_v60 }
  0x32   : > { %v730_v20 = vld [vmem:[#allocation2 + $0x18] sm:$0xff]  ;;  %v731_v23 = vld [vmem:[#allocation2 + $0x20] sm:$0xff]  ;;  %v1164_v28 = vld [vmem:[#allocation2 + $0x29] sm:$0xff]  ;;  %8999 = vmatpush3.bf16.msk.msra.mxu0 %vm8995_vm3, %v8994_v40  ;;  %638 = vst.msk [vmem:[#allocation2 + $0x99] sm:$0xff] %vm579_vm0, %v561_v63  ;;  %vm3680_vm3 = vcmask 523520  }
  0x33   : > { %v1596_v22 = vld [vmem:[#allocation2 + $0x1b] sm:$0xff]  ;;  %v1597_v24 = vld [vmem:[#allocation2 + $0x23] sm:$0xff]  ;;  %v1814_v30 = vld [vmem:[#allocation2 + $0x33] sm:$0xff]  ;;  %639 = vst.msk [vmem:[#allocation2 + $0xa1] sm:$0xff] %vm579_vm0, %v562_v13 }
  0x34   : > { %v658_v26 = vld [vmem:[#allocation2 + $0x17] sm:$0xff]  ;;  %v659_v27 = vld [vmem:[#allocation2 + $0x1f] sm:$0xff]  ;;  %v2030_v31 = vld [vmem:[#allocation2 + $0x2c] sm:$0xff]  ;;  %640 = vst.msk [vmem:[#allocation2 + $0xab] sm:$0xff] %vm579_vm0, %v563_v29 }
  0x35   : > { %1451 = vrot.lane.b32.xlu0 %v1379_v19, %s9700_s29  ;;  %804 = vrot.lane.b32.xlu1 %v730_v20, %s12886_s22  ;;  %694 = vst.msk [vmem:[#allocation3 + $0x10] sm:$0xff] %vm579_vm0, %v658_v26  ;;  %695 = vst.msk [vmem:[#allocation3 + $0x18] sm:$0xff] %vm579_vm0, %v659_v27  ;;  %v660_v32 = vld [vmem:[#allocation2 + $0x27] sm:$0xff]  ;;  %v1165_v33 = vld [vmem:[#allocation2 + $0x31] sm:$0xff] }
  0x36   : > { %696 = vst.msk [vmem:[#allocation3 + $0x20] sm:$0xff] %vm579_vm0, %v660_v32  ;;  %v1381_v34 = vld [vmem:[#allocation2 + $0x2a] sm:$0xff]  ;;  %v2031_v35 = vld [vmem:[#allocation2 + $0x34] sm:$0xff]  ;;  %v2032_v50 = vld [vmem:[#allocation2 + $0x3c] sm:$0xff] }
  0x37   : > { %v2247_v36 = vld [vmem:[#allocation2 + $0x2d] sm:$0xff]  ;;  %v2248_v43 = vld [vmem:[#allocation2 + $0x35] sm:$0xff]  ;;  %v1816_v49 = vld [vmem:[#allocation2 + $0x43] sm:$0xff] }
  0x38   : > { %v661_v37 = vld [vmem:[#allocation2 + $0x2f] sm:$0xff]  ;;  %v1815_v46 = vld [vmem:[#allocation2 + $0x3b] sm:$0xff]  ;;  %v2033_v54 = vld [vmem:[#allocation2 + $0x44] sm:$0xff] }
  0x39   : > { %1453 = vrot.lane.b32.xlu0 %v1380_v21, %s9700_s29  ;;  %1668 = vrot.lane.b32.xlu1 %v1596_v22, %s12888_s30  ;;  %697 = vst.msk [vmem:[#allocation3 + $0x28] sm:$0xff] %vm579_vm0, %v661_v37  ;;  %v732_v41 = vld [vmem:[#allocation2 + $0x28] sm:$0xff]  ;;  %v1382_v42 = vld [vmem:[#allocation2 + $0x32] sm:$0xff]  ;;  %v1383_v53 = vld [vmem:[#allocation2 + $0x3a] sm:$0xff] }
  0x3a   : > { %v733_v45 = vld [vmem:[#allocation2 + $0x30] sm:$0xff]  ;;  %v1166_v48 = vld [vmem:[#allocation2 + $0x39] sm:$0xff]  ;;  %v1167_v52 = vld [vmem:[#allocation2 + $0x41] sm:$0xff] }
  0x3b   : > { %v662_v51 = vld [vmem:[#allocation2 + $0x37] sm:$0xff]  ;;  %v663_v56 = vld [vmem:[#allocation2 + $0x3f] sm:$0xff]  ;;  %v1817_v62 = vld [vmem:[#allocation2 + $0x4b] sm:$0xff] }
  0x3c   : > { %698 = vst.msk [vmem:[#allocation3 + $0x30] sm:$0xff] %vm579_vm0, %v662_v51  ;;  %v2249_v55 = vld [vmem:[#allocation2 + $0x3d] sm:$0xff]  ;;  %699 = vst.msk [vmem:[#allocation3 + $0x38] sm:$0xff] %vm579_vm0, %v663_v56  ;;  %v2250_v59 = vld [vmem:[#allocation2 + $0x45] sm:$0xff] }
  0x3d   : > { %806 = vrot.lane.b32.xlu0 %v731_v23, %s12886_s22  ;;  %1021 = vrot.lane.b32.xlu1 %v1162_v18, %s12890_s21  ;;  %s12917_s22 = smov 3   ;;  %v734_v57 = vld [vmem:[#allocation2 + $0x38] sm:$0xff]  ;;  %v1384_v58 = vld [vmem:[#allocation2 + $0x42] sm:$0xff]  ;;  %v2034_v3 = vld [vmem:[#allocation2 + $0x4c] sm:$0xff] }
  0x3e   : > { %v735_v61 = vld [vmem:[#allocation2 + $0x40] sm:$0xff]  ;;  %v1168_v1 = vld [vmem:[#allocation2 + $0x49] sm:$0xff]  ;;  %v1818_v2 = vld [vmem:[#allocation2 + $0x53] sm:$0xff] }
  0x3f   : > { %v664_v4 = vld [vmem:[#allocation2 + $0x47] sm:$0xff]  ;;  %v1169_v5 = vld [vmem:[#allocation2 + $0x51] sm:$0xff]  ;;  %v1170_v20 = vld [vmem:[#allocation2 + $0x59] sm:$0xff] }
  0x40   : > { %700 = vst.msk [vmem:[#allocation3 + $0x40] sm:$0xff] %vm579_vm0, %v664_v4  ;;  %v1385_v6 = vld [vmem:[#allocation2 + $0x4a] sm:$0xff]  ;;  %v2035_v7 = vld [vmem:[#allocation2 + $0x54] sm:$0xff]  ;;  %v1388_v39 = vld [vmem:[#allocation2 + $0x62] sm:$0xff] }
  0x41   : > { %1670 = vrot.lane.b32.xlu0 %v1597_v24, %s12888_s30  ;;  %1885 = vrot.lane.b32.xlu1 %v1813_v25, %s12897_s23  ;;  %s9703_s30 = smov 7   ;;  %v2251_v8 = vld [vmem:[#allocation2 + $0x4d] sm:$0xff]  ;;  %v2252_v12 = vld [vmem:[#allocation2 + $0x55] sm:$0xff]  ;;  %v10060_v23 = vld [vmem:[#allocation2 + $0x63] sm:$0xff] }
  0x42   : > { %v665_v9 = vld [vmem:[#allocation2 + $0x4f] sm:$0xff]  ;;  %v2036_v24 = vld [vmem:[#allocation2 + $0x5c] sm:$0xff] }
  0x43   : > { %701 = vst.msk [vmem:[#allocation3 + $0x48] sm:$0xff] %vm579_vm0, %v665_v9  ;;  %v736_v10 = vld [vmem:[#allocation2 + $0x48] sm:$0xff]  ;;  %v1386_v11 = vld [vmem:[#allocation2 + $0x52] sm:$0xff] }
  0x44   : > { %v737_v14 = vld [vmem:[#allocation2 + $0x50] sm:$0xff]  ;;  %v738_v38 = vld [vmem:[#allocation2 + $0x58] sm:$0xff]  ;;  %v564_v51 = vld [vmem:[%s9941_s18 + $0x88] sm:$0xff] }
  0x45   : > { %1023 = vrot.lane.b32.xlu0 %v1163_v17, %s12890_s21  ;;  %1238 = vrot.lane.b32.xlu1 %v1164_v28, %s12917_s22  ;;  %v1819_v17 = vld [vmem:[#allocation2 + $0x5b] sm:$0xff]  ;;  %641 = vst.msk [vmem:[#allocation2 + $0xb3] sm:$0xff] %vm579_vm0, %v564_v51  ;;  %v1822_v56 = vld [vmem:[#allocation2 + $0x73] sm:$0xff] }
  0x46   : > { %v1173_v60 = vld [vmem:[#allocation2 + $0x71] sm:$0xff] }
  0x47   : > { %v2255_v4 = vld [vmem:[#allocation2 + $0x6d] sm:$0xff] }
  0x49   : > { %1887 = vrot.lane.b32.xlu0 %v1814_v30, %s12897_s23  ;;  %2102 = vrot.lane.b32.xlu1 %v2030_v31, %s9703_s30  ;;  %s9705_s23 = smov 8  }
  0x4d   : > { %1240 = vrot.lane.b32.xlu0 %v1165_v33, %s12917_s22  ;;  %1455 = vrot.lane.b32.xlu1 %v1381_v34, %s9700_s29  ;;  %v2253_v34 = vld [vmem:[#allocation2 + $0x5d] sm:$0xff] }
  0x51   : > { %2104 = vrot.lane.b32.xlu0 %v2031_v35, %s9703_s30  ;;  %2319 = vrot.lane.b32.xlu1 %v2247_v36, %s9705_s23  ;;  %v667_v35 = vld [vmem:[#allocation2 + $0x5f] sm:$0xff] }
  0x52   : > { %703 = vst.msk [vmem:[#allocation3 + $0x58] sm:$0xff] %vm579_vm0, %v667_v35 }
  0x55   : > { %808 = vrot.lane.b32.xlu0 %v732_v41, %s12920_s24  ;;  %1457 = vrot.lane.b32.xlu1 %v1382_v42, %s9700_s29  ;;  %v2254_v42 = vld [vmem:[#allocation2 + $0x65] sm:$0xff] }
  0x59   : > { %1672 = vrot.lane.b32.xlu0 %v1813_v25, %s12921_s26  ;;  %2321 = vrot.lane.b32.xlu1 %v2248_v43, %s9705_s23  ;;  %v666_v25 = vld [vmem:[#allocation2 + $0x57] sm:$0xff] }
  0x5a   : > { %702 = vst.msk [vmem:[#allocation3 + $0x50] sm:$0xff] %vm579_vm0, %v666_v25 }
  0x5d   : > { %810 = vrot.lane.b32.xlu0 %v733_v45, %s12920_s24  ;;  %1025 = vrot.lane.b32.xlu1 %v1164_v28, %s12922_s19  ;;  %v1171_v28 = vld [vmem:[#allocation2 + $0x61] sm:$0xff] }
  0x5e   : > { %v739_v45 = vld [vmem:[#allocation2 + $0x60] sm:$0xff] }
  0x61   : > { %1674 = vrot.lane.b32.xlu0 %v1814_v30, %s12921_s26  ;;  %1889 = vrot.lane.b32.xlu1 %v1815_v46, %s12923_s20  ;;  %v1387_v30 = vld [vmem:[#allocation2 + $0x5a] sm:$0xff] }
  0x65   : > { %1027 = vrot.lane.b32.xlu0 %v1165_v33, %s12922_s19  ;;  %1242 = vrot.lane.b32.xlu1 %v1166_v48, %s12917_s22  ;;  %v2037_v33 = vld [vmem:[#allocation2 + $0x64] sm:$0xff] }
  0x69   : > { %1891 = vrot.lane.b32.xlu0 %v1816_v49, %s12923_s20  ;;  %2106 = vrot.lane.b32.xlu1 %v2032_v50, %s9703_s30 }
  0x6d   : > { %1244 = vrot.lane.b32.xlu0 %v1167_v52, %s12917_s22  ;;  %1459 = vrot.lane.b32.xlu1 %v1383_v53, %s9700_s29 }
  0x71   : > { %2108 = vrot.lane.b32.xlu0 %v2033_v54, %s9703_s30  ;;  %2323 = vrot.lane.b32.xlu1 %v2249_v55, %s9705_s23  ;;  %v668_v55 = vld [vmem:[#allocation2 + $0x67] sm:$0xff] }
  0x72   : > { %704 = vst.msk [vmem:[#allocation3 + $0x60] sm:$0xff] %vm579_vm0, %v668_v55 }
  0x75   : > { %812 = vrot.lane.b32.xlu0 %v734_v57, %s12920_s24  ;;  %1461 = vrot.lane.b32.xlu1 %v1384_v58, %s9700_s29  ;;  %v2038_v57 = vld [vmem:[#allocation2 + $0x6c] sm:$0xff] }
  0x79   : > { %1676 = vrot.lane.b32.xlu0 %v1815_v46, %s12921_s26  ;;  %2325 = vrot.lane.b32.xlu1 %v2250_v59, %s9705_s23 }
  0x7d   : > { %814 = vrot.lane.b32.xlu0 %v735_v61, %s12920_s24  ;;  %1029 = vrot.lane.b32.xlu1 %v1166_v48, %s12922_s19  ;;  %v10093_v48 = vld [vmem:[#allocation2 + $0x6b] sm:$0xff] }
  0x7e   : > { %v1389_v61 = vld [vmem:[#allocation2 + $0x6a] sm:$0xff] }
  0x81   : > { %1678 = vrot.lane.b32.xlu0 %v1816_v49, %s12921_s26  ;;  %1893 = vrot.lane.b32.xlu1 %v1817_v62, %s12923_s20 }
  0x85   : > { %1031 = vrot.lane.b32.xlu0 %v1167_v52, %s12922_s19  ;;  %1246 = vrot.lane.b32.xlu1 %v1168_v1, %s12917_s22  ;;  %v1172_v52 = vld [vmem:[#allocation2 + $0x69] sm:$0xff] }
  0x89   : > { %1895 = vrot.lane.b32.xlu0 %v1818_v2, %s12923_s20  ;;  %2110 = vrot.lane.b32.xlu1 %v2034_v3, %s9703_s30  ;;  %v2039_v3 = vld [vmem:[#allocation2 + $0x74] sm:$0xff] }
  0x8d   : > { %1248 = vrot.lane.b32.xlu0 %v1169_v5, %s12917_s22  ;;  %1463 = vrot.lane.b32.xlu1 %v1385_v6, %s9700_s29 }
  0x90   : > { %v1018_v15 = vpop.permute.xlu1 %1017 }
  0x91   : > { %2112 = vrot.lane.b32.xlu0 %v2035_v7, %s9703_s30  ;;  %2327 = vrot.lane.b32.xlu1 %v2251_v8, %s9705_s23  ;;  %v801_v16 = vpop.permute.xlu0 %800  ;;  %v740_v7 = vld [vmem:[#allocation2 + $0x68] sm:$0xff]  ;;  %v1390_v8 = vld [vmem:[#allocation2 + $0x72] sm:$0xff] }
  0x92   : > { %909 = vst.msk [vmem:[#allocation3] sm:$0xff] %vm908_vm4, %v801_v16  ;;  %v741_v16 = vld [vmem:[#allocation2 + $0x70] sm:$0xff] }
  0x93   : > { %1126 = vst.msk [vmem:[#allocation3] sm:$0xff] %vm1125_vm5, %v1018_v15  ;;  %v565_v15 = vld [vmem:[%s9941_s18 + $0x90] sm:$0xff] }
  0x94   : > { %v1020_v18 = vpop.permute.xlu1 %1019  ;;  %642 = vst.msk [vmem:[#allocation2 + $0xbd] sm:$0xff] %vm579_vm0, %v565_v15 }
  0x95   : > { %816 = vrot.lane.b32.xlu0 %v736_v10, %s12920_s24  ;;  %1465 = vrot.lane.b32.xlu1 %v1386_v11, %s9700_s29  ;;  %v803_v19 = vpop.permute.xlu0 %802 }
  0x96   : > { %910 = vst.msk [vmem:[#allocation3 + $0x8] sm:$0xff] %vm908_vm4, %v803_v19  ;;  %v1823_v19 = vld [vmem:[#allocation2 + $0x7b] sm:$0xff] }
  0x97   : > { %1127 = vst.msk [vmem:[#allocation3 + $0x8] sm:$0xff] %vm1125_vm5, %v1020_v18 }
  0x99   : > { %1680 = vrot.lane.b32.xlu0 %v1817_v62, %s12921_s26  ;;  %2329 = vrot.lane.b32.xlu1 %v2252_v12, %s9705_s23  ;;  %v2256_v12 = vld [vmem:[#allocation2 + $0x75] sm:$0xff] }
  0x9d   : > { %818 = vrot.lane.b32.xlu0 %v737_v14, %s12920_s24  ;;  %1033 = vrot.lane.b32.xlu1 %v1168_v1, %s12922_s19 }
  0xa1   : > { %1682 = vrot.lane.b32.xlu0 %v1818_v2, %s12921_s26  ;;  %1897 = vrot.lane.b32.xlu1 %v1819_v17, %s12923_s20  ;;  %v669_v2 = vld [vmem:[#allocation2 + $0x6f] sm:$0xff] }
  0xa2   : > { %705 = vst.msk [vmem:[#allocation3 + $0x68] sm:$0xff] %vm579_vm0, %v669_v2  ;;  %v1177_v2 = vld [vmem:[#allocation2 + $0x91] sm:$0xff] }
  0xa3   : > { %v1237_v21 = vpop.permute.xlu1 %1236  ;;  %v1235_v22 = vpop.permute.xlu0 %1234 }
  0xa4   : > { %1344 = vst.msk [vmem:[#allocation3 + $0x8] sm:$0xff] %vm1342_vm6, %v1237_v21  ;;  %1343 = vst.msk [vmem:[#allocation3] sm:$0xff] %vm1342_vm6, %v1235_v22  ;;  %v566_v22 = vld [vmem:[%s9941_s18 + $0x98] sm:$0xff] }
  0xa5   : > { %1035 = vrot.lane.b32.xlu0 %v1169_v5, %s12922_s19  ;;  %1250 = vrot.lane.b32.xlu1 %v1170_v20, %s12917_s22  ;;  %643 = vst.msk [vmem:[#allocation2 + $0xc5] sm:$0xff] %vm579_vm0, %v566_v22 }
  0xa7   : > { %v1452_v26 = vpop.permute.xlu0 %1451  ;;  %v805_v27 = vpop.permute.xlu1 %804 }
  0xa8   : > { %1560 = vst.msk [vmem:[#allocation3] sm:$0xff] %vm1559_vm7, %v1452_v26  ;;  %v670_v26 = vld [vmem:[#allocation2 + $0x77] sm:$0xff] }
  0xa9   : > { %911 = vst.msk [vmem:[#allocation3 + $0x10] sm:$0xff] %vm908_vm4, %v805_v27  ;;  %1899 = vrot.lane.b32.xlu0 %v10060_v23, %s12923_s20  ;;  %2114 = vrot.lane.b32.xlu1 %v2036_v24, %s9703_s30  ;;  %v1824_v27 = vld [vmem:[#allocation2 + $0x83] sm:$0xff] }
  0xaa   : > { %706 = vst.msk [vmem:[#allocation3 + $0x70] sm:$0xff] %vm579_vm0, %v670_v26 }
  0xab   : > { %v1454_v31 = vpop.permute.xlu0 %1453  ;;  %v1669_v32 = vpop.permute.xlu1 %1668 }
  0xac   : > { %1561 = vst.msk [vmem:[#allocation3 + $0x8] sm:$0xff] %vm1559_vm7, %v1454_v31  ;;  %v1175_v31 = vld [vmem:[#allocation2 + $0x81] sm:$0xff] }
  0xad   : > { %1777 = vst.msk [vmem:[#allocation3] sm:$0xff] %vm1776_vm8, %v1669_v32  ;;  %1252 = vrot.lane.b32.xlu0 %v1171_v28, %s12917_s22  ;;  %1467 = vrot.lane.b32.xlu1 %v1387_v30, %s9700_s29  ;;  %v1391_v32 = vld [vmem:[#allocation2 + $0x7a] sm:$0xff] }
  0xaf   : > { %v807_v36 = vpop.permute.xlu0 %806  ;;  %v1022_v37 = vpop.permute.xlu1 %1021 }
  0xb0   : > { %912 = vst.msk [vmem:[#allocation3 + $0x18] sm:$0xff] %vm908_vm4, %v807_v36  ;;  %v671_v36 = vld [vmem:[#allocation2 + $0x7f] sm:$0xff] }
  0xb1   : > { %1128 = vst.msk [vmem:[#allocation3 + $0x10] sm:$0xff] %vm1125_vm5, %v1022_v37  ;;  %2116 = vrot.lane.b32.xlu0 %v2037_v33, %s9703_s30  ;;  %2331 = vrot.lane.b32.xlu1 %v2253_v34, %s9705_s23  ;;  %v2041_v37 = vld [vmem:[#allocation2 + $0x84] sm:$0xff] }
  0xb2   : > { %707 = vst.msk [vmem:[#allocation3 + $0x78] sm:$0xff] %vm579_vm0, %v671_v36  ;;  %v1179_v36 = vld [vmem:[#allocation2 + $0xa1] sm:$0xff] }
  0xb3   : > { %v1671_v40 = vpop.permute.xlu0 %1670  ;;  %v1886_v41 = vpop.permute.xlu1 %1885 }
  0xb4   : > { %1778 = vst.msk [vmem:[#allocation3 + $0x8] sm:$0xff] %vm1776_vm8, %v1671_v40 }
  0xb5   : > { %1994 = vst.msk [vmem:[#allocation3] sm:$0xff] %vm1993_vm9, %v1886_v41  ;;  %820 = vrot.lane.b32.xlu0 %v738_v38, %s12920_s24  ;;  %1469 = vrot.lane.b32.xlu1 %v1388_v39, %s9700_s29  ;;  %v2257_v38 = vld [vmem:[#allocation2 + $0x7d] sm:$0xff] }
  0xb6   : > { %v742_v41 = vld [vmem:[#allocation2 + $0x78] sm:$0xff] }
  0xb7   : > { %v1024_v43 = vpop.permute.xlu0 %1023  ;;  %v1239_v44 = vpop.permute.xlu1 %1238 }
  0xb8   : > { %1129 = vst.msk [vmem:[#allocation3 + $0x18] sm:$0xff] %vm1125_vm5, %v1024_v43 }
  0xb9   : > { %1345 = vst.msk [vmem:[#allocation3 + $0x10] sm:$0xff] %vm1342_vm6, %v1239_v44  ;;  %1684 = vrot.lane.b32.xlu0 %v1819_v17, %s12921_s26  ;;  %2333 = vrot.lane.b32.xlu1 %v2254_v42, %s9705_s23  ;;  %v1392_v42 = vld [vmem:[#allocation2 + $0x82] sm:$0xff] }
  0xbb   : > { %v1888_v46 = vpop.permute.xlu0 %1887  ;;  %v2103_v47 = vpop.permute.xlu1 %2102 }
  0xbc   : > { %1995 = vst.msk [vmem:[#allocation3 + $0x8] sm:$0xff] %vm1993_vm9, %v1888_v46  ;;  %v2258_v46 = vld [vmem:[#allocation2 + $0x85] sm:$0xff] }
  0xbd   : > { %2211 = vst.msk [vmem:[#allocation3] sm:$0xff] %vm2210_vm10, %v2103_v47  ;;  %822 = vrot.lane.b32.xlu0 %v739_v45, %s12920_s24  ;;  %1037 = vrot.lane.b32.xlu1 %v1170_v20, %s12922_s19 }
  0xbf   : > { %v1241_v49 = vpop.permute.xlu0 %1240  ;;  %v1456_v50 = vpop.permute.xlu1 %1455 }
  0xc0   : > { %1346 = vst.msk [vmem:[#allocation3 + $0x18] sm:$0xff] %vm1342_vm6, %v1241_v49  ;;  %v567_v49 = vld [vmem:[%s9941_s18 + $0xa0] sm:$0xff] }
  0xc1   : > { %1562 = vst.msk [vmem:[#allocation3 + $0x10] sm:$0xff] %vm1559_vm7, %v1456_v50  ;;  %1686 = vrot.lane.b32.xlu0 %v10060_v23, %s12921_s26  ;;  %1901 = vrot.lane.b32.xlu1 %v10093_v48, %s12923_s20  ;;  %v1174_v23 = vld [vmem:[#allocation2 + $0x79] sm:$0xff] }
  0xc2   : > { %644 = vst.msk [vmem:[#allocation2 + $0xcf] sm:$0xff] %vm579_vm0, %v567_v49  ;;  %v743_v50 = vld [vmem:[#allocation2 + $0x80] sm:$0xff] }
  0xc3   : > { %v2105_v53 = vpop.permute.xlu0 %2104  ;;  %v2320_v54 = vpop.permute.xlu1 %2319 }
  0xc4   : > { %2212 = vst.msk [vmem:[#allocation3 + $0x8] sm:$0xff] %vm2210_vm10, %v2105_v53  ;;  %v1825_v53 = vld [vmem:[#allocation2 + $0x8b] sm:$0xff] }
  0xc5   : > { %2428 = vst.msk [vmem:[#allocation3] sm:$0xff] %vm2427_vm11, %v2320_v54  ;;  %1039 = vrot.lane.b32.xlu0 %v1171_v28, %s12922_s19  ;;  %1254 = vrot.lane.b32.xlu1 %v1172_v52, %s12917_s22  ;;  %v2040_v28 = vld [vmem:[#allocation2 + $0x7c] sm:$0xff] }
  0xc7   : > { %v809_v58 = vpop.permute.xlu0 %808  ;;  %v1458_v59 = vpop.permute.xlu1 %1457 }
  0xc8   : > { %913 = vst.msk [vmem:[#allocation3 + $0x20] sm:$0xff] %vm908_vm4, %v809_v58 }
  0xc9   : > { %1563 = vst.msk [vmem:[#allocation3 + $0x18] sm:$0xff] %vm1559_vm7, %v1458_v59  ;;  %1903 = vrot.lane.b32.xlu0 %v1822_v56, %s12923_s20  ;;  %2118 = vrot.lane.b32.xlu1 %v2038_v57, %s9703_s30  ;;  %v1176_v57 = vld [vmem:[#allocation2 + $0x89] sm:$0xff] }
  0xcb   : > { %v1673_v62 = vpop.permute.xlu0 %1672  ;;  %v2322_v63 = vpop.permute.xlu1 %2321 }
  0xcc   : > { %v2464_v1 = vld [vmem:[#allocation3] sm:$0xff]  ;;  %1779 = vst.msk [vmem:[#allocation3 + $0x10] sm:$0xff] %vm1776_vm8, %v1673_v62  ;;  %v2042_v62 = vld [vmem:[#allocation2 + $0x8c] sm:$0xff] }
  0xcd   : > { %2429 = vst.msk [vmem:[#allocation3 + $0x8] sm:$0xff] %vm2427_vm11, %v2322_v63  ;;  %8846 = vmatprep.mubr.msk.f32.mxu0 %vm2502_vm12, %v2464_v1  ;;  %1256 = vrot.lane.b32.xlu0 %v1173_v60, %s12917_s22 }
  0xce   : > { %1471 = vrot.lane.b32.xlu1 %v1389_v61, %s9700_s29  ;;  %v1826_v61 = vld [vmem:[#allocation2 + $0x93] sm:$0xff] }
  0xcf   : > { %v811_v5 = vpop.permute.xlu0 %810  ;;  %v1026_v6 = vpop.permute.xlu1 %1025 }
  0xd0   : > { %914 = vst.msk [vmem:[#allocation3 + $0x28] sm:$0xff] %vm908_vm4, %v811_v5 }
  0xd1   : > { %1130 = vst.msk [vmem:[#allocation3 + $0x20] sm:$0xff] %vm1125_vm5, %v1026_v6  ;;  %2120 = vrot.lane.b32.xlu0 %v2039_v3, %s9703_s30  ;;  %v1393_v3 = vld [vmem:[#allocation2 + $0x8a] sm:$0xff] }
  0xd2   : > { %2335 = vrot.lane.b32.xlu1 %v2255_v4, %s9705_s23 }
  0xd3   : > { %v1675_v9 = vpop.permute.xlu0 %1674  ;;  %v1890_v10 = vpop.permute.xlu1 %1889 }
  0xd4   : > { %v2465_v11 = vld [vmem:[#allocation3 + $0x8] sm:$0xff]  ;;  %1780 = vst.msk [vmem:[#allocation3 + $0x18] sm:$0xff] %vm1776_vm8, %v1675_v9  ;;  %v2259_v9 = vld [vmem:[#allocation2 + $0x8d] sm:$0xff] }
  0xd5   : > { %1996 = vst.msk [vmem:[#allocation3 + $0x10] sm:$0xff] %vm1993_vm9, %v1890_v10  ;;  %8847 = vmatmul.mubr.msk.f32.vlgmr.msra.gmra.mrb[0].mxu0 %vm2502_vm12, %v2465_v11  ;;  %824 = vrot.lane.b32.xlu0 %v740_v7, %s12920_s24  ;;  %v673_v7 = vld [vmem:[#allocation2 + $0x8f] sm:$0xff] }
  0xd6   : > { %1473 = vrot.lane.b32.xlu1 %v1390_v8, %s9700_s29  ;;  %v2043_v8 = vld [vmem:[#allocation2 + $0x94] sm:$0xff]  ;;  %709 = vst.msk [vmem:[#allocation3 + $0x88] sm:$0xff] %vm579_vm0, %v673_v7 }
  0xd7   : > { %v1028_v13 = vpop.permute.xlu0 %1027  ;;  %v1243_v14 = vpop.permute.xlu1 %1242  ;;  %v1181_v7 = vld [vmem:[#allocation2 + $0xb1] sm:$0xff] }
  0xd8   : > { %1131 = vst.msk [vmem:[#allocation3 + $0x28] sm:$0xff] %vm1125_vm5, %v1028_v13  ;;  %v1394_v13 = vld [vmem:[#allocation2 + $0x92] sm:$0xff] }
  0xd9   : > { %1347 = vst.msk [vmem:[#allocation3 + $0x20] sm:$0xff] %vm1342_vm6, %v1243_v14  ;;  %1688 = vrot.lane.b32.xlu0 %v10093_v48, %s12921_s26 }
  0xda   : > { %2337 = vrot.lane.b32.xlu1 %v2256_v12, %s9705_s23  ;;  %v744_v12 = vld [vmem:[#allocation2 + $0x88] sm:$0xff] }
  0xdb   : > { %v1892_v17 = vpop.permute.xlu0 %1891  ;;  %v2107_v18 = vpop.permute.xlu1 %2106 }
  0xdc   : > { %1997 = vst.msk [vmem:[#allocation3 + $0x18] sm:$0xff] %vm1993_vm9, %v1892_v17  ;;  %v2260_v17 = vld [vmem:[#allocation2 + $0x95] sm:$0xff] }
  0xdd   : > { %2213 = vst.msk [vmem:[#allocation3 + $0x10] sm:$0xff] %vm2210_vm10, %v2107_v18  ;;  %826 = vrot.lane.b32.xlu0 %v741_v16, %s12920_s24 }
  0xde   : > { %1041 = vrot.lane.b32.xlu1 %v1172_v52, %s12922_s19 }
  0xdf   : > { %v1245_v20 = vpop.permute.xlu0 %1244  ;;  %v1460_v21 = vpop.permute.xlu1 %1459 }
  0xe0   : > { %1348 = vst.msk [vmem:[#allocation3 + $0x28] sm:$0xff] %vm1342_vm6, %v1245_v20  ;;  %v569_v20 = vld [vmem:[%s9941_s18 + $0xb0] sm:$0xff] }
  0xe1   : > { %1564 = vst.msk [vmem:[#allocation3 + $0x20] sm:$0xff] %vm1559_vm7, %v1460_v21  ;;  %1690 = vrot.lane.b32.xlu0 %v1822_v56, %s12921_s26  ;;  %v568_v56 = vld [vmem:[%s9941_s18 + $0xa8] sm:$0xff]  ;;  %v745_v21 = vld [vmem:[#allocation2 + $0x90] sm:$0xff] }
  0xe2   : > { %1905 = vrot.lane.b32.xlu1 %v1823_v19, %s12923_s20  ;;  %645 = vst.msk [vmem:[#allocation2 + $0xd7] sm:$0xff] %vm579_vm0, %v568_v56  ;;  %646 = vst.msk [vmem:[#allocation2 + $0xe1] sm:$0xff] %vm579_vm0, %v569_v20 }
  0xe3   : > { %v2109_v24 = vpop.permute.xlu0 %2108  ;;  %v2324_v25 = vpop.permute.xlu1 %2323 }
  0xe4   : > { %2214 = vst.msk [vmem:[#allocation3 + $0x18] sm:$0xff] %vm2210_vm10, %v2109_v24  ;;  %v1827_v24 = vld [vmem:[#allocation2 + $0x9b] sm:$0xff] }
  0xe5   : > { %2430 = vst.msk [vmem:[#allocation3 + $0x10] sm:$0xff] %vm2427_vm11, %v2324_v25  ;;  %1043 = vrot.lane.b32.xlu0 %v1173_v60, %s12922_s19  ;;  %v672_v60 = vld [vmem:[#allocation2 + $0x87] sm:$0xff] }
  0xe6   : > { %1258 = vrot.lane.b32.xlu1 %v1174_v23, %s12917_s22  ;;  %708 = vst.msk [vmem:[#allocation3 + $0x80] sm:$0xff] %vm579_vm0, %v672_v60  ;;  %v571_v60 = vld [vmem:[%s9941_s18 + $0xc0] sm:$0xff] }
  0xe7   : > { %v813_v29 = vpop.permute.xlu0 %812  ;;  %v1462_v30 = vpop.permute.xlu1 %1461  ;;  %648 = vst.msk [vmem:[#allocation2 + $0xf3] sm:$0xff] %vm579_vm0, %v571_v60 }
  0xe8   : > { %915 = vst.msk [vmem:[#allocation3 + $0x30] sm:$0xff] %vm908_vm4, %v813_v29 }
  0xe9   : > { %1565 = vst.msk [vmem:[#allocation3 + $0x28] sm:$0xff] %vm1559_vm7, %v1462_v30  ;;  %1907 = vrot.lane.b32.xlu0 %v1824_v27, %s12923_s20 }
  0xea   : > { %2122 = vrot.lane.b32.xlu1 %v2040_v28, %s9703_s30  ;;  %v1178_v28 = vld [vmem:[#allocation2 + $0x99] sm:$0xff] }
  0xeb   : > { %v1677_v33 = vpop.permute.xlu0 %1676  ;;  %v2326_v34 = vpop.permute.xlu1 %2325 }
  0xec   : > { %v2466_v35 = vld [vmem:[#allocation3 + $0x10] sm:$0xff]  ;;  %1781 = vst.msk [vmem:[#allocation3 + $0x20] sm:$0xff] %vm1776_vm8, %v1677_v33  ;;  %v2044_v33 = vld [vmem:[#allocation2 + $0x9c] sm:$0xff] }
  0xed   : > { %2431 = vst.msk [vmem:[#allocation3 + $0x18] sm:$0xff] %vm2427_vm11, %v2326_v34  ;;  %8849 = vmatprep.mubr.msk.f32.mxu0 %vm2502_vm12, %v2466_v35  ;;  %1260 = vrot.lane.b32.xlu0 %v1175_v31, %s12917_s22 }
  0xee   : > { %1475 = vrot.lane.b32.xlu1 %v1391_v32, %s9700_s29  ;;  %v1828_v32 = vld [vmem:[#allocation2 + $0xa3] sm:$0xff] }
  0xef   : > { %v815_v39 = vpop.permute.xlu0 %814  ;;  %v1030_v40 = vpop.permute.xlu1 %1029 }
  0xf0   : > { %916 = vst.msk [vmem:[#allocation3 + $0x38] sm:$0xff] %vm908_vm4, %v815_v39 }
  0xf1   : > { %1132 = vst.msk [vmem:[#allocation3 + $0x30] sm:$0xff] %vm1125_vm5, %v1030_v40  ;;  %2124 = vrot.lane.b32.xlu0 %v2041_v37, %s9703_s30  ;;  %v1395_v37 = vld [vmem:[#allocation2 + $0x9a] sm:$0xff] }
  0xf2   : > { %2339 = vrot.lane.b32.xlu1 %v2257_v38, %s9705_s23 }
  0xf3   : > { %v1679_v43 = vpop.permute.xlu0 %1678  ;;  %v1894_v44 = vpop.permute.xlu1 %1893 }
  0xf4   : > { %v2467_v45 = vld [vmem:[#allocation3 + $0x18] sm:$0xff]  ;;  %1782 = vst.msk [vmem:[#allocation3 + $0x28] sm:$0xff] %vm1776_vm8, %v1679_v43  ;;  %v2261_v43 = vld [vmem:[#allocation2 + $0x9d] sm:$0xff] }
  0xf5   : > { %1998 = vst.msk [vmem:[#allocation3 + $0x20] sm:$0xff] %vm1993_vm9, %v1894_v44  ;;  %8850 = vmatmul.mubr.msk.f32.gmra.mrb[2].mxu0 %vm2502_vm12, %v2467_v45  ;;  %828 = vrot.lane.b32.xlu0 %v742_v41, %s12920_s24  ;;  %v675_v41 = vld [vmem:[#allocation2 + $0x9f] sm:$0xff] }
  0xf6   : > { %1477 = vrot.lane.b32.xlu1 %v1392_v42, %s9700_s29  ;;  %v2045_v42 = vld [vmem:[#allocation2 + $0xa4] sm:$0xff]  ;;  %711 = vst.msk [vmem:[#allocation3 + $0x98] sm:$0xff] %vm579_vm0, %v675_v41  ;;  %v1399_v41 = vld [vmem:[#allocation2 + $0xba] sm:$0xff] }
  0xf7   : > { %v1032_v47 = vpop.permute.xlu0 %1031  ;;  %v1247_v48 = vpop.permute.xlu1 %1246 }
  0xf8   : > { %1133 = vst.msk [vmem:[#allocation3 + $0x38] sm:$0xff] %vm1125_vm5, %v1032_v47  ;;  %v1396_v47 = vld [vmem:[#allocation2 + $0xa2] sm:$0xff] }
  0xf9   : > { %1349 = vst.msk [vmem:[#allocation3 + $0x30] sm:$0xff] %vm1342_vm6, %v1247_v48  ;;  %1692 = vrot.lane.b32.xlu0 %v1823_v19, %s12921_s26 }
  0xfa   : > { %2341 = vrot.lane.b32.xlu1 %v2258_v46, %s9705_s23  ;;  %v746_v46 = vld [vmem:[#allocation2 + $0x98] sm:$0xff] }
  0xfb   : > { %v1896_v51 = vpop.permute.xlu0 %1895  ;;  %v2111_v52 = vpop.permute.xlu1 %2110 }
  0xfc   : > { %1999 = vst.msk [vmem:[#allocation3 + $0x28] sm:$0xff] %vm1993_vm9, %v1896_v51  ;;  %v2262_v51 = vld [vmem:[#allocation2 + $0xa5] sm:$0xff] }
  0xfd   : > { %2215 = vst.msk [vmem:[#allocation3 + $0x20] sm:$0xff] %vm2210_vm10, %v2111_v52  ;;  %830 = vrot.lane.b32.xlu0 %v743_v50, %s12920_s24 }
  0xfe   : > { %1045 = vrot.lane.b32.xlu1 %v1174_v23, %s12922_s19 }
  0xff   : > { %v1249_v54 = vpop.permute.xlu0 %1248  ;;  %v1464_v55 = vpop.permute.xlu1 %1463 }
 0x100   : > { %1350 = vst.msk [vmem:[#allocation3 + $0x38] sm:$0xff] %vm1342_vm6, %v1249_v54  ;;  %v747_v54 = vld [vmem:[#allocation2 + $0xa0] sm:$0xff] }
 0x101   : > { %1566 = vst.msk [vmem:[#allocation3 + $0x30] sm:$0xff] %vm1559_vm7, %v1464_v55  ;;  %1694 = vrot.lane.b32.xlu0 %v1824_v27, %s12921_s26  ;;  %v570_v27 = vld [vmem:[%s9941_s18 + $0xb8] sm:$0xff] }
 0x102   : > { %1909 = vrot.lane.b32.xlu1 %v1825_v53, %s12923_s20  ;;  %647 = vst.msk [vmem:[#allocation2 + $0xe9] sm:$0xff] %vm579_vm0, %v570_v27 }
 0x103   : > { %v2113_v58 = vpop.permute.xlu0 %2112  ;;  %v2328_v59 = vpop.permute.xlu1 %2327 }
 0x104   : > { %2216 = vst.msk [vmem:[#allocation3 + $0x28] sm:$0xff] %vm2210_vm10, %v2113_v58 }
 0x105   : > { %2432 = vst.msk [vmem:[#allocation3 + $0x20] sm:$0xff] %vm2427_vm11, %v2328_v59  ;;  %1047 = vrot.lane.b32.xlu0 %v1175_v31, %s12922_s19  ;;  %v674_v31 = vld [vmem:[#allocation2 + $0x97] sm:$0xff] }
 0x106   : > { %1262 = vrot.lane.b32.xlu1 %v1176_v57, %s12917_s22  ;;  %710 = vst.msk [vmem:[#allocation3 + $0x90] sm:$0xff] %vm579_vm0, %v674_v31  ;;  %v573_v31 = vld [vmem:[%s9941_s18 + $0xd0] sm:$0xff] }
 0x107   : > { %v817_v63 = vpop.permute.xlu0 %816  ;;  %v1466_v1 = vpop.permute.xlu1 %1465  ;;  %650 = vst.msk [vmem:[#allocation2 + $0x105] sm:$0xff] %vm579_vm0, %v573_v31 }
 0x108   : > { %917 = vst.msk [vmem:[#allocation3 + $0x40] sm:$0xff] %vm908_vm4, %v817_v63 }
 0x109   : > { %1567 = vst.msk [vmem:[#allocation3 + $0x38] sm:$0xff] %vm1559_vm7, %v1466_v1  ;;  %1911 = vrot.lane.b32.xlu0 %v1826_v61, %s12923_s20  ;;  %v1830_v1 = vld [vmem:[#allocation2 + $0xb3] sm:$0xff] }
 0x10a   : > { %2126 = vrot.lane.b32.xlu1 %v2042_v62, %s9703_s30 }
 0x10b   : > { %v1681_v4 = vpop.permute.xlu0 %1680  ;;  %v2330_v5 = vpop.permute.xlu1 %2329 }
 0x10c   : > { %v2468_v6 = vld [vmem:[#allocation3 + $0x20] sm:$0xff]  ;;  %1783 = vst.msk [vmem:[#allocation3 + $0x30] sm:$0xff] %vm1776_vm8, %v1681_v4 }
 0x10d   : > { %2433 = vst.msk [vmem:[#allocation3 + $0x28] sm:$0xff] %vm2427_vm11, %v2330_v5  ;;  %8852 = vmatprep.mubr.msk.f32.mxu0 %vm2502_vm12, %v2468_v6  ;;  %1264 = vrot.lane.b32.xlu0 %v1177_v2, %s12917_s22  ;;  %v572_v6 = vld [vmem:[%s9941_s18 + $0xc8] sm:$0xff] }
 0x10e   : > { %1479 = vrot.lane.b32.xlu1 %v1393_v3, %s9700_s29  ;;  %v676_v3 = vld [vmem:[#allocation2 + $0xa7] sm:$0xff]  ;;  %649 = vst.msk [vmem:[#allocation2 + $0xfb] sm:$0xff] %vm579_vm0, %v572_v6  ;;  %v1834_v6 = vld [vmem:[#allocation2 + $0xd3] sm:$0xff] }
 0x10f   : > { %v819_v10 = vpop.permute.xlu0 %818  ;;  %v1034_v11 = vpop.permute.xlu1 %1033  ;;  %712 = vst.msk [vmem:[#allocation3 + $0xa0] sm:$0xff] %vm579_vm0, %v676_v3  ;;  %v1184_v3 = vld [vmem:[#allocation2 + $0xc9] sm:$0xff] }
 0x110   : > { %918 = vst.msk [vmem:[#allocation3 + $0x48] sm:$0xff] %vm908_vm4, %v819_v10 }
 0x111   : > { %1134 = vst.msk [vmem:[#allocation3 + $0x40] sm:$0xff] %vm1125_vm5, %v1034_v11  ;;  %2128 = vrot.lane.b32.xlu0 %v2043_v8, %s9703_s30  ;;  %v1397_v8 = vld [vmem:[#allocation2 + $0xaa] sm:$0xff] }
 0x112   : > { %2343 = vrot.lane.b32.xlu1 %v2259_v9, %s9705_s23 }
 0x113   : > { %v1683_v14 = vpop.permute.xlu0 %1682  ;;  %v1898_v15 = vpop.permute.xlu1 %1897 }
 0x114   : > { %v2469_v16 = vld [vmem:[#allocation3 + $0x28] sm:$0xff]  ;;  %1784 = vst.msk [vmem:[#allocation3 + $0x38] sm:$0xff] %vm1776_vm8, %v1683_v14 }
 0x115   : > { %2000 = vst.msk [vmem:[#allocation3 + $0x30] sm:$0xff] %vm1993_vm9, %v1898_v15  ;;  %8853 = vmatmul.mubr.msk.f32.gmra.mrb[4].mxu0 %vm2502_vm12, %v2469_v16  ;;  %832 = vrot.lane.b32.xlu0 %v744_v12, %s12920_s24  ;;  %v2047_v12 = vld [vmem:[#allocation2 + $0xb4] sm:$0xff] }
 0x116   : > { %1481 = vrot.lane.b32.xlu1 %v1394_v13, %s9700_s29  ;;  %v2263_v13 = vld [vmem:[#allocation2 + $0xad] sm:$0xff] }
 0x117   : > { %v1036_v18 = vpop.permute.xlu0 %1035  ;;  %v1251_v19 = vpop.permute.xlu1 %1250  ;;  %v677_v16 = vld [vmem:[#allocation2 + $0xaf] sm:$0xff] }
 0x118   : > { %1135 = vst.msk [vmem:[#allocation3 + $0x48] sm:$0xff] %vm1125_vm5, %v1036_v18  ;;  %v1398_v18 = vld [vmem:[#allocation2 + $0xb2] sm:$0xff] }
 0x119   : > { %1351 = vst.msk [vmem:[#allocation3 + $0x40] sm:$0xff] %vm1342_vm6, %v1251_v19  ;;  %1696 = vrot.lane.b32.xlu0 %v1825_v53, %s12921_s26 }
 0x11a   : > { %2345 = vrot.lane.b32.xlu1 %v2260_v17, %s9705_s23  ;;  %713 = vst.msk [vmem:[#allocation3 + $0xa8] sm:$0xff] %vm579_vm0, %v677_v16  ;;  %v748_v17 = vld [vmem:[#allocation2 + $0xa8] sm:$0xff]  ;;  %v2051_v16 = vld [vmem:[#allocation2 + $0xd4] sm:$0xff] }
 0x11b   : > { %v1900_v22 = vpop.permute.xlu0 %1899  ;;  %v2115_v23 = vpop.permute.xlu1 %2114 }
 0x11c   : > { %2001 = vst.msk [vmem:[#allocation3 + $0x38] sm:$0xff] %vm1993_vm9, %v1900_v22  ;;  %v2264_v22 = vld [vmem:[#allocation2 + $0xb5] sm:$0xff] }
 0x11d   : > { %2217 = vst.msk [vmem:[#allocation3 + $0x30] sm:$0xff] %vm2210_vm10, %v2115_v23  ;;  %834 = vrot.lane.b32.xlu0 %v745_v21, %s12920_s24 }
 0x11e   : > { %1049 = vrot.lane.b32.xlu1 %v1176_v57, %s12922_s19  ;;  %v10256_v57 = vld [vmem:[#allocation2 + $0xab] sm:$0xff] }
 0x11f   : > { %v1253_v25 = vpop.permute.xlu0 %1252  ;;  %v1468_v26 = vpop.permute.xlu1 %1467 }
 0x120   : > { %1352 = vst.msk [vmem:[#allocation3 + $0x48] sm:$0xff] %vm1342_vm6, %v1253_v25  ;;  %v749_v25 = vld [vmem:[#allocation2 + $0xb0] sm:$0xff] }
 0x121   : > { %1568 = vst.msk [vmem:[#allocation3 + $0x40] sm:$0xff] %vm1559_vm7, %v1468_v26  ;;  %1698 = vrot.lane.b32.xlu0 %v1826_v61, %s12921_s26  ;;  %v1180_v61 = vld [vmem:[#allocation2 + $0xa9] sm:$0xff] }
 0x122   : > { %1913 = vrot.lane.b32.xlu1 %v1827_v24, %s12923_s20 }
 0x123   : > { %v2117_v29 = vpop.permute.xlu0 %2116  ;;  %v2332_v30 = vpop.permute.xlu1 %2331 }
 0x124   : > { %2218 = vst.msk [vmem:[#allocation3 + $0x38] sm:$0xff] %vm2210_vm10, %v2117_v29 }
 0x125   : > { %2434 = vst.msk [vmem:[#allocation3 + $0x30] sm:$0xff] %vm2427_vm11, %v2332_v30  ;;  %1051 = vrot.lane.b32.xlu0 %v1177_v2, %s12922_s19  ;;  %v2046_v2 = vld [vmem:[#allocation2 + $0xac] sm:$0xff] }
 0x126   : > { %1266 = vrot.lane.b32.xlu1 %v1178_v28, %s12917_s22 }
 0x127   : > { %v821_v34 = vpop.permute.xlu0 %820  ;;  %v1470_v35 = vpop.permute.xlu1 %1469 }
 0x128   : > { %919 = vst.msk [vmem:[#allocation3 + $0x50] sm:$0xff] %vm908_vm4, %v821_v34 }
 0x129   : > { %1569 = vst.msk [vmem:[#allocation3 + $0x48] sm:$0xff] %vm1559_vm7, %v1470_v35  ;;  %1915 = vrot.lane.b32.xlu0 %v1828_v32, %s12923_s20  ;;  %v1832_v35 = vld [vmem:[#allocation2 + $0xc3] sm:$0xff] }
 0x12a   : > { %2130 = vrot.lane.b32.xlu1 %v2044_v33, %s9703_s30 }
 0x12b   : > { %v1685_v38 = vpop.permute.xlu0 %1684  ;;  %v2334_v39 = vpop.permute.xlu1 %2333 }
 0x12c   : > { %v2470_v40 = vld [vmem:[#allocation3 + $0x30] sm:$0xff]  ;;  %1785 = vst.msk [vmem:[#allocation3 + $0x40] sm:$0xff] %vm1776_vm8, %v1685_v38 }
 0x12d   : > { %2435 = vst.msk [vmem:[#allocation3 + $0x38] sm:$0xff] %vm2427_vm11, %v2334_v39  ;;  %8855 = vmatprep.mubr.msk.f32.mxu0 %vm2502_vm12, %v2470_v40  ;;  %1268 = vrot.lane.b32.xlu0 %v1179_v36, %s12917_s22  ;;  %v1183_v40 = vld [vmem:[#allocation2 + $0xc1] sm:$0xff] }
 0x12e   : > { %1483 = vrot.lane.b32.xlu1 %v1395_v37, %s9700_s29  ;;  %v678_v37 = vld [vmem:[#allocation2 + $0xb7] sm:$0xff] }
 0x12f   : > { %v823_v44 = vpop.permute.xlu0 %822  ;;  %v1038_v45 = vpop.permute.xlu1 %1037  ;;  %714 = vst.msk [vmem:[#allocation3 + $0xb0] sm:$0xff] %vm579_vm0, %v678_v37  ;;  %v10388_v37 = vld [vmem:[#allocation2 + $0xd9] sm:$0xff] }
 0x130   : > { %920 = vst.msk [vmem:[#allocation3 + $0x58] sm:$0xff] %vm908_vm4, %v823_v44 }
 0x131   : > { %1136 = vst.msk [vmem:[#allocation3 + $0x50] sm:$0xff] %vm1125_vm5, %v1038_v45  ;;  %2132 = vrot.lane.b32.xlu0 %v2045_v42, %s9703_s30  ;;  %v2049_v45 = vld [vmem:[#allocation2 + $0xc4] sm:$0xff] }
 0x132   : > { %2347 = vrot.lane.b32.xlu1 %v2261_v43, %s9705_s23 }
 0x133   : > { %v1687_v48 = vpop.permute.xlu0 %1686  ;;  %v1902_v49 = vpop.permute.xlu1 %1901 }
 0x134   : > { %v2471_v50 = vld [vmem:[#allocation3 + $0x38] sm:$0xff]  ;;  %1786 = vst.msk [vmem:[#allocation3 + $0x48] sm:$0xff] %vm1776_vm8, %v1687_v48 }
 0x135   : > { %2002 = vst.msk [vmem:[#allocation3 + $0x40] sm:$0xff] %vm1993_vm9, %v1902_v49  ;;  %8856 = vmatmul.mubr.msk.f32.gmra.mrb[6].mxu0 %vm2502_vm12, %v2471_v50  ;;  %836 = vrot.lane.b32.xlu0 %v746_v46, %s12920_s24  ;;  %v2265_v46 = vld [vmem:[#allocation2 + $0xbd] sm:$0xff] }
 0x136   : > { %1485 = vrot.lane.b32.xlu1 %v1396_v47, %s9700_s29  ;;  %v679_v49 = vld [vmem:[#allocation2 + $0xbf] sm:$0xff] }
 0x137   : > { %v1040_v52 = vpop.permute.xlu0 %1039  ;;  %v1255_v53 = vpop.permute.xlu1 %1254  ;;  %715 = vst.msk [vmem:[#allocation3 + $0xb8] sm:$0xff] %vm579_vm0, %v679_v49  ;;  %v750_v50 = vld [vmem:[#allocation2 + $0xb8] sm:$0xff] }
 0x138   : > { %1137 = vst.msk [vmem:[#allocation3 + $0x58] sm:$0xff] %vm1125_vm5, %v1040_v52 }
 0x139   : > { %1353 = vst.msk [vmem:[#allocation3 + $0x50] sm:$0xff] %vm1342_vm6, %v1255_v53  ;;  %1700 = vrot.lane.b32.xlu0 %v1827_v24, %s12921_s26 }
 0x13a   : > { %2349 = vrot.lane.b32.xlu1 %v2262_v51, %s9705_s23  ;;  %v1400_v51 = vld [vmem:[#allocation2 + $0xc2] sm:$0xff] }
 0x13b   : > { %v1904_v55 = vpop.permute.xlu0 %1903  ;;  %v2119_v56 = vpop.permute.xlu1 %2118 }
 0x13c   : > { %2003 = vst.msk [vmem:[#allocation3 + $0x48] sm:$0xff] %vm1993_vm9, %v1904_v55  ;;  %v2266_v55 = vld [vmem:[#allocation2 + $0xc5] sm:$0xff] }
 0x13d   : > { %2219 = vst.msk [vmem:[#allocation3 + $0x40] sm:$0xff] %vm2210_vm10, %v2119_v56  ;;  %838 = vrot.lane.b32.xlu0 %v747_v54, %s12920_s24 }
 0x13e   : > { %1053 = vrot.lane.b32.xlu1 %v1178_v28, %s12922_s19  ;;  %v1831_v28 = vld [vmem:[#allocation2 + $0xbb] sm:$0xff] }
 0x13f   : > { %v1257_v58 = vpop.permute.xlu0 %1256 }
 0x140   : > { %v1472_v59 = vpop.permute.xlu1 %1471  ;;  %1354 = vst.msk [vmem:[#allocation3 + $0x58] sm:$0xff] %vm1342_vm6, %v1257_v58  ;;  %v574_v58 = vld [vmem:[%s9941_s18 + $0xd8] sm:$0xff] }
 0x141   : > { %1570 = vst.msk [vmem:[#allocation3 + $0x50] sm:$0xff] %vm1559_vm7, %v1472_v59  ;;  %1702 = vrot.lane.b32.xlu0 %v1828_v32, %s12921_s26  ;;  %v1182_v32 = vld [vmem:[#allocation2 + $0xb9] sm:$0xff] }
 0x142   : > { %1917 = vrot.lane.b32.xlu1 %v10256_v57, %s12923_s20  ;;  %v751_v59 = vld [vmem:[#allocation2 + $0xc0] sm:$0xff]  ;;  %651 = vst.msk [vmem:[#allocation2 + $0x10d] sm:$0xff] %vm579_vm0, %v574_v58 }
 0x143   : > { %v2121_v62 = vpop.permute.xlu0 %2120 }
 0x144   : > { %v2336_v63 = vpop.permute.xlu1 %2335  ;;  %2220 = vst.msk [vmem:[#allocation3 + $0x48] sm:$0xff] %vm2210_vm10, %v2121_v62  ;;  %v1833_v62 = vld [vmem:[#allocation2 + $0xcb] sm:$0xff] }
 0x145   : > { %2436 = vst.msk [vmem:[#allocation3 + $0x40] sm:$0xff] %vm2427_vm11, %v2336_v63  ;;  %1055 = vrot.lane.b32.xlu0 %v1179_v36, %s12922_s19  ;;  %v2048_v36 = vld [vmem:[#allocation2 + $0xbc] sm:$0xff] }
 0x146   : > { %1270 = vrot.lane.b32.xlu1 %v1180_v61, %s12917_s22 }
 0x147   : > { %v825_v4 = vpop.permute.xlu0 %824 }
 0x148   : > { %v1474_v5 = vpop.permute.xlu1 %1473  ;;  %921 = vst.msk [vmem:[#allocation3 + $0x60] sm:$0xff] %vm908_vm4, %v825_v4 }
 0x149   : > { %1571 = vst.msk [vmem:[#allocation3 + $0x58] sm:$0xff] %vm1559_vm7, %v1474_v5  ;;  %1919 = vrot.lane.b32.xlu0 %v1830_v1, %s12923_s20 }
 0x14a   : > { %2134 = vrot.lane.b32.xlu1 %v2046_v2, %s9703_s30  ;;  %v575_v2 = vld [vmem:[%s9941_s18 + $0xe0] sm:$0xff] }
 0x14b   : > { %v1689_v9 = vpop.permute.xlu0 %1688  ;;  %652 = vst.msk [vmem:[#allocation2 + $0x117] sm:$0xff] %vm579_vm0, %v575_v2  ;;  %v755_v2 = vld [vmem:[#allocation2 + $0xe0] sm:$0xff] }
 0x14c   : > { %v2338_v10 = vpop.permute.xlu1 %2337  ;;  %v2472_v11 = vld [vmem:[#allocation3 + $0x40] sm:$0xff]  ;;  %1787 = vst.msk [vmem:[#allocation3 + $0x50] sm:$0xff] %vm1776_vm8, %v1689_v9 }
 0x14d   : > { %2437 = vst.msk [vmem:[#allocation3 + $0x48] sm:$0xff] %vm2427_vm11, %v2338_v10  ;;  %8858 = vmatprep.mubr.msk.f32.mxu0 %vm2502_vm12, %v2472_v11  ;;  %1272 = vrot.lane.b32.xlu0 %v1181_v7, %s12917_s22  ;;  %v1185_v11 = vld [vmem:[#allocation2 + $0xd1] sm:$0xff] }
 0x14e   : > { %1487 = vrot.lane.b32.xlu1 %v1397_v8, %s9700_s29  ;;  %v680_v8 = vld [vmem:[#allocation2 + $0xc7] sm:$0xff] }
 0x14f   : > { %v827_v14 = vpop.permute.xlu0 %826  ;;  %716 = vst.msk [vmem:[#allocation3 + $0xc0] sm:$0xff] %vm579_vm0, %v680_v8 }
 0x150   : > { %v1042_v15 = vpop.permute.xlu1 %1041  ;;  %922 = vst.msk [vmem:[#allocation3 + $0x68] sm:$0xff] %vm908_vm4, %v827_v14 }
 0x151   : > { %1138 = vst.msk [vmem:[#allocation3 + $0x60] sm:$0xff] %vm1125_vm5, %v1042_v15  ;;  %2136 = vrot.lane.b32.xlu0 %v2047_v12, %s9703_s30  ;;  %v1401_v12 = vld [vmem:[#allocation2 + $0xca] sm:$0xff] }
 0x152   : > { %2351 = vrot.lane.b32.xlu1 %v2263_v13, %s9705_s23 }
 0x153   : > { %v1691_v19 = vpop.permute.xlu0 %1690 }
 0x154   : > { %v1906_v20 = vpop.permute.xlu1 %1905  ;;  %v2473_v21 = vld [vmem:[#allocation3 + $0x48] sm:$0xff]  ;;  %1788 = vst.msk [vmem:[#allocation3 + $0x58] sm:$0xff] %vm1776_vm8, %v1691_v19 }
 0x155   : > { %2004 = vst.msk [vmem:[#allocation3 + $0x50] sm:$0xff] %vm1993_vm9, %v1906_v20  ;;  %8859 = vmatmul.mubr.msk.f32.gmra.mrb[8].mxu0 %vm2502_vm12, %v2473_v21  ;;  %840 = vrot.lane.b32.xlu0 %v748_v17, %s12920_s24  ;;  %v2267_v17 = vld [vmem:[#allocation2 + $0xcd] sm:$0xff] }
 0x156   : > { %1489 = vrot.lane.b32.xlu1 %v1398_v18, %s9700_s29  ;;  %v681_v20 = vld [vmem:[#allocation2 + $0xcf] sm:$0xff] }
 0x157   : > { %v1044_v23 = vpop.permute.xlu0 %1043  ;;  %717 = vst.msk [vmem:[#allocation3 + $0xc8] sm:$0xff] %vm579_vm0, %v681_v20  ;;  %v752_v21 = vld [vmem:[#allocation2 + $0xc8] sm:$0xff] }
 0x158   : > { %v1259_v24 = vpop.permute.xlu1 %1258  ;;  %1139 = vst.msk [vmem:[#allocation3 + $0x68] sm:$0xff] %vm1125_vm5, %v1044_v23 }
 0x159   : > { %1355 = vst.msk [vmem:[#allocation3 + $0x60] sm:$0xff] %vm1342_vm6, %v1259_v24  ;;  %1704 = vrot.lane.b32.xlu0 %v10256_v57, %s12921_s26 }
 0x15a   : > { %2353 = vrot.lane.b32.xlu1 %v2264_v22, %s9705_s23  ;;  %v1402_v22 = vld [vmem:[#allocation2 + $0xd2] sm:$0xff] }
 0x15b   : > { %v1908_v26 = vpop.permute.xlu0 %1907 }
 0x15c   : > { %v2123_v27 = vpop.permute.xlu1 %2122  ;;  %2005 = vst.msk [vmem:[#allocation3 + $0x58] sm:$0xff] %vm1993_vm9, %v1908_v26  ;;  %v2268_v26 = vld [vmem:[#allocation2 + $0xd5] sm:$0xff] }
 0x15d   : > { %2221 = vst.msk [vmem:[#allocation3 + $0x50] sm:$0xff] %vm2210_vm10, %v2123_v27  ;;  %842 = vrot.lane.b32.xlu0 %v749_v25, %s12920_s24 }
 0x15e   : > { %1057 = vrot.lane.b32.xlu1 %v1180_v61, %s12922_s19 }
 0x15f   : > { %v1261_v29 = vpop.permute.xlu0 %1260 }
 0x160   : > { %v1476_v30 = vpop.permute.xlu1 %1475  ;;  %1356 = vst.msk [vmem:[#allocation3 + $0x68] sm:$0xff] %vm1342_vm6, %v1261_v29  ;;  %v576_v29 = vld [vmem:[%s9941_s18 + $0xe8] sm:$0xff] }
 0x161   : > { %1572 = vst.msk [vmem:[#allocation3 + $0x60] sm:$0xff] %vm1559_vm7, %v1476_v30  ;;  %1706 = vrot.lane.b32.xlu0 %v1830_v1, %s12921_s26  ;;  %v753_v30 = vld [vmem:[#allocation2 + $0xd0] sm:$0xff] }
 0x162   : > { %1921 = vrot.lane.b32.xlu1 %v1831_v28, %s12923_s20  ;;  %653 = vst.msk [vmem:[#allocation2 + $0x11f] sm:$0xff] %vm579_vm0, %v576_v29 }
 0x163   : > { %v2125_v33 = vpop.permute.xlu0 %2124 }
 0x164   : > { %v2340_v34 = vpop.permute.xlu1 %2339  ;;  %2222 = vst.msk [vmem:[#allocation3 + $0x58] sm:$0xff] %vm2210_vm10, %v2125_v33  ;;  %v10380_v33 = vld [vmem:[#allocation2 + $0xdb] sm:$0xff] }
 0x165   : > { %2438 = vst.msk [vmem:[#allocation3 + $0x50] sm:$0xff] %vm2427_vm11, %v2340_v34  ;;  %1059 = vrot.lane.b32.xlu0 %v1181_v7, %s12922_s19  ;;  %v2050_v7 = vld [vmem:[#allocation2 + $0xcc] sm:$0xff] }
 0x166   : > { %1274 = vrot.lane.b32.xlu1 %v1182_v32, %s12917_s22 }
 0x167   : > { %v829_v38 = vpop.permute.xlu0 %828 }
 0x168   : > { %v1478_v39 = vpop.permute.xlu1 %1477  ;;  %923 = vst.msk [vmem:[#allocation3 + $0x70] sm:$0xff] %vm908_vm4, %v829_v38 }
 0x169   : > { %1573 = vst.msk [vmem:[#allocation3 + $0x68] sm:$0xff] %vm1559_vm7, %v1478_v39  ;;  %1923 = vrot.lane.b32.xlu0 %v1832_v35, %s12923_s20 }
 0x16a   : > { %2138 = vrot.lane.b32.xlu1 %v2048_v36, %s9703_s30  ;;  %v577_v36 = vld [vmem:[%s9941_s18 + $0xf0] sm:$0xff] }
 0x16b   : > { %v1693_v42 = vpop.permute.xlu0 %1692  ;;  %654 = vst.msk [vmem:[#allocation2 + $0x129] sm:$0xff] %vm579_vm0, %v577_v36 }
 0x16c   : > { %v2342_v43 = vpop.permute.xlu1 %2341  ;;  %v2474_v44 = vld [vmem:[#allocation3 + $0x50] sm:$0xff]  ;;  %1789 = vst.msk [vmem:[#allocation3 + $0x60] sm:$0xff] %vm1776_vm8, %v1693_v42  ;;  %v682_v42 = vld [vmem:[#allocation2 + $0xd7] sm:$0xff] }
 0x16d   : > { %2439 = vst.msk [vmem:[#allocation3 + $0x58] sm:$0xff] %vm2427_vm11, %v2342_v43  ;;  %8861 = vmatprep.mubr.msk.f32.mxu0 %vm2502_vm12, %v2474_v44  ;;  %1276 = vrot.lane.b32.xlu0 %v1183_v40, %s12917_s22 }
 0x16e   : > { %1491 = vrot.lane.b32.xlu1 %v1399_v41, %s9700_s29  ;;  %v2052_v41 = vld [vmem:[#allocation2 + $0xdc] sm:$0xff]  ;;  %718 = vst.msk [vmem:[#allocation3 + $0xd0] sm:$0xff] %vm579_vm0, %v682_v42 }
 0x16f   : > { %v831_v47 = vpop.permute.xlu0 %830 }
 0x170   : > { %v1046_v48 = vpop.permute.xlu1 %1045  ;;  %924 = vst.msk [vmem:[#allocation3 + $0x78] sm:$0xff] %vm908_vm4, %v831_v47  ;;  %v1187_v47 = vld [vmem:[#allocation2 + $0xe1] sm:$0xff] }
 0x171   : > { %1140 = vst.msk [vmem:[#allocation3 + $0x70] sm:$0xff] %vm1125_vm5, %v1046_v48  ;;  %2140 = vrot.lane.b32.xlu0 %v2049_v45, %s9703_s30  ;;  %v1403_v48 = vld [vmem:[#allocation2 + $0xda] sm:$0xff] }
 0x172   : > { %2355 = vrot.lane.b32.xlu1 %v2265_v46, %s9705_s23 }
 0x173   : > { %v1695_v52 = vpop.permute.xlu0 %1694 }
 0x174   : > { %v1910_v53 = vpop.permute.xlu1 %1909  ;;  %v2475_v54 = vld [vmem:[#allocation3 + $0x58] sm:$0xff]  ;;  %1790 = vst.msk [vmem:[#allocation3 + $0x68] sm:$0xff] %vm1776_vm8, %v1695_v52  ;;  %v2053_v52 = vld [vmem:[#allocation2 + $0xe4] sm:$0xff] }
 0x175   : > { %2006 = vst.msk [vmem:[#allocation3 + $0x60] sm:$0xff] %vm1993_vm9, %v1910_v53  ;;  %8862 = vmatmul.mubr.msk.f32.gmra.mrb[10].mxu0 %vm2502_vm12, %v2475_v54  ;;  %844 = vrot.lane.b32.xlu0 %v750_v50, %s12920_s24  ;;  %v2269_v53 = vld [vmem:[#allocation2 + $0xdd] sm:$0xff] }
 0x176   : > { %1493 = vrot.lane.b32.xlu1 %v1400_v51, %s9700_s29 }
 0x177   : > { %v1048_v56 = vpop.permute.xlu0 %1047 }
 0x178   : > { %v1263_v57 = vpop.permute.xlu1 %1262  ;;  %1141 = vst.msk [vmem:[#allocation3 + $0x78] sm:$0xff] %vm1125_vm5, %v1048_v56 }
 0x179   : > { %1357 = vst.msk [vmem:[#allocation3 + $0x70] sm:$0xff] %vm1342_vm6, %v1263_v57  ;;  %1708 = vrot.lane.b32.xlu0 %v1831_v28, %s12921_s26  ;;  %v754_v57 = vld [vmem:[#allocation2 + $0xd8] sm:$0xff] }
 0x17a   : > { %2357 = vrot.lane.b32.xlu1 %v2266_v55, %s9705_s23  ;;  %v683_v55 = vld [vmem:[#allocation2 + $0xdf] sm:$0xff] }
 0x17b   : > { %v1912_v60 = vpop.permute.xlu0 %1911  ;;  %719 = vst.msk [vmem:[#allocation3 + $0xd8] sm:$0xff] %vm579_vm0, %v683_v55 }
 0x17c   : > { %v2127_v61 = vpop.permute.xlu1 %2126  ;;  %2007 = vst.msk [vmem:[#allocation3 + $0x68] sm:$0xff] %vm1993_vm9, %v1912_v60 }
 0x17d   : > { %2223 = vst.msk [vmem:[#allocation3 + $0x60] sm:$0xff] %vm2210_vm10, %v2127_v61  ;;  %846 = vrot.lane.b32.xlu0 %v751_v59, %s12920_s24  ;;  %v1404_v59 = vld [vmem:[#allocation2 + $0xe2] sm:$0xff] }
 0x17e   : > { %1061 = vrot.lane.b32.xlu1 %v1182_v32, %s12922_s19 }
 0x17f   : > { %v1265_v63 = vpop.permute.xlu0 %1264 }
 0x180   : > { %v1480_v1 = vpop.permute.xlu1 %1479  ;;  %1358 = vst.msk [vmem:[#allocation3 + $0x78] sm:$0xff] %vm1342_vm6, %v1265_v63  ;;  %v2270_v63 = vld [vmem:[#allocation2 + $0xe5] sm:$0xff] }
 0x181   : > { %1574 = vst.msk [vmem:[#allocation3 + $0x70] sm:$0xff] %vm1559_vm7, %v1480_v1  ;;  %1710 = vrot.lane.b32.xlu0 %v1832_v35, %s12921_s26 }
 0x182   : > { %1925 = vrot.lane.b32.xlu1 %v1833_v62, %s12923_s20 }
 0x183   : > { %v2129_v4 = vpop.permute.xlu0 %2128 }
 0x184   : > { %v2344_v5 = vpop.permute.xlu1 %2343  ;;  %2224 = vst.msk [vmem:[#allocation3 + $0x68] sm:$0xff] %vm2210_vm10, %v2129_v4 }
 0x185   : > { %2440 = vst.msk [vmem:[#allocation3 + $0x60] sm:$0xff] %vm2427_vm11, %v2344_v5  ;;  %1063 = vrot.lane.b32.xlu0 %v1183_v40, %s12922_s19  ;;  %v10396_v40 = vld [vmem:[#allocation2 + $0xe3] sm:$0xff] }
 0x186   : > { %1278 = vrot.lane.b32.xlu1 %v1184_v3, %s12917_s22 }
 0x187   : > { %v833_v9 = vpop.permute.xlu0 %832 }
 0x188   : > { %v1482_v10 = vpop.permute.xlu1 %1481  ;;  %925 = vst.msk [vmem:[#allocation3 + $0x80] sm:$0xff] %vm908_vm4, %v833_v9 }
 0x189   : > { %1575 = vst.msk [vmem:[#allocation3 + $0x78] sm:$0xff] %vm1559_vm7, %v1482_v10  ;;  %1927 = vrot.lane.b32.xlu0 %v1834_v6, %s12923_s20  ;;  %v10443_v10 = vld [vmem:[#allocation2 + $0xe9] sm:$0xff] }
 0x18a   : > { %2142 = vrot.lane.b32.xlu1 %v2050_v7, %s9703_s30  ;;  %v10435_v7 = vld [vmem:[#allocation2 + $0xeb] sm:$0xff] }
 0x18b   : > { %v1697_v13 = vpop.permute.xlu0 %1696 }
 0x18c   : > { %v2346_v14 = vpop.permute.xlu1 %2345  ;;  %v2476_v15 = vld [vmem:[#allocation3 + $0x60] sm:$0xff]  ;;  %1791 = vst.msk [vmem:[#allocation3 + $0x70] sm:$0xff] %vm1776_vm8, %v1697_v13 }
 0x18d   : > { %2441 = vst.msk [vmem:[#allocation3 + $0x68] sm:$0xff] %vm2427_vm11, %v2346_v14  ;;  %8864 = vmatprep.mubr.msk.f32.mxu0 %vm2502_vm12, %v2476_v15  ;;  %1280 = vrot.lane.b32.xlu0 %v1185_v11, %s12917_s22  ;;  %v10455_v13 = vld [vmem:[#allocation2 + $0xf3] sm:$0xff]  ;;  %v684_v14 = vld [vmem:[#allocation2 + $0xe7] sm:$0xff] }
 0x18e   : > { %1495 = vrot.lane.b32.xlu1 %v1401_v12, %s9700_s29  ;;  %v10449_v12 = vld [vmem:[%s12924_s2] ss:$0 sm:$0xff]  ;;  %720 = vst.msk [vmem:[#allocation3 + $0xe0] sm:$0xff] %vm579_vm0, %v684_v14 }
 0x18f   : > { %v835_v18 = vpop.permute.xlu0 %834 }
 0x190   : > { %v1050_v19 = vpop.permute.xlu1 %1049  ;;  %926 = vst.msk [vmem:[#allocation3 + $0x88] sm:$0xff] %vm908_vm4, %v835_v18 }
 0x191   : > { %1142 = vst.msk [vmem:[#allocation3 + $0x80] sm:$0xff] %vm1125_vm5, %v1050_v19  ;;  %2144 = vrot.lane.b32.xlu0 %v2051_v16, %s9703_s30 }
 0x192   : > { %2359 = vrot.lane.b32.xlu1 %v2267_v17, %s9705_s23  ;;  %v2054_v17 = vld [vmem:[#allocation2 + $0xec] sm:$0xff] }
 0x193   : > { %v1699_v23 = vpop.permute.xlu0 %1698 }
 0x194   : > { %v1914_v24 = vpop.permute.xlu1 %1913  ;;  %v2477_v25 = vld [vmem:[#allocation3 + $0x68] sm:$0xff]  ;;  %1792 = vst.msk [vmem:[#allocation3 + $0x78] sm:$0xff] %vm1776_vm8, %v1699_v23 }
 0x195   : > { %2008 = vst.msk [vmem:[#allocation3 + $0x70] sm:$0xff] %vm1993_vm9, %v1914_v24  ;;  %8865 = vmatmul.mubr.msk.f32.gmra.mrb[12].mxu0 %vm2502_vm12, %v2477_v25  ;;  %848 = vrot.lane.b32.xlu0 %v752_v21, %s12920_s24  ;;  %v10475_v25 = vld [vmem:[#allocation2 + $0xf1] sm:$0xff] }
 0x196   : > { %1497 = vrot.lane.b32.xlu1 %v1402_v22, %s9700_s29  ;;  %v10465_v22 = vld [vmem:[%s12868_s3] ss:$0 sm:$0xff] }
 0x197   : > { %v1052_v27 = vpop.permute.xlu0 %1051 }
 0x198   : > { %v1267_v28 = vpop.permute.xlu1 %1266  ;;  %1143 = vst.msk [vmem:[#allocation3 + $0x88] sm:$0xff] %vm1125_vm5, %v1052_v27 }
 0x199   : > { %1359 = vst.msk [vmem:[#allocation3 + $0x80] sm:$0xff] %vm1342_vm6, %v1267_v28  ;;  %1712 = vrot.lane.b32.xlu0 %v1833_v62, %s12921_s26  ;;  %v1405_v28 = vld [vmem:[#allocation2 + $0xea] sm:$0xff] }
 0x19a   : > { %2361 = vrot.lane.b32.xlu1 %v2268_v26, %s9705_s23 }
 0x19b   : > { %v1916_v31 = vpop.permute.xlu0 %1915 }
 0x19c   : > { %v2131_v32 = vpop.permute.xlu1 %2130  ;;  %2009 = vst.msk [vmem:[#allocation3 + $0x78] sm:$0xff] %vm1993_vm9, %v1916_v31 }
 0x19d   : > { %2225 = vst.msk [vmem:[#allocation3 + $0x70] sm:$0xff] %vm2210_vm10, %v2131_v32  ;;  %850 = vrot.lane.b32.xlu0 %v753_v30, %s12920_s24 }
 0x19e   : > { %1065 = vrot.lane.b32.xlu1 %v1184_v3, %s12922_s19  ;;  %v578_v3 = vld [vmem:[%s9941_s18 + $0xf8] sm:$0xff]  ;;  %s12899_s18 = smov 96  }
 0x19f   : > { %v1269_v34 = vpop.permute.xlu0 %1268  ;;  %655 = vst.msk [vmem:[#allocation2 + $0x131] sm:$0xff] %vm579_vm0, %v578_v3  ;;  %v2056_v3 = vld [vmem:[#allocation2 + $0xfc] sm:$0xff] }
 0x1a0   : > { %v1484_v35 = vpop.permute.xlu1 %1483  ;;  %1360 = vst.msk [vmem:[#allocation3 + $0x88] sm:$0xff] %vm1342_vm6, %v1269_v34 }
 0x1a1   : > { %1576 = vst.msk [vmem:[#allocation3 + $0x80] sm:$0xff] %vm1559_vm7, %v1484_v35  ;;  %1714 = vrot.lane.b32.xlu0 %v1834_v6, %s12921_s26  ;;  %v2055_v35 = vld [vmem:[#allocation2 + $0xf4] sm:$0xff] }
 0x1a2   : > { %1929 = vrot.lane.b32.xlu1 %v10380_v33, %s12923_s20 }
 0x1a3   : > { %v2133_v38 = vpop.permute.xlu0 %2132 }
 0x1a4   : > { %v2348_v39 = vpop.permute.xlu1 %2347  ;;  %2226 = vst.msk [vmem:[#allocation3 + $0x78] sm:$0xff] %vm2210_vm10, %v2133_v38  ;;  %v2271_v38 = vld [vmem:[#allocation2 + $0xed] sm:$0xff] }
 0x1a5   : > { %2442 = vst.msk [vmem:[#allocation3 + $0x70] sm:$0xff] %vm2427_vm11, %v2348_v39  ;;  %1067 = vrot.lane.b32.xlu0 %v1185_v11, %s12922_s19  ;;  %v685_v39 = vld [vmem:[#allocation2 + $0xef] sm:$0xff] }
 0x1a6   : > { %1282 = vrot.lane.b32.xlu1 %v10388_v37, %s12917_s22  ;;  %721 = vst.msk [vmem:[#allocation3 + $0xe8] sm:$0xff] %vm579_vm0, %v685_v39  ;;  %v1408_v39 = vld [vmem:[#allocation2 + $0x102] sm:$0xff] }
 0x1a7   : > { %v837_v43 = vpop.permute.xlu0 %836 }
 0x1a8   : > { %v10398_v44 = vpop.f32.mrb[0].mxu0  ;;  %927 = vst.msk [vmem:[#allocation3 + $0x90] sm:$0xff] %vm908_vm4, %v837_v43  ;;  %v1486_v45 = vpop.permute.xlu1 %1485  ;;  %v756_v43 = vld [vmem:[#allocation2 + $0xe8] sm:$0xff] }
 0x1a9   : > { %v10402_v46 = vpop.f32.mrb[1].mxu0  ;;  %1577 = vst.msk [vmem:[#allocation3 + $0x88] sm:$0xff] %vm1559_vm7, %v1486_v45  ;;  %1931 = vrot.lane.b32.xlu0 %v10396_v40, %s12923_s20 }
 0x1aa   : > { %2146 = vrot.lane.b32.xlu1 %v2052_v41, %s9703_s30  ;;  %v2867_v18 = vmul.f32 %v10449_v12, %v10402_v46 }
 0x1ab   : > { %v1701_v49 = vpop.permute.xlu0 %1700 }
 0x1ac   : > { %v2478_v50 = vld [vmem:[#allocation3 + $0x70] sm:$0xff]  ;;  %1793 = vst.msk [vmem:[#allocation3 + $0x80] sm:$0xff] %vm1776_vm8, %v1701_v49  ;;  %v2350_v51 = vpop.permute.xlu1 %2349  ;;  %v2910_v29 = vadd.f32 %v10465_v22, %v2867_v18 }
 0x1ad   : > { %8867 = vmatprep.mubr.msk.f32.mxu0 %vm2502_vm12, %v2478_v50  ;;  %2443 = vst.msk [vmem:[#allocation3 + $0x78] sm:$0xff] %vm2427_vm11, %v2350_v51  ;;  %1284 = vrot.lane.b32.xlu0 %v1187_v47, %s12917_s22  ;;  %v2272_v51 = vld [vmem:[#allocation2 + $0xf5] sm:$0xff] }
 0x1ae   : > { %1499 = vrot.lane.b32.xlu1 %v1403_v48, %s9700_s29 }
 0x1af   : > { %v839_v54 = vpop.permute.xlu0 %838 }
 0x1b0   : > { %928 = vst.msk [vmem:[#allocation3 + $0x98] sm:$0xff] %vm908_vm4, %v839_v54  ;;  %v1054_v56 = vpop.permute.xlu1 %1053 }
 0x1b1   : > { %1144 = vst.msk [vmem:[#allocation3 + $0x90] sm:$0xff] %vm1125_vm5, %v1054_v56  ;;  %2148 = vrot.lane.b32.xlu0 %v2053_v52, %s9703_s30 }
 0x1b2   : > { %2363 = vrot.lane.b32.xlu1 %v2269_v53, %s9705_s23  ;;  %v757_v53 = vld [vmem:[#allocation2 + $0xf0] sm:$0xff] }
 0x1b3   : > { %v1703_v58 = vpop.permute.xlu0 %1702 }
 0x1b4   : > { %1794 = vst.msk [vmem:[#allocation3 + $0x88] sm:$0xff] %vm1776_vm8, %v1703_v58  ;;  %v1918_v60 = vpop.permute.xlu1 %1917  ;;  %v2479_v61 = vld [vmem:[#allocation3 + $0x78] sm:$0xff] }
 0x1b5   : > { %2010 = vst.msk [vmem:[#allocation3 + $0x80] sm:$0xff] %vm1993_vm9, %v1918_v60  ;;  %8868 = vmatmul.mubr.msk.f32.gmra.mrb[14].mxu0 %vm2502_vm12, %v2479_v61  ;;  %852 = vrot.lane.b32.xlu0 %v754_v57, %s12920_s24  ;;  %v10519_v57 = vld [vmem:[#allocation2 + $0xfb] sm:$0xff] }
 0x1b6   : > { %1501 = vrot.lane.b32.xlu1 %v1404_v59, %s9700_s29  ;;  %v10527_v60 = vld [vmem:[#allocation2 + $0xf9] sm:$0xff] }
 0x1b7   : > { %v1056_v62 = vpop.permute.xlu0 %1055 }
 0x1b8   : > { %1145 = vst.msk [vmem:[#allocation3 + $0x98] sm:$0xff] %vm1125_vm5, %v1056_v62  ;;  %v1271_v1 = vpop.permute.xlu1 %1270  ;;  %v10535_v62 = vld [vmem:[#allocation2 + $0x103] sm:$0xff] }
 0x1b9   : > { %1361 = vst.msk [vmem:[#allocation3 + $0x90] sm:$0xff] %vm1342_vm6, %v1271_v1  ;;  %1716 = vrot.lane.b32.xlu0 %v10380_v33, %s12921_s26 }
 0x1ba   : > { %2365 = vrot.lane.b32.xlu1 %v2270_v63, %s9705_s23  ;;  %v686_v63 = vld [vmem:[#allocation2 + $0xf7] sm:$0xff] }
 0x1bb   : > { %v1920_v4 = vpop.permute.xlu0 %1919  ;;  %722 = vst.msk [vmem:[#allocation3 + $0xf0] sm:$0xff] %vm579_vm0, %v686_v63 }
 0x1bc   : > { %2011 = vst.msk [vmem:[#allocation3 + $0x88] sm:$0xff] %vm1993_vm9, %v1920_v4  ;;  %v2135_v5 = vpop.permute.xlu1 %2134  ;;  %v2868_v4 = vmul.f32 %v10398_v44, %v10449_v12 }
 0x1bd   : > { %2227 = vst.msk [vmem:[#allocation3 + $0x80] sm:$0xff] %vm2210_vm10, %v2135_v5  ;;  %854 = vrot.lane.b32.xlu0 %v755_v2, %s12920_s24 }
 0x1be   : > { %1069 = vrot.lane.b32.xlu1 %v10388_v37, %s12922_s19  ;;  %v2911_v14 = vadd.f32 %v10465_v22, %v2868_v4 }
 0x1bf   : > { %v1273_v6 = vpop.permute.xlu0 %1272 }
 0x1c0   : > { %1362 = vst.msk [vmem:[#allocation3 + $0x98] sm:$0xff] %vm1342_vm6, %v1273_v6  ;;  %v1488_v8 = vpop.permute.xlu1 %1487 }
 0x1c1   : > { %1578 = vst.msk [vmem:[#allocation3 + $0x90] sm:$0xff] %vm1559_vm7, %v1488_v8  ;;  %1718 = vrot.lane.b32.xlu0 %v10396_v40, %s12921_s26  ;;  %v2946_v40 = vmax.f32 %v2910_v29, 0.0 }
 0x1c2   : > { %1933 = vrot.lane.b32.xlu1 %v10435_v7, %s12923_s20 }
 0x1c3   : > { %v2137_v9 = vpop.permute.xlu0 %2136 }
 0x1c4   : > { %2228 = vst.msk [vmem:[#allocation3 + $0x88] sm:$0xff] %vm2210_vm10, %v2137_v9  ;;  %v2352_v11 = vpop.permute.xlu1 %2351 }
 0x1c5   : > { %2444 = vst.msk [vmem:[#allocation3 + $0x80] sm:$0xff] %vm2427_vm11, %v2352_v11  ;;  %1071 = vrot.lane.b32.xlu0 %v1187_v47, %s12922_s19  ;;  %v1406_v47 = vld [vmem:[#allocation2 + $0xf2] sm:$0xff] }
 0x1c6   : > { %1286 = vrot.lane.b32.xlu1 %v10443_v10, %s12917_s22 }
 0x1c7   : > { %v841_v15 = vpop.permute.xlu0 %840 }
 0x1c8   : > { %v8851_v16 = vpop.f32.mrb[2].mxu0  ;;  %929 = vst.msk [vmem:[#allocation3 + $0xa0] sm:$0xff] %vm908_vm4, %v841_v15  ;;  %v1490_v19 = vpop.permute.xlu1 %1489 }
 0x1c9   : > { %v2870_v20 = vmul.f32 %v8851_v16, %v10449_v12  ;;  %v2691_v21 = vpop.f32.mrb[3].mxu0  ;;  %1579 = vst.msk [vmem:[#allocation3 + $0x98] sm:$0xff] %vm1559_vm7, %v1490_v19  ;;  %1935 = vrot.lane.b32.xlu0 %v10455_v13, %s12923_s20 }
 0x1ca   : > { %v2869_v23 = vmul.f32 %v10449_v12, %v2691_v21  ;;  %2150 = vrot.lane.b32.xlu1 %v2054_v17, %s9703_s30 }
 0x1cb   : > { %v10472_v24 = vadd.f32 %v10465_v22, %v2870_v20  ;;  %v1705_v27 = vpop.permute.xlu0 %1704  ;;  %v2057_v20 = vld [vmem:[#allocation2 + $0x104] sm:$0xff] }
 0x1cc   : > { %v10478_v26 = vadd.f32 %v10465_v22, %v2869_v23  ;;  %1795 = vst.msk [vmem:[#allocation3 + $0x90] sm:$0xff] %vm1776_vm8, %v1705_v27  ;;  %v2354_v31 = vpop.permute.xlu1 %2353  ;;  %v2480_v32 = vld [vmem:[#allocation3 + $0x80] sm:$0xff] }
 0x1cd   : > { %v2949_v30 = vmax.f32 %v10472_v24, 0.0  ;;  %2445 = vst.msk [vmem:[#allocation3 + $0x88] sm:$0xff] %vm2427_vm11, %v2354_v31  ;;  %1288 = vrot.lane.b32.xlu0 %v10475_v25, %s12917_s22  ;;  %8870 = vmatprep.mubr.msk.f32.mxu0 %vm2502_vm12, %v2480_v32  ;;  %v687_v27 = vld [vmem:[#allocation2 + $0xff] sm:$0xff] }
 0x1ce   : > { %v2948_v33 = vmax.f32 %v10478_v26, 0.0  ;;  %1503 = vrot.lane.b32.xlu1 %v1405_v28, %s9700_s29  ;;  %v2947_v28 = vmax.f32 %v2911_v14, 0.0  ;;  %723 = vst.msk [vmem:[#allocation3 + $0xf8] sm:$0xff] %vm579_vm0, %v687_v27  ;;  %v2275_v27 = vld [vmem:[#allocation2 + $0x10d] sm:$0xff] }
 0x1cf   : > { %v10490_v34 = vrot.slane %v2949_v30, 2  ;;  %v843_v37 = vpop.permute.xlu0 %842 }
 0x1d0   : > { %v3017_v36 = vrot.slane %v2948_v33, 2  ;;  %930 = vst.msk [vmem:[#allocation3 + $0xa8] sm:$0xff] %vm908_vm4, %v843_v37  ;;  %v1058_v41 = vpop.permute.xlu1 %1057 }
 0x1d1   : > { %1146 = vst.msk [vmem:[#allocation3 + $0xa0] sm:$0xff] %vm1125_vm5, %v1058_v41  ;;  %2152 = vrot.lane.b32.xlu0 %v2055_v35, %s9703_s30 }
 0x1d2   : > { %v3019_v42 = vsel %vm3016_vm13, %v3017_v36, %v10490_v34  ;;  %2367 = vrot.lane.b32.xlu1 %v2271_v38, %s9705_s23  ;;  %v758_v36 = vld [vmem:[#allocation2 + $0xf8] sm:$0xff] }
 0x1d3   : > { %v10502_v45 = vmax.f32 %v2946_v40, %v3019_v42  ;;  %v1707_v46 = vpop.permute.xlu0 %1706 }
 0x1d4   : > { %1796 = vst.msk [vmem:[#allocation3 + $0x98] sm:$0xff] %vm1776_vm8, %v1707_v46  ;;  %v1922_v48 = vpop.permute.xlu1 %1921  ;;  %v2481_v49 = vld [vmem:[#allocation3 + $0x88] sm:$0xff] }
 0x1d5   : > { %2012 = vst.msk [vmem:[#allocation3 + $0x90] sm:$0xff] %vm1993_vm9, %v1922_v48  ;;  %8871 = vmatmul.mubr.msk.f32.gmra.mrb[16].mxu0 %vm2502_vm12, %v2481_v49  ;;  %856 = vrot.lane.b32.xlu0 %v756_v43, %s12920_s24  ;;  %v3187_v42 = vrot.slane %v10502_v45, 1 }
 0x1d6   : > { %1505 = vrot.lane.b32.xlu1 %v1406_v47, %s9700_s29  ;;  %v2274_v47 = vld [vmem:[#allocation2 + $0x105] sm:$0xff] }
 0x1d7   : > { %v1060_v50 = vpop.permute.xlu0 %1059 }
 0x1d8   : > { %1147 = vst.msk [vmem:[#allocation3 + $0xa8] sm:$0xff] %vm1125_vm5, %v1060_v50  ;;  %v1275_v52 = vpop.permute.xlu1 %1274 }
 0x1d9   : > { %1363 = vst.msk [vmem:[#allocation3 + $0xa0] sm:$0xff] %vm1342_vm6, %v1275_v52  ;;  %1720 = vrot.lane.b32.xlu0 %v10435_v7, %s12921_s26  ;;  %v759_v52 = vld [vmem:[#allocation2 + $0x100] sm:$0xff] }
 0x1da   : > { %2369 = vrot.lane.b32.xlu1 %v2272_v51, %s9705_s23 }
 0x1db   : > { %v1924_v54 = vpop.permute.xlu0 %1923 }
 0x1dc   : > { %2013 = vst.msk [vmem:[#allocation3 + $0x98] sm:$0xff] %vm1993_vm9, %v1924_v54  ;;  %v2139_v55 = vpop.permute.xlu1 %2138 }
 0x1dd   : > { %2229 = vst.msk [vmem:[#allocation3 + $0x90] sm:$0xff] %vm2210_vm10, %v2139_v55  ;;  %858 = vrot.lane.b32.xlu0 %v757_v53, %s12920_s24  ;;  %v10607_v55 = vld [vmem:[#allocation2 + $0x10b] sm:$0xff] }
 0x1de   : > { %1073 = vrot.lane.b32.xlu1 %v10443_v10, %s12922_s19  ;;  %v10550_v10 = vld [vmem:[#allocation2 + $0x101] sm:$0xff] }
 0x1df   : > { %v1277_v56 = vpop.permute.xlu0 %1276 }
 0x1e0   : > { %1364 = vst.msk [vmem:[#allocation3 + $0xa8] sm:$0xff] %vm1342_vm6, %v1277_v56  ;;  %v1492_v58 = vpop.permute.xlu1 %1491 }
 0x1e1   : > { %1580 = vst.msk [vmem:[#allocation3 + $0xa0] sm:$0xff] %vm1559_vm7, %v1492_v58  ;;  %1722 = vrot.lane.b32.xlu0 %v10455_v13, %s12921_s26  ;;  %v1407_v13 = vld [vmem:[#allocation2 + $0xfa] sm:$0xff]  ;;  %v10615_v58 = vld [vmem:[#allocation2 + $0x109] sm:$0xff] }
 0x1e2   : > { %1937 = vrot.lane.b32.xlu1 %v10519_v57, %s12923_s20 }
 0x1e3   : > { %v2141_v59 = vpop.permute.xlu0 %2140 }
 0x1e4   : > { %2230 = vst.msk [vmem:[#allocation3 + $0x98] sm:$0xff] %vm2210_vm10, %v2141_v59  ;;  %v2356_v61 = vpop.permute.xlu1 %2355 }
 0x1e5   : > { %2446 = vst.msk [vmem:[#allocation3 + $0x90] sm:$0xff] %vm2427_vm11, %v2356_v61  ;;  %1075 = vrot.lane.b32.xlu0 %v10475_v25, %s12922_s19  ;;  %v2273_v25 = vld [vmem:[#allocation2 + $0xfd] sm:$0xff]  ;;  %v10623_v61 = vld [vmem:[#allocation2 + $0x113] sm:$0xff] }
 0x1e6   : > { %1290 = vrot.lane.b32.xlu1 %v10527_v60, %s12917_s22 }
 0x1e7   : > { %v845_v1 = vpop.permute.xlu0 %844 }
 0x1e8   : > { %v8854_v2 = vpop.f32.mrb[4].mxu0  ;;  %931 = vst.msk [vmem:[#allocation3 + $0xb0] sm:$0xff] %vm908_vm4, %v845_v1  ;;  %v1494_v5 = vpop.permute.xlu1 %1493  ;;  %v2058_v1 = vld [vmem:[#allocation2 + $0x10c] sm:$0xff] }
 0x1e9   : > { %v2872_v6 = vmul.f32 %v8854_v2, %v10449_v12  ;;  %v2701_v7 = vpop.f32.mrb[5].mxu0  ;;  %1581 = vst.msk [vmem:[#allocation3 + $0xa8] sm:$0xff] %vm1559_vm7, %v1494_v5  ;;  %1939 = vrot.lane.b32.xlu0 %v10535_v62, %s12923_s20 }
 0x1ea   : > { %v2871_v8 = vmul.f32 %v10449_v12, %v2701_v7  ;;  %2154 = vrot.lane.b32.xlu1 %v2056_v3, %s9703_s30  ;;  %v10636_v7 = vld [vmem:[#allocation2 + $0x111] sm:$0xff] }
 0x1eb   : > { %v10547_v9 = vadd.f32 %v10465_v22, %v2872_v6  ;;  %v1709_v11 = vpop.permute.xlu0 %1708 }
 0x1ec   : > { %v10553_v44 = vadd.f32 %v10465_v22, %v2871_v8  ;;  %1797 = vst.msk [vmem:[#allocation3 + $0xa0] sm:$0xff] %vm1776_vm8, %v1709_v11  ;;  %v2358_v16 = vpop.permute.xlu1 %2357  ;;  %v2482_v17 = vld [vmem:[#allocation3 + $0x90] sm:$0xff] }
 0x1ed   : > { %v2951_v15 = vmax.f32 %v10547_v9, 0.0  ;;  %2447 = vst.msk [vmem:[#allocation3 + $0x98] sm:$0xff] %vm2427_vm11, %v2358_v16  ;;  %1292 = vrot.lane.b32.xlu0 %v10550_v10, %s12917_s22  ;;  %8873 = vmatprep.mubr.msk.f32.mxu0 %vm2502_vm12, %v2482_v17  ;;  %v1409_v11 = vld [vmem:[#allocation2 + $0x10a] sm:$0xff] }
 0x1ee   : > { %v2950_v18 = vmax.f32 %v10553_v44, 0.0  ;;  %1507 = vrot.lane.b32.xlu1 %v1407_v13, %s9700_s29 }
 0x1ef   : > { %v10565_v19 = vrot.slane %v2951_v15, 2  ;;  %v847_v23 = vpop.permute.xlu0 %846 }
 0x1f0   : > { %v3020_v21 = vrot.slane %v2950_v18, 2  ;;  %932 = vst.msk [vmem:[#allocation3 + $0xb8] sm:$0xff] %vm908_vm4, %v847_v23  ;;  %v1062_v29 = vpop.permute.xlu1 %1061 }
 0x1f1   : > { %1148 = vst.msk [vmem:[#allocation3 + $0xb0] sm:$0xff] %vm1125_vm5, %v1062_v29  ;;  %2156 = vrot.lane.b32.xlu0 %v2057_v20, %s9703_s30 }
 0x1f2   : > { %v3023_v31 = vsel %vm3016_vm13, %v3020_v21, %v10565_v19  ;;  %v3021_v32 = vsel %vm3016_vm13, %v10490_v34, %v3020_v21  ;;  %2371 = vrot.lane.b32.xlu1 %v2273_v25, %s9705_s23  ;;  %v2059_v21 = vld [vmem:[#allocation2 + $0x114] sm:$0xff] }
 0x1f3   : > { %v10580_v35 = vmax.f32 %v2948_v33, %v3023_v31  ;;  %v3119_v37 = vmax.f32 %v2947_v28, %v3021_v32  ;;  %v1711_v38 = vpop.permute.xlu0 %1710  ;;  %v689_v28 = vld [vmem:[#allocation2 + $0x10f] sm:$0xff] }
 0x1f4   : > { %1798 = vst.msk [vmem:[#allocation3 + $0xa8] sm:$0xff] %vm1776_vm8, %v1711_v38  ;;  %v1926_v40 = vpop.permute.xlu1 %1925  ;;  %v2483_v41 = vld [vmem:[#allocation3 + $0x98] sm:$0xff] }
 0x1f5   : > { %v3188_v43 = vrot.slane %v3119_v37, 1  ;;  %v3190_v34 = vrot.slane %v10580_v35, 1  ;;  %2014 = vst.msk [vmem:[#allocation3 + $0xa0] sm:$0xff] %vm1993_vm9, %v1926_v40  ;;  %8874 = vmatmul.mubr.msk.f32.gmra.mrb[18].mxu0 %vm2502_vm12, %v2483_v41  ;;  %860 = vrot.lane.b32.xlu0 %v758_v36, %s12920_s24  ;;  %v1410_v40 = vld [vmem:[#allocation2 + $0x112] sm:$0xff] }
 0x1f6   : > { %1509 = vrot.lane.b32.xlu1 %v1408_v39, %s9700_s29  ;;  %725 = vst.msk [vmem:[#allocation3 + $0x108] sm:$0xff] %vm579_vm0, %v689_v28  ;;  %v691_v28 = vld [vmem:[#allocation2 + $0x11f] sm:$0xff] }
 0x1f7   : > { %v3189_v26 = vsel %vm3186_vm14, %v3187_v42, %v3188_v43  ;;  %v3191_v33 = vsel %vm3186_vm14, %v3188_v43, %v3190_v34  ;;  %v1064_v46 = vpop.permute.xlu0 %1063  ;;  %727 = vst.msk [vmem:[#allocation3 + $0x118] sm:$0xff] %vm579_vm0, %v691_v28 }
 0x1f8   : > { %v3288_v48 = vmax.f32 %v10502_v45, %v3189_v26  ;;  %v3289_v49 = vmax.f32 %v3119_v37, %v3191_v33  ;;  %1149 = vst.msk [vmem:[#allocation3 + $0xb8] sm:$0xff] %vm1125_vm5, %v1064_v46  ;;  %v1279_v50 = vpop.permute.xlu1 %1278  ;;  %v760_v37 = vld [vmem:[#allocation2 + $0x108] sm:$0xff] }
 0x1f9   : > { %1365 = vst.msk [vmem:[#allocation3 + $0xb0] sm:$0xff] %vm1342_vm6, %v1279_v50  ;;  %1724 = vrot.lane.b32.xlu0 %v10519_v57, %s12921_s26  ;;  %v10695_v50 = vld [vmem:[#allocation2 + $0x11b] sm:$0xff] }
 0x1fa   : > { %v10599_v51 = vpack.c.bf16 %v3289_v49, %v3288_v48  ;;  %2373 = vrot.lane.b32.xlu1 %v2274_v47, %s9705_s23 }
 0x1fb   : > { %v1928_v53 = vpop.permute.xlu0 %1927 }
 0x1fc   : > { %2015 = vst.msk [vmem:[#allocation3 + $0xa8] sm:$0xff] %vm1993_vm9, %v1928_v53  ;;  %v2143_v54 = vpop.permute.xlu1 %2142 }
 0x1fd   : > { %2231 = vst.msk [vmem:[#allocation3 + $0xa0] sm:$0xff] %vm2210_vm10, %v2143_v54  ;;  %862 = vrot.lane.b32.xlu0 %v759_v52, %s12920_s24  ;;  %v10703_v54 = vld [vmem:[#allocation2 + $0x119] sm:$0xff] }
 0x1fe   : > { %1077 = vrot.lane.b32.xlu1 %v10527_v60, %s12922_s19  ;;  %v688_v60 = vld [vmem:[#allocation2 + $0x107] sm:$0xff] }
 0x1ff   : > { %v1281_v45 = vpop.permute.xlu0 %1280  ;;  %724 = vst.msk [vmem:[#allocation3 + $0x100] sm:$0xff] %vm579_vm0, %v688_v60 }
 0x200   : > { %1366 = vst.msk [vmem:[#allocation3 + $0xb8] sm:$0xff] %vm1342_vm6, %v1281_v45  ;;  %v1496_v56 = vpop.permute.xlu1 %1495 }
 0x201   : > { %1582 = vst.msk [vmem:[#allocation3 + $0xb0] sm:$0xff] %vm1559_vm7, %v1496_v56  ;;  %1726 = vrot.lane.b32.xlu0 %v10535_v62, %s12921_s26  ;;  %v10711_v56 = vld [vmem:[#allocation2 + $0x123] sm:$0xff] }
 0x202   : > { %1941 = vrot.lane.b32.xlu1 %v10607_v55, %s12923_s20 }
 0x203   : > { %v2145_v57 = vpop.permute.xlu0 %2144 }
 0x204   : > { %2232 = vst.msk [vmem:[#allocation3 + $0xa8] sm:$0xff] %vm2210_vm10, %v2145_v57  ;;  %v2360_v59 = vpop.permute.xlu1 %2359 }
 0x205   : > { %2448 = vst.msk [vmem:[#allocation3 + $0xa0] sm:$0xff] %vm2427_vm11, %v2360_v59  ;;  %1079 = vrot.lane.b32.xlu0 %v10550_v10, %s12922_s19  ;;  %v2060_v59 = vld [vmem:[#allocation2 + $0x11c] sm:$0xff] }
 0x206   : > { %1294 = vrot.lane.b32.xlu1 %v10615_v58, %s12917_s22 }
 0x207   : > { %v849_v62 = vpop.permute.xlu0 %848 }
 0x208   : > { %v8857_v63 = vpop.f32.mrb[6].mxu0  ;;  %933 = vst.msk [vmem:[#allocation3 + $0xc0] sm:$0xff] %vm908_vm4, %v849_v62  ;;  %v1498_v2 = vpop.permute.xlu1 %1497 }
 0x209   : > { %v2874_v3 = vmul.f32 %v8857_v63, %v10449_v12  ;;  %v2711_v4 = vpop.f32.mrb[7].mxu0  ;;  %1583 = vst.msk [vmem:[#allocation3 + $0xb8] sm:$0xff] %vm1559_vm7, %v1498_v2  ;;  %1943 = vrot.lane.b32.xlu0 %v10623_v61, %s12923_s20  ;;  %v10724_v2 = vld [vmem:[#allocation2 + $0x121] sm:$0xff] }
 0x20a   : > { %v2873_v5 = vmul.f32 %v10449_v12, %v2711_v4  ;;  %2158 = vrot.lane.b32.xlu1 %v2058_v1, %s9703_s30 }
 0x20b   : > { %v10633_v6 = vadd.f32 %v10465_v22, %v2874_v3  ;;  %v1713_v10 = vpop.permute.xlu0 %1712 }
 0x20c   : > { %v10639_v8 = vadd.f32 %v10465_v22, %v2873_v5  ;;  %1799 = vst.msk [vmem:[#allocation3 + $0xb0] sm:$0xff] %vm1776_vm8, %v1713_v10  ;;  %v2362_v14 = vpop.permute.xlu1 %2361  ;;  %v2484_v16 = vld [vmem:[#allocation3 + $0xa0] sm:$0xff] }
 0x20d   : > { %v2953_v13 = vmax.f32 %v10633_v6, 0.0  ;;  %2449 = vst.msk [vmem:[#allocation3 + $0xa8] sm:$0xff] %vm2427_vm11, %v2362_v14  ;;  %1296 = vrot.lane.b32.xlu0 %v10636_v7, %s12917_s22  ;;  %8876 = vmatprep.mubr.msk.f32.mxu0 %vm2502_vm12, %v2484_v16  ;;  %v1411_v5 = vld [vmem:[#allocation2 + $0x11a] sm:$0xff] }
 0x20e   : > { %v2952_v17 = vmax.f32 %v10639_v8, 0.0  ;;  %1511 = vrot.lane.b32.xlu1 %v1409_v11, %s9700_s29 }
 0x20f   : > { %v10650_v20 = vrot.slane %v2953_v13, 2  ;;  %v851_v25 = vpop.permute.xlu0 %850 }
 0x210   : > { %v3024_v23 = vrot.slane %v2952_v17, 2  ;;  %934 = vst.msk [vmem:[#allocation3 + $0xc8] sm:$0xff] %vm908_vm4, %v851_v25  ;;  %v1066_v29 = vpop.permute.xlu1 %1065 }
 0x211   : > { %1150 = vst.msk [vmem:[#allocation3 + $0xc0] sm:$0xff] %vm1125_vm5, %v1066_v29  ;;  %2160 = vrot.lane.b32.xlu0 %v2059_v21, %s9703_s30  ;;  %v2061_v21 = vld [vmem:[#allocation2 + $0x124] sm:$0xff] }
 0x212   : > { %v3027_v31 = vsel %vm3016_vm13, %v3024_v23, %v10650_v20  ;;  %v3025_v32 = vsel %vm3016_vm13, %v10565_v19, %v3024_v23  ;;  %2375 = vrot.lane.b32.xlu1 %v2275_v27, %s9705_s23  ;;  %v2277_v27 = vld [vmem:[#allocation2 + $0x11d] sm:$0xff] }
 0x213   : > { %v10665_v36 = vmax.f32 %v2950_v18, %v3027_v31  ;;  %v3121_v38 = vmax.f32 %v2949_v30, %v3025_v32  ;;  %v1715_v39 = vpop.permute.xlu0 %1714  ;;  %v2276_v18 = vld [vmem:[#allocation2 + $0x115] sm:$0xff] }
 0x214   : > { %1800 = vst.msk [vmem:[#allocation3 + $0xb8] sm:$0xff] %vm1776_vm8, %v1715_v39  ;;  %v1930_v41 = vpop.permute.xlu1 %1929  ;;  %v2485_v42 = vld [vmem:[#allocation3 + $0xa8] sm:$0xff] }
 0x215   : > { %v3192_v43 = vrot.slane %v3121_v38, 1  ;;  %v3194_v26 = vrot.slane %v10665_v36, 1  ;;  %2016 = vst.msk [vmem:[#allocation3 + $0xb0] sm:$0xff] %vm1993_vm9, %v1930_v41  ;;  %8877 = vmatmul.mubr.msk.f32.gmra.mrb[20].mxu0 %vm2502_vm12, %v2485_v42  ;;  %864 = vrot.lane.b32.xlu0 %v760_v37, %s12920_s24  ;;  %v1412_v41 = vld [vmem:[#allocation2 + $0x122] sm:$0xff] }
 0x216   : > { %1513 = vrot.lane.b32.xlu1 %v1410_v40, %s9700_s29 }
 0x217   : > { %v3193_v24 = vsel %vm3186_vm14, %v3190_v34, %v3192_v43  ;;  %v3195_v30 = vsel %vm3186_vm14, %v3192_v43, %v3194_v26  ;;  %v1068_v44 = vpop.permute.xlu0 %1067  ;;  %v761_v34 = vld [vmem:[#allocation2 + $0x110] sm:$0xff] }
 0x218   : > { %v3290_v19 = vmax.f32 %v10580_v35, %v3193_v24  ;;  %v3291_v33 = vmax.f32 %v3121_v38, %v3195_v30  ;;  %1151 = vst.msk [vmem:[#allocation3 + $0xc8] sm:$0xff] %vm1125_vm5, %v1068_v44  ;;  %v1283_v46 = vpop.permute.xlu1 %1282  ;;  %v762_v38 = vld [vmem:[#allocation2 + $0x118] sm:$0xff] }
 0x219   : > { %1367 = vst.msk [vmem:[#allocation3 + $0xc0] sm:$0xff] %vm1342_vm6, %v1283_v46  ;;  %1728 = vrot.lane.b32.xlu0 %v10607_v55, %s12921_s26  ;;  %v690_v55 = vld [vmem:[#allocation2 + $0x117] sm:$0xff] }
 0x21a   : > { %v10687_v47 = vpack.c.bf16 %v3291_v33, %v3290_v19  ;;  %2377 = vrot.lane.b32.xlu1 %v2276_v18, %s9705_s23  ;;  %726 = vst.msk [vmem:[#allocation3 + $0x110] sm:$0xff] %vm579_vm0, %v690_v55  ;;  %vm9033_vm0 = vmpackc.low %vm3371_vm15, %vm9704_vm2  ;;  %vm3585_vm2 = vcmask 261120  }
 0x21b   : > { %v1932_v48 = vpop.permute.xlu0 %1931  ;;  %3589 = vst.msk [vmem:[#allocation4 + $0x18] sm:$0xff] %vm3585_vm2, %v9696_v0  ;;  %3590 = vst.msk [vmem:[#allocation4 + $0x20] sm:$0xff] %vm3585_vm2, %v9696_v0 }
 0x21c   : > { %2017 = vst.msk [vmem:[#allocation3 + $0xb8] sm:$0xff] %vm1993_vm9, %v1932_v48  ;;  %v2147_v49 = vpop.permute.xlu1 %2146 }
 0x21d   : > { %2233 = vst.msk [vmem:[#allocation3 + $0xb0] sm:$0xff] %vm2210_vm10, %v2147_v49  ;;  %866 = vrot.lane.b32.xlu0 %v761_v34, %s12920_s24  ;;  %v1845_v34 = vld [vmem:[#allocation2 + $0x12b] sm:$0xff] }
 0x21e   : > { %1081 = vrot.lane.b32.xlu1 %v10615_v58, %s12922_s19  ;;  %3586 = vst.msk [vmem:[#allocation4] sm:$0xff] %vm3585_vm2, %v9696_v0  ;;  %3587 = vst.msk [vmem:[#allocation4 + $0x8] sm:$0xff] %vm3585_vm2, %v9696_v0 }
 0x21f   : > { %v1285_v35 = vpop.permute.xlu0 %1284  ;;  %3588 = vst.msk [vmem:[#allocation4 + $0x10] sm:$0xff] %vm3585_vm2, %v9696_v0  ;;  %3591 = vst.msk [vmem:[#allocation4 + $0x28] sm:$0xff] %vm3585_vm2, %v9696_v0 }
 0x220   : > { %1368 = vst.msk [vmem:[#allocation3 + $0xc8] sm:$0xff] %vm1342_vm6, %v1285_v35  ;;  %v1500_v52 = vpop.permute.xlu1 %1499  ;;  %v1196_v35 = vld [vmem:[#allocation2 + $0x129] sm:$0xff] }
 0x221   : > { %1584 = vst.msk [vmem:[#allocation3 + $0xc0] sm:$0xff] %vm1559_vm7, %v1500_v52  ;;  %1730 = vrot.lane.b32.xlu0 %v10623_v61, %s12921_s26  ;;  %v1846_v52 = vld [vmem:[#allocation2 + $0x133] sm:$0xff] }
 0x222   : > { %1945 = vrot.lane.b32.xlu1 %v10695_v50, %s12923_s20  ;;  %3592 = vst.msk [vmem:[#allocation4 + $0x30] sm:$0xff] %vm3585_vm2, %v9696_v0  ;;  %3593 = vst.msk [vmem:[#allocation4 + $0x38] sm:$0xff] %vm3585_vm2, %v9696_v0 }
 0x223   : > { %v2149_v53 = vpop.permute.xlu0 %2148  ;;  %3594 = vst.msk [vmem:[#allocation4 + $0x40] sm:$0xff] %vm3585_vm2, %v9696_v0  ;;  %3595 = vst.msk [vmem:[#allocation4 + $0x48] sm:$0xff] %vm3585_vm2, %v9696_v0 }
 0x224   : > { %2234 = vst.msk [vmem:[#allocation3 + $0xb8] sm:$0xff] %vm2210_vm10, %v2149_v53  ;;  %v2364_v45 = vpop.permute.xlu1 %2363 }
 0x225   : > { %2450 = vst.msk [vmem:[#allocation3 + $0xb0] sm:$0xff] %vm2427_vm11, %v2364_v45  ;;  %1083 = vrot.lane.b32.xlu0 %v10636_v7, %s12922_s19  ;;  %v2062_v45 = vld [vmem:[#allocation2 + $0x12c] sm:$0xff] }
 0x226   : > { %1298 = vrot.lane.b32.xlu1 %v10703_v54, %s12917_s22  ;;  %3596 = vst.msk [vmem:[#allocation4 + $0x50] sm:$0xff] %vm3585_vm2, %v9696_v0  ;;  %3597 = vst.msk [vmem:[#allocation4 + $0x58] sm:$0xff] %vm3585_vm2, %v9696_v0 }
 0x227   : > { %v853_v57 = vpop.permute.xlu0 %852  ;;  %3598 = vst.msk [vmem:[#allocation4 + $0x60] sm:$0xff] %vm3585_vm2, %v9696_v0  ;;  %3599 = vst.msk [vmem:[#allocation4 + $0x68] sm:$0xff] %vm3585_vm2, %v9696_v0 }
 0x228   : > { %v8860_v58 = vpop.f32.mrb[8].mxu0  ;;  %935 = vst.msk [vmem:[#allocation3 + $0xd0] sm:$0xff] %vm908_vm4, %v853_v57  ;;  %v1502_v60 = vpop.permute.xlu1 %1501 }
 0x229   : > { %v2876_v61 = vmul.f32 %v8860_v58, %v10449_v12  ;;  %v2721_v62 = vpop.f32.mrb[9].mxu0  ;;  %1585 = vst.msk [vmem:[#allocation3 + $0xc8] sm:$0xff] %vm1559_vm7, %v1502_v60  ;;  %1947 = vrot.lane.b32.xlu0 %v10711_v56, %s12923_s20  ;;  %v1197_v60 = vld [vmem:[#allocation2 + $0x131] sm:$0xff] }
 0x22a   : > { %v2875_v63 = vmul.f32 %v10449_v12, %v2721_v62  ;;  %2162 = vrot.lane.b32.xlu1 %v2060_v59, %s9703_s30 }
 0x22b   : > { %v10721_v1 = vadd.f32 %v10465_v22, %v2876_v61  ;;  %v1717_v4 = vpop.permute.xlu0 %1716 }
 0x22c   : > { %v10727_v3 = vadd.f32 %v10465_v22, %v2875_v63  ;;  %1801 = vst.msk [vmem:[#allocation3 + $0xc0] sm:$0xff] %vm1776_vm8, %v1717_v4  ;;  %v2366_v10 = vpop.permute.xlu1 %2365  ;;  %v2486_v11 = vld [vmem:[#allocation3 + $0xb0] sm:$0xff] }
 0x22d   : > { %v2955_v7 = vmax.f32 %v10721_v1, 0.0  ;;  %2451 = vst.msk [vmem:[#allocation3 + $0xb8] sm:$0xff] %vm2427_vm11, %v2366_v10  ;;  %1300 = vrot.lane.b32.xlu0 %v10724_v2, %s12917_s22  ;;  %8879 = vmatprep.mubr.msk.f32.mxu0 %vm2502_vm12, %v2486_v11  ;;  %v1413_v63 = vld [vmem:[#allocation2 + $0x12a] sm:$0xff] }
 0x22e   : > { %v2954_v14 = vmax.f32 %v10727_v3, 0.0  ;;  %1515 = vrot.lane.b32.xlu1 %v1411_v5, %s9700_s29  ;;  %v2280_v3 = vld [vmem:[#allocation2 + $0x135] sm:$0xff] }
 0x22f   : > { %v10738_v16 = vrot.slane %v2955_v7, 2  ;;  %v855_v25 = vpop.permute.xlu0 %854 }
 0x230   : > { %v3028_v23 = vrot.slane %v2954_v14, 2  ;;  %936 = vst.msk [vmem:[#allocation3 + $0xd8] sm:$0xff] %vm908_vm4, %v855_v25  ;;  %v1070_v29 = vpop.permute.xlu1 %1069 }
 0x231   : > { %1152 = vst.msk [vmem:[#allocation3 + $0xd0] sm:$0xff] %vm1125_vm5, %v1070_v29  ;;  %2164 = vrot.lane.b32.xlu0 %v2061_v21, %s9703_s30  ;;  %v2063_v21 = vld [vmem:[#allocation2 + $0x134] sm:$0xff] }
 0x232   : > { %v3031_v31 = vsel %vm3016_vm13, %v3028_v23, %v10738_v16  ;;  %v3029_v32 = vsel %vm3016_vm13, %v10650_v20, %v3028_v23  ;;  %2379 = vrot.lane.b32.xlu1 %v2277_v27, %s9705_s23  ;;  %v2279_v27 = vld [vmem:[#allocation2 + $0x12d] sm:$0xff] }
 0x233   : > { %v10753_v37 = vmax.f32 %v2952_v17, %v3031_v31  ;;  %v3123_v39 = vmax.f32 %v2951_v15, %v3029_v32  ;;  %v1719_v40 = vpop.permute.xlu0 %1718  ;;  %v2278_v17 = vld [vmem:[#allocation2 + $0x125] sm:$0xff] }
 0x234   : > { %1802 = vst.msk [vmem:[#allocation3 + $0xc8] sm:$0xff] %vm1776_vm8, %v1719_v40  ;;  %v1934_v42 = vpop.permute.xlu1 %1933  ;;  %v2487_v43 = vld [vmem:[#allocation3 + $0xb8] sm:$0xff] }
 0x235   : > { %v3196_v24 = vrot.slane %v3123_v39, 1  ;;  %v3198_v30 = vrot.slane %v10753_v37, 1  ;;  %2018 = vst.msk [vmem:[#allocation3 + $0xc0] sm:$0xff] %vm1993_vm9, %v1934_v42  ;;  %8880 = vmatmul.mubr.msk.f32.gmra.mrb[22].mxu0 %vm2502_vm12, %v2487_v43  ;;  %868 = vrot.lane.b32.xlu0 %v762_v38, %s12920_s24  ;;  %v1414_v38 = vld [vmem:[#allocation2 + $0x132] sm:$0xff] }
 0x236   : > { %1517 = vrot.lane.b32.xlu1 %v1412_v41, %s9700_s29 }
 0x237   : > { %v3197_v9 = vsel %vm3186_vm14, %v3194_v26, %v3196_v24  ;;  %v3199_v15 = vsel %vm3186_vm14, %v3196_v24, %v3198_v30  ;;  %v1072_v8 = vpop.permute.xlu0 %1071  ;;  %v763_v26 = vld [vmem:[#allocation2 + $0x120] sm:$0xff] }
 0x238   : > { %v3292_v20 = vmax.f32 %v10665_v36, %v3197_v9  ;;  %v3293_v44 = vmax.f32 %v3123_v39, %v3199_v15  ;;  %1153 = vst.msk [vmem:[#allocation3 + $0xd8] sm:$0xff] %vm1125_vm5, %v1072_v8  ;;  %v1287_v18 = vpop.permute.xlu1 %1286 }
 0x239   : > { %1369 = vst.msk [vmem:[#allocation3 + $0xd0] sm:$0xff] %vm1342_vm6, %v1287_v18  ;;  %1732 = vrot.lane.b32.xlu0 %v10695_v50, %s12921_s26 }
 0x23a   : > { %v10775_v19 = vpack.c.bf16 %v3293_v44, %v3292_v20  ;;  %2381 = vrot.lane.b32.xlu1 %v2278_v17, %s9705_s23  ;;  %v1848_v20 = vld [vmem:[#allocation2 + $0x143] sm:$0xff] }
 0x23b   : > { %v1936_v33 = vpop.permute.xlu0 %1935 }
 0x23c   : > { %2019 = vst.msk [vmem:[#allocation3 + $0xc8] sm:$0xff] %vm1993_vm9, %v1936_v33  ;;  %v2151_v46 = vpop.permute.xlu1 %2150 }
 0x23d   : > { %2235 = vst.msk [vmem:[#allocation3 + $0xc0] sm:$0xff] %vm2210_vm10, %v2151_v46  ;;  %870 = vrot.lane.b32.xlu0 %v763_v26, %s12920_s24  ;;  %v2065_v26 = vld [vmem:[#allocation2 + $0x144] sm:$0xff]  ;;  %s12927_s24 = smov 96  }
 0x23e   : > { %1085 = vrot.lane.b32.xlu1 %v10703_v54, %s12922_s19  ;;  %v2281_v46 = vld [vmem:[#allocation2 + $0x13d] sm:$0xff] }
 0x23f   : > { %v1289_v36 = vpop.permute.xlu0 %1288 }
 0x240   : > { %1370 = vst.msk [vmem:[#allocation3 + $0xd8] sm:$0xff] %vm1342_vm6, %v1289_v36  ;;  %v1504_v48 = vpop.permute.xlu1 %1503 }
 0x241   : > { %1586 = vst.msk [vmem:[#allocation3 + $0xd0] sm:$0xff] %vm1559_vm7, %v1504_v48  ;;  %1734 = vrot.lane.b32.xlu0 %v10711_v56, %s12921_s26 }
 0x242   : > { %1949 = vrot.lane.b32.xlu1 %v1845_v34, %s12923_s20 }
 0x243   : > { %v2153_v49 = vpop.permute.xlu0 %2152 }
 0x244   : > { %2236 = vst.msk [vmem:[#allocation3 + $0xc8] sm:$0xff] %vm2210_vm10, %v2153_v49  ;;  %v2368_v50 = vpop.permute.xlu1 %2367 }
 0x245   : > { %2452 = vst.msk [vmem:[#allocation3 + $0xc0] sm:$0xff] %vm2427_vm11, %v2368_v50  ;;  %1087 = vrot.lane.b32.xlu0 %v10724_v2, %s12922_s19 }
 0x246   : > { %1302 = vrot.lane.b32.xlu1 %v1196_v35, %s12917_s22 }
 0x247   : > { %v857_v53 = vpop.permute.xlu0 %856 }
 0x248   : > { %v8863_v54 = vpop.f32.mrb[10].mxu0  ;;  %937 = vst.msk [vmem:[#allocation3 + $0xe0] sm:$0xff] %vm908_vm4, %v857_v53  ;;  %v1506_v55 = vpop.permute.xlu1 %1505 }
 0x249   : > { %v2878_v56 = vmul.f32 %v8863_v54, %v10449_v12  ;;  %v2731_v57 = vpop.f32.mrb[11].mxu0  ;;  %1587 = vst.msk [vmem:[#allocation3 + $0xd8] sm:$0xff] %vm1559_vm7, %v1506_v55  ;;  %1951 = vrot.lane.b32.xlu0 %v1846_v52, %s12923_s20 }
 0x24a   : > { %v2877_v58 = vmul.f32 %v10449_v12, %v2731_v57  ;;  %2166 = vrot.lane.b32.xlu1 %v2062_v45, %s9703_s30 }
 0x24b   : > { %v10799_v59 = vadd.f32 %v10465_v22, %v2878_v56  ;;  %v1721_v62 = vpop.permute.xlu0 %1720 }
 0x24c   : > { %v10803_v61 = vadd.f32 %v10465_v22, %v2877_v58  ;;  %1803 = vst.msk [vmem:[#allocation3 + $0xd0] sm:$0xff] %vm1776_vm8, %v1721_v62  ;;  %v2370_v4 = vpop.permute.xlu1 %2369  ;;  %v2488_v5 = vld [vmem:[#allocation3 + $0xc0] sm:$0xff] }
 0x24d   : > { %v2957_v2 = vmax.f32 %v10799_v59, 0.0  ;;  %2453 = vst.msk [vmem:[#allocation3 + $0xc8] sm:$0xff] %vm2427_vm11, %v2370_v4  ;;  %1304 = vrot.lane.b32.xlu0 %v1197_v60, %s12917_s22  ;;  %8882 = vmatprep.mubr.msk.f32.mxu0 %vm2502_vm12, %v2488_v5 }
 0x24e   : > { %v2956_v10 = vmax.f32 %v10803_v61, 0.0  ;;  %1519 = vrot.lane.b32.xlu1 %v1413_v63, %s9700_s29 }
 0x24f   : > { %v10813_v11 = vrot.slane %v2957_v2, 2  ;;  %v859_v25 = vpop.permute.xlu0 %858 }
 0x250   : > { %v3032_v23 = vrot.slane %v2956_v10, 2  ;;  %938 = vst.msk [vmem:[#allocation3 + $0xe8] sm:$0xff] %vm908_vm4, %v859_v25  ;;  %v1074_v28 = vpop.permute.xlu1 %1073 }
 0x251   : > { %1154 = vst.msk [vmem:[#allocation3 + $0xe0] sm:$0xff] %vm1125_vm5, %v1074_v28  ;;  %2168 = vrot.lane.b32.xlu0 %v2063_v21, %s9703_s30 }
 0x252   : > { %v3035_v29 = vsel %vm3016_vm13, %v3032_v23, %v10813_v11  ;;  %v3033_v31 = vsel %vm3016_vm13, %v10738_v16, %v3032_v23  ;;  %2383 = vrot.lane.b32.xlu1 %v2279_v27, %s9705_s23 }
 0x253   : > { %v10827_v32 = vmax.f32 %v2954_v14, %v3035_v29  ;;  %v3125_v39 = vmax.f32 %v2953_v13, %v3033_v31  ;;  %v1723_v40 = vpop.permute.xlu0 %1722 }
 0x254   : > { %1804 = vst.msk [vmem:[#allocation3 + $0xd8] sm:$0xff] %vm1776_vm8, %v1723_v40  ;;  %v1938_v41 = vpop.permute.xlu1 %1937  ;;  %v2489_v42 = vld [vmem:[#allocation3 + $0xc8] sm:$0xff] }
 0x255   : > { %v3200_v43 = vrot.slane %v3125_v39, 1  ;;  %v3202_v24 = vrot.slane %v10827_v32, 1  ;;  %2020 = vst.msk [vmem:[#allocation3 + $0xd0] sm:$0xff] %vm1993_vm9, %v1938_v41  ;;  %8883 = vmatmul.mubr.msk.f32.gmra.mrb[24].mxu0 %vm2502_vm12, %v2489_v42  ;;  %1521 = vrot.lane.b32.xlu0 %v1414_v38, %s9700_s29  ;;  %s12903_s29 = smov 32  }
 0x256   : > { %1736 = vrot.lane.b32.xlu1 %v1845_v34, %s12921_s26  ;;  %v2282_v34 = vld [vmem:[#allocation2 + $0x145] sm:$0xff] }
 0x257   : > { %v3201_v6 = vsel %vm3186_vm14, %v3198_v30, %v3200_v43  ;;  %v3203_v13 = vsel %vm3186_vm14, %v3200_v43, %v3202_v24  ;;  %v1076_v14 = vpop.permute.xlu0 %1075  ;;  %v1847_v30 = vld [vmem:[#allocation2 + $0x13b] sm:$0xff] }
 0x258   : > { %v3294_v16 = vmax.f32 %v10753_v37, %v3201_v6  ;;  %v3295_v9 = vmax.f32 %v3125_v39, %v3203_v13  ;;  %1155 = vst.msk [vmem:[#allocation3 + $0xe8] sm:$0xff] %vm1125_vm5, %v1076_v14  ;;  %v1291_v15 = vpop.permute.xlu1 %1290  ;;  %v2064_v37 = vld [vmem:[#allocation2 + $0x13c] sm:$0xff] }
 0x259   : > { %1371 = vst.msk [vmem:[#allocation3 + $0xe0] sm:$0xff] %vm1342_vm6, %v1291_v15  ;;  %2385 = vrot.lane.b32.xlu0 %v2280_v3, %s9705_s23 }
 0x25a   : > { %v10848_v8 = vpack.c.bf16 %v3295_v9, %v3294_v16  ;;  %1738 = vrot.lane.b32.xlu1 %v1846_v52, %s12921_s26 }
 0x25b   : > { %v1940_v17 = vpop.permute.xlu0 %1939 }
 0x25c   : > { %2021 = vst.msk [vmem:[#allocation3 + $0xd8] sm:$0xff] %vm1993_vm9, %v1940_v17  ;;  %v2155_v44 = vpop.permute.xlu1 %2154  ;;  %v10923_v17 = vld [vmem:[%s12924_s2] ss:$0 sm:$0xff] }
 0x25d   : > { %2237 = vst.msk [vmem:[#allocation3 + $0xd0] sm:$0xff] %vm2210_vm10, %v2155_v44  ;;  %1953 = vrot.lane.b32.xlu0 %v1847_v30, %s12923_s20 }
 0x25e   : > { %1955 = vrot.lane.b32.xlu1 %v1848_v20, %s12923_s20  ;;  %s8527_s20 = sshll.u32 %s9825_s28, 4 }
 0x25f   : > { %v1293_v18 = vpop.permute.xlu0 %1292  ;;  %s12823_s2 = scalar_lea.hbm %s12882_s17, %s8527_s20 }
 0x260   : > { %1372 = vst.msk [vmem:[#allocation3 + $0xe8] sm:$0xff] %vm1342_vm6, %v1293_v18  ;;  %v1508_v33 = vpop.permute.xlu1 %1507 }
 0x261   : > { %1588 = vst.msk [vmem:[#allocation3 + $0xe0] sm:$0xff] %vm1559_vm7, %v1508_v33  ;;  %2170 = vrot.lane.b32.xlu0 %v2064_v37, %s9703_s30 }
 0x262   : > { %2172 = vrot.lane.b32.xlu1 %v2065_v26, %s9703_s30  ;;  %s12901_s30 = smov 64  }
 0x263   : > { %v2157_v36 = vpop.permute.xlu0 %2156 }
 0x264   : > { %2238 = vst.msk [vmem:[#allocation3 + $0xd8] sm:$0xff] %vm2210_vm10, %v2157_v36  ;;  %v2372_v48 = vpop.permute.xlu1 %2371 }
 0x265   : > { %2454 = vst.msk [vmem:[#allocation3 + $0xd0] sm:$0xff] %vm2427_vm11, %v2372_v48  ;;  %2387 = vrot.lane.b32.xlu0 %v2281_v46, %s9705_s23 }
 0x266   : > { %2389 = vrot.lane.b32.xlu1 %v2282_v34, %s9705_s23  ;;  %s12925_s23 = smov 32  }
 0x267   : > { %v861_v49 = vpop.permute.xlu0 %860 }
 0x268   : > { %v8866_v35 = vpop.f32.mrb[12].mxu0  ;;  %939 = vst.msk [vmem:[#allocation3 + $0xf0] sm:$0xff] %vm908_vm4, %v861_v49  ;;  %v1510_v50 = vpop.permute.xlu1 %1509 }
 0x269   : > { %v2880_v52 = vmul.f32 %v8866_v35, %v10449_v12  ;;  %v2741_v53 = vpop.f32.mrb[13].mxu0  ;;  %1589 = vst.msk [vmem:[#allocation3 + $0xe8] sm:$0xff] %vm1559_vm7, %v1510_v50 }
 0x26a   : > { %v2879_v54 = vmul.f32 %v10449_v12, %v2741_v53 }
 0x26b   : > { %v10868_v45 = vadd.f32 %v10465_v22, %v2880_v52  ;;  %v1725_v56 = vpop.permute.xlu0 %1724 }
 0x26c   : > { %v10871_v55 = vadd.f32 %v10465_v22, %v2879_v54  ;;  %1805 = vst.msk [vmem:[#allocation3 + $0xe0] sm:$0xff] %vm1776_vm8, %v1725_v56  ;;  %v2374_v58 = vpop.permute.xlu1 %2373  ;;  %v2490_v60 = vld [vmem:[#allocation3 + $0xd0] sm:$0xff] }
 0x26d   : > { %v2959_v57 = vmax.f32 %v10868_v45, 0.0  ;;  %2455 = vst.msk [vmem:[#allocation3 + $0xd8] sm:$0xff] %vm2427_vm11, %v2374_v58  ;;  %8885 = vmatprep.mubr.msk.f32.mxu0 %vm2502_vm12, %v2490_v60 }
 0x26e   : > { %v2958_v62 = vmax.f32 %v10871_v55, 0.0 }
 0x26f   : > { %v10880_v63 = vrot.slane %v2959_v57, 2  ;;  %v863_v5 = vpop.permute.xlu0 %862 }
 0x270   : > { %v3036_v4 = vrot.slane %v2958_v62, 2  ;;  %940 = vst.msk [vmem:[#allocation3 + $0xf8] sm:$0xff] %vm908_vm4, %v863_v5  ;;  %v1078_v21 = vpop.permute.xlu1 %1077 }
 0x271   : > { %1156 = vst.msk [vmem:[#allocation3 + $0xf0] sm:$0xff] %vm1125_vm5, %v1078_v21 }
 0x272   : > { %v3039_v23 = vsel %vm3016_vm13, %v3036_v4, %v10880_v63  ;;  %v3037_v25 = vsel %vm3016_vm13, %v10813_v11, %v3036_v4 }
 0x273   : > { %v10892_v27 = vmax.f32 %v2956_v10, %v3039_v23  ;;  %v3127_v28 = vmax.f32 %v2955_v7, %v3037_v25  ;;  %v1727_v29 = vpop.permute.xlu0 %1726 }
 0x274   : > { %1806 = vst.msk [vmem:[#allocation3 + $0xe8] sm:$0xff] %vm1776_vm8, %v1727_v29  ;;  %v1942_v31 = vpop.permute.xlu1 %1941  ;;  %v2491_v38 = vld [vmem:[#allocation3 + $0xd8] sm:$0xff] }
 0x275   : > { %v3204_v39 = vrot.slane %v3127_v28, 1  ;;  %v3206_v40 = vrot.slane %v10892_v27, 1  ;;  %2022 = vst.msk [vmem:[#allocation3 + $0xe0] sm:$0xff] %vm1993_vm9, %v1942_v31  ;;  %8886 = vmatmul.mubr.msk.f32.gmra.mrb[26].mxu0 %vm2502_vm12, %v2491_v38 }
 0x277   : > { %v3205_v61 = vsel %vm3186_vm14, %v3202_v24, %v3204_v39  ;;  %v3207_v1 = vsel %vm3186_vm14, %v3204_v39, %v3206_v40  ;;  %v1080_v7 = vpop.permute.xlu0 %1079 }
 0x278   : > { %v3296_v10 = vmax.f32 %v10827_v32, %v3205_v61  ;;  %v3297_v11 = vmax.f32 %v3127_v28, %v3207_v1  ;;  %1157 = vst.msk [vmem:[#allocation3 + $0xf8] sm:$0xff] %vm1125_vm5, %v1080_v7  ;;  %v1295_v41 = vpop.permute.xlu1 %1294  ;;  %v10981_v7 = vld [vmem:[%s12868_s3] ss:$0 sm:$0xff] }
 0x279   : > { %1373 = vst.msk [vmem:[#allocation3 + $0xf0] sm:$0xff] %vm1342_vm6, %v1295_v41 }
 0x27a   : > { %v10909_v42 = vpack.c.bf16 %v3297_v11, %v3296_v10 }
 0x27b   : > { %v1944_v43 = vpop.permute.xlu0 %1943 }
 0x27c   : > { %2023 = vst.msk [vmem:[#allocation3 + $0xe8] sm:$0xff] %vm1993_vm9, %v1944_v43  ;;  %v2159_v3 = vpop.permute.xlu1 %2158 }
 0x27d   : > { %2239 = vst.msk [vmem:[#allocation3 + $0xe0] sm:$0xff] %vm2210_vm10, %v2159_v3 }
 0x27f   : > { %v1297_v24 = vpop.permute.xlu0 %1296 }
 0x280   : > { %1374 = vst.msk [vmem:[#allocation3 + $0xf8] sm:$0xff] %vm1342_vm6, %v1297_v24  ;;  %v1512_v6 = vpop.permute.xlu1 %1511 }
 0x281   : > { %1590 = vst.msk [vmem:[#allocation3 + $0xf0] sm:$0xff] %vm1559_vm7, %v1512_v6 }
 0x283   : > { %v2161_v32 = vpop.permute.xlu0 %2160 }
 0x284   : > { %2240 = vst.msk [vmem:[#allocation3 + $0xe8] sm:$0xff] %vm2210_vm10, %v2161_v32  ;;  %v2376_v13 = vpop.permute.xlu1 %2375 }
 0x285   : > { %2456 = vst.msk [vmem:[#allocation3 + $0xe0] sm:$0xff] %vm2427_vm11, %v2376_v13 }
 0x287   : > { %v865_v14 = vpop.permute.xlu0 %864 }
 0x288   : > { %941 = vst.msk [vmem:[#allocation3 + $0x100] sm:$0xff] %vm908_vm4, %v865_v14  ;;  %v1514_v16 = vpop.permute.xlu1 %1513  ;;  %v8869_v9 = vpop.f32.mrb[14].mxu0 }
 0x289   : > { %1591 = vst.msk [vmem:[#allocation3 + $0xf8] sm:$0xff] %vm1559_vm7, %v1514_v16  ;;  %v2882_v15 = vmul.f32 %v8869_v9, %v10449_v12  ;;  %v2751_v30 = vpop.f32.mrb[15].mxu0 }
 0x28a   : > { %v2881_v20 = vmul.f32 %v10923_v17, %v2751_v30 }
 0x28b   : > { %v10927_v44 = vadd.f32 %v10465_v22, %v2882_v15  ;;  %v1729_v37 = vpop.permute.xlu0 %1728 }
 0x28c   : > { %v10930_v18 = vadd.f32 %v10465_v22, %v2881_v20  ;;  %1807 = vst.msk [vmem:[#allocation3 + $0xf0] sm:$0xff] %vm1776_vm8, %v1729_v37  ;;  %v2378_v26 = vpop.permute.xlu1 %2377  ;;  %v2492_v33 = vld [vmem:[#allocation3 + $0xe0] sm:$0xff] }
 0x28d   : > { %v2961_v12 = vmax.f32 %v10927_v44, 0.0  ;;  %2457 = vst.msk [vmem:[#allocation3 + $0xe8] sm:$0xff] %vm2427_vm11, %v2378_v26  ;;  %8888 = vmatprep.mubr.msk.f32.mxu0 %vm2502_vm12, %v2492_v33 }
 0x28e   : > { %v2960_v46 = vmax.f32 %v10930_v18, 0.0 }
 0x28f   : > { %v10939_v36 = vrot.slane %v2961_v12, 2  ;;  %v867_v34 = vpop.permute.xlu0 %866 }
 0x290   : > { %v3040_v22 = vrot.slane %v2960_v46, 2  ;;  %942 = vst.msk [vmem:[#allocation3 + $0x108] sm:$0xff] %vm908_vm4, %v867_v34  ;;  %v1082_v48 = vpop.permute.xlu1 %1081 }
 0x291   : > { %1158 = vst.msk [vmem:[#allocation3 + $0x100] sm:$0xff] %vm1125_vm5, %v1082_v48 }
 0x292   : > { %v3043_v49 = vsel %vm3016_vm13, %v3040_v22, %v10939_v36  ;;  %v3041_v35 = vsel %vm3016_vm13, %v10880_v63, %v3040_v22 }
 0x293   : > { %v10951_v50 = vmax.f32 %v2958_v62, %v3043_v49  ;;  %v1731_v52 = vpop.permute.xlu0 %1730  ;;  %v3129_v53 = vmax.f32 %v2957_v2, %v3041_v35 }
 0x294   : > { %1808 = vst.msk [vmem:[#allocation3 + $0xf8] sm:$0xff] %vm1776_vm8, %v1731_v52  ;;  %v1946_v54 = vpop.permute.xlu1 %1945  ;;  %v2493_v56 = vld [vmem:[#allocation3 + $0xe8] sm:$0xff] }
 0x295   : > { %2024 = vst.msk [vmem:[#allocation3 + $0xf0] sm:$0xff] %vm1993_vm9, %v1946_v54  ;;  %8889 = vmatmul.mubr.msk.f32.gmra.mrb[28].mxu0 %vm2502_vm12, %v2493_v56  ;;  %v3208_v58 = vrot.slane %v3129_v53, 1  ;;  %v3210_v60 = vrot.slane %v10951_v50, 1 }
 0x297   : > { %v1084_v63 = vpop.permute.xlu0 %1083  ;;  %v3209_v55 = vsel %vm3186_vm14, %v3206_v40, %v3208_v58  ;;  %v3211_v62 = vsel %vm3186_vm14, %v3208_v58, %v3210_v60 }
 0x298   : > { %1159 = vst.msk [vmem:[#allocation3 + $0x108] sm:$0xff] %vm1125_vm5, %v1084_v63  ;;  %v1299_v59 = vpop.permute.xlu1 %1298  ;;  %v3298_v2 = vmax.f32 %v10892_v27, %v3209_v55  ;;  %v3299_v4 = vmax.f32 %v3129_v53, %v3211_v62 }
 0x299   : > { %1375 = vst.msk [vmem:[#allocation3 + $0x100] sm:$0xff] %vm1342_vm6, %v1299_v59 }
 0x29a   : > { %v10966_v5 = vpack.c.bf16 %v3299_v4, %v3298_v2 }
 0x29b   : > { %v1948_v21 = vpop.permute.xlu0 %1947 }
 0x29c   : > { %2025 = vst.msk [vmem:[#allocation3 + $0xf8] sm:$0xff] %vm1993_vm9, %v1948_v21  ;;  %v2163_v23 = vpop.permute.xlu1 %2162 }
 0x29d   : > { %2241 = vst.msk [vmem:[#allocation3 + $0xf0] sm:$0xff] %vm2210_vm10, %v2163_v23 }
 0x29f   : > { %v1301_v25 = vpop.permute.xlu0 %1300 }
 0x2a0   : > { %1376 = vst.msk [vmem:[#allocation3 + $0x108] sm:$0xff] %vm1342_vm6, %v1301_v25  ;;  %v1516_v28 = vpop.permute.xlu1 %1515 }
 0x2a1   : > { %1592 = vst.msk [vmem:[#allocation3 + $0x100] sm:$0xff] %vm1559_vm7, %v1516_v28 }
 0x2a3   : > { %v2165_v29 = vpop.permute.xlu0 %2164 }
 0x2a4   : > { %2242 = vst.msk [vmem:[#allocation3 + $0xf8] sm:$0xff] %vm2210_vm10, %v2165_v29  ;;  %v2380_v27 = vpop.permute.xlu1 %2379 }
 0x2a5   : > { %2458 = vst.msk [vmem:[#allocation3 + $0xf0] sm:$0xff] %vm2427_vm11, %v2380_v27 }
 0x2a7   : > { %v869_v31 = vpop.permute.xlu0 %868 }
 0x2a8   : > { %943 = vst.msk [vmem:[#allocation3 + $0x110] sm:$0xff] %vm908_vm4, %v869_v31  ;;  %v1518_v38 = vpop.permute.xlu1 %1517  ;;  %v8872_v39 = vpop.f32.mrb[16].mxu0 }
 0x2a9   : > { %1593 = vst.msk [vmem:[#allocation3 + $0x108] sm:$0xff] %vm1559_vm7, %v1518_v38  ;;  %v2884_v40 = vmul.f32 %v10923_v17, %v8872_v39  ;;  %v2761_v61 = vpop.f32.mrb[17].mxu0 }
 0x2aa   : > { %v2883_v1 = vmul.f32 %v10923_v17, %v2761_v61 }
 0x2ab   : > { %v10984_v10 = vadd.f32 %v10981_v7, %v2884_v40  ;;  %v1733_v11 = vpop.permute.xlu0 %1732 }
 0x2ac   : > { %v10987_v41 = vadd.f32 %v10981_v7, %v2883_v1  ;;  %1809 = vst.msk [vmem:[#allocation3 + $0x100] sm:$0xff] %vm1776_vm8, %v1733_v11  ;;  %v2382_v43 = vpop.permute.xlu1 %2381  ;;  %v2494_v3 = vld [vmem:[#allocation3 + $0xf0] sm:$0xff] }
 0x2ad   : > { %v2963_v24 = vmax.f32 %v10984_v10, 0.0  ;;  %2459 = vst.msk [vmem:[#allocation3 + $0xf8] sm:$0xff] %vm2427_vm11, %v2382_v43  ;;  %8891 = vmatprep.mubr.msk.f32.mxu0 %vm2502_vm12, %v2494_v3 }
 0x2ae   : > { %v2962_v6 = vmax.f32 %v10987_v41, 0.0 }
 0x2af   : > { %v10996_v32 = vrot.slane %v2963_v24, 2  ;;  %v871_v13 = vpop.permute.xlu0 %870 }
 0x2b0   : > { %v3044_v14 = vrot.slane %v2962_v6, 2  ;;  %944 = vst.msk [vmem:[#allocation3 + $0x118] sm:$0xff] %vm908_vm4, %v871_v13  ;;  %v1086_v16 = vpop.permute.xlu1 %1085  ;;  %vm3741_vm4 = vcmask 785920  }
 0x2b1   : > { %1160 = vst.msk [vmem:[#allocation3 + $0x110] sm:$0xff] %vm1125_vm5, %v1086_v16 }
 0x2b2   : > { %v3047_v9 = vsel %vm3016_vm13, %v3044_v14, %v10996_v32  ;;  %v3045_v15 = vsel %vm3016_vm13, %v10939_v36, %v3044_v14 }
 0x2b3   : > { %v11008_v30 = vmax.f32 %v2960_v46, %v3047_v9  ;;  %v1735_v20 = vpop.permute.xlu0 %1734  ;;  %v3131_v37 = vmax.f32 %v2959_v57, %v3045_v15 }
 0x2b4   : > { %1810 = vst.msk [vmem:[#allocation3 + $0x108] sm:$0xff] %vm1776_vm8, %v1735_v20  ;;  %v1950_v26 = vpop.permute.xlu1 %1949  ;;  %v2495_v33 = vld [vmem:[#allocation3 + $0xf8] sm:$0xff] }
 0x2b5   : > { %2026 = vst.msk [vmem:[#allocation3 + $0x100] sm:$0xff] %vm1993_vm9, %v1950_v26  ;;  %8892 = vmatmul.mubr.msk.f32.gmra.mrb[30].mxu0 %vm2502_vm12, %v2495_v33  ;;  %v3212_v34 = vrot.slane %v3131_v37, 1  ;;  %v3214_v22 = vrot.slane %v11008_v30, 1 }
 0x2b7   : > { %v1088_v36 = vpop.permute.xlu0 %1087  ;;  %v3213_v18 = vsel %vm3186_vm14, %v3210_v60, %v3212_v34  ;;  %v3215_v46 = vsel %vm3186_vm14, %v3212_v34, %v3214_v22 }
 0x2b8   : > { %1161 = vst.msk [vmem:[#allocation3 + $0x118] sm:$0xff] %vm1125_vm5, %v1088_v36  ;;  %v1303_v45 = vpop.permute.xlu1 %1302  ;;  %v3300_v57 = vmax.f32 %v10951_v50, %v3213_v18  ;;  %v3301_v48 = vmax.f32 %v3131_v37, %v3215_v46  ;;  %vm3802_vm5 = vcmask 1048320  }
 0x2b9   : > { %1377 = vst.msk [vmem:[#allocation3 + $0x110] sm:$0xff] %vm1342_vm6, %v1303_v45 }
 0x2ba   : > { %v11021_v49 = vpack.c.bf16 %v3301_v48, %v3300_v57 }
 0x2bb   : > { %v1952_v35 = vpop.permute.xlu0 %1951 }
 0x2bc   : > { %2027 = vst.msk [vmem:[#allocation3 + $0x108] sm:$0xff] %vm1993_vm9, %v1952_v35  ;;  %v2167_v52 = vpop.permute.xlu1 %2166 }
 0x2bd   : > { %2243 = vst.msk [vmem:[#allocation3 + $0x100] sm:$0xff] %vm2210_vm10, %v2167_v52 }
 0x2bf   : > { %v1305_v53 = vpop.permute.xlu0 %1304 }
 0x2c0   : > { %1378 = vst.msk [vmem:[#allocation3 + $0x118] sm:$0xff] %vm1342_vm6, %v1305_v53  ;;  %v1520_v54 = vpop.permute.xlu1 %1519  ;;  %vm4493_vm6 = vcmask 564224  }
 0x2c1   : > { %1594 = vst.msk [vmem:[#allocation3 + $0x110] sm:$0xff] %vm1559_vm7, %v1520_v54 }
 0x2c3   : > { %v2169_v56 = vpop.permute.xlu0 %2168 }
 0x2c4   : > { %2244 = vst.msk [vmem:[#allocation3 + $0x108] sm:$0xff] %vm2210_vm10, %v2169_v56  ;;  %v2384_v50 = vpop.permute.xlu1 %2383 }
 0x2c5   : > { %2460 = vst.msk [vmem:[#allocation3 + $0x100] sm:$0xff] %vm2427_vm11, %v2384_v50 }
 0x2c7   : > { %v1522_v58 = vpop.permute.xlu0 %1521 }
 0x2c8   : > { %1595 = vst.msk [vmem:[#allocation3 + $0x118] sm:$0xff] %vm1559_vm7, %v1522_v58  ;;  %v8875_v60 = vpop.f32.mrb[18].mxu0  ;;  %v1737_v63 = vpop.permute.xlu1 %1736  ;;  %vm4578_vm7 = vcmask 523264  }
 0x2c9   : > { %v2886_v55 = vmul.f32 %v10923_v17, %v8875_v60  ;;  %1811 = vst.msk [vmem:[#allocation3 + $0x110] sm:$0xff] %vm1776_vm8, %v1737_v63  ;;  %v2771_v62 = vpop.f32.mrb[19].mxu0 }
 0x2ca   : > { %v2885_v59 = vmul.f32 %v10923_v17, %v2771_v62  ;;  %4582 = vst.msk [vmem:[#allocation6 + $0x18] sm:$0xff] %vm4578_vm7, %v9696_v0  ;;  %4583 = vst.msk [vmem:[#allocation6 + $0x20] sm:$0xff] %vm4578_vm7, %v9696_v0 }
 0x2cb   : > { %v11034_v2 = vadd.f32 %v10981_v7, %v2886_v55  ;;  %v2386_v4 = vpop.permute.xlu0 %2385  ;;  %4579 = vst.msk [vmem:[#allocation6] sm:$0xff] %vm4578_vm7, %v9696_v0  ;;  %4580 = vst.msk [vmem:[#allocation6 + $0x8] sm:$0xff] %vm4578_vm7, %v9696_v0 }
 0x2cc   : > { %v2928_v21 = vadd.f32 %v10981_v7, %v2885_v59  ;;  %2461 = vst.msk [vmem:[#allocation3 + $0x108] sm:$0xff] %vm2427_vm11, %v2386_v4  ;;  %v1739_v23 = vpop.permute.xlu1 %1738  ;;  %v2496_v25 = vld [vmem:[#allocation3 + $0x100] sm:$0xff] }
 0x2cd   : > { %v2965_v28 = vmax.f32 %v11034_v2, 0.0  ;;  %1812 = vst.msk [vmem:[#allocation3 + $0x118] sm:$0xff] %vm1776_vm8, %v1739_v23  ;;  %8894 = vmatprep.mubr.msk.f32.mxu0 %vm2502_vm12, %v2496_v25  ;;  %vm4585_vm8 = vcmask 519168  }
 0x2ce   : > { %v2964_v29 = vmax.f32 %v2928_v21, 0.0  ;;  %4581 = vst.msk [vmem:[#allocation6 + $0x10] sm:$0xff] %vm4578_vm7, %v9696_v0  ;;  %4584 = vst.msk [vmem:[#allocation6 + $0x28] sm:$0xff] %vm4578_vm7, %v9696_v0 }
 0x2cf   : > { %v3050_v27 = vrot.slane %v2965_v28, 2  ;;  %v1954_v31 = vpop.permute.xlu0 %1953 }
 0x2d0   : > { %v3048_v38 = vrot.slane %v2964_v29, 2  ;;  %2028 = vst.msk [vmem:[#allocation3 + $0x110] sm:$0xff] %vm1993_vm9, %v1954_v31  ;;  %v1956_v39 = vpop.permute.xlu1 %1955 }
 0x2d1   : > { %2029 = vst.msk [vmem:[#allocation3 + $0x118] sm:$0xff] %vm1993_vm9, %v1956_v39  ;;  %vm4588_vm9 = vcmask 523268  }
 0x2d2   : > { %v3051_v40 = vsel %vm3016_vm13, %v3048_v38, %v3050_v27  ;;  %v3049_v61 = vsel %vm3016_vm13, %v10996_v32, %v3048_v38 }
 0x2d3   : > { %v2171_v1 = vpop.permute.xlu0 %2170  ;;  %v2497_v11 = vld [vmem:[#allocation3 + $0x108] sm:$0xff]  ;;  %v3134_v43 = vmax.f32 %v2962_v6, %v3051_v40  ;;  %v3133_v3 = vmax.f32 %v2961_v12, %v3049_v61 }
 0x2d4   : > { %2245 = vst.msk [vmem:[#allocation3 + $0x110] sm:$0xff] %vm2210_vm10, %v2171_v1  ;;  %v2173_v13 = vpop.permute.xlu1 %2172  ;;  %8895 = vmatmul.mubr.msk.f32.gmra.mrb[32].mxu0 %vm2502_vm12, %v2497_v11 }
 0x2d5   : > { %2246 = vst.msk [vmem:[#allocation3 + $0x118] sm:$0xff] %vm2210_vm10, %v2173_v13  ;;  %v3218_v14 = vrot.slane %v3134_v43, 1  ;;  %v3216_v16 = vrot.slane %v3133_v3, 1  ;;  %vm4613_vm10 = vcmask 1048064  }
 0x2d7   : > { %v2388_v9 = vpop.permute.xlu0 %2387  ;;  %v3217_v32 = vsel %vm3186_vm14, %v3214_v22, %v3216_v16  ;;  %v3219_v15 = vsel %vm3186_vm14, %v3216_v16, %v3218_v14 }
 0x2d8   : > { %2462 = vst.msk [vmem:[#allocation3 + $0x110] sm:$0xff] %vm2427_vm11, %v2388_v9  ;;  %v2390_v41 = vpop.permute.xlu1 %2389  ;;  %v3302_v44 = vmax.f32 %v11008_v30, %v3217_v32  ;;  %v3303_v12 = vmax.f32 %v3133_v3, %v3219_v15 }
 0x2d9   : > { %2463 = vst.msk [vmem:[#allocation3 + $0x118] sm:$0xff] %vm2427_vm11, %v2390_v41  ;;  %vm9710_vm11 = vmmov 0  }
 0x2da   : > { %v11060_v6 = vpack.c.bf16 %v3303_v12, %v3302_v44 }
 0x2df   : > { %v2498_v20 = vld [vmem:[#allocation3 + $0x110] sm:$0xff] }
 0x2e0   : > { %8897 = vmatprep.mubr.msk.f32.mxu0 %vm2502_vm12, %v2498_v20  ;;  %v2499_v37 = vld [vmem:[#allocation3 + $0x118] sm:$0xff] }
 0x2e1   : > { %8898 = vmatmul.mubr.msk.f32.gmra.mrb[34].mxu0 %vm2502_vm12, %v2499_v37  ;;  %vm5056_vm12 = vcmask 195584  }
 0x2e8   : > { %v8878_v26 = vpop.f32.mrb[20].mxu0 }
 0x2e9   : > { %v2888_v33 = vmul.f32 %v10923_v17, %v8878_v26  ;;  %v2781_v34 = vpop.f32.mrb[21].mxu0 }
 0x2ea   : > { %v2887_v22 = vmul.f32 %v10923_v17, %v2781_v34 }
 0x2eb   : > { %v2931_v36 = vadd.f32 %v10981_v7, %v2888_v33 }
 0x2ec   : > { %v2930_v30 = vadd.f32 %v10981_v7, %v2887_v22 }
 0x2ed   : > { %v2967_v18 = vmax.f32 %v2931_v36, 0.0 }
 0x2ee   : > { %v2966_v46 = vmax.f32 %v2930_v30, 0.0 }
 0x2ef   : > { %v3054_v45 = vrot.slane %v2967_v18, 2 }
 0x2f0   : > { %v3052_v57 = vrot.slane %v2966_v46, 2 }
 0x2f2   : > { %v3055_v48 = vsel %vm3016_vm13, %v3052_v57, %v3054_v45  ;;  %v3053_v35 = vsel %vm3016_vm13, %v3050_v27, %v3052_v57 }
 0x2f3   : > { %v3135_v52 = vmax.f32 %v2963_v24, %v3053_v35  ;;  %v3136_v53 = vmax.f32 %v2964_v29, %v3055_v48 }
 0x2f5   : > { %v3220_v54 = vrot.slane %v3135_v52, 1  ;;  %v3222_v56 = vrot.slane %v3136_v53, 1 }
 0x2f7   : > { %v3221_v50 = vsel %vm3186_vm14, %v3218_v14, %v3220_v54  ;;  %v3223_v58 = vsel %vm3186_vm14, %v3220_v54, %v3222_v56 }
 0x2f8   : > { %v3304_v60 = vmax.f32 %v3134_v43, %v3221_v50  ;;  %v3305_v63 = vmax.f32 %v3135_v52, %v3223_v58 }
 0x2fa   : > { %v9000_v55 = vpack.c.bf16 %v3305_v63, %v3304_v60 }
 0x2fc   : > { %9001 = vmatprep.subr.bf16.mxu1 %v9000_v55 }
 0x2fd   : > { %9003 = vmatpush3.bf16.msra.mxu1 %v10599_v51 }
 0x308   : > { %v8881_v62 = vpop.f32.mrb[22].mxu0 }
 0x309   : > { %v2890_v59 = vmul.f32 %v10923_v17, %v8881_v62  ;;  %v2791_v4 = vpop.f32.mrb[23].mxu0 }
 0x30a   : > { %v2889_v10 = vmul.f32 %v10923_v17, %v2791_v4 }
 0x30b   : > { %v2933_v24 = vadd.f32 %v10981_v7, %v2890_v59 }
 0x30c   : > { %v2932_v21 = vadd.f32 %v10981_v7, %v2889_v10 }
 0x30d   : > { %v2969_v23 = vmax.f32 %v2933_v24, 0.0 }
 0x30e   : > { %v2968_v25 = vmax.f32 %v2932_v21, 0.0 }
 0x30f   : > { %v3058_v29 = vrot.slane %v2969_v23, 2 }
 0x310   : > { %v3056_v27 = vrot.slane %v2968_v25, 2 }
 0x312   : > { %v3059_v31 = vsel %vm3016_vm13, %v3056_v27, %v3058_v29  ;;  %v3057_v38 = vsel %vm3016_vm13, %v3054_v45, %v3056_v27 }
 0x313   : > { %v3138_v39 = vmax.f32 %v2966_v46, %v3059_v31  ;;  %v3137_v51 = vmax.f32 %v2965_v28, %v3057_v38 }
 0x315   : > { %v3224_v40 = vrot.slane %v3137_v51, 1  ;;  %v3226_v61 = vrot.slane %v3138_v39, 1 }
 0x317   : > { %v3225_v1 = vsel %vm3186_vm14, %v3222_v56, %v3224_v40  ;;  %v3227_v11 = vsel %vm3186_vm14, %v3224_v40, %v3226_v61 }
 0x318   : > { %v3306_v43 = vmax.f32 %v3136_v53, %v3225_v1  ;;  %v3307_v3 = vmax.f32 %v3137_v51, %v3227_v11 }
 0x31a   : > { %v9004_v13 = vpack.c.bf16 %v3307_v3, %v3306_v43 }
 0x31c   : > { %9005 = vmatprep.subr.bf16.mxu1 %v9004_v13 }
 0x31d   : > { %9007 = vmatpush3.bf16.msra.mxu1 %v10687_v47 }
 0x328   : > { %v8884_v14 = vpop.f32.mrb[24].mxu0 }
 0x329   : > { %v2892_v16 = vmul.f32 %v10923_v17, %v8884_v14  ;;  %v2801_v9 = vpop.f32.mrb[25].mxu0 }
 0x32a   : > { %v2891_v32 = vmul.f32 %v10923_v17, %v2801_v9 }
 0x32b   : > { %v2935_v2 = vadd.f32 %v10981_v7, %v2892_v16 }
 0x32c   : > { %v2934_v28 = vadd.f32 %v10981_v7, %v2891_v32 }
 0x32d   : > { %v2971_v15 = vmax.f32 %v2935_v2, 0.0 }
 0x32e   : > { %v2970_v41 = vmax.f32 %v2934_v28, 0.0 }
 0x32f   : > { %v3062_v44 = vrot.slane %v2971_v15, 2 }
 0x330   : > { %v3060_v12 = vrot.slane %v2970_v41, 2 }
 0x332   : > { %v3063_v20 = vsel %vm3016_vm13, %v3060_v12, %v3062_v44  ;;  %v3061_v37 = vsel %vm3016_vm13, %v3058_v29, %v3060_v12 }
 0x333   : > { %v3140_v26 = vmax.f32 %v2968_v25, %v3063_v20  ;;  %v3139_v47 = vmax.f32 %v2967_v18, %v3061_v37  ;;  %v3323_v18 = vld [vmem:[%s12869_s4 + $0x8] sm:$0xff] }
 0x334   : > { %3439 = vmatprep.mubr.f32.mxu1 %v3323_v18 }
 0x335   : > { %v3228_v33 = vrot.slane %v3139_v47, 1  ;;  %v3230_v34 = vrot.slane %v3140_v26, 1 }
 0x337   : > { %v3229_v22 = vsel %vm3186_vm14, %v3226_v61, %v3228_v33  ;;  %v3231_v36 = vsel %vm3186_vm14, %v3228_v33, %v3230_v34 }
 0x338   : > { %v3308_v30 = vmax.f32 %v3138_v39, %v3229_v22  ;;  %v3309_v46 = vmax.f32 %v3139_v47, %v3231_v36 }
 0x33a   : > { %v9008_v45 = vpack.c.bf16 %v3309_v46, %v3308_v30 }
 0x33c   : > { %9009 = vmatprep.subr.bf16.mxu1 %v9008_v45 }
 0x33d   : > { %9011 = vmatpush3.bf16.msra.mxu1 %v10775_v19 }
 0x348   : > { %v8887_v57 = vpop.f32.mrb[26].mxu0 }
 0x349   : > { %v2894_v48 = vmul.f32 %v10923_v17, %v8887_v57  ;;  %v2811_v35 = vpop.f32.mrb[27].mxu0 }
 0x34a   : > { %v2893_v52 = vmul.f32 %v10923_v17, %v2811_v35 }
 0x34b   : > { %v2937_v53 = vadd.f32 %v10981_v7, %v2894_v48 }
 0x34c   : > { %v2936_v54 = vadd.f32 %v10981_v7, %v2893_v52 }
 0x34d   : > { %v2973_v56 = vmax.f32 %v2937_v53, 0.0 }
 0x34e   : > { %v2972_v50 = vmax.f32 %v2936_v54, 0.0 }
 0x34f   : > { %v3066_v58 = vrot.slane %v2973_v56, 2 }
 0x350   : > { %v3064_v60 = vrot.slane %v2972_v50, 2 }
 0x352   : > { %v3067_v19 = vsel %vm3016_vm13, %v3064_v60, %v3066_v58  ;;  %v3065_v63 = vsel %vm3016_vm13, %v3062_v44, %v3064_v60 }
 0x353   : > { %v3142_v55 = vmax.f32 %v2970_v41, %v3067_v19  ;;  %v3141_v62 = vmax.f32 %v2969_v23, %v3065_v63 }
 0x355   : > { %v3232_v59 = vrot.slane %v3141_v62, 1  ;;  %v3234_v4 = vrot.slane %v3142_v55, 1 }
 0x357   : > { %v3233_v10 = vsel %vm3186_vm14, %v3230_v34, %v3232_v59  ;;  %v3235_v24 = vsel %vm3186_vm14, %v3232_v59, %v3234_v4 }
 0x358   : > { %v3310_v21 = vmax.f32 %v3140_v26, %v3233_v10  ;;  %v3311_v25 = vmax.f32 %v3141_v62, %v3235_v24 }
 0x35a   : > { %v9012_v29 = vpack.c.bf16 %v3311_v25, %v3310_v21 }
 0x35c   : > { %9013 = vmatprep.subr.bf16.mxu1 %v9012_v29 }
 0x35d   : > { %9015 = vmatpush3.bf16.msra.mxu1 %v10848_v8 }
 0x368   : > { %v8890_v27 = vpop.f32.mrb[28].mxu0 }
 0x369   : > { %v2896_v31 = vmul.f32 %v10923_v17, %v8890_v27  ;;  %v2821_v38 = vpop.f32.mrb[29].mxu0 }
 0x36a   : > { %v2895_v39 = vmul.f32 %v10923_v17, %v2821_v38 }
 0x36b   : > { %v2939_v23 = vadd.f32 %v10981_v7, %v2896_v31 }
 0x36c   : > { %v2938_v51 = vadd.f32 %v10981_v7, %v2895_v39 }
 0x36d   : > { %v2975_v40 = vmax.f32 %v2939_v23, 0.0 }
 0x36e   : > { %v2974_v61 = vmax.f32 %v2938_v51, 0.0 }
 0x36f   : > { %v3070_v1 = vrot.slane %v2975_v40, 2 }
 0x370   : > { %v3068_v11 = vrot.slane %v2974_v61, 2 }
 0x372   : > { %v3071_v43 = vsel %vm3016_vm13, %v3068_v11, %v3070_v1  ;;  %v3069_v3 = vsel %vm3016_vm13, %v3066_v58, %v3068_v11 }
 0x373   : > { %v3144_v13 = vmax.f32 %v2972_v50, %v3071_v43  ;;  %v3143_v8 = vmax.f32 %v2971_v15, %v3069_v3 }
 0x375   : > { %v3236_v14 = vrot.slane %v3143_v8, 1  ;;  %v3238_v16 = vrot.slane %v3144_v13, 1 }
 0x377   : > { %v3237_v9 = vsel %vm3186_vm14, %v3234_v4, %v3236_v14  ;;  %v3239_v32 = vsel %vm3186_vm14, %v3236_v14, %v3238_v16 }
 0x378   : > { %v3312_v2 = vmax.f32 %v3142_v55, %v3237_v9  ;;  %v3313_v28 = vmax.f32 %v3143_v8, %v3239_v32 }
 0x37a   : > { %v9016_v41 = vpack.c.bf16 %v3313_v28, %v3312_v2 }
 0x37c   : > { %9017 = vmatprep.subr.bf16.mxu1 %v9016_v41 }
 0x37d   : > { %9019 = vmatpush3.bf16.msra.mxu1 %v10909_v42 }
 0x388   : > { %v8893_v44 = vpop.f32.mrb[30].mxu0 }
 0x389   : > { %v2898_v12 = vmul.f32 %v10923_v17, %v8893_v44  ;;  %v2831_v20 = vpop.f32.mrb[31].mxu0 }
 0x38a   : > { %v2897_v37 = vmul.f32 %v10923_v17, %v2831_v20 }
 0x38b   : > { %v2941_v15 = vadd.f32 %v10981_v7, %v2898_v12 }
 0x38c   : > { %v2940_v26 = vadd.f32 %v10981_v7, %v2897_v37 }
 0x38d   : > { %v2977_v47 = vmax.f32 %v2941_v15, 0.0 }
 0x38e   : > { %v2976_v33 = vmax.f32 %v2940_v26, 0.0 }
 0x38f   : > { %v3074_v34 = vrot.slane %v2977_v47, 2 }
 0x390   : > { %v3072_v22 = vrot.slane %v2976_v33, 2 }
 0x392   : > { %v3075_v36 = vsel %vm3016_vm13, %v3072_v22, %v3074_v34  ;;  %v3073_v30 = vsel %vm3016_vm13, %v3070_v1, %v3072_v22  ;;  %v3325_v22 = vld [vmem:[%s12869_s4 + $0x18] sm:$0xff] }
 0x393   : > { %v3146_v46 = vmax.f32 %v2974_v61, %v3075_v36  ;;  %v3145_v42 = vmax.f32 %v2973_v56, %v3073_v30  ;;  %v3328_v36 = vld [vmem:[%s12869_s4 + $0x30] sm:$0xff] }
 0x394   : > { %v3332_v30 = vld [vmem:[%s12869_s4 + $0x50] sm:$0xff] }
 0x395   : > { %v3240_v45 = vrot.slane %v3145_v42, 1  ;;  %v3242_v57 = vrot.slane %v3146_v46, 1 }
 0x397   : > { %v3241_v48 = vsel %vm3186_vm14, %v3238_v16, %v3240_v45  ;;  %v3243_v35 = vsel %vm3186_vm14, %v3240_v45, %v3242_v57  ;;  %v3334_v45 = vld [vmem:[%s12869_s4 + $0x60] sm:$0xff] }
 0x398   : > { %v3314_v52 = vmax.f32 %v3144_v13, %v3241_v48  ;;  %v3315_v18 = vmax.f32 %v3145_v42, %v3243_v35  ;;  %v3335_v42 = vld [vmem:[%s12869_s4 + $0x68] sm:$0xff]  ;;  %v3337_v48 = vld [vmem:[%s12869_s4 + $0x78] sm:$0xff] }
 0x399   : > { %v3341_v35 = vld [vmem:[%s12869_s4 + $0x98] sm:$0xff] }
 0x39a   : > { %v9020_v53 = vpack.c.bf16 %v3315_v18, %v3314_v52  ;;  %v3340_v52 = vld [vmem:[%s12869_s4 + $0x90] sm:$0xff] }
 0x39b   : > { %v3344_v18 = vld [vmem:[%s12869_s4 + $0xb0] sm:$0xff] }
 0x39c   : > { %9021 = vmatprep.subr.bf16.mxu1 %v9020_v53  ;;  %v3343_v53 = vld [vmem:[%s12869_s4 + $0xa8] sm:$0xff] }
 0x39d   : > { %9023 = vmatpush3.bf16.msra.mxu1 %v10966_v5 }
 0x3a7   : > { %v8896_v54 = vpop.f32.mrb[32].mxu0 }
 0x3a8   : > { %v2900_v50 = vmul.f32 %v10923_v17, %v8896_v54  ;;  %v2841_v58 = vpop.f32.mrb[33].mxu0  ;;  %v3324_v54 = vld [vmem:[%s12869_s4 + $0x10] sm:$0xff] }
 0x3a9   : > { %v2899_v60 = vmul.f32 %v10923_v17, %v2841_v58  ;;  %v3330_v58 = vld [vmem:[%s12869_s4 + $0x40] sm:$0xff] }
 0x3aa   : > { %v2943_v56 = vadd.f32 %v10981_v7, %v2900_v50  ;;  %v3327_v50 = vld [vmem:[%s12869_s4 + $0x28] sm:$0xff] }
 0x3ab   : > { %v2942_v19 = vadd.f32 %v10981_v7, %v2899_v60  ;;  %v3333_v60 = vld [vmem:[%s12869_s4 + $0x58] sm:$0xff] }
 0x3ac   : > { %v2979_v63 = vmax.f32 %v2943_v56, 0.0  ;;  %v3336_v56 = vld [vmem:[%s12869_s4 + $0x70] sm:$0xff] }
 0x3ad   : > { %v2978_v55 = vmax.f32 %v2942_v19, 0.0  ;;  %v3339_v19 = vld [vmem:[%s12869_s4 + $0x88] sm:$0xff] }
 0x3ae   : > { %v3078_v62 = vrot.slane %v2979_v63, 2 }
 0x3af   : > { %v3076_v59 = vrot.slane %v2978_v55, 2 }
 0x3b1   : > { %v3079_v4 = vsel %vm3016_vm13, %v3076_v59, %v3078_v62  ;;  %v3077_v10 = vsel %vm3016_vm13, %v3074_v34, %v3076_v59  ;;  %v3326_v34 = vld [vmem:[%s12869_s4 + $0x20] sm:$0xff] }
 0x3b2   : > { %v3148_v24 = vmax.f32 %v2976_v33, %v3079_v4  ;;  %v3147_v5 = vmax.f32 %v2975_v40, %v3077_v10  ;;  %v3691_v59 = vld [vmem:[#allocation4 + $0x9] sm:$0xff] }
 0x3b3   : > { %v4095_v4 = vld [vmem:[%s12870_s5 + $0x100] sm:$0xff]  ;;  %v4096_v10 = vld [vmem:[%s12870_s5 + $0x108] sm:$0xff] }
 0x3b4   : > { %v8899_v21 = vpop.f32.mrb[34].mxu0  ;;  %v3244_v25 = vrot.slane %v3147_v5, 1  ;;  %v3246_v29 = vrot.slane %v3148_v24, 1 }
 0x3b5   : > { %v2902_v27 = vmul.f32 %v10923_v17, %v8899_v21  ;;  %v2851_v31 = vpop.f32.mrb[35].mxu0  ;;  %v4098_v21 = vld [vmem:[%s12870_s5 + $0x118] sm:$0xff] }
 0x3b6   : > { %v2901_v38 = vmul.f32 %v10923_v17, %v2851_v31  ;;  %v3245_v39 = vsel %vm3186_vm14, %v3242_v57, %v3244_v25  ;;  %v3247_v23 = vsel %vm3186_vm14, %v3244_v25, %v3246_v29  ;;  %v3338_v57 = vld [vmem:[%s12869_s4 + $0x80] sm:$0xff] }
 0x3b7   : > { %v2945_v51 = vadd.f32 %v10981_v7, %v2902_v27  ;;  %v3316_v61 = vmax.f32 %v3146_v46, %v3245_v39  ;;  %v3317_v1 = vmax.f32 %v3147_v5, %v3247_v23  ;;  %v3331_v46 = vld [vmem:[%s12869_s4 + $0x48] sm:$0xff]  ;;  %v4097_v5 = vld [vmem:[%s12870_s5 + $0x110] sm:$0xff] }
 0x3b8   : > { %v2944_v11 = vadd.f32 %v10981_v7, %v2901_v38  ;;  %v9074_v25 = vpack.c.bf16 %v4098_v21, %v4097_v5 }
 0x3b9   : > { %v2981_v43 = vmax.f32 %v2945_v51, 0.0  ;;  %v9024_v40 = vpack.c.bf16 %v3317_v1, %v3316_v61 }
 0x3ba   : > { %v2980_v3 = vmax.f32 %v2944_v11, 0.0 }
 0x3bb   : > { %v3082_v13 = vrot.slane %v2981_v43, 2  ;;  %9025 = vmatprep.subr.bf16.mxu1 %v9024_v40 }
 0x3bc   : > { %v3080_v8 = vrot.slane %v2980_v3, 2  ;;  %9027 = vmatpush3.bf16.msra.mxu1 %v11021_v49 }
 0x3bd   : > { %v3151_v14 = vmax.f32 %v2979_v63, %v3082_v13  ;;  %v3342_v63 = vld [vmem:[%s12869_s4 + $0xa0] sm:$0xff] }
 0x3be   : > { %v3081_v17 = vsel %vm3016_vm13, %v3078_v62, %v3080_v8  ;;  %v3083_v16 = vsel %vm3016_vm13, %v3080_v8, %v3082_v13  ;;  %v3630_v62 = vld [vmem:[#allocation4 + $0x8] sm:$0xff] }
 0x3bf   : > { %v3150_v9 = vmax.f32 %v2978_v55, %v3083_v16  ;;  %v3149_v32 = vmax.f32 %v2977_v47, %v3081_v17  ;;  %v3252_v2 = vrot.slane %v3151_v14, 1  ;;  %v3322_v47 = vld [vmem:[%s12869_s4] sm:$0xff]  ;;  %v3345_v55 = vld [vmem:[%s12869_s4 + $0xb8] sm:$0xff]  ;;  %3650 = vrot.lane.b32.xlu1 %v3630_v62, %s12903_s29  ;;  %v4080_v16 = vld [vmem:[%s12870_s5 + $0x88] sm:$0xff] }
 0x3c0   : > { %v4079_v17 = vld [vmem:[%s12870_s5 + $0x80] sm:$0xff] }
 0x3c1   : > { %v3250_v28 = vrot.slane %v3150_v9, 1  ;;  %v3248_v41 = vrot.slane %v3149_v32, 1  ;;  %v3321_v20 = vmax.f32 %v3151_v14, %v3252_v2  ;;  %v4087_v62 = vld [vmem:[%s12870_s5 + $0xc0] sm:$0xff] }
 0x3c3   : > { %v3249_v7 = vsel %vm3186_vm14, %v3246_v29, %v3248_v41  ;;  %v3251_v44 = vsel %vm3186_vm14, %v3248_v41, %v3250_v28  ;;  %v3253_v12 = vsel %vm3186_vm14, %v3250_v28, %v3252_v2  ;;  %3711 = vrot.lane.b32.xlu1 %v3691_v59, %s12901_s30  ;;  %v9038_v2 = vpack.c.bf16 %v4080_v16, %v4079_v17  ;;  %v4064_v28 = vld [vmem:[%s12870_s5 + $0x8] sm:$0xff]  ;;  %v3610_v41 = vld [vmem:[#allocation4 + $0x7] sm:$0xff] }
 0x3c4   : > { %v3318_v37 = vmax.f32 %v3148_v24, %v3249_v7  ;;  %v3319_v49 = vmax.f32 %v3149_v32, %v3251_v44  ;;  %v3320_v15 = vmax.f32 %v3150_v9, %v3253_v12  ;;  %v9070_v24 = vpack.c.bf16 %v4096_v10, %v4095_v4  ;;  %v4063_v9 = vld [vmem:[%s12870_s5] sm:$0xff]  ;;  %3620 = vst.msk [vmem:[#allocation5] sm:$0xff] %vm3585_vm2, %v3610_v41  ;;  %v4088_v59 = vld [vmem:[%s12870_s5 + $0xc8] sm:$0xff] }
 0x3c5   : > { %v9040_v44 = vpack.c.bf16 %v4064_v28, %v4063_v9  ;;  %9039 = vmatprep.subr.bf16.mxu0 %v9038_v2  ;;  %v9054_v10 = vpack.c.bf16 %v4088_v59, %v4087_v62  ;;  %v4077_v59 = vld [vmem:[%s12870_s5 + $0x70] sm:$0xff] }
 0x3c6   : > { %v9028_v26 = vpack.c.bf16 %v3319_v49, %v3318_v37  ;;  %v9032_v33 = vpack.c.bf16 %v3321_v20, %v3320_v15  ;;  %v4081_v37 = vld [vmem:[%s12870_s5 + $0x90] sm:$0xff]  ;;  %v4082_v49 = vld [vmem:[%s12870_s5 + $0x98] sm:$0xff] }
 0x3c7   : > { %9041 = vmatpush3.bf16.msra.mxu0 %v9040_v44  ;;  %v4065_v15 = vld [vmem:[%s12870_s5 + $0x10] sm:$0xff] }
 0x3c8   : > { %9029 = vmatprep.subr.bf16.mxu1 %v9028_v26 }
 0x3c9   : > { %9031 = vmatpush3.bf16.msra.mxu1 %v11060_v6  ;;  %v3329_v6 = vld [vmem:[%s12869_s4 + $0x38] sm:$0xff] }
 0x3ca   : > { %9034 = vmatprep.subr.msk.bf16.mxu1 %vm9033_vm0, %v9032_v33 }
 0x3cc   : > { %3440 = vmatmul.mubr.f32.vlgmr.msra.gmra.mrb[0].mxu1 %v3322_v47  ;;  %v4066_v47 = vld [vmem:[%s12870_s5 + $0x18] sm:$0xff] }
 0x3cd   : > { %9037 = vmatpush3.bf16.msk.msra.mxu1 %vm9033_vm0, %v9032_v33  ;;  %3444 = vmatprep.mubr.f32.mxu1 %v3326_v34  ;;  %v9042_v33 = vpack.c.bf16 %v4082_v49, %v4081_v37 }
 0x3ce   : > { %9071 = vmatprep.subr.bf16.mxu1 %v9070_v24 }
 0x3cf   : > { %9043 = vmatprep.subr.bf16.mxu0 %v9042_v33 }
 0x3d0   : > { %3445 = vmatmul.mubr.f32.gmra.mrb[2].mxu1 %v3325_v22  ;;  %v9044_v22 = vpack.c.bf16 %v4066_v47, %v4065_v15 }
 0x3d1   : > { %3449 = vmatprep.mubr.f32.mxu1 %v3329_v6 }
 0x3d2   : > { %9045 = vmatpush3.bf16.msra.mxu0 %v9044_v22 }
 0x3d4   : > { %3450 = vmatmul.mubr.f32.gmra.mrb[4].mxu1 %v3328_v36  ;;  %v4083_v36 = vld [vmem:[%s12870_s5 + $0xa0] sm:$0xff] }
 0x3d5   : > { %3454 = vmatprep.mubr.f32.mxu1 %v3332_v30  ;;  %v4084_v30 = vld [vmem:[%s12870_s5 + $0xa8] sm:$0xff] }
 0x3d8   : > { %3455 = vmatmul.mubr.f32.gmra.mrb[6].mxu1 %v3331_v46 }
 0x3d9   : > { %3459 = vmatprep.mubr.f32.mxu1 %v3335_v42  ;;  %v9046_v42 = vpack.c.bf16 %v4084_v30, %v4083_v36 }
 0x3db   : > { %9047 = vmatprep.subr.bf16.mxu0 %v9046_v42  ;;  %v4074_v42 = vld [vmem:[%s12870_s5 + $0x58] sm:$0xff] }
 0x3dc   : > { %3460 = vmatmul.mubr.f32.gmra.mrb[8].mxu1 %v3334_v45 }
 0x3dd   : > { %3464 = vmatprep.mubr.f32.mxu1 %v3338_v57  ;;  %v4067_v57 = vld [vmem:[%s12870_s5 + $0x20] sm:$0xff] }
 0x3e0   : > { %3465 = vmatmul.mubr.f32.gmra.mrb[10].mxu1 %v3337_v48  ;;  %v4068_v48 = vld [vmem:[%s12870_s5 + $0x28] sm:$0xff] }
 0x3e1   : > { %3469 = vmatprep.mubr.f32.mxu1 %v3341_v35 }
 0x3e4   : > { %3470 = vmatmul.mubr.f32.gmra.mrb[12].mxu1 %v3340_v52  ;;  %v9048_v52 = vpack.c.bf16 %v4068_v48, %v4067_v57  ;;  %v4092_v57 = vld [vmem:[%s12870_s5 + $0xe8] sm:$0xff] }
 0x3e5   : > { %3474 = vmatprep.mubr.f32.mxu1 %v3344_v18  ;;  %v4085_v18 = vld [vmem:[%s12870_s5 + $0xb0] sm:$0xff] }
 0x3e6   : > { %9049 = vmatpush3.bf16.msra.mxu0 %v9048_v52 }
 0x3e8   : > { %3475 = vmatmul.mubr.f32.gmra.mrb[14].mxu1 %v3343_v53  ;;  %v4086_v53 = vld [vmem:[%s12870_s5 + $0xb8] sm:$0xff] }
 0x3e9   : > { %8904 = vmatprep.mubr.msk.f32.mxu1 %vm3346_vm1, %v3324_v54 }
 0x3ec   : > { %8905 = vmatmul.mubr.msk.f32.vlgmr.msra.gmra.mrb[16].mxu1 %vm3346_vm1, %v3327_v50  ;;  %v9050_v50 = vpack.c.bf16 %v4086_v53, %v4085_v18  ;;  %v4075_v18 = vld [vmem:[%s12870_s5 + $0x60] sm:$0xff]  ;;  %v4076_v53 = vld [vmem:[%s12870_s5 + $0x68] sm:$0xff] }
 0x3ed   : > { %8907 = vmatprep.mubr.msk.f32.mxu1 %vm3346_vm1, %v3330_v58  ;;  %9073 = vmatpush3.bf16.msra.mxu1 %v9070_v24  ;;  %v9064_v62 = vpack.c.bf16 %v4076_v53, %v4075_v18 }
 0x3ee   : > { %9075 = vmatprep.subr.bf16.mxu1 %v9074_v25  ;;  %9051 = vmatprep.subr.bf16.mxu0 %v9050_v50 }
 0x3f0   : > { %8908 = vmatmul.mubr.msk.f32.gmra.mrb[18].mxu1 %vm3346_vm1, %v3333_v60 }
 0x3f1   : > { %8910 = vmatprep.mubr.msk.f32.mxu1 %vm3346_vm1, %v3336_v56  ;;  %9077 = vmatpush3.bf16.msra.mxu1 %v9074_v25  ;;  %v4069_v56 = vld [vmem:[%s12870_s5 + $0x30] sm:$0xff]  ;;  %v4071_v25 = vld [vmem:[%s12870_s5 + $0x40] sm:$0xff] }
 0x3f4   : > { %8911 = vmatmul.mubr.msk.f32.gmra.mrb[20].mxu1 %vm3346_vm1, %v3339_v19  ;;  %v4070_v19 = vld [vmem:[%s12870_s5 + $0x38] sm:$0xff] }
 0x3f5   : > { %8913 = vmatprep.mubr.msk.f32.mxu1 %vm3346_vm1, %v3342_v63 }
 0x3f8   : > { %8914 = vmatmul.mubr.msk.f32.gmra.mrb[22].mxu1 %vm3346_vm1, %v3345_v55  ;;  %v9052_v55 = vpack.c.bf16 %v4070_v19, %v4069_v56  ;;  %v4094_v56 = vld [vmem:[%s12870_s5 + $0xf8] sm:$0xff] }
 0x3fa   : > { %9053 = vmatpush3.bf16.msra.mxu0 %v9052_v55 }
 0x3fb   : > { %9055 = vmatprep.subr.bf16.mxu0 %v9054_v10 }
 0x431   : > { %v3651_v12 = vpop.permute.xlu1 %3650 }
 0x432   : > { %3681 = vst.msk [vmem:[#allocation5] sm:$0xff] %vm3680_vm3, %v3651_v12 }
 0x435   : > { %v3712_v6 = vpop.permute.xlu1 %3711 }
 0x436   : > { %3742 = vst.msk [vmem:[#allocation5] sm:$0xff] %vm3741_vm4, %v3712_v6 }
 0x49f   : > { %v8601_v29 = vpop.f32.mrb[0].mxu1 }
 0x4a0   : > { %v8602_v27 = vpop.f32.mrb[1].mxu1 }
 0x4a1   : > { %v8603_v31 = vadd.f32 %v8602_v27, %v8601_v29  ;;  %v4072_v29 = vld [vmem:[%s12870_s5 + $0x48] sm:$0xff] }
 0x4a2   : > { %v9056_v27 = vpack.c.bf16 %v4072_v29, %v4071_v25 }
 0x4a3   : > { %v8604_v38 = vpop.f32.mrb[2].mxu1 }
 0x4a4   : > { %v8605_v39 = vpop.f32.mrb[3].mxu1  ;;  %9057 = vmatpush3.bf16.msra.mxu0 %v9056_v27 }
 0x4a5   : > { %v8606_v23 = vadd.f32 %v8605_v39, %v8604_v38  ;;  %v4090_v38 = vld [vmem:[%s12870_s5 + $0xd8] sm:$0xff] }
 0x4a7   : > { %v8607_v51 = vpop.f32.mrb[4].mxu1 }
 0x4a8   : > { %v8608_v61 = vpop.f32.mrb[5].mxu1 }
 0x4a9   : > { %v11265_v1 = vadd.f32 %v8608_v61, %v8607_v51 }
 0x4ab   : > { %v8610_v11 = vpop.f32.mrb[6].mxu1 }
 0x4ac   : > { %v8611_v43 = vpop.f32.mrb[7].mxu1 }
 0x4ad   : > { %v11267_v40 = vadd.f32 %v8611_v43, %v8610_v11 }
 0x4af   : > { %v8613_v3 = vpop.f32.mrb[8].mxu1 }
 0x4b0   : > { %v8614_v13 = vpop.f32.mrb[9].mxu1 }
 0x4b1   : > { %v11269_v8 = vadd.f32 %v8614_v13, %v8613_v3 }
 0x4b3   : > { %v8616_v14 = vpop.f32.mrb[10].mxu1 }
 0x4b4   : > { %v8617_v32 = vpop.f32.mrb[11].mxu1 }
 0x4b5   : > { %v11283_v7 = vadd.f32 %v8617_v32, %v8616_v14 }
 0x4b7   : > { %v8619_v20 = vpop.f32.mrb[12].mxu1 }
 0x4b8   : > { %v8620_v26 = vpop.f32.mrb[13].mxu1 }
 0x4b9   : > { %v11299_v34 = vadd.f32 %v8620_v26, %v8619_v20 }
 0x4bb   : > { %v8622_v46 = vpop.f32.mrb[14].mxu1 }
 0x4bc   : > { %v8623_v45 = vpop.f32.mrb[15].mxu1 }
 0x4bd   : > { %v8624_v35 = vadd.f32 %v8623_v45, %v8622_v46  ;;  %v4073_v46 = vld [vmem:[%s12870_s5 + $0x50] sm:$0xff]  ;;  %v4091_v45 = vld [vmem:[%s12870_s5 + $0xe0] sm:$0xff] }
 0x4be   : > { %v9062_v52 = vpack.c.bf16 %v4092_v57, %v4091_v45  ;;  %v4022_v45 = vld [vmem:[#allocation4 + $0x65] sm:$0xff] }
 0x4bf   : > { %v8906_v54 = vpop.f32.mrb[16].mxu1  ;;  %v3902_v57 = vld [vmem:[#allocation4 + $0x63] sm:$0xff]  ;;  %4032 = vst.msk [vmem:[#allocation5 + $0xe8] sm:$0xff] %vm3585_vm2, %v4022_v45 }
 0x4c0   : > { %v3552_v58 = vadd.f32 %v8906_v54, %v8606_v23  ;;  %v3546_v60 = vpop.f32.mrb[17].mxu1 }
 0x4c1   : > { %v3547_v63 = vadd.f32 %v8603_v31, %v3546_v60  ;;  %v4089_v31 = vld [vmem:[%s12870_s5 + $0xd0] sm:$0xff] }
 0x4c2   : > { %3603 = vst.msk [vmem:[#allocation4 + $0x1d] sm:$0xff] %vm3585_vm2, %v3552_v58  ;;  %v9058_v23 = vpack.c.bf16 %v4090_v38, %v4089_v31  ;;  %v4093_v58 = vld [vmem:[%s12870_s5 + $0xf0] sm:$0xff] }
 0x4c3   : > { %3602 = vst.msk [vmem:[#allocation4 + $0x13] sm:$0xff] %vm3585_vm2, %v3547_v63  ;;  %v8909_v4 = vpop.f32.mrb[18].mxu1 }
 0x4c4   : > { %v3562_v24 = vadd.f32 %v8909_v4, %v11267_v40  ;;  %v3556_v5 = vpop.f32.mrb[19].mxu1  ;;  %9059 = vmatprep.subr.bf16.mxu0 %v9058_v23  ;;  %v4078_v4 = vld [vmem:[%s12870_s5 + $0x78] sm:$0xff] }
 0x4c5   : > { %v3557_v21 = vadd.f32 %v11265_v1, %v3556_v5  ;;  %v9066_v5 = vpack.c.bf16 %v4094_v56, %v4093_v58 }
 0x4c6   : > { %3605 = vst.msk [vmem:[#allocation4 + $0x31] sm:$0xff] %vm3585_vm2, %v3562_v24  ;;  %v4062_v18 = vld [vmem:[#allocation5 + $0xe8] sm:$0xff] }
 0x4c7   : > { %3604 = vst.msk [vmem:[#allocation4 + $0x27] sm:$0xff] %vm3585_vm2, %v3557_v21  ;;  %v8912_v39 = vpop.f32.mrb[20].mxu1 }
 0x4c8   : > { %v3572_v51 = vadd.f32 %v8912_v39, %v11283_v7  ;;  %v3566_v61 = vpop.f32.mrb[21].mxu1 }
 0x4c9   : > { %v3567_v1 = vadd.f32 %v11269_v8, %v3566_v61  ;;  %v3893_v11 = vld [vmem:[#allocation4 + $0x1b] sm:$0xff]  ;;  %v9068_v61 = vpack.c.bf16 %v4078_v4, %v4077_v59 }
 0x4ca   : > { %v4013_v43 = vld [vmem:[#allocation4 + $0x1d] sm:$0xff]  ;;  %3607 = vst.msk [vmem:[#allocation4 + $0x45] sm:$0xff] %vm3585_vm2, %v3572_v51  ;;  %3913 = vrot.lane.b32.xlu0 %v3893_v11, %s12901_s30  ;;  %v3752_v40 = vld [vmem:[#allocation4 + $0x11] sm:$0xff] }
 0x4cb   : > { %4023 = vst.msk [vmem:[#allocation5 + $0x10] sm:$0xff] %vm3585_vm2, %v4013_v43  ;;  %3606 = vst.msk [vmem:[#allocation4 + $0x3b] sm:$0xff] %vm3585_vm2, %v3567_v1  ;;  %v8915_v3 = vpop.f32.mrb[22].mxu1  ;;  %3772 = vrot.lane.b32.xlu1 %v3752_v40, %s12899_s18  ;;  %v3611_v13 = vld [vmem:[#allocation4 + $0xf] sm:$0xff]  ;;  %v3814_v8 = vld [vmem:[#allocation4 + $0x1a] sm:$0xff] }
 0x4cc   : > { %v3582_v14 = vadd.f32 %v8915_v3, %v8624_v35  ;;  %v3576_v17 = vpop.f32.mrb[23].mxu1  ;;  %3621 = vst.msk [vmem:[#allocation5 + $0x18] sm:$0xff] %vm3585_vm2, %v3611_v13  ;;  %v3813_v16 = vld [vmem:[#allocation4 + $0x12] sm:$0xff]  ;;  %v3953_v32 = vld [vmem:[#allocation4 + $0x1c] sm:$0xff]  ;;  %3824 = vst.msk [vmem:[#allocation5 + $0x20] sm:$0xff] %vm3585_vm2, %v3814_v8  ;;  %v9060_v35 = vpack.c.bf16 %v4074_v42, %v4073_v46 }
 0x4cd   : > { %v3577_v9 = vadd.f32 %v11299_v34, %v3576_v17  ;;  %3823 = vst.msk [vmem:[#allocation5 + $0x8] sm:$0xff] %vm3585_vm2, %v3813_v16  ;;  %v3631_v28 = vld [vmem:[#allocation4 + $0x10] sm:$0xff]  ;;  %v3753_v49 = vld [vmem:[#allocation4 + $0x19] sm:$0xff] }
 0x4ce   : > { %v4014_v2 = vld [vmem:[#allocation4 + $0x25] sm:$0xff]  ;;  %3609 = vst.msk [vmem:[#allocation4 + $0x59] sm:$0xff] %vm3585_vm2, %v3582_v14  ;;  %3973 = vrot.lane.b32.xlu0 %v3953_v32, %s12899_s18  ;;  %v4015_v41 = vld [vmem:[#allocation4 + $0x2d] sm:$0xff]  ;;  %v3632_v6 = vld [vmem:[#allocation4 + $0x18] sm:$0xff]  ;;  %9061 = vmatpush3.bf16.msra.mxu0 %v9060_v35 }
 0x4cf   : > { %4024 = vst.msk [vmem:[#allocation5 + $0x28] sm:$0xff] %vm3585_vm2, %v4014_v2  ;;  %3608 = vst.msk [vmem:[#allocation4 + $0x4f] sm:$0xff] %vm3585_vm2, %v3577_v9  ;;  %3652 = vrot.lane.b32.xlu1 %v3631_v28, %s12903_s29  ;;  %v3833_v37 = vld [vmem:[#allocation4 + $0x13] sm:$0xff]  ;;  %v3894_v60 = vld [vmem:[#allocation4 + $0x23] sm:$0xff]  ;;  %9063 = vmatprep.subr.bf16.mxu0 %v9062_v52 }
 0x4d0   : > { %4025 = vst.msk [vmem:[#allocation5 + $0x40] sm:$0xff] %vm3585_vm2, %v4015_v41  ;;  %v3896_v22 = vld [vmem:[#allocation4 + $0x33] sm:$0xff]  ;;  %v3815_v21 = vld [vmem:[#allocation4 + $0x22] sm:$0xff]  ;;  %v3816_v29 = vld [vmem:[#allocation4 + $0x2a] sm:$0xff] }
 0x4d1   : > { %v4018_v44 = vld [vmem:[#allocation4 + $0x45] sm:$0xff]  ;;  %v3612_v50 = vld [vmem:[#allocation4 + $0x17] sm:$0xff]  ;;  %v3615_v10 = vld [vmem:[#allocation4 + $0x2f] sm:$0xff]  ;;  %3825 = vst.msk [vmem:[#allocation5 + $0x38] sm:$0xff] %vm3585_vm2, %v3815_v21 }
 0x4d2   : > { %v4035_v7 = vld [vmem:[#allocation5 + $0x10] sm:$0xff]  ;;  %3855 = vrot.lane.b32.xlu0 %v3893_v11, %s12903_s29  ;;  %v4016_v12 = vld [vmem:[#allocation4 + $0x35] sm:$0xff]  ;;  %v4017_v20 = vld [vmem:[#allocation4 + $0x3d] sm:$0xff]  ;;  %4028 = vst.msk [vmem:[#allocation5 + $0x88] sm:$0xff] %vm3585_vm2, %v4018_v44  ;;  %9065 = vmatpush3.bf16.msra.mxu0 %v9064_v62 }
 0x4d3   : > { %8924 = vmatprep.mubr.msk.f32.mxu1 %vm3585_vm2, %v4035_v7  ;;  %3713 = vrot.lane.b32.xlu1 %v3752_v40, %s12901_s30  ;;  %4026 = vst.msk [vmem:[#allocation5 + $0x58] sm:$0xff] %vm3585_vm2, %v4016_v12  ;;  %4027 = vst.msk [vmem:[#allocation5 + $0x70] sm:$0xff] %vm3585_vm2, %v4017_v20  ;;  %v3817_v19 = vld [vmem:[#allocation4 + $0x32] sm:$0xff]  ;;  %v3613_v25 = vld [vmem:[#allocation4 + $0x1f] sm:$0xff] }
 0x4d4   : > { %3622 = vst.msk [vmem:[#allocation5 + $0x30] sm:$0xff] %vm3585_vm2, %v3612_v50  ;;  %v3756_v55 = vld [vmem:[#allocation4 + $0x31] sm:$0xff]  ;;  %3827 = vst.msk [vmem:[#allocation5 + $0x68] sm:$0xff] %vm3585_vm2, %v3817_v19  ;;  %v3614_v27 = vld [vmem:[#allocation4 + $0x27] sm:$0xff]  ;;  %9067 = vmatprep.subr.bf16.mxu0 %v9066_v5 }
 0x4d5   : > { %v4021_v15 = vld [vmem:[#allocation4 + $0x5d] sm:$0xff]  ;;  %3625 = vst.msk [vmem:[#allocation5 + $0x78] sm:$0xff] %vm3585_vm2, %v3615_v10  ;;  %3623 = vst.msk [vmem:[#allocation5 + $0x48] sm:$0xff] %vm3585_vm2, %v3613_v25  ;;  %v3618_v1 = vld [vmem:[#allocation4 + $0x47] sm:$0xff] }
 0x4d6   : > { %3853 = vrot.lane.b32.xlu0 %v3833_v37, %s12903_s29  ;;  %v4038_v26 = vld [vmem:[#allocation5 + $0x28] sm:$0xff]  ;;  %v4019_v47 = vld [vmem:[#allocation4 + $0x4d] sm:$0xff]  ;;  %4031 = vst.msk [vmem:[#allocation5 + $0xd0] sm:$0xff] %vm3585_vm2, %v4021_v15  ;;  %v4020_v34 = vld [vmem:[#allocation4 + $0x55] sm:$0xff]  ;;  %9069 = vmatpush3.bf16.msra.mxu0 %v9068_v61 }
 0x4d7   : > { %v4041_v33 = vld [vmem:[#allocation5 + $0x40] sm:$0xff]  ;;  %8925 = vmatmul.mubr.msk.f32.vlgmr.msra.gmra.mrb[24].mxu1 %vm3585_vm2, %v4038_v26  ;;  %3774 = vrot.lane.b32.xlu1 %v3753_v49, %s12899_s18  ;;  %4029 = vst.msk [vmem:[#allocation5 + $0xa0] sm:$0xff] %vm3585_vm2, %v4019_v47  ;;  %4030 = vst.msk [vmem:[#allocation5 + $0xb8] sm:$0xff] %vm3585_vm2, %v4020_v34  ;;  %s12926_s18 = smov 64   ;;  %v3819_v31 = vld [vmem:[#allocation4 + $0x42] sm:$0xff] }
 0x4d8   : > { %8927 = vmatprep.mubr.msk.f32.mxu1 %vm3585_vm2, %v4041_v33  ;;  %3826 = vst.msk [vmem:[#allocation5 + $0x50] sm:$0xff] %vm3585_vm2, %v3816_v29  ;;  %v3616_v38 = vld [vmem:[#allocation4 + $0x37] sm:$0xff]  ;;  %3624 = vst.msk [vmem:[#allocation5 + $0x60] sm:$0xff] %vm3585_vm2, %v3614_v27  ;;  %v3617_v23 = vld [vmem:[#allocation4 + $0x3f] sm:$0xff] }
 0x4d9   : > { %v4050_v48 = vld [vmem:[#allocation5 + $0x88] sm:$0xff]  ;;  %3829 = vst.msk [vmem:[#allocation5 + $0x98] sm:$0xff] %vm3585_vm2, %v3819_v31  ;;  %3626 = vst.msk [vmem:[#allocation5 + $0x90] sm:$0xff] %vm3585_vm2, %v3616_v38  ;;  %v3820_v11 = vld [vmem:[#allocation4 + $0x4a] sm:$0xff] }
 0x4da   : > { %3919 = vrot.lane.b32.xlu0 %v3896_v22, %s12901_s30  ;;  %v4044_v36 = vld [vmem:[#allocation5 + $0x58] sm:$0xff]  ;;  %v4047_v30 = vld [vmem:[#allocation5 + $0x70] sm:$0xff]  ;;  %v3818_v39 = vld [vmem:[#allocation4 + $0x3a] sm:$0xff]  ;;  %3627 = vst.msk [vmem:[#allocation5 + $0xa8] sm:$0xff] %vm3585_vm2, %v3617_v23 }
 0x4db   : > { %8928 = vmatmul.mubr.msk.f32.gmra.mrb[26].mxu1 %vm3585_vm2, %v4044_v36  ;;  %3654 = vrot.lane.b32.xlu1 %v3632_v6, %s12903_s29  ;;  %v3822_v51 = vld [vmem:[#allocation4 + $0x5a] sm:$0xff]  ;;  %3828 = vst.msk [vmem:[#allocation5 + $0x80] sm:$0xff] %vm3585_vm2, %v3818_v39  ;;  %v3619_v43 = vld [vmem:[#allocation4 + $0x4f] sm:$0xff]  ;;  %v3954_v40 = vld [vmem:[#allocation4 + $0x24] sm:$0xff] }
 0x4dc   : > { %8930 = vmatprep.mubr.msk.f32.mxu1 %vm3585_vm2, %v4047_v30  ;;  %3832 = vst.msk [vmem:[#allocation5 + $0xe0] sm:$0xff] %vm3585_vm2, %v3822_v51  ;;  %3628 = vst.msk [vmem:[#allocation5 + $0xc0] sm:$0xff] %vm3585_vm2, %v3618_v1  ;;  %v3821_v3 = vld [vmem:[#allocation4 + $0x52] sm:$0xff]  ;;  %v3754_v17 = vld [vmem:[#allocation4 + $0x21] sm:$0xff] }
 0x4dd   : > { %v4059_v24 = vld [vmem:[#allocation5 + $0xd0] sm:$0xff]  ;;  %3830 = vst.msk [vmem:[#allocation5 + $0xb0] sm:$0xff] %vm3585_vm2, %v3820_v11  ;;  %3629 = vst.msk [vmem:[#allocation5 + $0xd8] sm:$0xff] %vm3585_vm2, %v3619_v43  ;;  %v3635_v13 = vld [vmem:[#allocation4 + $0x30] sm:$0xff] }
 0x4de   : > { %3861 = vrot.lane.b32.xlu0 %v3896_v22, %s12925_s23  ;;  %v4053_v54 = vld [vmem:[#allocation5 + $0xa0] sm:$0xff]  ;;  %v4056_v63 = vld [vmem:[#allocation5 + $0xb8] sm:$0xff]  ;;  %3831 = vst.msk [vmem:[#allocation5 + $0xc8] sm:$0xff] %vm3585_vm2, %v3821_v3  ;;  %v3633_v16 = vld [vmem:[#allocation4 + $0x20] sm:$0xff] }
 0x4df   : > { %8931 = vmatmul.mubr.msk.f32.gmra.mrb[28].mxu1 %vm3585_vm2, %v4050_v48  ;;  %3715 = vrot.lane.b32.xlu1 %v3753_v49, %s12926_s18  ;;  %v3895_v14 = vld [vmem:[#allocation4 + $0x2b] sm:$0xff]  ;;  %v3898_v9 = vld [vmem:[#allocation4 + $0x43] sm:$0xff]  ;;  %v3956_v41 = vld [vmem:[#allocation4 + $0x34] sm:$0xff] }
 0x4e0   : > { %8933 = vmatprep.mubr.msk.f32.mxu1 %vm3585_vm2, %v4053_v54  ;;  %v3955_v8 = vld [vmem:[#allocation4 + $0x2c] sm:$0xff]  ;;  %v3958_v2 = vld [vmem:[#allocation4 + $0x44] sm:$0xff]  ;;  %v3757_v7 = vld [vmem:[#allocation4 + $0x39] sm:$0xff] }
 0x4e1   : > { %v3755_v32 = vld [vmem:[#allocation4 + $0x29] sm:$0xff]  ;;  %v3897_v44 = vld [vmem:[#allocation4 + $0x3b] sm:$0xff]  ;;  %v3760_v6 = vld [vmem:[#allocation4 + $0x51] sm:$0xff] }
 0x4e2   : > { %3915 = vrot.lane.b32.xlu0 %v3894_v60, %s12926_s18  ;;  %v3634_v28 = vld [vmem:[#allocation4 + $0x28] sm:$0xff]  ;;  %v3636_v12 = vld [vmem:[#allocation4 + $0x38] sm:$0xff]  ;;  %v3637_v15 = vld [vmem:[#allocation4 + $0x40] sm:$0xff] }
 0x4e3   : > { %8934 = vmatmul.mubr.msk.f32.gmra.mrb[30].mxu1 %vm3585_vm2, %v4056_v63  ;;  %3780 = vrot.lane.b32.xlu1 %v3756_v55, %s12927_s24  ;;  %v3957_v20 = vld [vmem:[#allocation4 + $0x3c] sm:$0xff]  ;;  %v3759_v33 = vld [vmem:[#allocation4 + $0x49] sm:$0xff]  ;;  %v3900_v36 = vld [vmem:[#allocation4 + $0x53] sm:$0xff] }
 0x4e4   : > { %8936 = vmatprep.mubr.msk.f32.mxu1 %vm3585_vm2, %v4059_v24  ;;  %v3758_v37 = vld [vmem:[#allocation4 + $0x41] sm:$0xff]  ;;  %v3899_v47 = vld [vmem:[#allocation4 + $0x4b] sm:$0xff]  ;;  %v3960_v46 = vld [vmem:[#allocation4 + $0x54] sm:$0xff] }
 0x4e5   : > { %v3901_v49 = vld [vmem:[#allocation4 + $0x5b] sm:$0xff]  ;;  %v3638_v34 = vld [vmem:[#allocation4 + $0x48] sm:$0xff]  ;;  %v3639_v30 = vld [vmem:[#allocation4 + $0x50] sm:$0xff] }
 0x4e6   : > { %3975 = vrot.lane.b32.xlu0 %v3954_v40, %s12927_s24  ;;  %v3961_v26 = vld [vmem:[#allocation4 + $0x5c] sm:$0xff]  ;;  %v3959_v22 = vld [vmem:[#allocation4 + $0x4c] sm:$0xff]  ;;  %v3962_v48 = vld [vmem:[#allocation4 + $0x64] sm:$0xff] }
 0x4e7   : > { %3660 = vrot.lane.b32.xlu1 %v3635_v13, %s12925_s23  ;;  %v3761_v42 = vld [vmem:[#allocation4 + $0x59] sm:$0xff]  ;;  %8937 = vmatmul.mubr.msk.f32.gmra.mrb[32].mxu1 %vm3585_vm2, %v4062_v18 }
 0x4ea   : > { %3857 = vrot.lane.b32.xlu0 %v3894_v60, %s12925_s23 }
 0x4eb   : > { %3721 = vrot.lane.b32.xlu1 %v3756_v55, %s12926_s18 }
 0x4ee   : > { %3917 = vrot.lane.b32.xlu0 %v3895_v14, %s12926_s18 }
 0x4ef   : > { %3776 = vrot.lane.b32.xlu1 %v3754_v17, %s12927_s24 }
 0x4f2   : > { %3977 = vrot.lane.b32.xlu0 %v3955_v8, %s12927_s24 }
 0x4f3   : > { %3656 = vrot.lane.b32.xlu1 %v3633_v16, %s12925_s23 }
 0x4f6   : > { %3859 = vrot.lane.b32.xlu0 %v3895_v14, %s12925_s23 }
 0x4f7   : > { %3717 = vrot.lane.b32.xlu1 %v3754_v17, %s12926_s18 }
 0x4fa   : > { %3923 = vrot.lane.b32.xlu0 %v3898_v9, %s12926_s18 }
 0x4fb   : > { %3778 = vrot.lane.b32.xlu1 %v3755_v32, %s12927_s24 }
 0x4fe   : > { %3983 = vrot.lane.b32.xlu0 %v3958_v2, %s12927_s24 }
 0x4ff   : > { %3658 = vrot.lane.b32.xlu1 %v3634_v28, %s12925_s23 }
 0x502   : > { %3865 = vrot.lane.b32.xlu0 %v3898_v9, %s12925_s23 }
 0x503   : > { %3719 = vrot.lane.b32.xlu1 %v3755_v32, %s12926_s18 }
 0x506   : > { %3979 = vrot.lane.b32.xlu0 %v3956_v41, %s12927_s24 }
 0x507   : > { %3782 = vrot.lane.b32.xlu1 %v3757_v7, %s12927_s24 }
 0x50a   : > { %3921 = vrot.lane.b32.xlu0 %v3897_v44, %s12926_s18 }
 0x50b   : > { %3662 = vrot.lane.b32.xlu1 %v3636_v12, %s12925_s23 }
 0x50e   : > { %3981 = vrot.lane.b32.xlu0 %v3957_v20, %s12927_s24 }
 0x50f   : > { %3723 = vrot.lane.b32.xlu1 %v3757_v7, %s12926_s18 }
 0x512   : > { %3863 = vrot.lane.b32.xlu0 %v3897_v44, %s12925_s23 }
 0x513   : > { %3784 = vrot.lane.b32.xlu1 %v3758_v37, %s12927_s24 }
 0x516   : > { %3929 = vrot.lane.b32.xlu0 %v3901_v49, %s12926_s18 }
 0x517   : > { %3664 = vrot.lane.b32.xlu1 %v3637_v15, %s12925_s23 }
 0x51a   : > { %3989 = vrot.lane.b32.xlu0 %v3961_v26, %s12927_s24 }
 0x51b   : > { %3725 = vrot.lane.b32.xlu1 %v3758_v37, %s12926_s18 }
 0x51e   : > { %3871 = vrot.lane.b32.xlu0 %v3901_v49, %s12925_s23 }
 0x51f   : > { %3786 = vrot.lane.b32.xlu1 %v3759_v33, %s12927_s24 }
 0x522   : > { %3925 = vrot.lane.b32.xlu0 %v3899_v47, %s12926_s18 }
 0x523   : > { %3666 = vrot.lane.b32.xlu1 %v3638_v34, %s12925_s23 }
 0x526   : > { %3985 = vrot.lane.b32.xlu0 %v3959_v22, %s12927_s24 }
 0x527   : > { %3727 = vrot.lane.b32.xlu1 %v3759_v33, %s12926_s18 }
 0x52a   : > { %3867 = vrot.lane.b32.xlu0 %v3899_v47, %s12925_s23 }
 0x52b   : > { %3788 = vrot.lane.b32.xlu1 %v3760_v6, %s12927_s24 }
 0x52e   : > { %3927 = vrot.lane.b32.xlu0 %v3900_v36, %s12926_s18 }
 0x52f   : > { %3668 = vrot.lane.b32.xlu1 %v3639_v30, %s12925_s23 }
 0x532   : > { %3987 = vrot.lane.b32.xlu0 %v3960_v46, %s12927_s24 }
 0x533   : > { %3729 = vrot.lane.b32.xlu1 %v3760_v6, %s12926_s18 }
 0x536   : > { %3869 = vrot.lane.b32.xlu0 %v3900_v36, %s12925_s23  ;;  %s539_s23 = sand.u32 1, %s9686_s25  }
 0x537   : > { %3790 = vrot.lane.b32.xlu1 %v3761_v42, %s12927_s24  ;;  %s540_s29 = scalar_lea.vmem [#allocation8], %s539_s23  ;;  %s7872_s22 = scalar_lea.sflag [#allocation9], %s539_s23 }
 0x538   : > { %s7884_s30 = sshll.u32 %s540_s29, 4  ;;  %s12825_s30 = int_to_ptr.vmem [resolvable:$true] %s7884_s30 }
 0x539   : > { %s9632_s28 = scalar_lea.vmem %s12825_s30, 16 }
 0x53a   : > { %3931 = vrot.lane.b32.xlu0 %v3902_v57, %s12926_s18  ;;  %p9633_p11 = scmp.ne.s32.totalorder %s12825_s30, %s9632_s28 }
 0x53c   : > { %v3914_v35 = vpop.permute.xlu0 %3913  ;;  %p9634_p12 = pnand %p9633_p11, %p9842_p5 }
 0x53d   : > { %v3773_v52 = vpop.permute.xlu1 %3772 }
 0x53e   : > { %3803 = vst.msk [vmem:[#allocation5] sm:$0xff] %vm3802_vm5, %v3773_v52  ;;  %3991 = vrot.lane.b32.xlu0 %v3962_v48, %s12927_s24  ;;  %p9635_p13 = pneg %p9634_p12 }
 0x540   : > { %v3974_v53 = vpop.permute.xlu0 %3973 }
 0x541   : > { %v3653_v54 = vpop.permute.xlu1 %3652 }
 0x542   : > { %3682 = vst.msk [vmem:[#allocation5 + $0x18] sm:$0xff] %vm3680_vm3, %v3653_v54 }
 0x544   : > { %v3856_v50 = vpop.permute.xlu0 %3855 }
 0x545   : > { %3884 = vst.msk [vmem:[#allocation5 + $0x20] sm:$0xff] %vm3680_vm3, %v3856_v50  ;;  %v3714_v58 = vpop.permute.xlu1 %3713  ;;  %v4033_v4 = vld [vmem:[#allocation5] sm:$0xff] }
 0x546   : > { %3743 = vst.msk [vmem:[#allocation5 + $0x18] sm:$0xff] %vm3741_vm4, %v3714_v58 }
 0x548   : > { %v3854_v60 = vpop.permute.xlu0 %3853 }
 0x549   : > { %3883 = vst.msk [vmem:[#allocation5 + $0x8] sm:$0xff] %vm3680_vm3, %v3854_v60  ;;  %v3775_v56 = vpop.permute.xlu1 %3774 }
 0x54a   : > { %3943 = vst.msk [vmem:[#allocation5 + $0x8] sm:$0xff] %vm3741_vm4, %v3914_v35 }
 0x54b   : > { %3804 = vst.msk [vmem:[#allocation5 + $0x18] sm:$0xff] %vm3802_vm5, %v3775_v56  ;;  %4003 = vst.msk [vmem:[#allocation5 + $0x8] sm:$0xff] %vm3802_vm5, %v3974_v53 }
 0x54c   : > { %v3920_v19 = vpop.permute.xlu0 %3919 }
 0x54d   : > { %v3655_v63 = vpop.permute.xlu1 %3654 }
 0x54e   : > { %3683 = vst.msk [vmem:[#allocation5 + $0x30] sm:$0xff] %vm3680_vm3, %v3655_v63 }
 0x550   : > { %v3862_v55 = vpop.permute.xlu0 %3861 }
 0x551   : > { %3887 = vst.msk [vmem:[#allocation5 + $0x68] sm:$0xff] %vm3680_vm3, %v3862_v55  ;;  %v3716_v62 = vpop.permute.xlu1 %3715 }
 0x552   : > { %3744 = vst.msk [vmem:[#allocation5 + $0x30] sm:$0xff] %vm3741_vm4, %v3716_v62  ;;  %v4034_v59 = vld [vmem:[#allocation5 + $0x8] sm:$0xff]  ;;  %v4036_v39 = vld [vmem:[#allocation5 + $0x18] sm:$0xff] }
 0x553   : > { %4193 = vmatprep.mubr.f32.mxu0 %v4034_v59 }
 0x554   : > { %v3916_v10 = vpop.permute.xlu0 %3915  ;;  %4194 = vmatmul.mubr.f32.vlgmr.msra.gmra.mrb[36].mxu0 %v4033_v4 }
 0x555   : > { %3944 = vst.msk [vmem:[#allocation5 + $0x20] sm:$0xff] %vm3741_vm4, %v3916_v10  ;;  %v3781_v24 = vpop.permute.xlu1 %3780 }
 0x558   : > { %v3976_v5 = vpop.permute.xlu0 %3975 }
 0x559   : > { %4004 = vst.msk [vmem:[#allocation5 + $0x20] sm:$0xff] %vm3802_vm5, %v3976_v5  ;;  %v3661_v21 = vpop.permute.xlu1 %3660 }
 0x55a   : > { %3686 = vst.msk [vmem:[#allocation5 + $0x78] sm:$0xff] %vm3680_vm3, %v3661_v21 }
 0x55c   : > { %v3858_v25 = vpop.permute.xlu0 %3857 }
 0x55d   : > { %3885 = vst.msk [vmem:[#allocation5 + $0x38] sm:$0xff] %vm3680_vm3, %v3858_v25  ;;  %v3722_v29 = vpop.permute.xlu1 %3721 }
 0x55e   : > { %3747 = vst.msk [vmem:[#allocation5 + $0x78] sm:$0xff] %vm3741_vm4, %v3722_v29 }
 0x560   : > { %v3918_v27 = vpop.permute.xlu0 %3917  ;;  %v4037_v31 = vld [vmem:[#allocation5 + $0x20] sm:$0xff] }
 0x561   : > { %3945 = vst.msk [vmem:[#allocation5 + $0x38] sm:$0xff] %vm3741_vm4, %v3918_v27  ;;  %4198 = vmatprep.mubr.f32.mxu0 %v4037_v31  ;;  %v3777_v38 = vpop.permute.xlu1 %3776 }
 0x562   : > { %3805 = vst.msk [vmem:[#allocation5 + $0x30] sm:$0xff] %vm3802_vm5, %v3777_v38  ;;  %4199 = vmatmul.mubr.f32.gmra.mrb[38].mxu0 %v4036_v39 }
 0x564   : > { %v3978_v23 = vpop.permute.xlu0 %3977 }
 0x565   : > { %4005 = vst.msk [vmem:[#allocation5 + $0x38] sm:$0xff] %vm3802_vm5, %v3978_v23  ;;  %v3657_v51 = vpop.permute.xlu1 %3656 }
 0x566   : > { %3684 = vst.msk [vmem:[#allocation5 + $0x48] sm:$0xff] %vm3680_vm3, %v3657_v51 }
 0x568   : > { %v3860_v61 = vpop.permute.xlu0 %3859 }
 0x569   : > { %3886 = vst.msk [vmem:[#allocation5 + $0x50] sm:$0xff] %vm3680_vm3, %v3860_v61  ;;  %v3718_v1 = vpop.permute.xlu1 %3717  ;;  %v4039_v3 = vld [vmem:[#allocation5 + $0x30] sm:$0xff] }
 0x56a   : > { %3946 = vst.msk [vmem:[#allocation5 + $0x50] sm:$0xff] %vm3741_vm4, %v3920_v19  ;;  %3745 = vst.msk [vmem:[#allocation5 + $0x48] sm:$0xff] %vm3741_vm4, %v3718_v1 }
 0x56c   : > { %v3924_v11 = vpop.permute.xlu0 %3923  ;;  %v4040_v43 = vld [vmem:[#allocation5 + $0x38] sm:$0xff] }
 0x56d   : > { %v3779_v40 = vpop.permute.xlu1 %3778  ;;  %4203 = vmatprep.mubr.f32.mxu0 %v4040_v43 }
 0x56e   : > { %3806 = vst.msk [vmem:[#allocation5 + $0x48] sm:$0xff] %vm3802_vm5, %v3779_v40  ;;  %4204 = vmatmul.mubr.f32.gmra.mrb[40].mxu0 %v4039_v3 }
 0x570   : > { %v3984_v13 = vpop.permute.xlu0 %3983 }
 0x571   : > { %v3659_v14 = vpop.permute.xlu1 %3658 }
 0x572   : > { %3685 = vst.msk [vmem:[#allocation5 + $0x60] sm:$0xff] %vm3680_vm3, %v3659_v14 }
 0x574   : > { %v3866_v17 = vpop.permute.xlu0 %3865 }
 0x575   : > { %3889 = vst.msk [vmem:[#allocation5 + $0x98] sm:$0xff] %vm3680_vm3, %v3866_v17  ;;  %v3720_v8 = vpop.permute.xlu1 %3719  ;;  %v4042_v44 = vld [vmem:[#allocation5 + $0x48] sm:$0xff]  ;;  %v11559_v17 = vld [vmem:[%s12871_s6] ss:$0 sm:$0xff] }
 0x576   : > { %3746 = vst.msk [vmem:[#allocation5 + $0x60] sm:$0xff] %vm3741_vm4, %v3720_v8 }
 0x577   : > { %3807 = vst.msk [vmem:[#allocation5 + $0x60] sm:$0xff] %vm3802_vm5, %v3781_v24 }
 0x578   : > { %v3980_v16 = vpop.permute.xlu0 %3979 }
 0x579   : > { %4006 = vst.msk [vmem:[#allocation5 + $0x50] sm:$0xff] %vm3802_vm5, %v3980_v16  ;;  %v3783_v9 = vpop.permute.xlu1 %3782 }
 0x57a   : > { %3808 = vst.msk [vmem:[#allocation5 + $0x78] sm:$0xff] %vm3802_vm5, %v3783_v9 }
 0x57c   : > { %v3922_v32 = vpop.permute.xlu0 %3921 }
 0x57d   : > { %3947 = vst.msk [vmem:[#allocation5 + $0x68] sm:$0xff] %vm3741_vm4, %v3922_v32  ;;  %v3663_v2 = vpop.permute.xlu1 %3662 }
 0x57e   : > { %3687 = vst.msk [vmem:[#allocation5 + $0x90] sm:$0xff] %vm3680_vm3, %v3663_v2  ;;  %v4045_v26 = vld [vmem:[#allocation5 + $0x60] sm:$0xff]  ;;  %v11565_v2 = vld [vmem:[%s12872_s7] ss:$0 sm:$0xff] }
 0x580   : > { %v3982_v28 = vpop.permute.xlu0 %3981  ;;  %v4043_v41 = vld [vmem:[#allocation5 + $0x50] sm:$0xff] }
 0x581   : > { %4007 = vst.msk [vmem:[#allocation5 + $0x68] sm:$0xff] %vm3802_vm5, %v3982_v28  ;;  %v3724_v7 = vpop.permute.xlu1 %3723  ;;  %4208 = vmatprep.mubr.f32.mxu0 %v4043_v41  ;;  %v4048_v22 = vld [vmem:[#allocation5 + $0x78] sm:$0xff] }
 0x582   : > { %3748 = vst.msk [vmem:[#allocation5 + $0x90] sm:$0xff] %vm3741_vm4, %v3724_v7  ;;  %4209 = vmatmul.mubr.f32.gmra.mrb[42].mxu0 %v4042_v44 }
 0x584   : > { %v3864_v12 = vpop.permute.xlu0 %3863 }
 0x585   : > { %3888 = vst.msk [vmem:[#allocation5 + $0x80] sm:$0xff] %vm3680_vm3, %v3864_v12  ;;  %v3785_v20 = vpop.permute.xlu1 %3784 }
 0x586   : > { %3948 = vst.msk [vmem:[#allocation5 + $0x80] sm:$0xff] %vm3741_vm4, %v3924_v11  ;;  %v4491_v11 = vld [vmem:[%s12873_s8] sm:$0xff] }
 0x587   : > { %3809 = vst.msk [vmem:[#allocation5 + $0x90] sm:$0xff] %vm3802_vm5, %v3785_v20  ;;  %4008 = vst.msk [vmem:[#allocation5 + $0x80] sm:$0xff] %vm3802_vm5, %v3984_v13  ;;  %8957 = vmatprep.mubr.msk.f32.mxu1 %vm4493_vm6, %v4491_v11 }
 0x588   : > { %v3930_v37 = vpop.permute.xlu0 %3929  ;;  %v4046_v49 = vld [vmem:[#allocation5 + $0x68] sm:$0xff] }
 0x589   : > { %v3665_v15 = vpop.permute.xlu1 %3664  ;;  %4213 = vmatprep.mubr.f32.mxu0 %v4046_v49 }
 0x58a   : > { %3688 = vst.msk [vmem:[#allocation5 + $0xa8] sm:$0xff] %vm3680_vm3, %v3665_v15  ;;  %4214 = vmatmul.mubr.f32.gmra.mrb[44].mxu0 %v4045_v26 }
 0x58c   : > { %v3990_v33 = vpop.permute.xlu0 %3989 }
 0x58d   : > { %v3726_v47 = vpop.permute.xlu1 %3725 }
 0x58e   : > { %3749 = vst.msk [vmem:[#allocation5 + $0xa8] sm:$0xff] %vm3741_vm4, %v3726_v47  ;;  %v4049_v34 = vld [vmem:[#allocation5 + $0x80] sm:$0xff]  ;;  %v4051_v53 = vld [vmem:[#allocation5 + $0x90] sm:$0xff] }
 0x58f   : > { %4218 = vmatprep.mubr.f32.mxu0 %v4049_v34 }
 0x590   : > { %v3872_v6 = vpop.permute.xlu0 %3871  ;;  %4219 = vmatmul.mubr.f32.gmra.mrb[46].mxu0 %v4048_v22 }
 0x591   : > { %3892 = vst.msk [vmem:[#allocation5 + $0xe0] sm:$0xff] %vm3680_vm3, %v3872_v6  ;;  %v3787_v36 = vpop.permute.xlu1 %3786 }
 0x592   : > { %3810 = vst.msk [vmem:[#allocation5 + $0xa8] sm:$0xff] %vm3802_vm5, %v3787_v36 }
 0x594   : > { %v3926_v30 = vpop.permute.xlu0 %3925 }
 0x595   : > { %3949 = vst.msk [vmem:[#allocation5 + $0x98] sm:$0xff] %vm3741_vm4, %v3926_v30  ;;  %v3667_v46 = vpop.permute.xlu1 %3666 }
 0x596   : > { %3689 = vst.msk [vmem:[#allocation5 + $0xc0] sm:$0xff] %vm3680_vm3, %v3667_v46 }
 0x598   : > { %v3986_v42 = vpop.permute.xlu0 %3985 }
 0x599   : > { %4009 = vst.msk [vmem:[#allocation5 + $0x98] sm:$0xff] %vm3802_vm5, %v3986_v42  ;;  %v3728_v45 = vpop.permute.xlu1 %3727  ;;  %v4054_v62 = vld [vmem:[#allocation5 + $0xa8] sm:$0xff] }
 0x59a   : > { %3750 = vst.msk [vmem:[#allocation5 + $0xc0] sm:$0xff] %vm3741_vm4, %v3728_v45 }
 0x59c   : > { %v3868_v57 = vpop.permute.xlu0 %3867 }
 0x59d   : > { %3890 = vst.msk [vmem:[#allocation5 + $0xb0] sm:$0xff] %vm3680_vm3, %v3868_v57  ;;  %v3789_v48 = vpop.permute.xlu1 %3788 }
 0x59e   : > { %3811 = vst.msk [vmem:[#allocation5 + $0xc0] sm:$0xff] %vm3802_vm5, %v3789_v48 }
 0x5a0   : > { %v3928_v35 = vpop.permute.xlu0 %3927  ;;  %v4052_v52 = vld [vmem:[#allocation5 + $0x98] sm:$0xff] }
 0x5a1   : > { %3950 = vst.msk [vmem:[#allocation5 + $0xb0] sm:$0xff] %vm3741_vm4, %v3928_v35  ;;  %v3669_v18 = vpop.permute.xlu1 %3668  ;;  %4223 = vmatprep.mubr.f32.mxu0 %v4052_v52 }
 0x5a2   : > { %3690 = vst.msk [vmem:[#allocation5 + $0xd8] sm:$0xff] %vm3680_vm3, %v3669_v18  ;;  %4224 = vmatmul.mubr.f32.gmra.mrb[48].mxu0 %v4051_v53 }
 0x5a4   : > { %v3988_v54 = vpop.permute.xlu0 %3987 }
 0x5a5   : > { %4010 = vst.msk [vmem:[#allocation5 + $0xb0] sm:$0xff] %vm3802_vm5, %v3988_v54  ;;  %v3730_v50 = vpop.permute.xlu1 %3729  ;;  %v4057_v25 = vld [vmem:[#allocation5 + $0xc0] sm:$0xff] }
 0x5a6   : > { %3751 = vst.msk [vmem:[#allocation5 + $0xd8] sm:$0xff] %vm3741_vm4, %v3730_v50 }
 0x5a8   : > { %v3870_v58 = vpop.permute.xlu0 %3869 }
 0x5a9   : > { %3891 = vst.msk [vmem:[#allocation5 + $0xc8] sm:$0xff] %vm3680_vm3, %v3870_v58  ;;  %v3791_v60 = vpop.permute.xlu1 %3790 }
 0x5aa   : > { %3951 = vst.msk [vmem:[#allocation5 + $0xc8] sm:$0xff] %vm3741_vm4, %v3930_v37  ;;  %v8926_v56 = vpop.f32.mrb[24].mxu1 }
 0x5ab   : > { %3812 = vst.msk [vmem:[#allocation5 + $0xd8] sm:$0xff] %vm3802_vm5, %v3791_v60  ;;  %4011 = vst.msk [vmem:[#allocation5 + $0xc8] sm:$0xff] %vm3802_vm5, %v3990_v33  ;;  %v4310_v19 = vpop.f32.mrb[25].mxu1 }
 0x5ac   : > { %v3932_v63 = vpop.permute.xlu0 %3931  ;;  %v4055_v55 = vld [vmem:[#allocation5 + $0xb0] sm:$0xff] }
 0x5ad   : > { %3952 = vst.msk [vmem:[#allocation5 + $0xe0] sm:$0xff] %vm3741_vm4, %v3932_v63  ;;  %4228 = vmatprep.mubr.f32.mxu0 %v4055_v55 }
 0x5ae   : > { %4229 = vmatmul.mubr.f32.gmra.mrb[50].mxu0 %v4054_v62  ;;  %v8929_v59 = vpop.f32.mrb[26].mxu1 }
 0x5af   : > { %v4320_v4 = vpop.f32.mrb[27].mxu1 }
 0x5b0   : > { %v3992_v10 = vpop.permute.xlu0 %3991 }
 0x5b1   : > { %4012 = vst.msk [vmem:[#allocation5 + $0xe0] sm:$0xff] %vm3802_vm5, %v3992_v10 }
 0x5b2   : > { %v11542_v24 = vpop.f32.mrb[28].mxu1  ;;  %v4058_v5 = vld [vmem:[#allocation5 + $0xc8] sm:$0xff]  ;;  %v4060_v38 = vld [vmem:[#allocation5 + $0xd8] sm:$0xff] }
 0x5b3   : > { %4233 = vmatprep.mubr.f32.mxu0 %v4058_v5  ;;  %v4330_v21 = vpop.f32.mrb[29].mxu1 }
 0x5b4   : > { %4234 = vmatmul.mubr.f32.gmra.mrb[52].mxu0 %v4057_v25 }
 0x5b6   : > { %v11544_v29 = vpop.f32.mrb[30].mxu1 }
 0x5b7   : > { %v11546_v27 = vpop.f32.mrb[31].mxu1 }
 0x5b8   : > { %v4061_v31 = vld [vmem:[#allocation5 + $0xe0] sm:$0xff] }
 0x5b9   : > { %4238 = vmatprep.mubr.f32.mxu0 %v4061_v31 }
 0x5ba   : > { %4239 = vmatmul.mubr.f32.gmra.mrb[54].mxu0 %v4060_v38  ;;  %v11548_v39 = vpop.f32.mrb[32].mxu1 }
 0x5bb   : > { %v11550_v23 = vpop.f32.mrb[33].mxu1 }
 0x627   : > { %v8667_v51 = vpop.f32.mrb[36].mxu0 }
 0x628   : > { %v8668_v61 = vpop.f32.mrb[37].mxu0 }
 0x629   : > { %v8669_v1 = vadd.f32 %v8668_v61, %v8667_v51 }
 0x62b   : > { %v4311_v43 = vadd.f32 %v8669_v1, %v4310_v19 }
 0x62d   : > { %v4366_v7 = vmul.f32 %v11559_v17, %v4311_v43 }
 0x62f   : > { %v4383_v37 = vadd.f32 %v11565_v2, %v4366_v7 }
 0x631   : > { %v4393_v33 = vmax.f32 %v4383_v37, 0.0 }
 0x635   : > { %v8670_v40 = vpop.f32.mrb[38].mxu0 }
 0x636   : > { %v8671_v3 = vpop.f32.mrb[39].mxu0 }
 0x637   : > { %v8672_v13 = vadd.f32 %v8671_v3, %v8670_v40 }
 0x639   : > { %v4316_v14 = vadd.f32 %v8926_v56, %v8672_v13 }
 0x63b   : > { %v4367_v8 = vmul.f32 %v11559_v17, %v4316_v14 }
 0x63d   : > { %v4384_v28 = vadd.f32 %v11565_v2, %v4367_v8 }
 0x63f   : > { %v4394_v12 = vmax.f32 %v4384_v28, 0.0 }
 0x641   : > { %v8673_v16 = vpop.f32.mrb[40].mxu0  ;;  %v4412_v15 = vrot.slane %v4394_v12, 2 }
 0x642   : > { %v8674_v9 = vpop.f32.mrb[41].mxu0 }
 0x643   : > { %v8675_v32 = vadd.f32 %v8674_v9, %v8673_v16 }
 0x645   : > { %v4321_v41 = vadd.f32 %v8675_v32, %v4320_v4 }
 0x647   : > { %v4368_v44 = vmul.f32 %v11559_v17, %v4321_v41 }
 0x649   : > { %v4385_v20 = vadd.f32 %v11565_v2, %v4368_v44 }
 0x64b   : > { %v4395_v49 = vmax.f32 %v4385_v20, 0.0 }
 0x64d   : > { %v4413_v26 = vrot.slane %v4395_v49, 2 }
 0x64f   : > { %v4414_v47 = vsel %vm3016_vm13, %v4412_v15, %v4413_v26 }
 0x650   : > { %v4438_v34 = vmax.f32 %v4393_v33, %v4414_v47 }
 0x652   : > { %v4456_v63 = vrot.slane %v4438_v34, 1 }
 0x655   : > { %v8676_v22 = vpop.f32.mrb[42].mxu0 }
 0x656   : > { %v8677_v6 = vpop.f32.mrb[43].mxu0 }
 0x657   : > { %v8678_v36 = vadd.f32 %v8677_v6, %v8676_v22 }
 0x659   : > { %v4326_v30 = vadd.f32 %v8929_v59, %v8678_v36 }
 0x65b   : > { %v4369_v46 = vmul.f32 %v11559_v17, %v4326_v30 }
 0x65d   : > { %v4386_v42 = vadd.f32 %v11565_v2, %v4369_v46  ;;  %v8679_v45 = vpop.f32.mrb[44].mxu0 }
 0x65e   : > { %v8680_v57 = vpop.f32.mrb[45].mxu0 }
 0x65f   : > { %v4396_v48 = vmax.f32 %v4386_v42, 0.0  ;;  %v8681_v35 = vadd.f32 %v8680_v57, %v8679_v45 }
 0x661   : > { %v4415_v52 = vrot.slane %v4396_v48, 2  ;;  %v4331_v18 = vadd.f32 %v8681_v35, %v4330_v21 }
 0x663   : > { %v4370_v53 = vmul.f32 %v11559_v17, %v4331_v18  ;;  %v8682_v54 = vpop.f32.mrb[46].mxu0  ;;  %v4416_v50 = vsel %vm3016_vm13, %v4413_v26, %v4415_v52 }
 0x664   : > { %v8683_v58 = vpop.f32.mrb[47].mxu0  ;;  %v4439_v60 = vmax.f32 %v4394_v12, %v4416_v50 }
 0x665   : > { %v4387_v56 = vadd.f32 %v11565_v2, %v4370_v53  ;;  %v8684_v19 = vadd.f32 %v8683_v58, %v8682_v54 }
 0x666   : > { %v4457_v55 = vrot.slane %v4439_v60, 1 }
 0x667   : > { %v4397_v62 = vmax.f32 %v4387_v56, 0.0  ;;  %v4336_v59 = vadd.f32 %v11542_v24, %v8684_v19 }
 0x668   : > { %v4458_v4 = vsel %vm3186_vm14, %v4456_v63, %v4457_v55 }
 0x669   : > { %v4417_v10 = vrot.slane %v4397_v62, 2  ;;  %v4371_v5 = vmul.f32 %v11559_v17, %v4336_v59  ;;  %v4482_v21 = vmax.f32 %v4438_v34, %v4458_v4 }
 0x66b   : > { %v4418_v25 = vsel %vm3016_vm13, %v4415_v52, %v4417_v10  ;;  %v4388_v31 = vadd.f32 %v11565_v2, %v4371_v5 }
 0x66c   : > { %v4440_v38 = vmax.f32 %v4395_v49, %v4418_v25 }
 0x66d   : > { %v4398_v51 = vmax.f32 %v4388_v31, 0.0 }
 0x66e   : > { %v4459_v61 = vrot.slane %v4440_v38, 1 }
 0x66f   : > { %v4419_v1 = vrot.slane %v4398_v51, 2 }
 0x670   : > { %v4460_v11 = vsel %vm3186_vm14, %v4457_v55, %v4459_v61 }
 0x671   : > { %v4483_v43 = vmax.f32 %v4439_v60, %v4460_v11  ;;  %v4420_v40 = vsel %vm3016_vm13, %v4417_v10, %v4419_v1 }
 0x672   : > { %v4441_v24 = vmax.f32 %v4396_v48, %v4420_v40 }
 0x673   : > { %v9078_v3 = vpack.c.bf16 %v4483_v43, %v4482_v21 }
 0x674   : > { %v4461_v13 = vrot.slane %v4441_v24, 1 }
 0x675   : > { %v8685_v14 = vpop.f32.mrb[48].mxu0  ;;  %9079 = vmatprep.subr.bf16.mxu1 %v9078_v3 }
 0x676   : > { %v8686_v8 = vpop.f32.mrb[49].mxu0  ;;  %9081 = vmatpush3.bf16.msra.mxu1 %v9078_v3  ;;  %v4462_v16 = vsel %vm3186_vm14, %v4459_v61, %v4461_v13 }
 0x677   : > { %v8687_v9 = vadd.f32 %v8686_v8, %v8685_v14  ;;  %v4484_v32 = vmax.f32 %v4440_v38, %v4462_v16  ;;  %v4726_v14 = vld [vmem:[%s12874_s9 + $0x80] sm:$0xff]  ;;  %v4727_v8 = vld [vmem:[%s12874_s9 + $0x88] sm:$0xff] }
 0x678   : > { %v4710_v16 = vld [vmem:[%s12874_s9] sm:$0xff] }
 0x679   : > { %v4341_v28 = vadd.f32 %v8687_v9, %v11546_v27  ;;  %v9094_v9 = vpack.c.bf16 %v4727_v8, %v4726_v14  ;;  %v4748_v14 = vld [vmem:[%s12874_s9 + $0x130] sm:$0xff]  ;;  %v4749_v8 = vld [vmem:[%s12874_s9 + $0x138] sm:$0xff] }
 0x67b   : > { %v4372_v41 = vmul.f32 %v11559_v17, %v4341_v28  ;;  %v4728_v28 = vld [vmem:[%s12874_s9 + $0x90] sm:$0xff]  ;;  %9095 = vmatprep.subr.bf16.mxu0 %v9094_v9 }
 0x67d   : > { %v4389_v7 = vadd.f32 %v11565_v2, %v4372_v41  ;;  %v4729_v41 = vld [vmem:[%s12874_s9 + $0x98] sm:$0xff] }
 0x67f   : > { %v4399_v44 = vmax.f32 %v4389_v7, 0.0 }
 0x681   : > { %v4421_v12 = vrot.slane %v4399_v44, 2  ;;  %v8688_v20 = vpop.f32.mrb[50].mxu0 }
 0x682   : > { %v8689_v37 = vpop.f32.mrb[51].mxu0 }
 0x683   : > { %v4422_v49 = vsel %vm3016_vm13, %v4419_v1, %v4421_v12  ;;  %v8690_v15 = vadd.f32 %v8689_v37, %v8688_v20  ;;  %v4713_v20 = vld [vmem:[%s12874_s9 + $0x18] sm:$0xff]  ;;  %v4730_v37 = vld [vmem:[%s12874_s9 + $0xa0] sm:$0xff] }
 0x684   : > { %v4442_v26 = vmax.f32 %v4397_v62, %v4422_v49  ;;  %v4731_v49 = vld [vmem:[%s12874_s9 + $0xa8] sm:$0xff] }
 0x685   : > { %v4346_v33 = vadd.f32 %v11544_v29, %v8690_v15 }
 0x686   : > { %v4463_v47 = vrot.slane %v4442_v26, 1 }
 0x687   : > { %v4373_v34 = vmul.f32 %v11559_v17, %v4346_v33  ;;  %v8691_v22 = vpop.f32.mrb[52].mxu0  ;;  %v4758_v33 = vld [vmem:[%s12874_s9 + $0x180] sm:$0xff] }
 0x688   : > { %v8692_v6 = vpop.f32.mrb[53].mxu0  ;;  %v4464_v27 = vsel %vm3186_vm14, %v4461_v13, %v4463_v47  ;;  %v4492_v13 = vld [vmem:[%s12873_s8 + $0x8] sm:$0xff] }
 0x689   : > { %v4390_v36 = vadd.f32 %v11565_v2, %v4373_v34  ;;  %v8693_v30 = vadd.f32 %v8692_v6, %v8691_v22  ;;  %v4485_v46 = vmax.f32 %v4441_v24, %v4464_v27  ;;  %v4715_v34 = vld [vmem:[%s12874_s9 + $0x28] sm:$0xff]  ;;  %v4732_v22 = vld [vmem:[%s12874_s9 + $0xb0] sm:$0xff]  ;;  %v4733_v27 = vld [vmem:[%s12874_s9 + $0xb8] sm:$0xff] }
 0x68a   : > { %v4759_v6 = vld [vmem:[%s12874_s9 + $0x188] sm:$0xff] }
 0x68b   : > { %v4400_v42 = vmax.f32 %v4390_v36, 0.0  ;;  %v4351_v45 = vadd.f32 %v8693_v30, %v11550_v23  ;;  %v9082_v57 = vpack.c.bf16 %v4485_v46, %v4484_v32  ;;  %v4711_v32 = vld [vmem:[%s12874_s9 + $0x8] sm:$0xff]  ;;  %v9126_v36 = vpack.c.bf16 %v4759_v6, %v4758_v33  ;;  %v4742_v30 = vld [vmem:[%s12874_s9 + $0x100] sm:$0xff]  ;;  %v4769_v6 = vld [vmem:[%s12874_s9 + $0x1d8] sm:$0xff] }
 0x68c   : > { %v9096_v7 = vpack.c.bf16 %v4711_v32, %v4710_v16  ;;  %v4743_v46 = vld [vmem:[%s12874_s9 + $0x108] sm:$0xff]  ;;  %v9140_v32 = vpack.c.bf16 %v4749_v8, %v4748_v14  ;;  %v4750_v33 = vld [vmem:[%s12874_s9 + $0x140] sm:$0xff] }
 0x68d   : > { %v4423_v48 = vrot.slane %v4400_v42, 2  ;;  %v4374_v35 = vmul.f32 %v11559_v17, %v4351_v45  ;;  %v8694_v52 = vpop.f32.mrb[54].mxu0  ;;  %9083 = vmatprep.subr.bf16.mxu1 %v9082_v57  ;;  %v4760_v45 = vld [vmem:[%s12874_s9 + $0x190] sm:$0xff]  ;;  %v4774_v14 = vld [vmem:[%s12874_s9 + $0x200] sm:$0xff]  ;;  %v4775_v8 = vld [vmem:[%s12874_s9 + $0x208] sm:$0xff] }
 0x68e   : > { %v8695_v29 = vpop.f32.mrb[55].mxu0  ;;  %9085 = vmatpush3.bf16.msra.mxu1 %v9082_v57  ;;  %9097 = vmatpush3.bf16.msra.mxu0 %v9096_v7  ;;  %v4761_v57 = vld [vmem:[%s12874_s9 + $0x198] sm:$0xff] }
 0x68f   : > { %v4391_v18 = vadd.f32 %v11565_v2, %v4374_v35  ;;  %v8696_v53 = vadd.f32 %v8695_v29, %v8694_v52  ;;  %v4424_v54 = vsel %vm3016_vm13, %v4421_v12, %v4423_v48  ;;  %v4712_v12 = vld [vmem:[%s12874_s9 + $0x10] sm:$0xff]  ;;  %v9130_v52 = vpack.c.bf16 %v4761_v57, %v4760_v45  ;;  %v4741_v7 = vld [vmem:[%s12874_s9 + $0xf8] sm:$0xff] }
 0x690   : > { %v4443_v50 = vmax.f32 %v4398_v51, %v4424_v54  ;;  %v9100_v15 = vpack.c.bf16 %v4713_v20, %v4712_v12  ;;  %v4716_v35 = vld [vmem:[%s12874_s9 + $0x30] sm:$0xff]  ;;  %v4734_v54 = vld [vmem:[%s12874_s9 + $0xc0] sm:$0xff]  ;;  %v4767_v20 = vld [vmem:[%s12874_s9 + $0x1c8] sm:$0xff] }
 0x691   : > { %v4401_v58 = vmax.f32 %v4391_v18, 0.0  ;;  %v4356_v60 = vadd.f32 %v11548_v39, %v8696_v53  ;;  %v4744_v29 = vld [vmem:[%s12874_s9 + $0x110] sm:$0xff]  ;;  %v9106_v18 = vpack.c.bf16 %v4733_v27, %v4732_v22  ;;  %v4717_v53 = vld [vmem:[%s12874_s9 + $0x38] sm:$0xff] }
 0x692   : > { %v4465_v56 = vrot.slane %v4443_v50, 1  ;;  %v4768_v22 = vld [vmem:[%s12874_s9 + $0x1d0] sm:$0xff] }
 0x693   : > { %v4425_v19 = vrot.slane %v4401_v58, 2  ;;  %v4375_v23 = vmul.f32 %v11559_v17, %v4356_v60  ;;  %v9146_v27 = vpack.c.bf16 %v4769_v6, %v4768_v22 }
 0x694   : > { %v4466_v63 = vsel %vm3186_vm14, %v4463_v47, %v4465_v56  ;;  %v9102_v47 = vpack.c.bf16 %v4731_v49, %v4730_v37  ;;  %v4724_v37 = vld [vmem:[%s12874_s9 + $0x70] sm:$0xff]  ;;  %v4725_v49 = vld [vmem:[%s12874_s9 + $0x78] sm:$0xff] }
 0x695   : > { %v4426_v55 = vsel %vm3016_vm13, %v4423_v48, %v4425_v19  ;;  %v4392_v62 = vadd.f32 %v11565_v2, %v4375_v23  ;;  %v4486_v59 = vmax.f32 %v4442_v26, %v4466_v63  ;;  %v4714_v26 = vld [vmem:[%s12874_s9 + $0x20] sm:$0xff] }
 0x696   : > { %v4444_v4 = vmax.f32 %v4399_v44, %v4426_v55  ;;  %v9098_v44 = vpack.c.bf16 %v4729_v41, %v4728_v28  ;;  %v9104_v48 = vpack.c.bf16 %v4715_v34, %v4714_v26  ;;  %v4746_v63 = vld [vmem:[%s12874_s9 + $0x120] sm:$0xff]  ;;  %v4747_v55 = vld [vmem:[%s12874_s9 + $0x128] sm:$0xff]  ;;  %v4740_v41 = vld [vmem:[%s12874_s9 + $0xf0] sm:$0xff]  ;;  %v9124_v26 = vpack.c.bf16 %v4725_v49, %v4724_v37 }
 0x697   : > { %v4402_v10 = vmax.f32 %v4392_v62, 0.0  ;;  %v9108_v62 = vpack.c.bf16 %v4717_v53, %v4716_v35  ;;  %v9122_v12 = vpack.c.bf16 %v4741_v7, %v4740_v41 }
 0x698   : > { %v4467_v5 = vrot.slane %v4444_v4, 1  ;;  %9099 = vmatprep.subr.bf16.mxu0 %v9098_v44  ;;  %v4766_v44 = vld [vmem:[%s12874_s9 + $0x1c0] sm:$0xff] }
 0x699   : > { %v4427_v21 = vrot.slane %v4402_v10, 2  ;;  %9101 = vmatpush3.bf16.msra.mxu0 %v9100_v15  ;;  %v4719_v10 = vld [vmem:[%s12874_s9 + $0x48] sm:$0xff]  ;;  %v9142_v15 = vpack.c.bf16 %v4767_v20, %v4766_v44  ;;  %v4777_v44 = vld [vmem:[%s12874_s9 + $0x218] sm:$0xff] }
 0x69a   : > { %v4468_v25 = vsel %vm3186_vm14, %v4465_v56, %v4467_v5  ;;  %9103 = vmatprep.subr.bf16.mxu0 %v9102_v47  ;;  %v4762_v56 = vld [vmem:[%s12874_s9 + $0x1a0] sm:$0xff]  ;;  %v4751_v47 = vld [vmem:[%s12874_s9 + $0x148] sm:$0xff] }
 0x69b   : > { %v4446_v31 = vmax.f32 %v4401_v58, %v4427_v21  ;;  %v4487_v38 = vmax.f32 %v4443_v50, %v4468_v25  ;;  %v4428_v39 = vsel %vm3016_vm13, %v4425_v19, %v4427_v21  ;;  %v4745_v50 = vld [vmem:[%s12874_s9 + $0x118] sm:$0xff]  ;;  %v4735_v58 = vld [vmem:[%s12874_s9 + $0xc8] sm:$0xff]  ;;  %v4736_v21 = vld [vmem:[%s12874_s9 + $0xd0] sm:$0xff]  ;;  %v9144_v34 = vpack.c.bf16 %v4751_v47, %v4750_v33 }
 0x69c   : > { %v4445_v51 = vmax.f32 %v4400_v42, %v4428_v39  ;;  %v9128_v42 = vpack.c.bf16 %v4743_v46, %v4742_v30  ;;  %v9132_v60 = vpack.c.bf16 %v4745_v50, %v4744_v29  ;;  %v4763_v19 = vld [vmem:[%s12874_s9 + $0x1a8] sm:$0xff]  ;;  %v4737_v25 = vld [vmem:[%s12874_s9 + $0xd8] sm:$0xff]  ;;  %v4720_v39 = vld [vmem:[%s12874_s9 + $0x50] sm:$0xff]  ;;  %v9709_v46 = vmov 0.0|0.0  }
 0x69d   : > { %v9086_v61 = vpack.c.bf16 %v4487_v38, %v4486_v59  ;;  %v4471_v17 = vrot.slane %v4446_v31, 1  ;;  %v9134_v23 = vpack.c.bf16 %v4763_v19, %v4762_v56  ;;  %9105 = vmatpush3.bf16.msra.mxu0 %v9104_v48  ;;  %v9110_v59 = vpack.c.bf16 %v4735_v58, %v4734_v54  ;;  %v4753_v30 = vld [vmem:[%s12874_s9 + $0x158] sm:$0xff]  ;;  %v4771_v56 = vld [vmem:[%s12874_s9 + $0x1e8] sm:$0xff]  ;;  %v4754_v19 = vld [vmem:[%s12874_s9 + $0x160] sm:$0xff] }
 0x69e   : > { %v4469_v1 = vrot.slane %v4445_v51, 1  ;;  %9107 = vmatprep.subr.bf16.mxu0 %v9106_v18  ;;  %v9114_v38 = vpack.c.bf16 %v4737_v25, %v4736_v21  ;;  %v4780_v47 = vld [vmem:[%s12874_s9 + $0x230] sm:$0xff]  ;;  %vm7869_vm13 = vcmask 16384  }
 0x69f   : > { %9087 = vmatprep.subr.bf16.mxu1 %v9086_v61  ;;  %v4490_v3 = vmax.f32 %v4446_v31, %v4471_v17 }
 0x6a0   : > { %9089 = vmatpush3.bf16.msra.mxu1 %v9086_v61  ;;  %v4470_v11 = vsel %vm3186_vm14, %v4467_v5, %v4469_v1  ;;  %v4472_v2 = vsel %vm3186_vm14, %v4469_v1, %v4471_v17  ;;  %v9136_v5 = vpack.c.bf16 %v4747_v55, %v4746_v63  ;;  %v4592_v17 = vld [vmem:[#allocation6 + $0x7] sm:$0xff] }
 0x6a1   : > { %v4488_v43 = vmax.f32 %v4444_v4, %v4470_v11  ;;  %v4489_v40 = vmax.f32 %v4445_v51, %v4472_v2  ;;  %v4718_v4 = vld [vmem:[%s12874_s9 + $0x40] sm:$0xff]  ;;  %9109 = vmatpush3.bf16.msra.mxu0 %v9108_v62  ;;  %v4721_v51 = vld [vmem:[%s12874_s9 + $0x58] sm:$0xff]  ;;  %v4739_v11 = vld [vmem:[%s12874_s9 + $0xe8] sm:$0xff]  ;;  %4595 = vst.msk [vmem:[#allocation7] sm:$0xff] %vm4578_vm7, %v4592_v17 }
 0x6a2   : > { %v9112_v31 = vpack.c.bf16 %v4719_v10, %v4718_v4  ;;  %9111 = vmatprep.subr.bf16.mxu0 %v9110_v59  ;;  %v9116_v61 = vpack.c.bf16 %v4721_v51, %v4720_v39  ;;  %v4738_v1 = vld [vmem:[%s12874_s9 + $0xe0] sm:$0xff]  ;;  %v4755_v62 = vld [vmem:[%s12874_s9 + $0x168] sm:$0xff]  ;;  %v4772_v10 = vld [vmem:[%s12874_s9 + $0x1f0] sm:$0xff] }
 0x6a3   : > { %v9090_v24 = vpack.c.bf16 %v4489_v40, %v4488_v43  ;;  %v9118_v2 = vpack.c.bf16 %v4739_v11, %v4738_v1  ;;  %v4764_v43 = vld [vmem:[%s12874_s9 + $0x1b0] sm:$0xff]  ;;  %v4765_v40 = vld [vmem:[%s12874_s9 + $0x1b8] sm:$0xff]  ;;  %v9152_v59 = vpack.c.bf16 %v4755_v62, %v4754_v19  ;;  %v4691_v11 = vld [vmem:[#allocation6 + $0x25] sm:$0xff] }
 0x6a4   : > { %4694 = vst.msk [vmem:[#allocation7 + $0x70] sm:$0xff] %vm4578_vm7, %v4691_v11  ;;  %v9236_v19 = vld [vmem:[%s12878_s13 + $0x10] ss:$8 sps:$4 sm:$0xff]  }
 0x6a5   : > { %9091 = vmatprep.subr.bf16.mxu1 %v9090_v24  ;;  %9113 = vmatpush3.bf16.msra.mxu0 %v9112_v31  ;;  %v4756_v31 = vld [vmem:[%s12874_s9 + $0x170] sm:$0xff] }
 0x6a6   : > { %9093 = vmatpush3.bf16.msra.mxu1 %v9090_v24  ;;  %9115 = vmatprep.subr.bf16.mxu0 %v9114_v38  ;;  %v4722_v24 = vld [vmem:[%s12874_s9 + $0x60] sm:$0xff]  ;;  %v4757_v38 = vld [vmem:[%s12874_s9 + $0x178] sm:$0xff] }
 0x6a7   : > { %8955 = vmatprep.subr.msk.mxu1 %vm3371_vm15, %v4490_v3  ;;  %v9248_v62 = vld [vmem:[%s12878_s13 + $0x30] ss:$8 sps:$4 sm:$0xff]  }
 0x6a9   : > { %9117 = vmatpush3.bf16.msra.mxu0 %v9116_v61  ;;  %v9156_v61 = vpack.c.bf16 %v4757_v38, %v4756_v31  ;;  %v9274_v31 = vld [vmem:[%s12878_s13 + $0x74] ss:$8 sps:$4 sm:$0xff]   ;;  %v9272_v38 = vld [vmem:[%s12878_s13 + $0x70] ss:$8 sps:$4 sm:$0xff]  }
 0x6aa   : > { %8956 = vmatpush3.msk.msra.mxu1 %vm3371_vm15, %v4490_v3  ;;  %v9138_v3 = vpack.c.bf16 %v4765_v40, %v4764_v43  ;;  %9119 = vmatprep.subr.bf16.mxu0 %v9118_v2 }
 0x6ab   : > { %8958 = vmatmul.mubr.msk.f32.vlgmr.msra.gmra.mrb[34].mxu1 %vm4493_vm6, %v4492_v13  ;;  %9127 = vmatprep.subr.bf16.mxu1 %v9126_v36  ;;  %v4723_v13 = vld [vmem:[%s12874_s9 + $0x68] sm:$0xff]  ;;  %v4752_v36 = vld [vmem:[%s12874_s9 + $0x150] sm:$0xff] }
 0x6ac   : > { %9129 = vmatpush3.bf16.msra.mxu1 %v9128_v42  ;;  %v9120_v9 = vpack.c.bf16 %v4723_v13, %v4722_v24  ;;  %v9148_v42 = vpack.c.bf16 %v4753_v30, %v4752_v36  ;;  %v4781_v36 = vld [vmem:[%s12874_s9 + $0x238] sm:$0xff] }
 0x6ad   : > { %9131 = vmatprep.subr.bf16.mxu1 %v9130_v52 }
 0x6ae   : > { %9121 = vmatpush3.bf16.msra.mxu0 %v9120_v9  ;;  %v4776_v9 = vld [vmem:[%s12874_s9 + $0x210] sm:$0xff] }
 0x6af   : > { %9123 = vmatprep.subr.bf16.mxu0 %v9122_v12  ;;  %v9162_v12 = vpack.c.bf16 %v4777_v44, %v4776_v9 }
 0x6b0   : > { %9133 = vmatpush3.bf16.msra.mxu1 %v9132_v60  ;;  %v4770_v60 = vld [vmem:[%s12874_s9 + $0x1e0] sm:$0xff] }
 0x6b1   : > { %9135 = vmatprep.subr.bf16.mxu1 %v9134_v23  ;;  %v9150_v55 = vpack.c.bf16 %v4771_v56, %v4770_v60  ;;  %v9230_v60 = vld [vmem:[%s12878_s13] ss:$8 sps:$4 sm:$0xff]   ;;  %v9232_v56 = vld [vmem:[%s12878_s13 + $0x4] ss:$8 sps:$4 sm:$0xff]  }
 0x6b2   : > { %9125 = vmatpush3.bf16.msra.mxu0 %v9124_v26  ;;  %v4779_v26 = vld [vmem:[%s12874_s9 + $0x228] sm:$0xff] }
 0x6b3   : > { %9158 = vmatprep.subr.bf16.mxu0 %v9709_v46 }
 0x6b4   : > { %9137 = vmatpush3.bf16.msra.mxu1 %v9136_v5  ;;  %v4773_v5 = vld [vmem:[%s12874_s9 + $0x1f8] sm:$0xff] }
 0x6b5   : > { %9139 = vmatprep.subr.bf16.mxu1 %v9138_v3  ;;  %v9154_v25 = vpack.c.bf16 %v4773_v5, %v4772_v10  ;;  %v9262_v10 = vld [vmem:[%s12878_s13 + $0x54] ss:$8 sps:$4 sm:$0xff]   ;;  %v9260_v5 = vld [vmem:[%s12878_s13 + $0x50] ss:$8 sps:$4 sm:$0xff]  }
 0x6b8   : > { %9141 = vmatpush3.bf16.msra.mxu1 %v9140_v32 }
 0x6b9   : > { %9143 = vmatprep.subr.bf16.mxu1 %v9142_v15  ;;  %v4778_v15 = vld [vmem:[%s12874_s9 + $0x220] sm:$0xff] }
 0x6ba   : > { %v9165_v33 = vpack.c.bf16 %v4779_v26, %v4778_v15 }
 0x6bc   : > { %9145 = vmatpush3.bf16.msra.mxu1 %v9144_v34 }
 0x6bd   : > { %9147 = vmatprep.subr.bf16.mxu1 %v9146_v27 }
 0x6c0   : > { %9149 = vmatpush3.bf16.msra.mxu1 %v9148_v42  ;;  %v9168_v42 = vpack.c.bf16 %v4781_v36, %v4780_v47 }
 0x6c1   : > { %9151 = vmatprep.subr.bf16.mxu1 %v9150_v55  ;;  %v9250_v55 = vld [vmem:[%s12878_s13 + $0x34] ss:$8 sps:$4 sm:$0xff]  }
 0x6c4   : > { %9153 = vmatpush3.bf16.msra.mxu1 %v9152_v59  ;;  %v9256_v59 = vld [vmem:[%s12878_s13 + $0x44] ss:$8 sps:$4 sm:$0xff]  }
 0x6c5   : > { %9155 = vmatprep.subr.bf16.mxu1 %v9154_v25  ;;  %v9266_v25 = vld [vmem:[%s12878_s13 + $0x60] ss:$8 sps:$4 sm:$0xff]  }
 0x6c8   : > { %9157 = vmatpush3.bf16.msra.mxu1 %v9156_v61 }
 0x6c9   : > { %5236 = vmatprep.subr.bf16.mxu1 %v9232_v56  ;;  %v9253_v56 = vld [vmem:[%s12878_s13 + $0xb4] ss:$8 sps:$4 sm:$0xff]  }
 0x77e   : > { %v8959_v16 = vpop.f32.mrb[34].mxu1 }
 0x77f   : > { %4590 = vst.msk [vmem:[#allocation6 + $0x1b] sm:$0xf] %vm4585_vm8, %v8959_v16  ;;  %v4569_v28 = vpop.f32.mrb[35].mxu1 }
 0x780   : > { %4591 = vst.msk [vmem:[#allocation6 + $0x1d] sm:$0xf0] %vm4588_vm9, %v8959_v16  ;;  %4589 = vst.msk [vmem:[#allocation6 + $0x11] sm:$0xf0] %vm4588_vm9, %v4569_v28  ;;  %v9159_v16 = vpack.c.bf16 %v4775_v8, %v4774_v14 }
 0x781   : > { %4587 = vst.msk [vmem:[#allocation6 + $0xf] sm:$0xf] %vm4585_vm8, %v4569_v28 }
 0x786   : > { %v4619_v54 = vld [vmem:[#allocation6 + $0x19] sm:$0xff] }
 0x787   : > { %v4690_v45 = vld [vmem:[#allocation6 + $0x1d] sm:$0xff]  ;;  %v4689_v57 = vld [vmem:[#allocation6 + $0x15] sm:$0xff]  ;;  %4622 = vst.msk [vmem:[#allocation7 + $0x58] sm:$0xff] %vm4578_vm7, %v4619_v54 }
 0x788   : > { %4693 = vst.msk [vmem:[#allocation7 + $0x48] sm:$0xff] %vm4578_vm7, %v4690_v45  ;;  %v4623_v48 = vld [vmem:[#allocation6 + $0xd] sm:$0xff]  ;;  %4692 = vst.msk [vmem:[#allocation7 + $0x20] sm:$0xff] %vm4578_vm7, %v4689_v57  ;;  %v4648_v29 = vld [vmem:[#allocation6 + $0x17] sm:$0xff] }
 0x789   : > { %v4598_v35 = vld [vmem:[#allocation6 + $0x8] sm:$0xff]  ;;  %4629 = vrot.lane.b32.xlu0 %v4623_v48, %s12926_s18  ;;  %v4618_v53 = vld [vmem:[#allocation6 + $0x11] sm:$0xff]  ;;  %4597 = vst.msk [vmem:[#allocation7 + $0x50] sm:$0xff] %vm4578_vm7, %v4648_v29  ;;  %v4666_v23 = vld [vmem:[#allocation6 + $0x1b] sm:$0xff] }
 0x78a   : > { %4604 = vrot.lane.b32.xlu1 %v4598_v35, %s12926_s18  ;;  %v4647_v52 = vld [vmem:[#allocation6 + $0xf] sm:$0xff]  ;;  %4621 = vst.msk [vmem:[#allocation7 + $0x30] sm:$0xff] %vm4578_vm7, %v4618_v53  ;;  %4669 = vst.msk [vmem:[#allocation7 + $0x40] sm:$0xff] %vm4578_vm7, %v4666_v23  ;;  %v4667_v39 = vld [vmem:[#allocation6 + $0x23] sm:$0xff] }
 0x78b   : > { %4596 = vst.msk [vmem:[#allocation7 + $0x28] sm:$0xff] %vm4578_vm7, %v4647_v52  ;;  %v4617_v18 = vld [vmem:[#allocation6 + $0x9] sm:$0xff]  ;;  %v4665_v50 = vld [vmem:[#allocation6 + $0x13] sm:$0xff]  ;;  %v4643_v51 = vld [vmem:[#allocation6 + $0x1e] sm:$0xff] }
 0x78c   : > { %4620 = vst.msk [vmem:[#allocation7 + $0x8] sm:$0xff] %vm4578_vm7, %v4617_v18  ;;  %v4641_v58 = vld [vmem:[#allocation6 + $0xe] sm:$0xff]  ;;  %4668 = vst.msk [vmem:[#allocation7 + $0x18] sm:$0xff] %vm4578_vm7, %v4665_v50  ;;  %v4642_v4 = vld [vmem:[#allocation6 + $0x16] sm:$0xff] }
 0x78d   : > { %4631 = vrot.lane.b32.xlu0 %v4689_v57, %s12926_s18  ;;  %4644 = vst.msk [vmem:[#allocation7 + $0x10] sm:$0xff] %vm4578_vm7, %v4641_v58  ;;  %v4671_v63 = vld [vmem:[#allocation6 + $0x14] sm:$0xff]  ;;  %4645 = vst.msk [vmem:[#allocation7 + $0x38] sm:$0xff] %vm4578_vm7, %v4642_v4  ;;  %v4672_v1 = vld [vmem:[#allocation6 + $0x1c] sm:$0xff] }
 0x78e   : > { %4633 = vrot.lane.b32.xlu1 %v4690_v45, %s12926_s18  ;;  %v4599_v21 = vld [vmem:[#allocation6 + $0x10] sm:$0xff]  ;;  %4670 = vst.msk [vmem:[#allocation7 + $0x68] sm:$0xff] %vm4578_vm7, %v4667_v39  ;;  %4646 = vst.msk [vmem:[#allocation7 + $0x60] sm:$0xff] %vm4578_vm7, %v4643_v51  ;;  %v4600_v17 = vld [vmem:[#allocation6 + $0x18] sm:$0xff] }
 0x78f   : > { %v4673_v2 = vld [vmem:[#allocation6 + $0x24] sm:$0xff]  ;;  %v4699_v18 = vld [vmem:[#allocation7 + $0x20] sm:$0xff] }
 0x790   : > { %v4649_v43 = vld [vmem:[#allocation6 + $0x1f] sm:$0xff]  ;;  %v4709_v50 = vld [vmem:[#allocation7 + $0x70] sm:$0xff] }
 0x791   : > { %4677 = vrot.lane.b32.xlu0 %v4671_v63, %s12926_s18  ;;  %v4704_v54 = vld [vmem:[#allocation7 + $0x48] sm:$0xff] }
 0x792   : > { %4606 = vrot.lane.b32.xlu1 %v4599_v21, %s12926_s18  ;;  %v5054_v58 = vld [vmem:[%s12877_s12] sm:$0xff] }
 0x793   : > { %v9244_v23 = vld [vmem:[%s12878_s13 + $0x24] ss:$8 sps:$4 sm:$0xff]   ;;  %v9242_v63 = vld [vmem:[%s12878_s13 + $0x20] ss:$8 sps:$4 sm:$0xff]  }
 0x794   : > { %v9254_v4 = vld [vmem:[%s12878_s13 + $0x40] ss:$8 sps:$4 sm:$0xff]   ;;  %v9268_v21 = vld [vmem:[%s12878_s13 + $0x64] ss:$8 sps:$4 sm:$0xff]  }
 0x795   : > { %4653 = vrot.lane.b32.xlu0 %v4647_v52, %s12926_s18 }
 0x796   : > { %4608 = vrot.lane.b32.xlu1 %v4600_v17, %s12926_s18 }
 0x799   : > { %4679 = vrot.lane.b32.xlu0 %v4672_v1, %s12926_s18 }
 0x79a   : > { %4655 = vrot.lane.b32.xlu1 %v4648_v29, %s12926_s18 }
 0x79d   : > { %4681 = vrot.lane.b32.xlu0 %v4673_v2, %s12926_s18 }
 0x79e   : > { %4657 = vrot.lane.b32.xlu1 %v4649_v43, %s12926_s18  ;;  %s9713_s18 = smov [#allocation8]  }
 0x79f   : > { %s9636_s24 = sshll.u32 %s9713_s18, 4  ;;  %s9637_s24 = int_to_ptr.vmem [resolvable:$false] %s9636_s24 }
 0x7a0   : > { %s9638_s26 = scalar_lea.vmem %s9637_s24, 32  ;;  %p9639_p0 = scmp.lt.s32.totalorder %s12825_s30, %s9637_s24 }
 0x7a1   : > { %p9640_p1 = scmp.lt.s32.totalorder %s9638_s26, %s9632_s28 }
 0x7a3   : > { %p9641_p2 = por %p9640_p1, %p9639_p0 }
 0x7a5   : > { %p9642_p3 = pnand %p9641_p2, %p9635_p13 }
 0x7fb   : > { %v4630_v40 = vpop.permute.xlu0 %4629 }
 0x7fc   : > { %v4605_v24 = vpop.permute.xlu1 %4604  ;;  %4638 = vst.msk [vmem:[#allocation7 + $0x8] sm:$0xff] %vm4613_vm10, %v4630_v40 }
 0x7fd   : > { %4614 = vst.msk [vmem:[#allocation7] sm:$0xff] %vm4613_vm10, %v4605_v24 }
 0x7ff   : > { %v4632_v3 = vpop.permute.xlu0 %4631 }
 0x800   : > { %v4634_v13 = vpop.permute.xlu1 %4633  ;;  %4639 = vst.msk [vmem:[#allocation7 + $0x30] sm:$0xff] %vm4613_vm10, %v4632_v3 }
 0x801   : > { %4640 = vst.msk [vmem:[#allocation7 + $0x58] sm:$0xff] %vm4613_vm10, %v4634_v13 }
 0x803   : > { %v4678_v32 = vpop.permute.xlu0 %4677  ;;  %v4696_v41 = vld [vmem:[#allocation7 + $0x8] sm:$0xff] }
 0x804   : > { %v4607_v28 = vpop.permute.xlu1 %4606  ;;  %v4695_v7 = vld [vmem:[#allocation7] sm:$0xff]  ;;  %4686 = vst.msk [vmem:[#allocation7 + $0x18] sm:$0xff] %vm4613_vm10, %v4678_v32  ;;  %4855 = vmatprep.mubr.f32.mxu0 %v4696_v41  ;;  %v8011_v32 = vld [vmem:[%s12875_s10] ss:$0 sm:$0xff] }
 0x805   : > { %4615 = vst.msk [vmem:[#allocation7 + $0x28] sm:$0xff] %vm4613_vm10, %v4607_v28  ;;  %4856 = vmatmul.mubr.f32.vlgmr.msra.gmra.mrb[56].mxu0 %v4695_v7 }
 0x806   : > { %9160 = vmatpush3.bf16.msra.mxu0 %v9159_v16 }
 0x807   : > { %v4654_v20 = vpop.permute.xlu0 %4653  ;;  %v4701_v49 = vld [vmem:[#allocation7 + $0x30] sm:$0xff]  ;;  %9161 = vmatprep.subr.bf16.mxu0 %v9709_v46 }
 0x808   : > { %v4609_v37 = vpop.permute.xlu1 %4608  ;;  %4662 = vst.msk [vmem:[#allocation7 + $0x10] sm:$0xff] %vm4613_vm10, %v4654_v20  ;;  %4860 = vmatprep.mubr.f32.mxu0 %v4701_v49  ;;  %v4706_v30 = vld [vmem:[#allocation7 + $0x58] sm:$0xff]  ;;  %v8012_v49 = vld [vmem:[%s12876_s11] ss:$0 sm:$0xff] }
 0x809   : > { %4616 = vst.msk [vmem:[#allocation7 + $0x50] sm:$0xff] %vm4613_vm10, %v4609_v37 }
 0x80a   : > { %9163 = vmatpush3.bf16.msra.mxu0 %v9162_v12 }
 0x80b   : > { %v4680_v34 = vpop.permute.xlu0 %4679  ;;  %v4698_v27 = vld [vmem:[#allocation7 + $0x18] sm:$0xff]  ;;  %9164 = vmatprep.subr.bf16.mxu0 %v9709_v46 }
 0x80c   : > { %v4656_v22 = vpop.permute.xlu1 %4655  ;;  %v4700_v6 = vld [vmem:[#allocation7 + $0x28] sm:$0xff]  ;;  %4687 = vst.msk [vmem:[#allocation7 + $0x40] sm:$0xff] %vm4613_vm10, %v4680_v34  ;;  %4935 = vmatprep.mubr.f32.mxu1 %v4698_v27 }
 0x80d   : > { %4663 = vst.msk [vmem:[#allocation7 + $0x38] sm:$0xff] %vm4613_vm10, %v4656_v22  ;;  %4861 = vmatmul.mubr.f32.gmra.mrb[58].mxu0 %v4700_v6 }
 0x80e   : > { %4865 = vmatprep.mubr.f32.mxu0 %v4706_v30  ;;  %9166 = vmatpush3.bf16.msra.mxu0 %v9165_v33 }
 0x80f   : > { %v4682_v45 = vpop.permute.xlu0 %4681  ;;  %v4697_v35 = vld [vmem:[#allocation7 + $0x10] sm:$0xff]  ;;  %9167 = vmatprep.subr.bf16.mxu0 %v9709_v46 }
 0x810   : > { %v4658_v57 = vpop.permute.xlu1 %4657  ;;  %v4705_v48 = vld [vmem:[#allocation7 + $0x50] sm:$0xff]  ;;  %4688 = vst.msk [vmem:[#allocation7 + $0x68] sm:$0xff] %vm4613_vm10, %v4682_v45  ;;  %4936 = vmatmul.mubr.f32.vlgmr.msra.gmra.mrb[36].mxu1 %v4697_v35 }
 0x811   : > { %4664 = vst.msk [vmem:[#allocation7 + $0x60] sm:$0xff] %vm4613_vm10, %v4658_v57  ;;  %4866 = vmatmul.mubr.f32.gmra.mrb[60].mxu0 %v4705_v48  ;;  %5237 = vmatpush1.bf16.msra.mxu1 %v9230_v60  ;;  %v9245_v60 = vld [vmem:[%s12878_s13 + $0xa0] ss:$8 sps:$4 sm:$0xff]  }
 0x812   : > { %8976 = vmatprep.mubr.msk.f32.mxu0 %vm9710_vm11, %v9696_v0  ;;  %9169 = vmatpush3.bf16.msra.mxu0 %v9168_v42 }
 0x813   : > { %v4703_v52 = vld [vmem:[#allocation7 + $0x40] sm:$0xff] }
 0x814   : > { %v4702_v29 = vld [vmem:[#allocation7 + $0x38] sm:$0xff]  ;;  %4940 = vmatprep.mubr.f32.mxu1 %v4703_v52 }
 0x815   : > { %8977 = vmatmul.mubr.msk.f32.vlgmr.msra.gmra.mrb[62].mxu0 %vm4578_vm7, %v4699_v18  ;;  %4941 = vmatmul.mubr.f32.gmra.mrb[38].mxu1 %v4702_v29  ;;  %v9235_v18 = vld [vmem:[%s12878_s13 + $0x84] ss:$8 sps:$4 sm:$0xff]  }
 0x816   : > { %8979 = vmatprep.mubr.msk.f32.mxu0 %vm9710_vm11, %v9696_v0 }
 0x817   : > { %v4708_v46 = vld [vmem:[#allocation7 + $0x68] sm:$0xff] }
 0x818   : > { %v4707_v53 = vld [vmem:[#allocation7 + $0x60] sm:$0xff]  ;;  %4945 = vmatprep.mubr.f32.mxu1 %v4708_v46  ;;  %v5055_v46 = vld [vmem:[%s12877_s12 + $0x8] sm:$0xff] }
 0x819   : > { %8980 = vmatmul.mubr.msk.f32.gmra.mrb[64].mxu0 %vm4578_vm7, %v4704_v54  ;;  %4946 = vmatmul.mubr.f32.gmra.mrb[40].mxu1 %v4707_v53  ;;  %v9233_v53 = vld [vmem:[%s12878_s13 + $0x80] ss:$8 sps:$4 sm:$0xff]   ;;  %v9241_v54 = vld [vmem:[%s12878_s13 + $0x94] ss:$8 sps:$4 sm:$0xff]  }
 0x81a   : > { %8982 = vmatprep.mubr.msk.f32.mxu0 %vm9710_vm11, %v9696_v0  ;;  %v9238_v0 = vld [vmem:[%s12878_s13 + $0x14] ss:$8 sps:$4 sm:$0xff]  }
 0x81b   : > { %5238 = vmatprep.subr.bf16.mxu1 %v9238_v0  ;;  %v9251_v0 = vld [vmem:[%s12878_s13 + $0xb0] ss:$8 sps:$4 sm:$0xff]  }
 0x81c   : > { %5239 = vmatpush1.bf16.msra.mxu1 %v9236_v19  ;;  %v9259_v19 = vld [vmem:[%s12878_s13 + $0xc4] ss:$8 sps:$4 sm:$0xff]  }
 0x81d   : > { %8983 = vmatmul.mubr.msk.f32.gmra.mrb[66].mxu0 %vm4578_vm7, %v4709_v50  ;;  %5240 = vmatprep.subr.bf16.mxu1 %v9244_v23  ;;  %v9239_v50 = vld [vmem:[%s12878_s13 + $0x90] ss:$8 sps:$4 sm:$0xff]   ;;  %v9257_v23 = vld [vmem:[%s12878_s13 + $0xc0] ss:$8 sps:$4 sm:$0xff]  }
 0x81e   : > { %8991 = vmatprep.mubr.msk.f32.mxu0 %vm5056_vm12, %v5054_v58  ;;  %v9247_v58 = vld [vmem:[%s12878_s13 + $0xa4] ss:$8 sps:$4 sm:$0xff]  }
 0x820   : > { %5241 = vmatpush1.bf16.msra.mxu1 %v9242_v63  ;;  %v9265_v63 = vld [vmem:[%s12878_s13 + $0xd4] ss:$8 sps:$4 sm:$0xff]  }
 0x821   : > { %5242 = vmatprep.subr.bf16.mxu1 %v9250_v55  ;;  %v9263_v55 = vld [vmem:[%s12878_s13 + $0xd0] ss:$8 sps:$4 sm:$0xff]  }
 0x824   : > { %5243 = vmatpush1.bf16.msra.mxu1 %v9248_v62  ;;  %v9271_v62 = vld [vmem:[%s12878_s13 + $0xe4] ss:$8 sps:$4 sm:$0xff]  }
 0x825   : > { %5244 = vmatprep.subr.bf16.mxu1 %v9256_v59  ;;  %v9269_v59 = vld [vmem:[%s12878_s13 + $0xe0] ss:$8 sps:$4 sm:$0xff]  }
 0x828   : > { %5245 = vmatpush1.bf16.msra.mxu1 %v9254_v4  ;;  %v9275_v4 = vld [vmem:[%s12878_s13 + $0xf0] ss:$8 sps:$4 sm:$0xff]  }
 0x829   : > { %5246 = vmatprep.subr.bf16.mxu1 %v9262_v10  ;;  %v9277_v10 = vld [vmem:[%s12878_s13 + $0xf4] ss:$8 sps:$4 sm:$0xff]  }
 0x82c   : > { %5247 = vmatpush1.bf16.msra.mxu1 %v9260_v5  ;;  %v9711_v5 = vmov 0  }
 0x82d   : > { %5248 = vmatprep.subr.bf16.mxu1 %v9268_v21  ;;  %5268 = vmatprep.mubr.bf16.mxu1 %v9711_v5  ;;  %v9280_v21 = vld [vmem:[%s12878_s13 + $0x104] ss:$8 sps:$4 sm:$0xff]  }
 0x830   : > { %5249 = vmatpush1.bf16.msra.mxu1 %v9266_v25  ;;  %v9283_v25 = vld [vmem:[%s12878_s13 + $0x184] ss:$8 sps:$4 sm:$0xff]  }
 0x831   : > { %5250 = vmatprep.subr.bf16.mxu1 %v9274_v31 }
 0x834   : > { %5251 = vmatpush1.bf16.msra.mxu1 %v9272_v38 }
 0x835   : > { %5557 = vmatprep.subr.bf16.mxu1 %v9280_v21  ;;  %v9367_v21 = vld [vmem:[%s12878_s13 + $0x2e4] ss:$8 sps:$4 sm:$0xff]  }
 0x8d8   : > { %v8754_v39 = vpop.f32.mrb[56].mxu0 }
 0x8d9   : > { %v8755_v51 = vpop.f32.mrb[57].mxu0 }
 0x8da   : > { %v8756_v61 = vadd.f32 %v8755_v51, %v8754_v39  ;;  %v9278_v39 = vld [vmem:[%s12878_s13 + $0x100] ss:$8 sps:$4 sm:$0xff]  }
 0x8e0   : > { %v8757_v17 = vpop.f32.mrb[58].mxu0 }
 0x8e1   : > { %v8758_v1 = vpop.f32.mrb[59].mxu0 }
 0x8e2   : > { %v8759_v11 = vadd.f32 %v8758_v1, %v8757_v17  ;;  %v9281_v17 = vld [vmem:[%s12878_s13 + $0x180] ss:$8 sps:$4 sm:$0xff]  }
 0x8e3   : > { %v8795_v43 = vpop.f32.mrb[36].mxu1 }
 0x8e4   : > { %v8760_v2 = vpop.f32.mrb[60].mxu0  ;;  %v8796_v24 = vpop.f32.mrb[37].mxu1 }
 0x8e5   : > { %v8761_v40 = vpop.f32.mrb[61].mxu0  ;;  %v8797_v13 = vadd.f32 %v8796_v24, %v8795_v43  ;;  %v9292_v43 = vld [vmem:[%s12878_s13 + $0x124] ss:$8 sps:$4 sm:$0xff]  }
 0x8e6   : > { %v8762_v3 = vadd.f32 %v8761_v40, %v8760_v2  ;;  %v9284_v2 = vld [vmem:[%s12878_s13 + $0x110] ss:$8 sps:$4 sm:$0xff]   ;;  %v9295_v24 = vld [vmem:[%s12878_s13 + $0x1a4] ss:$8 sps:$4 sm:$0xff]  }
 0x8e7   : > { %v4938_v14 = vadd.f32 %v8797_v13, %v8756_v61  ;;  %v9286_v61 = vld [vmem:[%s12878_s13 + $0x114] ss:$8 sps:$4 sm:$0xff]   ;;  %v9287_v40 = vld [vmem:[%s12878_s13 + $0x190] ss:$8 sps:$4 sm:$0xff]  }
 0x8e8   : > { %v5017_v8 = vpop.f32.mrb[62].mxu0  ;;  %v8798_v16 = vpop.f32.mrb[38].mxu1  ;;  %v9298_v13 = vld [vmem:[%s12878_s13 + $0x134] ss:$8 sps:$4 sm:$0xff]  }
 0x8e9   : > { %v5018_v9 = vadd.f32 %v5017_v8, %v4938_v14  ;;  %v8978_v28 = vpop.f32.mrb[63].mxu0  ;;  %v8799_v41 = vpop.f32.mrb[39].mxu1  ;;  %v9293_v14 = vld [vmem:[%s12878_s13 + $0x1a0] ss:$8 sps:$4 sm:$0xff]   ;;  %v9301_v8 = vld [vmem:[%s12878_s13 + $0x1b4] ss:$8 sps:$4 sm:$0xff]  }
 0x8ea   : > { %v8800_v7 = vadd.f32 %v8799_v41, %v8798_v16  ;;  %v9296_v16 = vld [vmem:[%s12878_s13 + $0x130] ss:$8 sps:$4 sm:$0xff]   ;;  %v9307_v28 = vld [vmem:[%s12878_s13 + $0x1c4] ss:$8 sps:$4 sm:$0xff]   ;;  %v9302_v41 = vld [vmem:[%s12878_s13 + $0x140] ss:$8 sps:$4 sm:$0xff]  }
 0x8eb   : > { %v5038_v44 = vmul.f32 %v8011_v32, %v5018_v9  ;;  %v9304_v9 = vld [vmem:[%s12878_s13 + $0x144] ss:$8 sps:$4 sm:$0xff]  }
 0x8ec   : > { %v4943_v12 = vadd.f32 %v8800_v7, %v8759_v11  ;;  %v5022_v20 = vpop.f32.mrb[64].mxu0  ;;  %v8801_v37 = vpop.f32.mrb[40].mxu1  ;;  %v9289_v11 = vld [vmem:[%s12878_s13 + $0x194] ss:$8 sps:$4 sm:$0xff]  }
 0x8ed   : > { %v8981_v15 = vpop.f32.mrb[65].mxu0  ;;  %v8802_v26 = vpop.f32.mrb[41].mxu1  ;;  %v5048_v34 = vadd.f32 %v8012_v49, %v5038_v44  ;;  %v9310_v7 = vld [vmem:[%s12878_s13 + $0x154] ss:$8 sps:$4 sm:$0xff]   ;;  %v9305_v44 = vld [vmem:[%s12878_s13 + $0x1c0] ss:$8 sps:$4 sm:$0xff]  }
 0x8ee   : > { %v5023_v33 = vadd.f32 %v5022_v20, %v4943_v12  ;;  %v8803_v47 = vadd.f32 %v8802_v26, %v8801_v37  ;;  %v9313_v12 = vld [vmem:[%s12878_s13 + $0x1d4] ss:$8 sps:$4 sm:$0xff]   ;;  %v9308_v20 = vld [vmem:[%s12878_s13 + $0x150] ss:$8 sps:$4 sm:$0xff]   ;;  %v9316_v37 = vld [vmem:[%s12878_s13 + $0x164] ss:$8 sps:$4 sm:$0xff]  }
 0x8ef   : > { %v5051_v45 = vmax.f32 %v5048_v34, 0.0  ;;  %v9319_v15 = vld [vmem:[%s12878_s13 + $0x1e4] ss:$8 sps:$4 sm:$0xff]   ;;  %v9314_v26 = vld [vmem:[%s12878_s13 + $0x160] ss:$8 sps:$4 sm:$0xff]  }
 0x8f0   : > { %v5039_v22 = vmul.f32 %v8011_v32, %v5023_v33  ;;  %v4948_v6 = vadd.f32 %v8803_v47, %v8762_v3  ;;  %v5027_v27 = vpop.f32.mrb[66].mxu0  ;;  %v9290_v3 = vld [vmem:[%s12878_s13 + $0x120] ss:$8 sps:$4 sm:$0xff]   ;;  %v9322_v33 = vld [vmem:[%s12878_s13 + $0x174] ss:$8 sps:$4 sm:$0xff]  }
 0x8f1   : > { %v8984_v36 = vpop.f32.mrb[67].mxu0  ;;  %v9317_v47 = vld [vmem:[%s12878_s13 + $0x1e0] ss:$8 sps:$4 sm:$0xff]   ;;  %v9325_v34 = vld [vmem:[%s12878_s13 + $0x1f4] ss:$8 sps:$4 sm:$0xff]  }
 0x8f2   : > { %v5049_v30 = vadd.f32 %v8012_v49, %v5039_v22  ;;  %v5028_v42 = vadd.f32 %v5027_v27, %v4948_v6  ;;  %v9320_v22 = vld [vmem:[%s12878_s13 + $0x170] ss:$8 sps:$4 sm:$0xff]   ;;  %v9328_v6 = vld [vmem:[%s12878_s13 + $0x204] ss:$8 sps:$4 sm:$0xff]  }
 0x8f3   : > { %v9323_v27 = vld [vmem:[%s12878_s13 + $0x1f0] ss:$8 sps:$4 sm:$0xff]   ;;  %v9331_v36 = vld [vmem:[%s12878_s13 + $0x284] ss:$8 sps:$4 sm:$0xff]  }
 0x8f4   : > { %v5052_v57 = vmax.f32 %v5049_v30, 0.0  ;;  %v5040_v48 = vmul.f32 %v8011_v32, %v5028_v42  ;;  %v9299_v32 = vld [vmem:[%s12878_s13 + $0x1b0] ss:$8 sps:$4 sm:$0xff]   ;;  %v9326_v30 = vld [vmem:[%s12878_s13 + $0x200] ss:$8 sps:$4 sm:$0xff]  }
 0x8f6   : > { %v9170_v35 = vpack.c.bf16 %v5052_v57, %v5051_v45  ;;  %v5050_v52 = vadd.f32 %v8012_v49, %v5040_v48  ;;  %v9311_v49 = vld [vmem:[%s12878_s13 + $0x1d0] ss:$8 sps:$4 sm:$0xff]   ;;  %v9334_v45 = vld [vmem:[%s12878_s13 + $0x214] ss:$8 sps:$4 sm:$0xff]   ;;  %v9329_v57 = vld [vmem:[%s12878_s13 + $0x280] ss:$8 sps:$4 sm:$0xff]  }
 0x8f8   : > { %9171 = vmatprep.subr.bf16.mxu0 %v9170_v35  ;;  %v5053_v29 = vmax.f32 %v5050_v52, 0.0  ;;  %v9332_v52 = vld [vmem:[%s12878_s13 + $0x210] ss:$8 sps:$4 sm:$0xff]  }
 0x8f9   : > { %9173 = vmatpush3.bf16.msra.mxu0 %v9170_v35  ;;  %v9337_v35 = vld [vmem:[%s12878_s13 + $0x294] ss:$8 sps:$4 sm:$0xff]  }
 0x8fa   : > { %8989 = vmatprep.subr.mxu0 %v5053_v29 }
 0x8fd   : > { %8990 = vmatpush3.msra.mxu0 %v5053_v29  ;;  %v9340_v29 = vld [vmem:[%s12878_s13 + $0x224] ss:$8 sps:$4 sm:$0xff]  }
 0x8fe   : > { %8992 = vmatmul.mubr.msk.f32.vlgmr.msra.gmra.mrb[68].mxu0 %vm5056_vm12, %v5055_v46  ;;  %5397 = vmatprep.subr.bf16.mxu0 %v9235_v18  ;;  %v9335_v18 = vld [vmem:[%s12878_s13 + $0x290] ss:$8 sps:$4 sm:$0xff]   ;;  %v9343_v46 = vld [vmem:[%s12878_s13 + $0x2a4] ss:$8 sps:$4 sm:$0xff]  }
 0x8ff   : > { %5398 = vmatpush1.bf16.msra.mxu0 %v9233_v53  ;;  %5429 = vmatprep.mubr.bf16.mxu0 %v9711_v5  ;;  %v9338_v53 = vld [vmem:[%s12878_s13 + $0x220] ss:$8 sps:$4 sm:$0xff]  }
 0x900   : > { %5399 = vmatprep.subr.bf16.mxu0 %v9241_v54  ;;  %v9346_v54 = vld [vmem:[%s12878_s13 + $0x234] ss:$8 sps:$4 sm:$0xff]  }
 0x903   : > { %5400 = vmatpush1.bf16.msra.mxu0 %v9239_v50  ;;  %v9341_v50 = vld [vmem:[%s12878_s13 + $0x2a0] ss:$8 sps:$4 sm:$0xff]  }
 0x904   : > { %5401 = vmatprep.subr.bf16.mxu0 %v9247_v58  ;;  %v9349_v58 = vld [vmem:[%s12878_s13 + $0x2b4] ss:$8 sps:$4 sm:$0xff]  }
 0x907   : > { %5402 = vmatpush1.bf16.msra.mxu0 %v9245_v60  ;;  %v9344_v60 = vld [vmem:[%s12878_s13 + $0x230] ss:$8 sps:$4 sm:$0xff]  }
 0x908   : > { %5403 = vmatprep.subr.bf16.mxu0 %v9253_v56  ;;  %v9352_v56 = vld [vmem:[%s12878_s13 + $0x244] ss:$8 sps:$4 sm:$0xff]  }
 0x90b   : > { %5404 = vmatpush1.bf16.msra.mxu0 %v9251_v0  ;;  %v9347_v0 = vld [vmem:[%s12878_s13 + $0x2b0] ss:$8 sps:$4 sm:$0xff]  }
 0x90c   : > { %5405 = vmatprep.subr.bf16.mxu0 %v9259_v19  ;;  %v9355_v19 = vld [vmem:[%s12878_s13 + $0x2c4] ss:$8 sps:$4 sm:$0xff]  }
 0x90f   : > { %5406 = vmatpush1.bf16.msra.mxu0 %v9257_v23  ;;  %v9350_v23 = vld [vmem:[%s12878_s13 + $0x240] ss:$8 sps:$4 sm:$0xff]  }
 0x910   : > { %5407 = vmatprep.subr.bf16.mxu0 %v9265_v63  ;;  %v9358_v63 = vld [vmem:[%s12878_s13 + $0x254] ss:$8 sps:$4 sm:$0xff]  }
 0x913   : > { %5408 = vmatpush1.bf16.msra.mxu0 %v9263_v55  ;;  %v9353_v55 = vld [vmem:[%s12878_s13 + $0x2c0] ss:$8 sps:$4 sm:$0xff]  }
 0x914   : > { %5409 = vmatprep.subr.bf16.mxu0 %v9271_v62  ;;  %v9361_v62 = vld [vmem:[%s12878_s13 + $0x2d4] ss:$8 sps:$4 sm:$0xff]  }
 0x917   : > { %5410 = vmatpush1.bf16.msra.mxu0 %v9269_v59  ;;  %v9356_v59 = vld [vmem:[%s12878_s13 + $0x250] ss:$8 sps:$4 sm:$0xff]  }
 0x918   : > { %5411 = vmatprep.subr.bf16.mxu0 %v9277_v10  ;;  %v9359_v10 = vld [vmem:[%s12878_s13 + $0x2d0] ss:$8 sps:$4 sm:$0xff]  }
 0x91b   : > { %5412 = vmatpush1.bf16.msra.mxu0 %v9275_v4  ;;  %v9364_v4 = vld [vmem:[%s12878_s13 + $0x264] ss:$8 sps:$4 sm:$0xff]  }
 0x91c   : > { %5716 = vmatprep.subr.bf16.mxu0 %v9283_v25  ;;  %v9362_v25 = vld [vmem:[%s12878_s13 + $0x260] ss:$8 sps:$4 sm:$0xff]  }
 0x9d1   : > { %v12015_v31 = vpop.f32.mrb[68].mxu0 }
 0x9d2   : > { %v5129_v38 = vpop.f32.mrb[69].mxu0 }
 0x9d3   : > { %v12020_v51 = vpack.c.bf16 %v5129_v38, %v5129_v38  ;;  %v9370_v38 = vld [vmem:[%s12878_s13 + $0x274] ss:$8 sps:$4 sm:$0xff]  }
 0x9d5   : > { %5269 = vmatmul.mubr.bf16.vlgmr.msra.gmra.mrb[44].mxu1 %v12020_v51  ;;  %v12030_v1 = vshrl.u32 %v12020_v51, 16  ;;  %v5475_v42 = vrot.slane %v12020_v51, 1 }
 0x9d6   : > { %5558 = vmatpush1.bf16.msra.mxu1 %v9278_v39  ;;  %5589 = vmatprep.mubr.bf16.mxu1 %v9711_v5  ;;  %v9365_v39 = vld [vmem:[%s12878_s13 + $0x2e0] ss:$8 sps:$4 sm:$0xff]  }
 0x9d7   : > { %5430 = vmatmul.mubr.bf16.vlgmr.msra.gmra.mrb[72].mxu0 %v12030_v1  ;;  %5559 = vmatprep.subr.bf16.mxu1 %v9286_v61  ;;  %v5634_v48 = vrot.slane %v12030_v1, 1  ;;  %v9373_v61 = vld [vmem:[%s12878_s13 + $0x2f4] ss:$8 sps:$4 sm:$0xff]  }
 0x9d8   : > { %5717 = vmatpush1.bf16.msra.mxu0 %v9281_v17  ;;  %5748 = vmatprep.mubr.bf16.mxu0 %v9711_v5  ;;  %v9368_v17 = vld [vmem:[%s12878_s13 + $0x270] ss:$8 sps:$4 sm:$0xff]  }
 0x9d9   : > { %5718 = vmatprep.subr.bf16.mxu0 %v9289_v11  ;;  %v9376_v11 = vld [vmem:[%s12878_s13 + $0x304] ss:$8 sps:$4 sm:$0xff]  }
 0x9da   : > { %5560 = vmatpush1.bf16.msra.mxu1 %v9284_v2  ;;  %v9371_v2 = vld [vmem:[%s12878_s13 + $0x2f0] ss:$8 sps:$4 sm:$0xff]  }
 0x9db   : > { %5561 = vmatprep.subr.bf16.mxu1 %v9292_v43  ;;  %v9379_v43 = vld [vmem:[%s12878_s13 + $0x384] ss:$8 sps:$4 sm:$0xff]  }
 0x9dc   : > { %5719 = vmatpush1.bf16.msra.mxu0 %v9287_v40  ;;  %v9374_v40 = vld [vmem:[%s12878_s13 + $0x300] ss:$8 sps:$4 sm:$0xff]  }
 0x9dd   : > { %5720 = vmatprep.subr.bf16.mxu0 %v9295_v24  ;;  %v5793_v24 = vrot.slane %v12020_v51, 2 }
 0x9de   : > { %5562 = vmatpush1.bf16.msra.mxu1 %v9290_v3  ;;  %v9382_v3 = vld [vmem:[%s12878_s13 + $0x314] ss:$8 sps:$4 sm:$0xff]  }
 0x9df   : > { %5563 = vmatprep.subr.bf16.mxu1 %v9298_v13  ;;  %v9377_v13 = vld [vmem:[%s12878_s13 + $0x380] ss:$8 sps:$4 sm:$0xff]  }
 0x9e0   : > { %5721 = vmatpush1.bf16.msra.mxu0 %v9293_v14  ;;  %v5952_v14 = vrot.slane %v12030_v1, 2 }
 0x9e1   : > { %5722 = vmatprep.subr.bf16.mxu0 %v9301_v8  ;;  %v9385_v8 = vld [vmem:[%s12878_s13 + $0x394] ss:$8 sps:$4 sm:$0xff]  }
 0x9e2   : > { %5564 = vmatpush1.bf16.msra.mxu1 %v9296_v16  ;;  %v9380_v16 = vld [vmem:[%s12878_s13 + $0x310] ss:$8 sps:$4 sm:$0xff]  }
 0x9e3   : > { %5565 = vmatprep.subr.bf16.mxu1 %v9304_v9  ;;  %v9388_v9 = vld [vmem:[%s12878_s13 + $0x324] ss:$8 sps:$4 sm:$0xff]  }
 0x9e4   : > { %5723 = vmatpush1.bf16.msra.mxu0 %v9299_v32  ;;  %v9383_v32 = vld [vmem:[%s12878_s13 + $0x390] ss:$8 sps:$4 sm:$0xff]  }
 0x9e5   : > { %5724 = vmatprep.subr.bf16.mxu0 %v9307_v28  ;;  %v9391_v28 = vld [vmem:[%s12878_s13 + $0x3a4] ss:$8 sps:$4 sm:$0xff]  }
 0x9e6   : > { %5566 = vmatpush1.bf16.msra.mxu1 %v9302_v41  ;;  %v9386_v41 = vld [vmem:[%s12878_s13 + $0x320] ss:$8 sps:$4 sm:$0xff]  }
 0x9e7   : > { %5567 = vmatprep.subr.bf16.mxu1 %v9310_v7  ;;  %v9394_v7 = vld [vmem:[%s12878_s13 + $0x334] ss:$8 sps:$4 sm:$0xff]  }
 0x9e8   : > { %5725 = vmatpush1.bf16.msra.mxu0 %v9305_v44  ;;  %v9389_v44 = vld [vmem:[%s12878_s13 + $0x3a0] ss:$8 sps:$4 sm:$0xff]  }
 0x9e9   : > { %5726 = vmatprep.subr.bf16.mxu0 %v9313_v12  ;;  %v9397_v12 = vld [vmem:[%s12878_s13 + $0x3b4] ss:$8 sps:$4 sm:$0xff]  }
 0x9ea   : > { %5568 = vmatpush1.bf16.msra.mxu1 %v9308_v20  ;;  %v9392_v20 = vld [vmem:[%s12878_s13 + $0x330] ss:$8 sps:$4 sm:$0xff]  }
 0x9eb   : > { %5569 = vmatprep.subr.bf16.mxu1 %v9316_v37  ;;  %v9400_v37 = vld [vmem:[%s12878_s13 + $0x344] ss:$8 sps:$4 sm:$0xff]  }
 0x9ec   : > { %5727 = vmatpush1.bf16.msra.mxu0 %v9311_v49  ;;  %v9395_v49 = vld [vmem:[%s12878_s13 + $0x3b0] ss:$8 sps:$4 sm:$0xff]  }
 0x9ed   : > { %5728 = vmatprep.subr.bf16.mxu0 %v9319_v15  ;;  %v9403_v15 = vld [vmem:[%s12878_s13 + $0x3c4] ss:$8 sps:$4 sm:$0xff]  }
 0x9ee   : > { %5570 = vmatpush1.bf16.msra.mxu1 %v9314_v26  ;;  %v9398_v26 = vld [vmem:[%s12878_s13 + $0x340] ss:$8 sps:$4 sm:$0xff]  }
 0x9ef   : > { %5571 = vmatprep.subr.bf16.mxu1 %v9322_v33  ;;  %v9406_v33 = vld [vmem:[%s12878_s13 + $0x354] ss:$8 sps:$4 sm:$0xff]  }
 0x9f0   : > { %5729 = vmatpush1.bf16.msra.mxu0 %v9317_v47  ;;  %v9401_v47 = vld [vmem:[%s12878_s13 + $0x3c0] ss:$8 sps:$4 sm:$0xff]  }
 0x9f1   : > { %5730 = vmatprep.subr.bf16.mxu0 %v9325_v34  ;;  %v9409_v34 = vld [vmem:[%s12878_s13 + $0x3d4] ss:$8 sps:$4 sm:$0xff]  }
 0x9f2   : > { %5572 = vmatpush1.bf16.msra.mxu1 %v9320_v22  ;;  %v9404_v22 = vld [vmem:[%s12878_s13 + $0x350] ss:$8 sps:$4 sm:$0xff]  }
 0x9f3   : > { %5875 = vmatprep.subr.bf16.mxu1 %v9328_v6  ;;  %v9412_v6 = vld [vmem:[%s12878_s13 + $0x364] ss:$8 sps:$4 sm:$0xff]  }
 0x9f4   : > { %5731 = vmatpush1.bf16.msra.mxu0 %v9323_v27  ;;  %v9407_v27 = vld [vmem:[%s12878_s13 + $0x3d0] ss:$8 sps:$4 sm:$0xff]  }
 0x9f5   : > { %5590 = vmatmul.mubr.bf16.vlgmr.msra.gmra.mrb[48].mxu1 %v5475_v42  ;;  %6034 = vmatprep.subr.bf16.mxu0 %v9331_v36  ;;  %v9415_v36 = vld [vmem:[%s12878_s13 + $0x3e4] ss:$8 sps:$4 sm:$0xff]   ;;  %v9418_v42 = vld [vmem:[%s12878_s13 + $0x374] ss:$8 sps:$4 sm:$0xff]  }
 0x9f6   : > { %5876 = vmatpush1.bf16.msra.mxu1 %v9326_v30  ;;  %5907 = vmatprep.mubr.bf16.mxu1 %v9711_v5  ;;  %v9410_v30 = vld [vmem:[%s12878_s13 + $0x360] ss:$8 sps:$4 sm:$0xff]  }
 0x9f7   : > { %5749 = vmatmul.mubr.bf16.vlgmr.msra.gmra.mrb[76].mxu0 %v5634_v48  ;;  %5877 = vmatprep.subr.bf16.mxu1 %v9334_v45  ;;  %v9413_v45 = vld [vmem:[%s12878_s13 + $0x3e0] ss:$8 sps:$4 sm:$0xff]   ;;  %v9416_v48 = vld [vmem:[%s12878_s13 + $0x370] ss:$8 sps:$4 sm:$0xff]  }
 0x9f8   : > { %6035 = vmatpush1.bf16.msra.mxu0 %v9329_v57  ;;  %6066 = vmatprep.mubr.bf16.mxu0 %v9711_v5  ;;  %v9421_v57 = vld [vmem:[%s12878_s13 + $0x3f4] ss:$8 sps:$4 sm:$0xff]  }
 0x9f9   : > { %6036 = vmatprep.subr.bf16.mxu0 %v9337_v35  ;;  %v9424_v35 = vld [vmem:[%s12878_s13 + $0x404] ss:$8 sps:$4 sm:$0xff]  }
 0x9fa   : > { %5878 = vmatpush1.bf16.msra.mxu1 %v9332_v52  ;;  %v9419_v52 = vld [vmem:[%s12878_s13 + $0x3f0] ss:$8 sps:$4 sm:$0xff]  }
 0x9fb   : > { %5879 = vmatprep.subr.bf16.mxu1 %v9340_v29  ;;  %v9427_v29 = vld [vmem:[%s12878_s13 + $0x484] ss:$8 sps:$4 sm:$0xff]  }
 0x9fc   : > { %6037 = vmatpush1.bf16.msra.mxu0 %v9335_v18  ;;  %v9422_v18 = vld [vmem:[%s12878_s13 + $0x400] ss:$8 sps:$4 sm:$0xff]  }
 0x9fd   : > { %6038 = vmatprep.subr.bf16.mxu0 %v9343_v46  ;;  %v6111_v46 = vrot.slane %v12020_v51, 3  ;;  %v9428_v51 = vld [vmem:[%s12878_s13 + $0x410] ss:$8 sps:$4 sm:$0xff]  }
 0x9fe   : > { %5880 = vmatpush1.bf16.msra.mxu1 %v9338_v53  ;;  %v9430_v53 = vld [vmem:[%s12878_s13 + $0x414] ss:$8 sps:$4 sm:$0xff]  }
 0x9ff   : > { %5881 = vmatprep.subr.bf16.mxu1 %v9346_v54  ;;  %v9425_v54 = vld [vmem:[%s12878_s13 + $0x480] ss:$8 sps:$4 sm:$0xff]  }
 0xa00   : > { %6039 = vmatpush1.bf16.msra.mxu0 %v9341_v50  ;;  %v6270_v50 = vrot.slane %v12030_v1, 3  ;;  %v9431_v1 = vld [vmem:[%s12878_s13 + $0x490] ss:$8 sps:$4 sm:$0xff]  }
 0xa01   : > { %6040 = vmatprep.subr.bf16.mxu0 %v9349_v58  ;;  %v9433_v58 = vld [vmem:[%s12878_s13 + $0x494] ss:$8 sps:$4 sm:$0xff]  }
 0xa02   : > { %5882 = vmatpush1.bf16.msra.mxu1 %v9344_v60  ;;  %v9436_v60 = vld [vmem:[%s12878_s13 + $0x424] ss:$8 sps:$4 sm:$0xff]  }
 0xa03   : > { %5883 = vmatprep.subr.bf16.mxu1 %v9352_v56  ;;  %v9439_v56 = vld [vmem:[%s12878_s13 + $0x4a4] ss:$8 sps:$4 sm:$0xff]  }
 0xa04   : > { %6041 = vmatpush1.bf16.msra.mxu0 %v9347_v0  ;;  %v9434_v0 = vld [vmem:[%s12878_s13 + $0x420] ss:$8 sps:$4 sm:$0xff]  }
 0xa05   : > { %6042 = vmatprep.subr.bf16.mxu0 %v9355_v19  ;;  %v9442_v19 = vld [vmem:[%s12878_s13 + $0x434] ss:$8 sps:$4 sm:$0xff]  }
 0xa06   : > { %5884 = vmatpush1.bf16.msra.mxu1 %v9350_v23  ;;  %v9437_v23 = vld [vmem:[%s12878_s13 + $0x4a0] ss:$8 sps:$4 sm:$0xff]  }
 0xa07   : > { %5885 = vmatprep.subr.bf16.mxu1 %v9358_v63  ;;  %v9445_v63 = vld [vmem:[%s12878_s13 + $0x4b4] ss:$8 sps:$4 sm:$0xff]  }
 0xa08   : > { %6043 = vmatpush1.bf16.msra.mxu0 %v9353_v55  ;;  %v9440_v55 = vld [vmem:[%s12878_s13 + $0x430] ss:$8 sps:$4 sm:$0xff]  }
 0xa09   : > { %6044 = vmatprep.subr.bf16.mxu0 %v9361_v62  ;;  %v9448_v62 = vld [vmem:[%s12878_s13 + $0x444] ss:$8 sps:$4 sm:$0xff]  }
 0xa0a   : > { %5886 = vmatpush1.bf16.msra.mxu1 %v9356_v59  ;;  %v9443_v59 = vld [vmem:[%s12878_s13 + $0x4b0] ss:$8 sps:$4 sm:$0xff]  }
 0xa0b   : > { %5887 = vmatprep.subr.bf16.mxu1 %v9364_v4  ;;  %v9451_v4 = vld [vmem:[%s12878_s13 + $0x4c4] ss:$8 sps:$4 sm:$0xff]  }
 0xa0c   : > { %6045 = vmatpush1.bf16.msra.mxu0 %v9359_v10  ;;  %v9446_v10 = vld [vmem:[%s12878_s13 + $0x440] ss:$8 sps:$4 sm:$0xff]  }
 0xa0d   : > { %6046 = vmatprep.subr.bf16.mxu0 %v9367_v21  ;;  %v9454_v21 = vld [vmem:[%s12878_s13 + $0x454] ss:$8 sps:$4 sm:$0xff]  }
 0xa0e   : > { %5888 = vmatpush1.bf16.msra.mxu1 %v9362_v25  ;;  %v9449_v25 = vld [vmem:[%s12878_s13 + $0x4c0] ss:$8 sps:$4 sm:$0xff]  }
 0xa0f   : > { %5889 = vmatprep.subr.bf16.mxu1 %v9370_v38  ;;  %v9457_v38 = vld [vmem:[%s12878_s13 + $0x4d4] ss:$8 sps:$4 sm:$0xff]  }
 0xa10   : > { %6047 = vmatpush1.bf16.msra.mxu0 %v9365_v39  ;;  %v9452_v39 = vld [vmem:[%s12878_s13 + $0x450] ss:$8 sps:$4 sm:$0xff]  }
 0xa11   : > { %6048 = vmatprep.subr.bf16.mxu0 %v9373_v61  ;;  %v9460_v61 = vld [vmem:[%s12878_s13 + $0x464] ss:$8 sps:$4 sm:$0xff]  }
 0xa12   : > { %5890 = vmatpush1.bf16.msra.mxu1 %v9368_v17  ;;  %v9455_v17 = vld [vmem:[%s12878_s13 + $0x4d0] ss:$8 sps:$4 sm:$0xff]  }
 0xa13   : > { %6193 = vmatprep.subr.bf16.mxu1 %v9376_v11  ;;  %v9463_v11 = vld [vmem:[%s12878_s13 + $0x4e4] ss:$8 sps:$4 sm:$0xff]  }
 0xa14   : > { %6049 = vmatpush1.bf16.msra.mxu0 %v9371_v2  ;;  %v9458_v2 = vld [vmem:[%s12878_s13 + $0x460] ss:$8 sps:$4 sm:$0xff]  }
 0xa15   : > { %5908 = vmatmul.mubr.bf16.vlgmr.msra.gmra.mrb[52].mxu1 %v5793_v24  ;;  %6352 = vmatprep.subr.bf16.mxu0 %v9379_v43  ;;  %v9466_v43 = vld [vmem:[%s12878_s13 + $0x474] ss:$8 sps:$4 sm:$0xff]  }
 0xa16   : > { %6194 = vmatpush1.bf16.msra.mxu1 %v9374_v40  ;;  %6225 = vmatprep.mubr.bf16.mxu1 %v9711_v5  ;;  %v9461_v40 = vld [vmem:[%s12878_s13 + $0x4e0] ss:$8 sps:$4 sm:$0xff]   ;;  %v9469_v24 = vld [vmem:[%s12878_s13 + $0x4f4] ss:$8 sps:$4 sm:$0xff]  }
 0xa17   : > { %6067 = vmatmul.mubr.bf16.vlgmr.msra.gmra.mrb[80].mxu0 %v5952_v14  ;;  %6195 = vmatprep.subr.bf16.mxu1 %v9382_v3  ;;  %v9464_v3 = vld [vmem:[%s12878_s13 + $0x470] ss:$8 sps:$4 sm:$0xff]  }
 0xa18   : > { %6353 = vmatpush1.bf16.msra.mxu0 %v9377_v13  ;;  %6384 = vmatprep.mubr.bf16.mxu0 %v9711_v5  ;;  %v9472_v13 = vld [vmem:[%s12878_s13 + $0x504] ss:$8 sps:$4 sm:$0xff]   ;;  %v9467_v14 = vld [vmem:[%s12878_s13 + $0x4f0] ss:$8 sps:$4 sm:$0xff]  }
 0xa19   : > { %6354 = vmatprep.subr.bf16.mxu0 %v9385_v8  ;;  %v12421_v8 = vpack.c.bf16 %v12015_v31, %v12015_v31  ;;  %v9473_v31 = vld [vmem:[%s12878_s13 + $0x580] ss:$8 sps:$4 sm:$0xff]  }
 0xa1a   : > { %6196 = vmatpush1.bf16.msra.mxu1 %v9380_v16  ;;  %v9475_v16 = vld [vmem:[%s12878_s13 + $0x584] ss:$8 sps:$4 sm:$0xff]  }
 0xa1b   : > { %6197 = vmatprep.subr.bf16.mxu1 %v9388_v9  ;;  %v9470_v9 = vld [vmem:[%s12878_s13 + $0x500] ss:$8 sps:$4 sm:$0xff]  }
 0xa1c   : > { %6355 = vmatpush1.bf16.msra.mxu0 %v9383_v32  ;;  %v9478_v32 = vld [vmem:[%s12878_s13 + $0x514] ss:$8 sps:$4 sm:$0xff]  }
 0xa1d   : > { %6356 = vmatprep.subr.bf16.mxu0 %v9391_v28  ;;  %v12437_v28 = vshrl.u32 %v12421_v8, 16 }
 0xa1e   : > { %6198 = vmatpush1.bf16.msra.mxu1 %v9386_v41  ;;  %v9481_v41 = vld [vmem:[%s12878_s13 + $0x594] ss:$8 sps:$4 sm:$0xff]  }
 0xa1f   : > { %6199 = vmatprep.subr.bf16.mxu1 %v9394_v7  ;;  %v9476_v7 = vld [vmem:[%s12878_s13 + $0x510] ss:$8 sps:$4 sm:$0xff]  }
 0xa20   : > { %6357 = vmatpush1.bf16.msra.mxu0 %v9389_v44  ;;  %v9484_v44 = vld [vmem:[%s12878_s13 + $0x524] ss:$8 sps:$4 sm:$0xff]  }
 0xa21   : > { %6358 = vmatprep.subr.bf16.mxu0 %v9397_v12  ;;  %v9479_v12 = vld [vmem:[%s12878_s13 + $0x590] ss:$8 sps:$4 sm:$0xff]  }
 0xa22   : > { %6200 = vmatpush1.bf16.msra.mxu1 %v9392_v20  ;;  %v9487_v20 = vld [vmem:[%s12878_s13 + $0x5a4] ss:$8 sps:$4 sm:$0xff]  }
 0xa23   : > { %6201 = vmatprep.subr.bf16.mxu1 %v9400_v37  ;;  %v9482_v37 = vld [vmem:[%s12878_s13 + $0x520] ss:$8 sps:$4 sm:$0xff]  }
 0xa24   : > { %6359 = vmatpush1.bf16.msra.mxu0 %v9395_v49  ;;  %v9490_v49 = vld [vmem:[%s12878_s13 + $0x534] ss:$8 sps:$4 sm:$0xff]  }
 0xa25   : > { %6360 = vmatprep.subr.bf16.mxu0 %v9403_v15  ;;  %v9485_v15 = vld [vmem:[%s12878_s13 + $0x5a0] ss:$8 sps:$4 sm:$0xff]  }
 0xa26   : > { %6202 = vmatpush1.bf16.msra.mxu1 %v9398_v26  ;;  %v9493_v26 = vld [vmem:[%s12878_s13 + $0x5b4] ss:$8 sps:$4 sm:$0xff]  }
 0xa27   : > { %6203 = vmatprep.subr.bf16.mxu1 %v9406_v33  ;;  %v9488_v33 = vld [vmem:[%s12878_s13 + $0x530] ss:$8 sps:$4 sm:$0xff]  }
 0xa28   : > { %6361 = vmatpush1.bf16.msra.mxu0 %v9401_v47  ;;  %v9496_v47 = vld [vmem:[%s12878_s13 + $0x544] ss:$8 sps:$4 sm:$0xff]  }
 0xa29   : > { %6362 = vmatprep.subr.bf16.mxu0 %v9409_v34  ;;  %v9491_v34 = vld [vmem:[%s12878_s13 + $0x5b0] ss:$8 sps:$4 sm:$0xff]  }
 0xa2a   : > { %6204 = vmatpush1.bf16.msra.mxu1 %v9404_v22  ;;  %v9499_v22 = vld [vmem:[%s12878_s13 + $0x5c4] ss:$8 sps:$4 sm:$0xff]  }
 0xa2b   : > { %6205 = vmatprep.subr.bf16.mxu1 %v9412_v6  ;;  %v9494_v6 = vld [vmem:[%s12878_s13 + $0x540] ss:$8 sps:$4 sm:$0xff]  }
 0xa2c   : > { %6363 = vmatpush1.bf16.msra.mxu0 %v9407_v27  ;;  %v9502_v27 = vld [vmem:[%s12878_s13 + $0x554] ss:$8 sps:$4 sm:$0xff]  }
 0xa2d   : > { %6364 = vmatprep.subr.bf16.mxu0 %v9415_v36  ;;  %v9497_v36 = vld [vmem:[%s12878_s13 + $0x5c0] ss:$8 sps:$4 sm:$0xff]  }
 0xa2e   : > { %6206 = vmatpush1.bf16.msra.mxu1 %v9410_v30  ;;  %v9505_v30 = vld [vmem:[%s12878_s13 + $0x5d4] ss:$8 sps:$4 sm:$0xff]  }
 0xa2f   : > { %6207 = vmatprep.subr.bf16.mxu1 %v9418_v42  ;;  %v9500_v42 = vld [vmem:[%s12878_s13 + $0x550] ss:$8 sps:$4 sm:$0xff]  }
 0xa30   : > { %6365 = vmatpush1.bf16.msra.mxu0 %v9413_v45  ;;  %v9508_v45 = vld [vmem:[%s12878_s13 + $0x564] ss:$8 sps:$4 sm:$0xff]  }
 0xa31   : > { %6366 = vmatprep.subr.bf16.mxu0 %v9421_v57  ;;  %v9503_v57 = vld [vmem:[%s12878_s13 + $0x5d0] ss:$8 sps:$4 sm:$0xff]  }
 0xa32   : > { %6208 = vmatpush1.bf16.msra.mxu1 %v9416_v48  ;;  %v9511_v48 = vld [vmem:[%s12878_s13 + $0x5e4] ss:$8 sps:$4 sm:$0xff]  }
 0xa33   : > { %6510 = vmatprep.subr.bf16.mxu1 %v9424_v35  ;;  %v9506_v35 = vld [vmem:[%s12878_s13 + $0x560] ss:$8 sps:$4 sm:$0xff]  }
 0xa34   : > { %6367 = vmatpush1.bf16.msra.mxu0 %v9419_v52  ;;  %v9514_v52 = vld [vmem:[%s12878_s13 + $0x574] ss:$8 sps:$4 sm:$0xff]  }
 0xa35   : > { %6226 = vmatmul.mubr.bf16.vlgmr.msra.gmra.mrb[56].mxu1 %v6111_v46  ;;  %6671 = vmatprep.subr.bf16.mxu0 %v9427_v29  ;;  %v9509_v29 = vld [vmem:[%s12878_s13 + $0x5e0] ss:$8 sps:$4 sm:$0xff]   ;;  %v9512_v46 = vld [vmem:[%s12878_s13 + $0x570] ss:$8 sps:$4 sm:$0xff]  }
 0xa36   : > { %6511 = vmatpush1.bf16.msra.mxu1 %v9422_v18  ;;  %6542 = vmatprep.mubr.bf16.mxu1 %v9711_v5  ;;  %v9517_v18 = vld [vmem:[%s12878_s13 + $0x5f4] ss:$8 sps:$4 sm:$0xff]  }
 0xa37   : > { %6385 = vmatmul.mubr.bf16.vlgmr.msra.gmra.mrb[84].mxu0 %v6270_v50  ;;  %6512 = vmatprep.subr.bf16.mxu1 %v9430_v53  ;;  %v9520_v53 = vld [vmem:[%s12878_s13 + $0x604] ss:$8 sps:$4 sm:$0xff]  }
 0xa38   : > { %6672 = vmatpush1.bf16.msra.mxu0 %v9425_v54  ;;  %6703 = vmatprep.mubr.bf16.mxu0 %v9711_v5  ;;  %v9515_v54 = vld [vmem:[%s12878_s13 + $0x5f0] ss:$8 sps:$4 sm:$0xff]   ;;  %v9523_v50 = vld [vmem:[%s12878_s13 + $0x684] ss:$8 sps:$4 sm:$0xff]  }
 0xa39   : > { %6673 = vmatprep.subr.bf16.mxu0 %v9433_v58  ;;  %v9518_v58 = vld [vmem:[%s12878_s13 + $0x600] ss:$8 sps:$4 sm:$0xff]  }
 0xa3a   : > { %6513 = vmatpush1.bf16.msra.mxu1 %v9428_v51  ;;  %v6749_v51 = vrot.slane %v12421_v8, 1 }
 0xa3b   : > { %6514 = vmatprep.subr.bf16.mxu1 %v9436_v60  ;;  %v9526_v60 = vld [vmem:[%s12878_s13 + $0x614] ss:$8 sps:$4 sm:$0xff]  }
 0xa3c   : > { %6674 = vmatpush1.bf16.msra.mxu0 %v9431_v1  ;;  %v9521_v1 = vld [vmem:[%s12878_s13 + $0x680] ss:$8 sps:$4 sm:$0xff]  }
 0xa3d   : > { %6675 = vmatprep.subr.bf16.mxu0 %v9439_v56  ;;  %v6908_v56 = vrot.slane %v12437_v28, 1 }
 0xa3e   : > { %6515 = vmatpush1.bf16.msra.mxu1 %v9434_v0  ;;  %v9529_v0 = vld [vmem:[%s12878_s13 + $0x694] ss:$8 sps:$4 sm:$0xff]  }
 0xa3f   : > { %6516 = vmatprep.subr.bf16.mxu1 %v9442_v19  ;;  %v9524_v19 = vld [vmem:[%s12878_s13 + $0x610] ss:$8 sps:$4 sm:$0xff]  }
 0xa40   : > { %6676 = vmatpush1.bf16.msra.mxu0 %v9437_v23  ;;  %v9532_v23 = vld [vmem:[%s12878_s13 + $0x624] ss:$8 sps:$4 sm:$0xff]  }
 0xa41   : > { %6677 = vmatprep.subr.bf16.mxu0 %v9445_v63  ;;  %v9527_v63 = vld [vmem:[%s12878_s13 + $0x690] ss:$8 sps:$4 sm:$0xff]  }
 0xa42   : > { %6517 = vmatpush1.bf16.msra.mxu1 %v9440_v55  ;;  %v9535_v55 = vld [vmem:[%s12878_s13 + $0x6a4] ss:$8 sps:$4 sm:$0xff]  }
 0xa43   : > { %6518 = vmatprep.subr.bf16.mxu1 %v9448_v62  ;;  %v9530_v62 = vld [vmem:[%s12878_s13 + $0x620] ss:$8 sps:$4 sm:$0xff]  }
 0xa44   : > { %6678 = vmatpush1.bf16.msra.mxu0 %v9443_v59  ;;  %v9538_v59 = vld [vmem:[%s12878_s13 + $0x634] ss:$8 sps:$4 sm:$0xff]  }
 0xa45   : > { %6679 = vmatprep.subr.bf16.mxu0 %v9451_v4  ;;  %v9533_v4 = vld [vmem:[%s12878_s13 + $0x6a0] ss:$8 sps:$4 sm:$0xff]  }
 0xa46   : > { %6519 = vmatpush1.bf16.msra.mxu1 %v9446_v10  ;;  %v9541_v10 = vld [vmem:[%s12878_s13 + $0x6b4] ss:$8 sps:$4 sm:$0xff]  }
 0xa47   : > { %6520 = vmatprep.subr.bf16.mxu1 %v9454_v21  ;;  %v9536_v21 = vld [vmem:[%s12878_s13 + $0x630] ss:$8 sps:$4 sm:$0xff]  }
 0xa48   : > { %6680 = vmatpush1.bf16.msra.mxu0 %v9449_v25  ;;  %v9544_v25 = vld [vmem:[%s12878_s13 + $0x644] ss:$8 sps:$4 sm:$0xff]  }
 0xa49   : > { %6681 = vmatprep.subr.bf16.mxu0 %v9457_v38  ;;  %v9539_v38 = vld [vmem:[%s12878_s13 + $0x6b0] ss:$8 sps:$4 sm:$0xff]  }
 0xa4a   : > { %6521 = vmatpush1.bf16.msra.mxu1 %v9452_v39  ;;  %v9547_v39 = vld [vmem:[%s12878_s13 + $0x6c4] ss:$8 sps:$4 sm:$0xff]  }
 0xa4b   : > { %6522 = vmatprep.subr.bf16.mxu1 %v9460_v61  ;;  %v9542_v61 = vld [vmem:[%s12878_s13 + $0x640] ss:$8 sps:$4 sm:$0xff]  }
 0xa4c   : > { %6682 = vmatpush1.bf16.msra.mxu0 %v9455_v17  ;;  %v9550_v17 = vld [vmem:[%s12878_s13 + $0x654] ss:$8 sps:$4 sm:$0xff]  }
 0xa4d   : > { %6683 = vmatprep.subr.bf16.mxu0 %v9463_v11  ;;  %v9545_v11 = vld [vmem:[%s12878_s13 + $0x6c0] ss:$8 sps:$4 sm:$0xff]  }
 0xa4e   : > { %6523 = vmatpush1.bf16.msra.mxu1 %v9458_v2  ;;  %v9553_v2 = vld [vmem:[%s12878_s13 + $0x6d4] ss:$8 sps:$4 sm:$0xff]  }
 0xa4f   : > { %6524 = vmatprep.subr.bf16.mxu1 %v9466_v43  ;;  %v9548_v43 = vld [vmem:[%s12878_s13 + $0x650] ss:$8 sps:$4 sm:$0xff]  }
 0xa50   : > { %6684 = vmatpush1.bf16.msra.mxu0 %v9461_v40  ;;  %v9556_v40 = vld [vmem:[%s12878_s13 + $0x664] ss:$8 sps:$4 sm:$0xff]  }
 0xa51   : > { %6685 = vmatprep.subr.bf16.mxu0 %v9469_v24  ;;  %v9551_v24 = vld [vmem:[%s12878_s13 + $0x6d0] ss:$8 sps:$4 sm:$0xff]  }
 0xa52   : > { %6525 = vmatpush1.bf16.msra.mxu1 %v9464_v3  ;;  %v9559_v3 = vld [vmem:[%s12878_s13 + $0x6e4] ss:$8 sps:$4 sm:$0xff]  }
 0xa53   : > { %6831 = vmatprep.subr.bf16.mxu1 %v9472_v13  ;;  %v9554_v13 = vld [vmem:[%s12878_s13 + $0x660] ss:$8 sps:$4 sm:$0xff]  }
 0xa54   : > { %6686 = vmatpush1.bf16.msra.mxu0 %v9467_v14  ;;  %v9562_v14 = vld [vmem:[%s12878_s13 + $0x674] ss:$8 sps:$4 sm:$0xff]  }
 0xa55   : > { %6543 = vmatmul.mubr.bf16.vlgmr.msra.gmra.mrb[60].mxu1 %v12421_v8  ;;  %6990 = vmatprep.subr.bf16.mxu0 %v9475_v16  ;;  %v9557_v16 = vld [vmem:[%s12878_s13 + $0x6e0] ss:$8 sps:$4 sm:$0xff]  }
 0xa56   : > { %6832 = vmatpush1.bf16.msra.mxu1 %v9470_v9  ;;  %6863 = vmatprep.mubr.bf16.mxu1 %v9711_v5  ;;  %v9565_v9 = vld [vmem:[%s12878_s13 + $0x6f4] ss:$8 sps:$4 sm:$0xff]  }
 0xa57   : > { %6704 = vmatmul.mubr.bf16.vlgmr.msra.gmra.mrb[88].mxu0 %v12437_v28  ;;  %6833 = vmatprep.subr.bf16.mxu1 %v9478_v32  ;;  %v9560_v32 = vld [vmem:[%s12878_s13 + $0x670] ss:$8 sps:$4 sm:$0xff]  }
 0xa58   : > { %6991 = vmatpush1.bf16.msra.mxu0 %v9473_v31  ;;  %7022 = vmatprep.mubr.bf16.mxu0 %v9711_v5  ;;  %v9568_v31 = vld [vmem:[%s12878_s13 + $0x704] ss:$8 sps:$4 sm:$0xff]  }
 0xa59   : > { %6992 = vmatprep.subr.bf16.mxu0 %v9481_v41  ;;  %v9563_v41 = vld [vmem:[%s12878_s13 + $0x6f0] ss:$8 sps:$4 sm:$0xff]  }
 0xa5a   : > { %6834 = vmatpush1.bf16.msra.mxu1 %v9476_v7  ;;  %v9571_v7 = vld [vmem:[%s12878_s13 + $0x784] ss:$8 sps:$4 sm:$0xff]  }
 0xa5b   : > { %6835 = vmatprep.subr.bf16.mxu1 %v9484_v44  ;;  %v9566_v44 = vld [vmem:[%s12878_s13 + $0x700] ss:$8 sps:$4 sm:$0xff]  }
 0xa5c   : > { %6993 = vmatpush1.bf16.msra.mxu0 %v9479_v12  ;;  %v7067_v12 = vrot.slane %v12421_v8, 2 }
 0xa5d   : > { %6994 = vmatprep.subr.bf16.mxu0 %v9487_v20  ;;  %v9574_v20 = vld [vmem:[%s12878_s13 + $0x714] ss:$8 sps:$4 sm:$0xff]  }
 0xa5e   : > { %6836 = vmatpush1.bf16.msra.mxu1 %v9482_v37  ;;  %v9569_v37 = vld [vmem:[%s12878_s13 + $0x780] ss:$8 sps:$4 sm:$0xff]  }
 0xa5f   : > { %6837 = vmatprep.subr.bf16.mxu1 %v9490_v49  ;;  %v7226_v49 = vrot.slane %v12437_v28, 2 }
 0xa60   : > { %6995 = vmatpush1.bf16.msra.mxu0 %v9485_v15  ;;  %v9577_v15 = vld [vmem:[%s12878_s13 + $0x794] ss:$8 sps:$4 sm:$0xff]  }
 0xa61   : > { %6996 = vmatprep.subr.bf16.mxu0 %v9493_v26  ;;  %v9572_v26 = vld [vmem:[%s12878_s13 + $0x710] ss:$8 sps:$4 sm:$0xff]  }
 0xa62   : > { %6838 = vmatpush1.bf16.msra.mxu1 %v9488_v33  ;;  %v9580_v33 = vld [vmem:[%s12878_s13 + $0x724] ss:$8 sps:$4 sm:$0xff]  }
 0xa63   : > { %6839 = vmatprep.subr.bf16.mxu1 %v9496_v47  ;;  %v9575_v47 = vld [vmem:[%s12878_s13 + $0x790] ss:$8 sps:$4 sm:$0xff]  }
 0xa64   : > { %6997 = vmatpush1.bf16.msra.mxu0 %v9491_v34  ;;  %v9583_v34 = vld [vmem:[%s12878_s13 + $0x7a4] ss:$8 sps:$4 sm:$0xff]  }
 0xa65   : > { %6998 = vmatprep.subr.bf16.mxu0 %v9499_v22  ;;  %v9578_v22 = vld [vmem:[%s12878_s13 + $0x720] ss:$8 sps:$4 sm:$0xff]  }
 0xa66   : > { %6840 = vmatpush1.bf16.msra.mxu1 %v9494_v6  ;;  %v9586_v6 = vld [vmem:[%s12878_s13 + $0x734] ss:$8 sps:$4 sm:$0xff]  }
 0xa67   : > { %6841 = vmatprep.subr.bf16.mxu1 %v9502_v27  ;;  %v9589_v27 = vld [vmem:[%s12878_s13 + $0x7b4] ss:$8 sps:$4 sm:$0xff]  }
 0xa68   : > { %6999 = vmatpush1.bf16.msra.mxu0 %v9497_v36  ;;  %v9584_v36 = vld [vmem:[%s12878_s13 + $0x730] ss:$8 sps:$4 sm:$0xff]  }
 0xa69   : > { %7000 = vmatprep.subr.bf16.mxu0 %v9505_v30  ;;  %v9592_v30 = vld [vmem:[%s12878_s13 + $0x744] ss:$8 sps:$4 sm:$0xff]  }
 0xa6a   : > { %6842 = vmatpush1.bf16.msra.mxu1 %v9500_v42  ;;  %v9587_v42 = vld [vmem:[%s12878_s13 + $0x7b0] ss:$8 sps:$4 sm:$0xff]  }
 0xa6b   : > { %6843 = vmatprep.subr.bf16.mxu1 %v9508_v45  ;;  %v9712_v45 = vmov 1966171168  }
 0xa6c   : > { %7001 = vmatpush1.bf16.msra.mxu0 %v9503_v57  ;;  %v5281_v57 = vunpack.c.l.s4 %v9712_v45 }
 0xa6d   : > { %7002 = vmatprep.subr.bf16.mxu0 %v9511_v48  ;;  %v5283_v48 = vlaneseq }
 0xa6e   : > { %6844 = vmatpush1.bf16.msra.mxu1 %v9506_v35  ;;  %v9595_v35 = vld [vmem:[%s12878_s13 + $0x7c4] ss:$8 sps:$4 sm:$0xff]  }
 0xa6f   : > { %6845 = vmatprep.subr.bf16.mxu1 %v9514_v52  ;;  %v9590_v52 = vld [vmem:[%s12878_s13 + $0x740] ss:$8 sps:$4 sm:$0xff]  }
 0xa70   : > { %7003 = vmatpush1.bf16.msra.mxu0 %v9509_v29  ;;  %v9598_v29 = vld [vmem:[%s12878_s13 + $0x754] ss:$8 sps:$4 sm:$0xff]  }
 0xa71   : > { %7004 = vmatprep.subr.bf16.mxu0 %v9517_v18  ;;  %v9593_v18 = vld [vmem:[%s12878_s13 + $0x7c0] ss:$8 sps:$4 sm:$0xff]  }
 0xa72   : > { %6846 = vmatpush1.bf16.msra.mxu1 %v9512_v46  ;;  %v5282_v46 = vunpack.c.0.s8 %v5281_v57 }
 0xa73   : > { %7149 = vmatprep.subr.bf16.mxu1 %v9520_v53  ;;  %v12690_v53 = vshrl.u32 %v5283_v48, 7 }
 0xa74   : > { %7005 = vmatpush1.bf16.msra.mxu0 %v9515_v54  ;;  %v9601_v54 = vld [vmem:[%s12878_s13 + $0x7d4] ss:$8 sps:$4 sm:$0xff]  }
 0xa75   : > { %6864 = vmatmul.mubr.bf16.vlgmr.msra.gmra.mrb[64].mxu1 %v6749_v51  ;;  %7308 = vmatprep.subr.bf16.mxu0 %v9523_v50  ;;  %v9596_v50 = vld [vmem:[%s12878_s13 + $0x750] ss:$8 sps:$4 sm:$0xff]  }
 0xa76   : > { %7150 = vmatpush1.bf16.msra.mxu1 %v9518_v58  ;;  %7181 = vmatprep.mubr.bf16.mxu1 %v9711_v5  ;;  %v9604_v58 = vld [vmem:[%s12878_s13 + $0x764] ss:$8 sps:$4 sm:$0xff]   ;;  %v9599_v51 = vld [vmem:[%s12878_s13 + $0x7d0] ss:$8 sps:$4 sm:$0xff]  }
 0xa77   : > { %7023 = vmatmul.mubr.bf16.vlgmr.msra.gmra.mrb[92].mxu0 %v6908_v56  ;;  %7151 = vmatprep.subr.bf16.mxu1 %v9526_v60 }
 0xa78   : > { %7309 = vmatpush1.bf16.msra.mxu0 %v9521_v1  ;;  %7340 = vmatprep.mubr.bf16.mxu0 %v9711_v5  ;;  %v12705_v1 = vsub.s32 %v5282_v46, %v12690_v53 }
 0xa79   : > { %7310 = vmatprep.subr.bf16.mxu0 %v9529_v0  ;;  %v9607_v0 = vld [vmem:[%s12878_s13 + $0x7e4] ss:$8 sps:$4 sm:$0xff]  }
 0xa7a   : > { %7152 = vmatpush1.bf16.msra.mxu1 %v9524_v19 }
 0xa7b   : > { %7153 = vmatprep.subr.bf16.mxu1 %v9532_v23  ;;  %v9602_v23 = vld [vmem:[%s12878_s13 + $0x760] ss:$8 sps:$4 sm:$0xff]  }
 0xa7c   : > { %7311 = vmatpush1.bf16.msra.mxu0 %v9527_v63 }
 0xa7d   : > { %7312 = vmatprep.subr.bf16.mxu0 %v9535_v55 }
 0xa7e   : > { %7154 = vmatpush1.bf16.msra.mxu1 %v9530_v62 }
 0xa7f   : > { %7155 = vmatprep.subr.bf16.mxu1 %v9538_v59 }
 0xa80   : > { %7313 = vmatpush1.bf16.msra.mxu0 %v9533_v4  ;;  %v9610_v4 = vld [vmem:[%s12878_s13 + $0x774] ss:$8 sps:$4 sm:$0xff]  }
 0xa81   : > { %7314 = vmatprep.subr.bf16.mxu0 %v9541_v10 }
 0xa82   : > { %7156 = vmatpush1.bf16.msra.mxu1 %v9536_v21 }
 0xa83   : > { %7157 = vmatprep.subr.bf16.mxu1 %v9544_v25  ;;  %v9605_v25 = vld [vmem:[%s12878_s13 + $0x7e0] ss:$8 sps:$4 sm:$0xff]  }
 0xa84   : > { %7315 = vmatpush1.bf16.msra.mxu0 %v9539_v38 }
 0xa85   : > { %7316 = vmatprep.subr.bf16.mxu0 %v9547_v39  ;;  %v5138_v39 = vld [vmem:[%s12879_s14] sm:$0x3] }
 0xa86   : > { %7158 = vmatpush1.bf16.msra.mxu1 %v9542_v61 }
 0xa87   : > { %7159 = vmatprep.subr.bf16.mxu1 %v9550_v17  ;;  %v9613_v17 = vld [vmem:[%s12878_s13 + $0x7f4] ss:$8 sps:$4 sm:$0xff]  }
 0xa88   : > { %7317 = vmatpush1.bf16.msra.mxu0 %v9545_v11 }
 0xa89   : > { %7318 = vmatprep.subr.bf16.mxu0 %v9553_v2 }
 0xa8a   : > { %7160 = vmatpush1.bf16.msra.mxu1 %v9548_v43  ;;  %v9608_v43 = vld [vmem:[%s12878_s13 + $0x770] ss:$8 sps:$4 sm:$0xff]  }
 0xa8b   : > { %7161 = vmatprep.subr.bf16.mxu1 %v9556_v40 }
 0xa8c   : > { %7319 = vmatpush1.bf16.msra.mxu0 %v9551_v24 }
 0xa8d   : > { %7320 = vmatprep.subr.bf16.mxu0 %v9559_v3  ;;  %v9611_v3 = vld [vmem:[%s12878_s13 + $0x7f0] ss:$8 sps:$4 sm:$0xff]  }
 0xa8e   : > { %7162 = vmatpush1.bf16.msra.mxu1 %v9554_v13 }
 0xa8f   : > { %7163 = vmatprep.subr.bf16.mxu1 %v9562_v14  ;;  %v7385_v14 = vrot.slane %v12421_v8, 3 }
 0xa90   : > { %7321 = vmatpush1.bf16.msra.mxu0 %v9557_v16  ;;  %v7544_v16 = vrot.slane %v12437_v28, 3 }
 0xa91   : > { %7322 = vmatprep.subr.bf16.mxu0 %v9565_v9 }
 0xa92   : > { %7164 = vmatpush1.bf16.msra.mxu1 %v9560_v32 }
 0xa93   : > { %7467 = vmatprep.subr.bf16.mxu1 %v9568_v31 }
 0xa94   : > { %7323 = vmatpush1.bf16.msra.mxu0 %v9563_v41 }
 0xa95   : > { %7182 = vmatmul.mubr.bf16.vlgmr.msra.gmra.mrb[68].mxu1 %v7067_v12  ;;  %7626 = vmatprep.subr.bf16.mxu0 %v9571_v7 }
 0xa96   : > { %7468 = vmatpush1.bf16.msra.mxu1 %v9566_v44  ;;  %7499 = vmatprep.mubr.bf16.mxu1 %v9711_v5 }
 0xa97   : > { %7341 = vmatmul.mubr.bf16.vlgmr.msra.gmra.mrb[96].mxu0 %v7226_v49  ;;  %7469 = vmatprep.subr.bf16.mxu1 %v9574_v20 }
 0xa98   : > { %7627 = vmatpush1.bf16.msra.mxu0 %v9569_v37  ;;  %7658 = vmatprep.mubr.bf16.mxu0 %v9711_v5  ;;  %v9581_v5 = vld [vmem:[%s12878_s13 + $0x7a0] ss:$8 sps:$4 sm:$0xff]  }
 0xa99   : > { %7628 = vmatprep.subr.bf16.mxu0 %v9577_v15 }
 0xa9a   : > { %7470 = vmatpush1.bf16.msra.mxu1 %v9572_v26 }
 0xa9b   : > { %7471 = vmatprep.subr.bf16.mxu1 %v9580_v33 }
 0xa9c   : > { %7629 = vmatpush1.bf16.msra.mxu0 %v9575_v47 }
 0xa9d   : > { %7630 = vmatprep.subr.bf16.mxu0 %v9583_v34 }
 0xa9e   : > { %7472 = vmatpush1.bf16.msra.mxu1 %v9578_v22 }
 0xa9f   : > { %7473 = vmatprep.subr.bf16.mxu1 %v9586_v6 }
 0xaa0   : > { %7631 = vmatpush1.bf16.msra.mxu0 %v9581_v5 }
 0xaa1   : > { %7632 = vmatprep.subr.bf16.mxu0 %v9589_v27 }
 0xaa2   : > { %7474 = vmatpush1.bf16.msra.mxu1 %v9584_v36 }
 0xaa3   : > { %7475 = vmatprep.subr.bf16.mxu1 %v9592_v30 }
 0xaa4   : > { %7633 = vmatpush1.bf16.msra.mxu0 %v9587_v42 }
 0xaa5   : > { %7634 = vmatprep.subr.bf16.mxu0 %v9595_v35 }
 0xaa6   : > { %7476 = vmatpush1.bf16.msra.mxu1 %v9590_v52 }
 0xaa7   : > { %7477 = vmatprep.subr.bf16.mxu1 %v9598_v29 }
 0xaa8   : > { %7635 = vmatpush1.bf16.msra.mxu0 %v9593_v18  ;;  %v5270_v60 = vpop.f32.mrb[44].mxu1 }
 0xaa9   : > { %7636 = vmatprep.subr.bf16.mxu0 %v9601_v54  ;;  %v5272_v56 = vpop.f32.mrb[45].mxu1  ;;  %v9614_v54 = vld [vmem:[%s12880_s15 + $0x40] sm:$0xff]  }
 0xaaa   : > { %7478 = vmatpush1.bf16.msra.mxu1 %v9596_v50  ;;  %v5279_v19 = vcombine.low %v5270_v60, %v5272_v56  ;;  %v5274_v63 = vpop.f32.mrb[46].mxu1  ;;  %v5431_v55 = vpop.f32.mrb[72].mxu0  ;;  %v9615_v50 = vld [vmem:[%s12880_s15] sm:$0xff]   ;;  %v9618_v60 = vld [vmem:[%s12880_s15 + $0x50] sm:$0xff]  }
 0xaab   : > { %7479 = vmatprep.subr.bf16.mxu1 %v9604_v58  ;;  %v5275_v62 = vpop.f32.mrb[47].mxu1  ;;  %v5433_v59 = vpop.f32.mrb[73].mxu0  ;;  %v9616_v58 = vld [vmem:[%s12880_s15 + $0x48] sm:$0xff]   ;;  %v9619_v56 = vld [vmem:[%s12880_s15 + $0x10] sm:$0xff]  }
 0xaac   : > { %7637 = vmatpush1.bf16.msra.mxu0 %v9599_v51  ;;  %v5286_v10 = vrot.slane %v5279_v19, %v12705_v1  ;;  %v5440_v21 = vcombine.low %v5431_v55, %v5433_v59  ;;  %v5435_v38 = vpop.f32.mrb[74].mxu0  ;;  %v9617_v51 = vld [vmem:[%s12880_s15 + $0x8] sm:$0xff]  }
 0xaad   : > { %7638 = vmatprep.subr.bf16.mxu0 %v9607_v0  ;;  %v5436_v61 = vpop.f32.mrb[75].mxu0  ;;  %v9620_v0 = vld [vmem:[%s12880_s15 + $0x58] sm:$0xff]  }
 0xaae   : > { %v5293_v11 = vrot.slane %v5286_v10, %v12705_v1  ;;  %7480 = vmatpush1.bf16.msra.mxu1 %v9602_v23  ;;  %v5447_v2 = vrot.slane %v5440_v21, %v12705_v1  ;;  %v9621_v23 = vld [vmem:[%s12880_s15 + $0x18] sm:$0xff]  }
 0xaaf   : > { %7481 = vmatprep.subr.bf16.mxu1 %v9610_v4 }
 0xab0   : > { %v5295_v40 = vadd.f32 %v5293_v11, %v5138_v39  ;;  %v5454_v24 = vrot.slane %v5447_v2, %v12705_v1  ;;  %7639 = vmatpush1.bf16.msra.mxu0 %v9605_v25 }
 0xab1   : > { %7640 = vmatprep.subr.bf16.mxu0 %v9613_v17 }
 0xab2   : > { %v5456_v13 = vadd.f32 %v5454_v24, %v5295_v40  ;;  %7482 = vmatpush1.bf16.msra.mxu1 %v9608_v43  ;;  %v9622_v40 = vld [vmem:[%s12880_s15 + $0x60] sm:$0xff]  }
 0xab3   : > { %8820 = vmatprep.subr.bf16.mxu1 %v9614_v54  ;;  %v9623_v24 = vld [vmem:[%s12880_s15 + $0x20] sm:$0xff]  }
 0xab4   : > { %7641 = vmatpush1.bf16.msra.mxu0 %v9611_v3  ;;  %v9624_v3 = vld [vmem:[%s12880_s15 + $0x68] sm:$0xff]  }
 0xab5   : > { %7500 = vmatmul.mubr.bf16.vlgmr.msra.gmra.mrb[72].mxu1 %v7385_v14  ;;  %v9626_v14 = vld [vmem:[%s12880_s15 + $0x70] sm:$0xff]  }
 0xab6   : > { %8821 = vmatpush3.bf16.msra.mxu1 %v9615_v50 }
 0xab7   : > { %7659 = vmatmul.mubr.bf16.vlgmr.msra.gmra.mrb[100].mxu0 %v7544_v16  ;;  %8822 = vmatprep.subr.bf16.mxu1 %v9616_v58  ;;  %v9627_v16 = vld [vmem:[%s12880_s15 + $0x30] sm:$0xff]  }
 0xaba   : > { %8823 = vmatpush3.bf16.msra.mxu1 %v9617_v51 }
 0xabb   : > { %8824 = vmatprep.subr.bf16.mxu1 %v9618_v60 }
 0xabe   : > { %8825 = vmatpush3.bf16.msra.mxu1 %v9619_v56 }
 0xabf   : > { %8826 = vmatprep.subr.bf16.mxu1 %v9620_v0 }
 0xac2   : > { %8827 = vmatpush3.bf16.msra.mxu1 %v9621_v23 }
 0xac3   : > { %8828 = vmatprep.subr.bf16.mxu1 %v9622_v40 }
 0xac6   : > { %8829 = vmatpush3.bf16.msra.mxu1 %v9623_v24 }
 0xac7   : > { %8830 = vmatprep.subr.bf16.mxu1 %v9624_v3 }
 0xac8   : > { %v5591_v9 = vpop.f32.mrb[48].mxu1 }
 0xac9   : > { %v5593_v32 = vpop.f32.mrb[49].mxu1 }
 0xaca   : > { %v5600_v31 = vcombine.low %v5591_v9, %v5593_v32  ;;  %v5595_v41 = vpop.f32.mrb[50].mxu1  ;;  %v5750_v7 = vpop.f32.mrb[76].mxu0  ;;  %v9628_v9 = vld [vmem:[%s12880_s15 + $0x78] sm:$0xff]  }
 0xacb   : > { %v5596_v44 = vpop.f32.mrb[51].mxu1  ;;  %v5752_v12 = vpop.f32.mrb[77].mxu0  ;;  %v9629_v32 = vld [vmem:[%s12880_s15 + $0x38] sm:$0xff]  }
 0xacc   : > { %v5607_v20 = vrot.slane %v5600_v31, %v12705_v1  ;;  %v5759_v37 = vcombine.low %v5750_v7, %v5752_v12  ;;  %v5754_v49 = vpop.f32.mrb[78].mxu0 }
 0xacd   : > { %v5755_v15 = vpop.f32.mrb[79].mxu0 }
 0xace   : > { %v5614_v26 = vrot.slane %v5607_v20, %v12705_v1  ;;  %v5766_v8 = vrot.slane %v5759_v37, %v12705_v1 }
 0xad0   : > { %v5616_v33 = vadd.f32 %v5614_v26, %v5456_v13  ;;  %v5773_v28 = vrot.slane %v5766_v8, %v12705_v1  ;;  %v9625_v13 = vld [vmem:[%s12880_s15 + $0x28] sm:$0xff]  }
 0xad1   : > { %8831 = vmatpush3.bf16.msra.mxu1 %v9625_v13 }
 0xad2   : > { %v5775_v47 = vadd.f32 %v5773_v28, %v5616_v33  ;;  %8832 = vmatprep.subr.bf16.mxu1 %v9626_v14 }
 0xad5   : > { %8833 = vmatpush3.bf16.msra.mxu1 %v9627_v16 }
 0xad6   : > { %8834 = vmatprep.subr.bf16.mxu1 %v9628_v9 }
 0xad9   : > { %8835 = vmatpush3.bf16.msra.mxu1 %v9629_v32 }
 0xae8   : > { %v5909_v34 = vpop.f32.mrb[52].mxu1 }
 0xae9   : > { %v5911_v22 = vpop.f32.mrb[53].mxu1 }
 0xaea   : > { %v5918_v6 = vcombine.low %v5909_v34, %v5911_v22  ;;  %v5913_v5 = vpop.f32.mrb[54].mxu1  ;;  %v6068_v27 = vpop.f32.mrb[80].mxu0 }
 0xaeb   : > { %v5914_v36 = vpop.f32.mrb[55].mxu1  ;;  %v6070_v30 = vpop.f32.mrb[81].mxu0 }
 0xaec   : > { %v5925_v42 = vrot.slane %v5918_v6, %v12705_v1  ;;  %v6077_v45 = vcombine.low %v6068_v27, %v6070_v30  ;;  %v6072_v57 = vpop.f32.mrb[82].mxu0 }
 0xaed   : > { %v6073_v48 = vpop.f32.mrb[83].mxu0 }
 0xaee   : > { %v5932_v35 = vrot.slane %v5925_v42, %v12705_v1  ;;  %v6084_v52 = vrot.slane %v6077_v45, %v12705_v1 }
 0xaf0   : > { %v5934_v29 = vadd.f32 %v5932_v35, %v5775_v47  ;;  %v6091_v18 = vrot.slane %v6084_v52, %v12705_v1 }
 0xaf2   : > { %v6093_v46 = vadd.f32 %v6091_v18, %v5934_v29 }
 0xb08   : > { %v6227_v19 = vpop.f32.mrb[56].mxu1 }
 0xb09   : > { %v6229_v63 = vpop.f32.mrb[57].mxu1 }
 0xb0a   : > { %v6236_v55 = vcombine.low %v6227_v19, %v6229_v63  ;;  %v6231_v62 = vpop.f32.mrb[58].mxu1  ;;  %v6386_v59 = vpop.f32.mrb[84].mxu0 }
 0xb0b   : > { %v6232_v4 = vpop.f32.mrb[59].mxu1  ;;  %v6388_v10 = vpop.f32.mrb[85].mxu0 }
 0xb0c   : > { %v6243_v21 = vrot.slane %v6236_v55, %v12705_v1  ;;  %v6395_v25 = vcombine.low %v6386_v59, %v6388_v10  ;;  %v6390_v38 = vpop.f32.mrb[86].mxu0 }
 0xb0d   : > { %v6391_v39 = vpop.f32.mrb[87].mxu0 }
 0xb0e   : > { %v6250_v61 = vrot.slane %v6243_v21, %v12705_v1  ;;  %v6402_v17 = vrot.slane %v6395_v25, %v12705_v1 }
 0xb10   : > { %v6252_v11 = vadd.f32 %v6250_v61, %v6093_v46  ;;  %v6409_v2 = vrot.slane %v6402_v17, %v12705_v1 }
 0xb12   : > { %v6411_v43 = vadd.f32 %v6409_v2, %v6252_v11 }
 0xb28   : > { %v6544_v31 = vpop.f32.mrb[60].mxu1 }
 0xb29   : > { %v6546_v41 = vpop.f32.mrb[61].mxu1 }
 0xb2a   : > { %v6553_v7 = vcombine.low %v6544_v31, %v6546_v41  ;;  %v6548_v44 = vpop.f32.mrb[62].mxu1  ;;  %v6705_v12 = vpop.f32.mrb[88].mxu0 }
 0xb2b   : > { %v6549_v20 = vpop.f32.mrb[63].mxu1  ;;  %v6707_v37 = vpop.f32.mrb[89].mxu0  ;;  %v7690_v44 = vsub.s32 0, %v12690_v53 }
 0xb2c   : > { %v6560_v49 = vrot.slane %v6553_v7, %v12705_v1  ;;  %v6714_v15 = vcombine.low %v6705_v12, %v6707_v37  ;;  %v6709_v26 = vpop.f32.mrb[90].mxu0  ;;  %v7694_v7 = vsub.s32 1, %v12690_v53 }
 0xb2d   : > { %v6710_v8 = vpop.f32.mrb[91].mxu0 }
 0xb2e   : > { %v6567_v33 = vrot.slane %v6560_v49, %v12705_v1  ;;  %v6721_v28 = vrot.slane %v6714_v15, %v12705_v1  ;;  %v7732_v8 = vld [vmem:[%s12881_s16] sm:$0x1] }
 0xb30   : > { %v6569_v47 = vadd.f32 %v6567_v33, %v6411_v43  ;;  %v6728_v34 = vrot.slane %v6721_v28, %v12705_v1 }
 0xb32   : > { %v6730_v22 = vadd.f32 %v6728_v34, %v6569_v47 }
 0xb48   : > { %v6865_v6 = vpop.f32.mrb[64].mxu1 }
 0xb49   : > { %v6867_v5 = vpop.f32.mrb[65].mxu1 }
 0xb4a   : > { %v6874_v27 = vcombine.low %v6865_v6, %v6867_v5  ;;  %v6869_v36 = vpop.f32.mrb[66].mxu1  ;;  %v7024_v30 = vpop.f32.mrb[92].mxu0 }
 0xb4b   : > { %v6870_v42 = vpop.f32.mrb[67].mxu1  ;;  %v7026_v45 = vpop.f32.mrb[93].mxu0 }
 0xb4c   : > { %v6881_v57 = vrot.slane %v6874_v27, %v12705_v1  ;;  %v7033_v48 = vcombine.low %v7024_v30, %v7026_v45  ;;  %v7028_v35 = vpop.f32.mrb[94].mxu0 }
 0xb4d   : > { %v7029_v52 = vpop.f32.mrb[95].mxu0 }
 0xb4e   : > { %v6888_v29 = vrot.slane %v6881_v57, %v12705_v1  ;;  %v7040_v18 = vrot.slane %v7033_v48, %v12705_v1 }
 0xb50   : > { %v6890_v46 = vadd.f32 %v6888_v29, %v6730_v22  ;;  %v7047_v54 = vrot.slane %v7040_v18, %v12705_v1 }
 0xb52   : > { %v7049_v50 = vadd.f32 %v7047_v54, %v6890_v46 }
 0xb68   : > { %v7183_v58 = vpop.f32.mrb[68].mxu1 }
 0xb69   : > { %v7185_v51 = vpop.f32.mrb[69].mxu1 }
 0xb6a   : > { %v7192_v60 = vcombine.low %v7183_v58, %v7185_v51  ;;  %v7187_v56 = vpop.f32.mrb[70].mxu1  ;;  %v7342_v0 = vpop.f32.mrb[96].mxu0 }
 0xb6b   : > { %v7188_v19 = vpop.f32.mrb[71].mxu1  ;;  %v7344_v23 = vpop.f32.mrb[97].mxu0 }
 0xb6c   : > { %v7199_v63 = vrot.slane %v7192_v60, %v12705_v1  ;;  %v7351_v55 = vcombine.low %v7342_v0, %v7344_v23  ;;  %v7346_v62 = vpop.f32.mrb[98].mxu0 }
 0xb6d   : > { %v7347_v59 = vpop.f32.mrb[99].mxu0 }
 0xb6e   : > { %v7206_v4 = vrot.slane %v7199_v63, %v12705_v1  ;;  %v7358_v10 = vrot.slane %v7351_v55, %v12705_v1 }
 0xb70   : > { %v7208_v21 = vadd.f32 %v7206_v4, %v7049_v50  ;;  %v7365_v25 = vrot.slane %v7358_v10, %v12705_v1 }
 0xb72   : > { %v7367_v38 = vadd.f32 %v7365_v25, %v7208_v21 }
 0xb88   : > { %v7501_v39 = vpop.f32.mrb[72].mxu1 }
 0xb89   : > { %v7503_v61 = vpop.f32.mrb[73].mxu1 }
 0xb8a   : > { %v7510_v17 = vcombine.low %v7501_v39, %v7503_v61  ;;  %v7505_v11 = vpop.f32.mrb[74].mxu1  ;;  %v7660_v2 = vpop.f32.mrb[100].mxu0 }
 0xb8b   : > { %v7506_v43 = vpop.f32.mrb[75].mxu1  ;;  %v7662_v40 = vpop.f32.mrb[101].mxu0 }
 0xb8c   : > { %v7517_v24 = vrot.slane %v7510_v17, %v12705_v1  ;;  %v7669_v3 = vcombine.low %v7660_v2, %v7662_v40  ;;  %v7664_v13 = vpop.f32.mrb[102].mxu0 }
 0xb8d   : > { %v7665_v14 = vpop.f32.mrb[103].mxu0 }
 0xb8e   : > { %v7524_v16 = vrot.slane %v7517_v24, %v12705_v1  ;;  %v7676_v9 = vrot.slane %v7669_v3, %v12705_v1 }
 0xb90   : > { %v7526_v32 = vadd.f32 %v7524_v16, %v7367_v38  ;;  %v7683_v31 = vrot.slane %v7676_v9, %v12705_v1 }
 0xb92   : > { %v7685_v41 = vadd.f32 %v7683_v31, %v7526_v32 }
 0xb94   : > { %v7686_v12 = vmax.f32 %v7685_v41, 0.0 }
 0xb96   : > { %v7695_v20 = vrot.slane %v7686_v12, %v7694_v7  ;;  %v7691_v37 = vrot.slane %v7686_v12, %v7690_v44 }
 0xb98   : > { %v7699_v49 = vpack.c.bf16 %v7695_v20, %v7695_v20  ;;  %v7698_v15 = vpack.c.bf16 %v7691_v37, %v7691_v37 }
 0xb9a   : > { %7861 = vmatprep.mubr.bf16.mxu1 %v7699_v49 }
 0xb9b   : > { %7862 = vmatmul.mubr.bf16.vlgmr.msra.gmra.mrb[76].mxu1 %v7698_v15 }
 0xc6e   : > { %v8836_v26 = vpop.f32.mrb[76].mxu1 }
 0xc6f   : > { %v8837_v1 = vpop.f32.mrb[77].mxu1 }
 0xc70   : > { %v8838_v33 = vadd.f32 %v8837_v1, %v8836_v26  ;;  %v8839_v53 = vpop.f32.mrb[78].mxu1 }
 0xc71   : > { %v8840_v28 = vpop.f32.mrb[79].mxu1 }
 0xc72   : > { %v7864_v47 = vadd.f32 %v8838_v33, %v7732_v8 }
 0xc74   : > { %7870 = vst.msk [vmem:[%s540_s29] sm:$0x1] %vm7869_vm13, %v7864_v47 }
 0xc75   : > { %9645 = shalt.err (!%p9642_p3)
}
 0xc76   : > { %s9646_s23 = scalar_lea.hbm %s12823_s2, 16  ;;  %s9650_s29 = scalar_lea.hbm %s12882_s17, 32 }
 0xc77   : > { %p9647_p4 = scmp.ne.s32.totalorder %s12823_s2, %s9646_s23  ;;  %p9651_p9 = scmp.lt.u32.totalorder %s12823_s2, %s12882_s17 }
 0xc78   : > { %p9652_p10 = scmp.lt.u32.totalorder %s9650_s29, %s9646_s23  ;;  %p9654_p12 = scmp.lt.u32.totalorder %s9646_s23, %s12823_s2 }
 0xc79   : > { %p9648_p7 = pnand %p9647_p4, %p9842_p5 }
 0xc7a   : > { %p9653_p11 = por %p9652_p10, %p9651_p9 }
 0xc7b   : > { %p9649_p8 = pneg %p9648_p7 }
 0xc7c   : > { %p9655_p13 = por %p9654_p12, %p9653_p11 }
 0xc7e   : > { %p9656_p0 = pnand %p9655_p13, %p9649_p8 }
 0xc80   : > { %9659 = shalt.err (!%p9656_p0)
}
 0xc81   : > { %9174 = dma.vmem_to_hbm [thread:$0]  (%p9842_p5), %s12825_s30, 16, %s12823_s2, %s7872_s22  }
 0xc82 PF: > { %s12928_s28 = sld [smem:[#allocation11_spill]]  ;;  %p9180_p1 = scmp.ge.s32.totalorder %s9694_s27, 2 }
 0xc84   : > { %p9177_p2 = pnand %p9180_p1, %p9846_p6 }
 0xc88   : > { %s7896_s24 = sand.u32 1, %s12928_s28  }
 0xc89   : > { %s7897_s26 = scalar_lea.sflag [#allocation9], %s7896_s24 }
 0xc8a   : > { %9677 = dma.done.wait (!%p9177_p2), %s7897_s26, 16  }
 0xc8b   : > { %9679 = vsyncadd (!%p9177_p2), %s7897_s26, 4294967280  ;;  %s12930_s27 = sld [smem:[#allocation13_spill]]  ;;  %s12931_s23 = sld [smem:[#allocation12_spill]] }
 0xc8c   : > { %s12932_s26 = sld [smem:[#allocation14_spill]]  ;;  %s12933_s24 = smov %s9686_s25 }
 0xc91   : > { %p27_p3 = scmp.ge.s32.totalorder %s12930_s27, 4   ;;  %s12934_s25 = smov %s12931_s23 }
 0xc93   :  { %29 = sbr.rel (!%p27_p3) target bundleno = 7 (0x7), region = 138 }
 0xc9a   :  { %7901 = vsyncpa [#allocation9], 1 }
 0xc9b   :  { %7903 = vsyncpa [#allocation9 + $0x1], 1 }

</bundles_post_ra>
